<compile_context>
chip_gen: v5e
topology: v5e:2x2
jax: 0.10.0
libtpu: 0.0.40
codegen_flags: <defaults>
</compile_context>

<pallas_src>
import functools

import jax
import jax.numpy as jnp
import numpy as np
from jax import lax
from jax.experimental import pallas as pl
from jax.experimental.pallas import tpu as pltpu


# ----------------------------------------------------------------------------
# Shared static layout of the packed parameter slab
# ----------------------------------------------------------------------------
def _slab_layout(H, W, Cin, C1, C2):
    Hp, Wq = H + 2, W + 2                 # extended stage-1 grid (1-halo for conv2)
    lanes = Wq * C1                        # fused (w, c1) lane width of y1
    nout = W * C2                          # fused (w, c2) lane width of y2
    k1 = 9 * Cin                           # im2col contraction depth of stage 1
    ln = max(k1, lanes, nout)
    off = {}
    r = 0
    off["w1t"] = r;  r += C1               # (C1, 9*Cin)  folded conv1 weights (transposed)
    off["pb1"] = r;  r += 1                # (lanes,)     folded conv1 bias, per fused lane
    off["dw2"] = r;  r += 9                # (9, lanes)   conv2 depthwise taps, per fused lane
    off["mask"] = r; r += Hp               # (Hp, lanes)  interior / zero-pad mask
    off["w2t"] = r;  r += nout             # (nout, W*C1) block-diag folded conv2 pointwise
    off["pb2"] = r;  r += 1                # (nout,)      folded conv2 bias
    off["lw"] = r;   r += H                # (H, nout)    linear weights, '(H W C)' order
    off["lb"] = r;   r += 1                # scalar       linear bias
    return dict(Hp=Hp, Wq=Wq, LANES=lanes, NOUT=nout, K1=k1, LN=ln, R=r, off=off)


def _pick_block_batch(B, H, W, Cin, C1, budget_bytes=20 << 20):
    """Batch elements per grid step: one step unless VMEM would overflow."""
    per_b = 4 * (2 * (H + 4) * (W + 4) * Cin          # input block (x2 buffering)
                 + (H + 2) * (W + 2) * 9 * Cin         # im2col temporary
                 + (H + 2) * (W + 2) * 4 * C1)         # acc1 / fused y1 / stage-2 temps
    bb = max(1, min(B, budget_bytes // max(per_b, 1)))
    while B % bb:
        bb -= 1
    return bb


# ----------------------------------------------------------------------------
# Pallas kernel: one grid step processes Bb batch elements end-to-end.
# ----------------------------------------------------------------------------
def _cls_head_kernel(H, W, Cin, C1, C2, Bb,
                     x_ref,      # (Bb, H+4, W+4, Cin) zero-padded NHWC input
                     slab_ref,   # (R, LN)             packed parameters
                     out_ref):   # (Bb, 1, 1)
    lay = _slab_layout(H, W, Cin, C1, C2)
    Hp, Wq = lay["Hp"], lay["Wq"]
    LANES, NOUT, K1 = lay["LANES"], lay["NOUT"], lay["K1"]
    off = lay["off"]
    WC1 = W * C1
    M1 = Bb * Hp * Wq
    f32 = jnp.float32
    dn = (((1,), (1,)), ((), ()))          # contract the last dim of both operands

    # ---- stage 1: depthwise 3x3 + pointwise 1x1 + BN as ONE im2col MXU matmul.
    #      The 9 shifted windows of the padded input are lane-concatenated
    #      (K = 9*Cin), computed on the extended (Hp x Wq) grid so the halo the
    #      second conv needs is produced directly in registers.
    cols = [x_ref[:, dy:dy + Hp, dx:dx + Wq, :]
            for dy in range(3) for dx in range(3)]
    xcol = jnp.concatenate(cols, axis=-1).reshape(M1, K1)          # (M1, 9*Cin)
    w1t = slab_ref[off["w1t"]:off["w1t"] + C1, :K1]                # (C1, 9*Cin)
    acc1 = lax.dot_general(xcol, w1t, dn,
                           precision=lax.Precision.HIGHEST,
                           preferred_element_type=f32)             # (M1, C1)

    # ---- relayout: fuse (w, c1) onto the lane axis so stage 2 runs lane-dense
    acc1_4d = acc1.reshape(Bb, Hp, Wq, C1)
    y1f = jnp.concatenate([acc1_4d[:, :, w, :] for w in range(Wq)],
                          axis=-1)                                  # (Bb, Hp, Wq*C1)

    # bias + ReLU + precomputed interior mask (zero pad for conv2 in one multiply)
    pb1 = slab_ref[off["pb1"]:off["pb1"] + 1, :LANES]               # (1, LANES)
    mask = slab_ref[off["mask"]:off["mask"] + Hp, :LANES]           # (Hp, LANES)
    y1f = jnp.maximum(y1f + pb1, 0.0) * mask

    # ---- stage 2 depthwise 3x3: dy = sublane slice, dx = lane-offset slice,
    #      per-lane taps; everything stays lane-dense.
    dw2 = slab_ref[off["dw2"]:off["dw2"] + 9, :WC1]                 # (9, W*C1)
    acc2 = None
    for dy in range(3):
        for dx in range(3):
            k = dy * 3 + dx
            piece = y1f[:, dy:dy + H, dx * C1:dx * C1 + WC1]        # (Bb, H, W*C1)
            term = piece * dw2[k:k + 1, :]
            acc2 = term if acc2 is None else acc2 + term

    # ---- stage 2 pointwise 1x1 (+ folded BN / biases) as one block-diagonal
    #      MXU matmul producing the '(w c2)' lane layout directly.
    w2t = slab_ref[off["w2t"]:off["w2t"] + NOUT, :WC1]              # (NOUT, W*C1)
    pb2 = slab_ref[off["pb2"]:off["pb2"] + 1, :NOUT]                # (1, NOUT)
    y2 = lax.dot_general(acc2.reshape(Bb * H, WC1), w2t, dn,
                         precision=lax.Precision.HIGHEST,
                         preferred_element_type=f32)                # (Bb*H, NOUT)
    y2 = jnp.maximum(y2 + pb2, 0.0).reshape(Bb, H, NOUT)

    # ---- linear over the rearranged '(H W C)' features + bias
    lw = slab_ref[off["lw"]:off["lw"] + H, :NOUT]                   # (H, NOUT)
    lb = slab_ref[off["lb"]:off["lb"] + 1, 0:1]                     # (1, 1)
    s = jnp.sum(y2 * lw, axis=2)                                    # (Bb, H)
    out = jnp.sum(s, axis=1, keepdims=True) + lb                    # (Bb, 1)
    out_ref[...] = out.reshape(Bb, 1, 1)


# ----------------------------------------------------------------------------
# Wrapper
# ----------------------------------------------------------------------------
@functools.partial(jax.jit, static_argnames=("C1", "C2"))
def cls_head_forward(x_nchw, slab, *, C1, C2):
    B, Cin, H, W = x_nchw.shape

    # glue: NCHW (PyTorch) -> NHWC + zero pad by 2.  Under jit these fuse into
    # a single copy; an NHWC-native caller could feed the padded activation
    # straight into the pallas_call and skip this HBM round trip entirely.
    x_nhwc = jnp.transpose(x_nchw, (0, 2, 3, 1)).astype(jnp.float32)
    x_pad = jnp.pad(x_nhwc, ((0, 0), (2, 2), (2, 2), (0, 0)))       # (B, H+4, W+4, Cin)

    Bb = _pick_block_batch(B, H, W, Cin, C1)
    kernel = functools.partial(_cls_head_kernel, H, W, Cin, C1, C2, Bb)

    out = pl.pallas_call(
        kernel,
        out_shape=jax.ShapeDtypeStruct((B, 1, 1), jnp.float32),
        grid=(B // Bb,),
        in_specs=[pl.BlockSpec((Bb, H + 4, W + 4, Cin), lambda i: (i, 0, 0, 0)),
                  pl.BlockSpec(slab.shape, lambda i: (0, 0))],
        out_specs=pl.BlockSpec((Bb, 1, 1), lambda i: (i, 0, 0)),
        compiler_params=pltpu.CompilerParams(dimension_semantics=("parallel",)),
    )(x_pad, slab)
    return out[:, :, 0]                                             # (B, 1)


# ----------------------------------------------------------------------------
# Deterministic parameter construction (PyTorch layouts) + folding / packing
# ----------------------------------------------------------------------------
def init_torch_params(key, Cin, C1, C2, H, W):
    ks = jax.random.split(key, 18)

    def n(k, shape, scale=0.2):
        return scale * jax.random.normal(k, shape, dtype=jnp.float32)

    return dict(
        w_dw1=n(ks[0], (Cin, 1, 3, 3)), b_dw1=n(ks[1], (Cin,)),
        w_pw1=n(ks[2], (C1, Cin, 1, 1)), b_pw1=n(ks[3], (C1,)),
        g1=1.0 + n(ks[4], (C1,), 0.1), be1=n(ks[5], (C1,), 0.1),
        m1=n(ks[6], (C1,), 0.1),
        v1=0.5 + jax.random.uniform(ks[7], (C1,), dtype=jnp.float32),
        w_dw2=n(ks[8], (C1, 1, 3, 3)), b_dw2=n(ks[9], (C1,)),
        w_pw2=n(ks[10], (C2, C1, 1, 1)), b_pw2=n(ks[11], (C2,)),
        g2=1.0 + n(ks[12], (C2,), 0.1), be2=n(ks[13], (C2,), 0.1),
        m2=n(ks[14], (C2,), 0.1),
        v2=0.5 + jax.random.uniform(ks[15], (C2,), dtype=jnp.float32),
        w_lin=n(ks[16], (1, H * W * C2)), b_lin=n(ks[17], (1,)),
    )


def fold_for_kernel(p, H, W, eps=1e-5):
    """Fold biases + eval-mode BN into the pointwise GEMMs and pack everything
    into a single (R, LN) parameter slab (one DMA in the kernel)."""
    Cin = p["w_dw1"].shape[0]
    C1 = p["w_pw1"].shape[0]
    C2 = p["w_pw2"].shape[0]
    lay = _slab_layout(H, W, Cin, C1, C2)
    Hp, Wq = lay["Hp"], lay["Wq"]
    LANES, NOUT, K1, LN = lay["LANES"], lay["NOUT"], lay["K1"], lay["LN"]
    off = lay["off"]

    # depthwise taps in (k = dy*3+dx, channel) layout
    dw1 = jnp.transpose(p["w_dw1"][:, 0], (1, 2, 0)).reshape(9, Cin)
    dw2 = jnp.transpose(p["w_dw2"][:, 0], (1, 2, 0)).reshape(9, C1)

    # fold depthwise bias + pointwise bias + eval-mode BN into the pointwise GEMMs
    s1 = p["g1"] / jnp.sqrt(p["v1"] + eps)
    t1 = p["be1"] - p["m1"] * s1
    pw1f = jnp.transpose(p["w_pw1"][:, :, 0, 0]) * s1[None, :]           # (Cin, C1)
    pb1f = p["b_dw1"] @ pw1f + p["b_pw1"] * s1 + t1                      # (C1,)

    s2 = p["g2"] / jnp.sqrt(p["v2"] + eps)
    t2 = p["be2"] - p["m2"] * s2
    pw2f = jnp.transpose(p["w_pw2"][:, :, 0, 0]) * s2[None, :]           # (C1, C2)
    pb2f = p["b_dw2"] @ pw2f + p["b_pw2"] * s2 + t2                      # (C2,)

    # stage-1 im2col weight, transposed: w1t[c1, k*Cin+cin] = dw1[k,cin]*pw1f[cin,c1]
    w1 = dw1[:, :, None] * pw1f[None, :, :]                              # (9, Cin, C1)
    w1t = jnp.transpose(w1, (2, 0, 1)).reshape(C1, K1)

    # per-fused-lane replicas: lane index = w*C1 + c1
    pb1_lanes = jnp.tile(pb1f, Wq)                                       # (LANES,)
    dw2_lanes = jnp.tile(dw2, (1, Wq))                                   # (9, LANES)

    # interior / zero-pad mask on the extended (Hp, Wq) grid, fused lanes
    row_ok = ((jnp.arange(Hp) >= 1) & (jnp.arange(Hp) <= H)).astype(jnp.float32)
    col_ok = ((jnp.arange(Wq) >= 1) & (jnp.arange(Wq) <= W)).astype(jnp.float32)
    mask = jnp.repeat(row_ok[:, None] * col_ok[None, :], C1, axis=1)     # (Hp, LANES)

    # stage-2 pointwise as block-diagonal matmul over fused lanes (transposed):
    #   w2t[ow*C2+c2, ow'*C1+c1] = pw2f[c1, c2] iff ow == ow'
    eye_w = jnp.eye(W, dtype=jnp.float32)
    w2t = (eye_w[:, None, :, None] *
           jnp.transpose(pw2f)[None, :, None, :]).reshape(NOUT, W * C1)

    pb2_row = jnp.tile(pb2f, W)                                          # (NOUT,)
    lw2d = p["w_lin"].reshape(H, NOUT)                                   # '(H W C)' order
    lb = p["b_lin"][0]

    slab = jnp.zeros((lay["R"], LN), jnp.float32)
    slab = slab.at[off["w1t"]:off["w1t"] + C1, :K1].set(w1t)
    slab = slab.at[off["pb1"], :LANES].set(pb1_lanes)
    slab = slab.at[off["dw2"]:off["dw2"] + 9, :LANES].set(dw2_lanes)
    slab = slab.at[off["mask"]:off["mask"] + Hp, :LANES].set(mask)
    slab = slab.at[off["w2t"]:off["w2t"] + NOUT, :W * C1].set(w2t)
    slab = slab.at[off["pb2"], :NOUT].set(pb2_row)
    slab = slab.at[off["lw"]:off["lw"] + H, :NOUT].set(lw2d)
    slab = slab.at[off["lb"], 0].set(lb)
    return {"slab": slab, "C1": C1, "C2": C2}


# ----------------------------------------------------------------------------
# Independent pure-JAX reference (NCHW, lax convs) mirroring the PyTorch module
# ----------------------------------------------------------------------------
def ref_forward(x, p, eps=1e-5):
    dn = ("NCHW", "OIHW", "NCHW")
    B, Cin, H, W = x.shape

    def bn(y, g, be, m, v):
        return (y - m[None, :, None, None]) / jnp.sqrt(v[None, :, None, None] + eps) \
               * g[None, :, None, None] + be[None, :, None, None]

    y = lax.conv_general_dilated(x, p["w_dw1"], (1, 1), ((1, 1), (1, 1)),
                                 dimension_numbers=dn, feature_group_count=Cin)
    y = y + p["b_dw1"][None, :, None, None]
    y = lax.conv_general_dilated(y, p["w_pw1"], (1, 1), "VALID", dimension_numbers=dn)
    y = y + p["b_pw1"][None, :, None, None]
    y = jnp.maximum(bn(y, p["g1"], p["be1"], p["m1"], p["v1"]), 0.0)

    C1 = y.shape[1]
    y = lax.conv_general_dilated(y, p["w_dw2"], (1, 1), ((1, 1), (1, 1)),
                                 dimension_numbers=dn, feature_group_count=C1)
    y = y + p["b_dw2"][None, :, None, None]
    y = lax.conv_general_dilated(y, p["w_pw2"], (1, 1), "VALID", dimension_numbers=dn)
    y = y + p["b_pw2"][None, :, None, None]
    y = jnp.maximum(bn(y, p["g2"], p["be2"], p["m2"], p["v2"]), 0.0)

    feat = jnp.transpose(y, (0, 2, 3, 1)).reshape(B, -1)       # 'B C H W -> B (H W C)'
    return feat @ p["w_lin"].T + p["b_lin"][None, :]


if __name__ == "__main__":
    # small shapes consistent with ClsHead(in_channels=32, feat_sz=8)
    B, Cin, H = 2, 32, 8
    W = H
    C1, C2 = Cin // 4, Cin // 16

    key = jax.random.PRNGKey(0)
    kx, kp = jax.random.split(key)
    x = jax.random.normal(kx, (B, Cin, H, W), dtype=jnp.float32)   # NCHW, like PyTorch

    torch_params = init_torch_params(kp, Cin, C1, C2, H, W)
    folded = fold_for_kernel(torch_params, H, W)

    out = jax.block_until_ready(
        cls_head_forward(x, folded["slab"], C1=folded["C1"], C2=folded["C2"]))
    ref = jax.block_until_ready(ref_forward(x, torch_params))
    np.testing.assert_allclose(np.asarray(out), np.asarray(ref), rtol=1e-3, atol=1e-3)

    print("KERNEL_OK")
</pallas_src>

<mosaic_0001>
module attributes {stable_mosaic.version = 11 : i64} {
  func.func @_cls_head_kernel(%arg0: i32, %arg1: memref<2x12x12x32xf32, #tpu.memory_space<vmem>>, %arg2: memref<54x288xf32, #tpu.memory_space<vmem>>, %arg3: memref<2x1x1xf32, #tpu.memory_space<vmem>>) attributes {dimension_semantics = [#tpu.dimension_semantics<parallel>], iteration_bounds = array<i64: 1>, scalar_prefetch = 0 : i64, scratch_operands = 0 : i64, tpu.core_type = #tpu.core_type<tc>, window_params = [{transform_indices = @transform_0, window_bounds = array<i64: 2, 12, 12, 32>}, {pipeline_mode = #tpu.pipeline_mode<synchronous>, transform_indices = @transform_1, window_bounds = array<i64: 54, 288>}, {transform_indices = @transform_2, window_bounds = array<i64: 2, 1, 1>}]} {
    %c0 = arith.constant 0 : index
    %c0_0 = arith.constant 0 : index
    %c0_1 = arith.constant 0 : index
    %c0_2 = arith.constant 0 : index
    %0 = vector.load %arg1[%c0, %c0_0, %c0_1, %c0_2] : memref<2x12x12x32xf32, #tpu.memory_space<vmem>>, vector<2x10x10x32xf32>
    %c0_3 = arith.constant 0 : index
    %c0_4 = arith.constant 0 : index
    %c1 = arith.constant 1 : index
    %c0_5 = arith.constant 0 : index
    %1 = vector.load %arg1[%c0_3, %c0_4, %c1, %c0_5] : memref<2x12x12x32xf32, #tpu.memory_space<vmem>>, vector<2x10x10x32xf32>
    %c0_6 = arith.constant 0 : index
    %c0_7 = arith.constant 0 : index
    %c2 = arith.constant 2 : index
    %c0_8 = arith.constant 0 : index
    %2 = vector.load %arg1[%c0_6, %c0_7, %c2, %c0_8] : memref<2x12x12x32xf32, #tpu.memory_space<vmem>>, vector<2x10x10x32xf32>
    %c0_9 = arith.constant 0 : index
    %c1_10 = arith.constant 1 : index
    %c0_11 = arith.constant 0 : index
    %c0_12 = arith.constant 0 : index
    %3 = vector.load %arg1[%c0_9, %c1_10, %c0_11, %c0_12] : memref<2x12x12x32xf32, #tpu.memory_space<vmem>>, vector<2x10x10x32xf32>
    %c0_13 = arith.constant 0 : index
    %c1_14 = arith.constant 1 : index
    %c1_15 = arith.constant 1 : index
    %c0_16 = arith.constant 0 : index
    %4 = vector.load %arg1[%c0_13, %c1_14, %c1_15, %c0_16] : memref<2x12x12x32xf32, #tpu.memory_space<vmem>>, vector<2x10x10x32xf32>
    %c0_17 = arith.constant 0 : index
    %c1_18 = arith.constant 1 : index
    %c2_19 = arith.constant 2 : index
    %c0_20 = arith.constant 0 : index
    %5 = vector.load %arg1[%c0_17, %c1_18, %c2_19, %c0_20] : memref<2x12x12x32xf32, #tpu.memory_space<vmem>>, vector<2x10x10x32xf32>
    %c0_21 = arith.constant 0 : index
    %c2_22 = arith.constant 2 : index
    %c0_23 = arith.constant 0 : index
    %c0_24 = arith.constant 0 : index
    %6 = vector.load %arg1[%c0_21, %c2_22, %c0_23, %c0_24] : memref<2x12x12x32xf32, #tpu.memory_space<vmem>>, vector<2x10x10x32xf32>
    %c0_25 = arith.constant 0 : index
    %c2_26 = arith.constant 2 : index
    %c1_27 = arith.constant 1 : index
    %c0_28 = arith.constant 0 : index
    %7 = vector.load %arg1[%c0_25, %c2_26, %c1_27, %c0_28] : memref<2x12x12x32xf32, #tpu.memory_space<vmem>>, vector<2x10x10x32xf32>
    %c0_29 = arith.constant 0 : index
    %c2_30 = arith.constant 2 : index
    %c2_31 = arith.constant 2 : index
    %c0_32 = arith.constant 0 : index
    %8 = vector.load %arg1[%c0_29, %c2_30, %c2_31, %c0_32] : memref<2x12x12x32xf32, #tpu.memory_space<vmem>>, vector<2x10x10x32xf32>
    %9 = tpu.concatenate %0, %1, %2, %3, %4, %5, %6, %7, %8 in 3 : vector<2x10x10x32xf32>, vector<2x10x10x32xf32>, vector<2x10x10x32xf32>, vector<2x10x10x32xf32>, vector<2x10x10x32xf32>, vector<2x10x10x32xf32>, vector<2x10x10x32xf32>, vector<2x10x10x32xf32>, vector<2x10x10x32xf32> -> vector<2x10x10x288xf32>
    %10 = vector.shape_cast %9 : vector<2x10x10x288xf32> to vector<200x288xf32>
    %c0_33 = arith.constant 0 : index
    %c0_34 = arith.constant 0 : index
    %11 = vector.load %arg2[%c0_33, %c0_34] : memref<54x288xf32, #tpu.memory_space<vmem>>, vector<8x288xf32>
    %cst = arith.constant dense<0.000000e+00> : vector<200x8xf32>
    %12 = tpu.matmul %10, %11, %cst {dimension_numbers = #tpu.dot_dimension_numbers<[1], [1], [0], [0], [0, 0, 1, 0], [], []>, precision = #tpu.contract_precision<fp32>} : vector<200x288xf32>, vector<8x288xf32>, vector<200x8xf32> -> vector<200x8xf32>
    %13 = vector.shape_cast %12 : vector<200x8xf32> to vector<2x10x10x8xf32>
    %14 = vector.extract_strided_slice %13 {offsets = [0, 0, 0, 0], sizes = [2, 10, 1, 8], strides = [1, 1, 1, 1]} : vector<2x10x10x8xf32> to vector<2x10x1x8xf32>
    %15 = vector.shape_cast %14 : vector<2x10x1x8xf32> to vector<2x10x8xf32>
    %16 = vector.extract_strided_slice %13 {offsets = [0, 0, 1, 0], sizes = [2, 10, 1, 8], strides = [1, 1, 1, 1]} : vector<2x10x10x8xf32> to vector<2x10x1x8xf32>
    %17 = vector.shape_cast %16 : vector<2x10x1x8xf32> to vector<2x10x8xf32>
    %18 = vector.extract_strided_slice %13 {offsets = [0, 0, 2, 0], sizes = [2, 10, 1, 8], strides = [1, 1, 1, 1]} : vector<2x10x10x8xf32> to vector<2x10x1x8xf32>
    %19 = vector.shape_cast %18 : vector<2x10x1x8xf32> to vector<2x10x8xf32>
    %20 = vector.extract_strided_slice %13 {offsets = [0, 0, 3, 0], sizes = [2, 10, 1, 8], strides = [1, 1, 1, 1]} : vector<2x10x10x8xf32> to vector<2x10x1x8xf32>
    %21 = vector.shape_cast %20 : vector<2x10x1x8xf32> to vector<2x10x8xf32>
    %22 = vector.extract_strided_slice %13 {offsets = [0, 0, 4, 0], sizes = [2, 10, 1, 8], strides = [1, 1, 1, 1]} : vector<2x10x10x8xf32> to vector<2x10x1x8xf32>
    %23 = vector.shape_cast %22 : vector<2x10x1x8xf32> to vector<2x10x8xf32>
    %24 = vector.extract_strided_slice %13 {offsets = [0, 0, 5, 0], sizes = [2, 10, 1, 8], strides = [1, 1, 1, 1]} : vector<2x10x10x8xf32> to vector<2x10x1x8xf32>
    %25 = vector.shape_cast %24 : vector<2x10x1x8xf32> to vector<2x10x8xf32>
    %26 = vector.extract_strided_slice %13 {offsets = [0, 0, 6, 0], sizes = [2, 10, 1, 8], strides = [1, 1, 1, 1]} : vector<2x10x10x8xf32> to vector<2x10x1x8xf32>
    %27 = vector.shape_cast %26 : vector<2x10x1x8xf32> to vector<2x10x8xf32>
    %28 = vector.extract_strided_slice %13 {offsets = [0, 0, 7, 0], sizes = [2, 10, 1, 8], strides = [1, 1, 1, 1]} : vector<2x10x10x8xf32> to vector<2x10x1x8xf32>
    %29 = vector.shape_cast %28 : vector<2x10x1x8xf32> to vector<2x10x8xf32>
    %30 = vector.extract_strided_slice %13 {offsets = [0, 0, 8, 0], sizes = [2, 10, 1, 8], strides = [1, 1, 1, 1]} : vector<2x10x10x8xf32> to vector<2x10x1x8xf32>
    %31 = vector.shape_cast %30 : vector<2x10x1x8xf32> to vector<2x10x8xf32>
    %32 = vector.extract_strided_slice %13 {offsets = [0, 0, 9, 0], sizes = [2, 10, 1, 8], strides = [1, 1, 1, 1]} : vector<2x10x10x8xf32> to vector<2x10x1x8xf32>
    %33 = vector.shape_cast %32 : vector<2x10x1x8xf32> to vector<2x10x8xf32>
    %34 = tpu.concatenate %15, %17, %19, %21, %23, %25, %27, %29, %31, %33 in 2 : vector<2x10x8xf32>, vector<2x10x8xf32>, vector<2x10x8xf32>, vector<2x10x8xf32>, vector<2x10x8xf32>, vector<2x10x8xf32>, vector<2x10x8xf32>, vector<2x10x8xf32>, vector<2x10x8xf32>, vector<2x10x8xf32> -> vector<2x10x80xf32>
    %c8 = arith.constant 8 : index
    %c0_35 = arith.constant 0 : index
    %35 = vector.load %arg2[%c8, %c0_35] : memref<54x288xf32, #tpu.memory_space<vmem>>, vector<1x80xf32>
    %c18 = arith.constant 18 : index
    %c0_36 = arith.constant 0 : index
    %36 = vector.load %arg2[%c18, %c0_36] : memref<54x288xf32, #tpu.memory_space<vmem>>, vector<10x80xf32>
    %37 = vector.shape_cast %35 : vector<1x80xf32> to vector<1x1x80xf32>
    %38 = vector.broadcast %37 : vector<1x1x80xf32> to vector<2x10x80xf32>
    %39 = arith.addf %34, %38 : vector<2x10x80xf32>
    %cst_37 = arith.constant 0.000000e+00 : f32
    %40 = vector.broadcast %cst_37 : f32 to vector<2x10x80xf32>
    %41 = arith.maximumf %39, %40 : vector<2x10x80xf32>
    %42 = vector.shape_cast %36 : vector<10x80xf32> to vector<1x10x80xf32>
    %43 = vector.broadcast %42 : vector<1x10x80xf32> to vector<2x10x80xf32>
    %44 = arith.mulf %41, %43 : vector<2x10x80xf32>
    %c9 = arith.constant 9 : index
    %c0_38 = arith.constant 0 : index
    %45 = vector.load %arg2[%c9, %c0_38] : memref<54x288xf32, #tpu.memory_space<vmem>>, vector<9x64xf32>
    %46 = vector.extract_strided_slice %44 {offsets = [0, 0, 0], sizes = [2, 8, 64], strides = [1, 1, 1]} : vector<2x10x80xf32> to vector<2x8x64xf32>
    %47 = vector.extract_strided_slice %45 {offsets = [0, 0], sizes = [1, 64], strides = [1, 1]} : vector<9x64xf32> to vector<1x64xf32>
    %48 = vector.shape_cast %47 : vector<1x64xf32> to vector<1x1x64xf32>
    %49 = vector.broadcast %48 : vector<1x1x64xf32> to vector<2x8x64xf32>
    %50 = arith.mulf %46, %49 : vector<2x8x64xf32>
    %51 = vector.extract_strided_slice %44 {offsets = [0, 0, 8], sizes = [2, 8, 64], strides = [1, 1, 1]} : vector<2x10x80xf32> to vector<2x8x64xf32>
    %52 = vector.extract_strided_slice %45 {offsets = [1, 0], sizes = [1, 64], strides = [1, 1]} : vector<9x64xf32> to vector<1x64xf32>
    %53 = vector.shape_cast %52 : vector<1x64xf32> to vector<1x1x64xf32>
    %54 = vector.broadcast %53 : vector<1x1x64xf32> to vector<2x8x64xf32>
    %55 = arith.mulf %51, %54 : vector<2x8x64xf32>
    %56 = arith.addf %50, %55 : vector<2x8x64xf32>
    %57 = vector.extract_strided_slice %44 {offsets = [0, 0, 16], sizes = [2, 8, 64], strides = [1, 1, 1]} : vector<2x10x80xf32> to vector<2x8x64xf32>
    %58 = vector.extract_strided_slice %45 {offsets = [2, 0], sizes = [1, 64], strides = [1, 1]} : vector<9x64xf32> to vector<1x64xf32>
    %59 = vector.shape_cast %58 : vector<1x64xf32> to vector<1x1x64xf32>
    %60 = vector.broadcast %59 : vector<1x1x64xf32> to vector<2x8x64xf32>
    %61 = arith.mulf %57, %60 : vector<2x8x64xf32>
    %62 = arith.addf %56, %61 : vector<2x8x64xf32>
    %63 = vector.extract_strided_slice %44 {offsets = [0, 1, 0], sizes = [2, 8, 64], strides = [1, 1, 1]} : vector<2x10x80xf32> to vector<2x8x64xf32>
    %64 = vector.extract_strided_slice %45 {offsets = [3, 0], sizes = [1, 64], strides = [1, 1]} : vector<9x64xf32> to vector<1x64xf32>
    %65 = vector.shape_cast %64 : vector<1x64xf32> to vector<1x1x64xf32>
    %66 = vector.broadcast %65 : vector<1x1x64xf32> to vector<2x8x64xf32>
    %67 = arith.mulf %63, %66 : vector<2x8x64xf32>
    %68 = arith.addf %62, %67 : vector<2x8x64xf32>
    %69 = vector.extract_strided_slice %44 {offsets = [0, 1, 8], sizes = [2, 8, 64], strides = [1, 1, 1]} : vector<2x10x80xf32> to vector<2x8x64xf32>
    %70 = vector.extract_strided_slice %45 {offsets = [4, 0], sizes = [1, 64], strides = [1, 1]} : vector<9x64xf32> to vector<1x64xf32>
    %71 = vector.shape_cast %70 : vector<1x64xf32> to vector<1x1x64xf32>
    %72 = vector.broadcast %71 : vector<1x1x64xf32> to vector<2x8x64xf32>
    %73 = arith.mulf %69, %72 : vector<2x8x64xf32>
    %74 = arith.addf %68, %73 : vector<2x8x64xf32>
    %75 = vector.extract_strided_slice %44 {offsets = [0, 1, 16], sizes = [2, 8, 64], strides = [1, 1, 1]} : vector<2x10x80xf32> to vector<2x8x64xf32>
    %76 = vector.extract_strided_slice %45 {offsets = [5, 0], sizes = [1, 64], strides = [1, 1]} : vector<9x64xf32> to vector<1x64xf32>
    %77 = vector.shape_cast %76 : vector<1x64xf32> to vector<1x1x64xf32>
    %78 = vector.broadcast %77 : vector<1x1x64xf32> to vector<2x8x64xf32>
    %79 = arith.mulf %75, %78 : vector<2x8x64xf32>
    %80 = arith.addf %74, %79 : vector<2x8x64xf32>
    %81 = vector.extract_strided_slice %44 {offsets = [0, 2, 0], sizes = [2, 8, 64], strides = [1, 1, 1]} : vector<2x10x80xf32> to vector<2x8x64xf32>
    %82 = vector.extract_strided_slice %45 {offsets = [6, 0], sizes = [1, 64], strides = [1, 1]} : vector<9x64xf32> to vector<1x64xf32>
    %83 = vector.shape_cast %82 : vector<1x64xf32> to vector<1x1x64xf32>
    %84 = vector.broadcast %83 : vector<1x1x64xf32> to vector<2x8x64xf32>
    %85 = arith.mulf %81, %84 : vector<2x8x64xf32>
    %86 = arith.addf %80, %85 : vector<2x8x64xf32>
    %87 = vector.extract_strided_slice %44 {offsets = [0, 2, 8], sizes = [2, 8, 64], strides = [1, 1, 1]} : vector<2x10x80xf32> to vector<2x8x64xf32>
    %88 = vector.extract_strided_slice %45 {offsets = [7, 0], sizes = [1, 64], strides = [1, 1]} : vector<9x64xf32> to vector<1x64xf32>
    %89 = vector.shape_cast %88 : vector<1x64xf32> to vector<1x1x64xf32>
    %90 = vector.broadcast %89 : vector<1x1x64xf32> to vector<2x8x64xf32>
    %91 = arith.mulf %87, %90 : vector<2x8x64xf32>
    %92 = arith.addf %86, %91 : vector<2x8x64xf32>
    %93 = vector.extract_strided_slice %44 {offsets = [0, 2, 16], sizes = [2, 8, 64], strides = [1, 1, 1]} : vector<2x10x80xf32> to vector<2x8x64xf32>
    %94 = vector.extract_strided_slice %45 {offsets = [8, 0], sizes = [1, 64], strides = [1, 1]} : vector<9x64xf32> to vector<1x64xf32>
    %95 = vector.shape_cast %94 : vector<1x64xf32> to vector<1x1x64xf32>
    %96 = vector.broadcast %95 : vector<1x1x64xf32> to vector<2x8x64xf32>
    %97 = arith.mulf %93, %96 : vector<2x8x64xf32>
    %98 = arith.addf %92, %97 : vector<2x8x64xf32>
    %c28 = arith.constant 28 : index
    %c0_39 = arith.constant 0 : index
    %99 = vector.load %arg2[%c28, %c0_39] : memref<54x288xf32, #tpu.memory_space<vmem>>, vector<16x64xf32>
    %c44 = arith.constant 44 : index
    %c0_40 = arith.constant 0 : index
    %100 = vector.load %arg2[%c44, %c0_40] : memref<54x288xf32, #tpu.memory_space<vmem>>, vector<1x16xf32>
    %101 = vector.shape_cast %98 : vector<2x8x64xf32> to vector<16x64xf32>
    %cst_41 = arith.constant dense<0.000000e+00> : vector<16x16xf32>
    %102 = tpu.matmul %101, %99, %cst_41 {dimension_numbers = #tpu.dot_dimension_numbers<[1], [1], [0], [0], [0, 0, 1, 0], [], []>, precision = #tpu.contract_precision<fp32>} : vector<16x64xf32>, vector<16x64xf32>, vector<16x16xf32> -> vector<16x16xf32>
    %103 = vector.broadcast %100 : vector<1x16xf32> to vector<16x16xf32>
    %104 = arith.addf %102, %103 : vector<16x16xf32>
    %cst_42 = arith.constant 0.000000e+00 : f32
    %105 = vector.broadcast %cst_42 : f32 to vector<16x16xf32>
    %106 = arith.maximumf %104, %105 : vector<16x16xf32>
    %107 = vector.shape_cast %106 : vector<16x16xf32> to vector<2x8x16xf32>
    %c45 = arith.constant 45 : index
    %c0_43 = arith.constant 0 : index
    %108 = vector.load %arg2[%c45, %c0_43] : memref<54x288xf32, #tpu.memory_space<vmem>>, vector<8x16xf32>
    %c53 = arith.constant 53 : index
    %c0_44 = arith.constant 0 : index
    %109 = vector.load %arg2[%c53, %c0_44] : memref<54x288xf32, #tpu.memory_space<vmem>>, vector<1x1xf32>
    %110 = vector.shape_cast %108 : vector<8x16xf32> to vector<1x8x16xf32>
    %111 = vector.broadcast %110 : vector<1x8x16xf32> to vector<2x8x16xf32>
    %112 = arith.mulf %107, %111 : vector<2x8x16xf32>
    %cst_45 = arith.constant dense<0.000000e+00> : vector<2x8xf32>
    %113 = vector.multi_reduction <add>, %112, %cst_45 [2] : vector<2x8x16xf32> to vector<2x8xf32>
    %cst_46 = arith.constant dense<0.000000e+00> : vector<2xf32>
    %114 = vector.multi_reduction <add>, %113, %cst_46 [1] : vector<2x8xf32> to vector<2xf32>
    %115 = vector.shape_cast %114 : vector<2xf32> to vector<2x1xf32>
    %116 = vector.broadcast %109 : vector<1x1xf32> to vector<2x1xf32>
    %117 = arith.addf %115, %116 : vector<2x1xf32>
    %118 = vector.shape_cast %117 : vector<2x1xf32> to vector<2x1x1xf32>
    %c0_47 = arith.constant 0 : index
    %c0_48 = arith.constant 0 : index
    %c0_49 = arith.constant 0 : index
    %119 = vector.load %arg3[%c0_47, %c0_48, %c0_49] : memref<2x1x1xf32, #tpu.memory_space<vmem>>, vector<2x1x1xf32>
    tpu.vector_store %arg3[%c0_47, %c0_48, %c0_49], %118 {strides = array<i32>} : memref<2x1x1xf32, #tpu.memory_space<vmem>>, vector<2x1x1xf32>,
    return
  }
  func.func @transform_0(%arg0: i32) -> (i32, i32, i32, i32) {
    %c0_i32 = arith.constant 0 : i32
    %c0_i32_0 = arith.constant 0 : i32
    %c0_i32_1 = arith.constant 0 : i32
    %c0_i32_2 = arith.constant 0 : i32
    return %arg0, %c0_i32, %c0_i32_0, %c0_i32_1 : i32, i32, i32, i32
  }
  func.func @transform_1(%arg0: i32) -> (i32, i32) {
    %c0_i32 = arith.constant 0 : i32
    %c0_i32_0 = arith.constant 0 : i32
    %c0_i32_1 = arith.constant 0 : i32
    return %c0_i32, %c0_i32_0 : i32, i32
  }
  func.func @transform_2(%arg0: i32) -> (i32, i32, i32) {
    %c0_i32 = arith.constant 0 : i32
    %c0_i32_0 = arith.constant 0 : i32
    %c0_i32_1 = arith.constant 0 : i32
    return %arg0, %c0_i32, %c0_i32_0 : i32, i32, i32
  }
}

</mosaic_0001>

<bundles_post_ra>
// kernel: cls_head_forward.1
= control target key start
LH: loop header
LB: loop body
LE: loop exit
PB: predicated region body
PF: predicated region fallthrough
CT: control target
= control target key end

     0   :  { %s6340_s15 = smov 32   ;;  %s6341_s16 = smov 64   ;;  %vm1333_vm0 = vcmask 261120   ;;  %vm1374_vm1 = vcmask 523264   ;;  %vm1415_vm2 = vcmask 785408   ;;  %vm1776_vm3 = vcmask 1041408   ;;  %s11076_s0 = inlined_call_operand.vmem [shape: f32[2,12,12,32], index: 0, kind: input, shape index: {}]   ;;  %s11077_s1 = inlined_call_operand.vmem [shape: f32[54,288], index: 1, kind: input, shape index: {}]   ;;  %s11078_s2 = inlined_call_operand.vmem [shape: f32[2,1,1], index: 2, kind: output, shape index: {}]  }
   0x1   :  { %v6165_v0 = vld [vmem:[%s11076_s0 + $0x12] sm:$0xff]  ;;  %v91_v1 = vld [vmem:[%s11076_s0 + $0x2] sm:$0xff]  ;;  %s6342_s23 = smov 96   ;;  %v6166_v11 = vld [vmem:[%s11076_s0 + $0x1a] sm:$0x3]  ;;  %vm1780_vm4 = vcmask 1043458  }
   0x2   :  { %v51_v2 = vld [vmem:[%s11076_s0 + $0x1] sm:$0xff]  ;;  %893 = vrot.lane.b32.xlu0 %v6165_v0, %s6340_s15  ;;  %573 = vrot.lane.b32.xlu2 %v91_v1, %s6341_s16  ;;  %v6387_v4 = vld [vmem:[%s11076_s0 + $0x10] sm:$0xff]  ;;  %vm1785_vm5 = vcmask 1045508   ;;  %vm1789_vm6 = vcmask 1045504   ;;  %vm1778_vm7 = vcmask 1043456   ;;  %vm1782_vm8 = vcmask 1045506  }
   0x3   :  { %413 = vrot.lane.b32.xlu1 %v51_v2, %s6340_s15  ;;  %v6382_v3 = vld [vmem:[%s11076_s0 + $0x20] sm:$0xff]  ;;  %v6408_v7 = vld [vmem:[%s11076_s0 + $0x30] sm:$0xff]  ;;  %v6168_v13 = vld [vmem:[%s11076_s0 + $0x2a] sm:$0x3]  ;;  %vm5120_vm9 = vcmask 1041409   ;;  %vm5122_vm10 = vcmask 1042434  }
   0x4   :  { %v6392_v5 = vld [vmem:[%s11076_s0 + $0x21] sm:$0xff]  ;;  %v6413_v8 = vld [vmem:[%s11076_s0 + $0x32] sm:$0xff]  ;;  %v52_v16 = vld [vmem:[%s11076_s0 + $0x9] sm:$0x3]  ;;  %vm5124_vm11 = vcmask 1043459   ;;  %s6343_s5 = smov 8  }
   0x5   :  { %v6403_v6 = vld [vmem:[%s11076_s0 + $0x22] sm:$0xff]  ;;  %v6429_v10 = vld [vmem:[%s11076_s0 + $0x11] sm:$0xff]  ;;  %v54_v18 = vld [vmem:[%s11076_s0 + $0x19] sm:$0x3]  ;;  %vm5126_vm12 = vcmask 1044484   ;;  %s6344_s6 = smov 16  }
   0x6   :  { %v6424_v9 = vld [vmem:[%s11076_s0 + $0x40] sm:$0xff]  ;;  %v6443_v12 = vld [vmem:[%s11076_s0 + $0x31] sm:$0xff]  ;;  %v6206_v15 = vld [vmem:[%s11076_s0 + $0x28] sm:$0x3]  ;;  %v1697_v59 = vrot.slane %v6403_v6, 4  ;;  %vm5128_vm13 = vcmask 1045509  }
   0x7   :  { %v6455_v14 = vld [vmem:[%s11076_s0 + $0x41] sm:$0xff]  ;;  %v6208_v17 = vld [vmem:[%s11076_s0 + $0x38] sm:$0x3]  ;;  %v6246_v19 = vld [vmem:[%s11076_s0 + $0x29] sm:$0x3]  ;;  %vm5130_vm14 = vcmask 1046534  }
   0x8   :  { %v92_v20 = vld [vmem:[%s11076_s0 + $0xa] sm:$0x3]  ;;  %v6248_v21 = vld [vmem:[%s11076_s0 + $0x39] sm:$0x3]  ;;  %v6088_v23 = vld [vmem:[%s11076_s0 + $0x28] sm:$0x3] }
   0x9   :  { %v94_v22 = vld [vmem:[%s11076_s0 + $0x1a] sm:$0x3]  ;;  %v6086_v24 = vld [vmem:[%s11076_s0 + $0x18] sm:$0x3]  ;;  %v6509_v25 = vld [vmem:[%s11076_s0 + $0x42] sm:$0xff]  ;;  %vm5132_vm15 = vcmask 1047559  }
   0xa   :  { %1053 = vrot.lane.b32.xlu0 %v6382_v3, %s6341_s16  ;;  %733 = vrot.lane.b32.xlu2 %v6387_v4, %s6342_s23  ;;  %v6514_v26 = vld [vmem:[%s11076_s0 + $0x50] sm:$0xff]  ;;  %v6170_v27 = vld [vmem:[%s11076_s0 + $0x3a] sm:$0x3]  ;;  %s6345_s7 = smov 24   ;;  %s6346_s8 = smov 40  }
   0xb   :  { %1213 = vrot.lane.b32.xlu1 %v6392_v5, %s6342_s23  ;;  %v6528_v28 = vld [vmem:[%s11076_s0 + $0x51] sm:$0xff]  ;;  %v6172_v29 = vld [vmem:[%s11076_s0 + $0x4a] sm:$0x3]  ;;  %v6210_v32 = vld [vmem:[%s11076_s0 + $0x48] sm:$0x3]  ;;  %s6347_s9 = smov 48  }
   0xc   :  { %v6212_v31 = vld [vmem:[%s11076_s0 + $0x58] sm:$0x3]  ;;  %v2042_v34 = vld [vmem:[%s11077_s1] sm:$0xff]  ;;  %v56_v36 = vld [vmem:[%s11076_s0 + $0x29] sm:$0x3]  ;;  %s6348_s10 = smov 56  }
   0xd   :  { %v2345_v35 = vand.u32 4294901760, %v2042_v34  ;;  %v58_v37 = vld [vmem:[%s11076_s0 + $0x39] sm:$0x3]  ;;  %v6250_v43 = vld [vmem:[%s11076_s0 + $0x49] sm:$0x3]  ;;  %v11_v49 = vld [vmem:[%s11076_s0] sm:$0xff] }
   0xe   :  { %v96_v44 = vld [vmem:[%s11076_s0 + $0x2a] sm:$0x3]  ;;  %v6252_v45 = vld [vmem:[%s11076_s0 + $0x59] sm:$0x3]  ;;  %v6092_v51 = vld [vmem:[%s11076_s0 + $0x48] sm:$0x3] }
   0xf   :  { %v2564_v38 = vsub.f32 %v2042_v34, %v2345_v35  ;;  %2346 = vmatpush.xpose.msra.mxu0 %v2345_v35  ;;  %6325 = vmatpush.xpose.msra.mxu2 %v2345_v35  ;;  %v98_v50 = vld [vmem:[%s11076_s0 + $0x3a] sm:$0x3]  ;;  %v6090_v52 = vld [vmem:[%s11076_s0 + $0x38] sm:$0x3]  ;;  %v6609_v1 = vld [vmem:[%s11076_s0 + $0x60] sm:$0xff]  ;;  %s6349_s11 = smov 72  }
  0x10   :  { %v6603_v63 = vld [vmem:[%s11076_s0 + $0x52] sm:$0xff]  ;;  %v6614_v2 = vld [vmem:[%s11076_s0 + $0x62] sm:$0xff]  ;;  %v6174_v34 = vld [vmem:[%s11076_s0 + $0x5a] sm:$0x3] }
  0x11   :  { %v2565_v39 = vand.u32 4294901760, %v2564_v38 }
  0x12   :  { %897 = vrot.lane.b32.xlu0 %v6403_v6, %s6340_s15  ;;  %1057 = vrot.lane.b32.xlu2 %v6408_v7, %s6341_s16 }
  0x13   :  { %901 = vrot.lane.b32.xlu1 %v6413_v8, %s6340_s15  ;;  %2687 = vmatpush.xpose.msrb.mxu2 %v2564_v38  ;;  %v2566_v41 = vsub.f32 %v2564_v38, %v2565_v39 }
  0x14   :  { %3000 = vmatpush.xpose.msrb.mxu0 %v2565_v39 }
  0x15   :  { %v2567_v42 = vand.u32 4294901760, %v2566_v41 }
  0x17   :  { %2568 = vmatpush.xpose.msra.mxu1 %v2567_v42  ;;  %6326 = vmatpush.xpose.msra.mxu3 %v2567_v42 }
  0x1a   :  { %1061 = vrot.lane.b32.xlu0 %v6424_v9, %s6341_s16  ;;  %421 = vrot.lane.b32.xlu2 %v6392_v5, %s6340_s15 }
  0x1b   :  { %417 = vrot.lane.b32.xlu1 %v6429_v10, %s6340_s15  ;;  %3118 = vmatpush.xpose.msrb.mxu1 %v2345_v35 }
  0x1c   :  { %2830 = vmatpush.xpose.msrb.mxu3 %v2345_v35  ;;  %v6651_v35 = vld [vmem:[%s11076_s0 + $0x71] sm:$0xff] }
  0x22   :  { %895 = vrot.lane.b32.xlu0 %v6166_v11, %s6340_s15  ;;  %1217 = vrot.lane.b32.xlu2 %v6443_v12, %s6342_s23 }
  0x23   :  { %899 = vrot.lane.b32.xlu1 %v6168_v13, %s6340_s15 }
  0x2a   :  { %1221 = vrot.lane.b32.xlu0 %v6455_v14, %s6342_s23  ;;  %581 = vrot.lane.b32.xlu2 %v6403_v6, %s6341_s16 }
  0x2b   :  { %577 = vrot.lane.b32.xlu1 %v6165_v0, %s6341_s16 }
  0x32   :  { %1055 = vrot.lane.b32.xlu0 %v6206_v15, %s6341_s16  ;;  %415 = vrot.lane.b32.xlu2 %v52_v16, %s6340_s15 }
  0x33   :  { %1059 = vrot.lane.b32.xlu1 %v6208_v17, %s6341_s16 }
  0x3a   :  { %419 = vrot.lane.b32.xlu0 %v54_v18, %s6340_s15  ;;  %741 = vrot.lane.b32.xlu2 %v6408_v7, %s6342_s23 }
  0x3b   :  { %737 = vrot.lane.b32.xlu1 %v6382_v3, %s6342_s23 }
  0x42   :  { %1215 = vrot.lane.b32.xlu0 %v6246_v19, %s6342_s23  ;;  %575 = vrot.lane.b32.xlu2 %v92_v20, %s6341_s16 }
  0x43   :  { %1219 = vrot.lane.b32.xlu1 %v6248_v21, %s6342_s23 }
  0x4a   :  { %579 = vrot.lane.b32.xlu0 %v94_v22, %s6341_s16  ;;  %739 = vrot.lane.b32.xlu2 %v6088_v23, %s6342_s23 }
  0x4b   :  { %735 = vrot.lane.b32.xlu1 %v6086_v24, %s6342_s23 }
  0x52   :  { %905 = vrot.lane.b32.xlu0 %v6509_v25, %s6340_s15  ;;  %425 = vrot.lane.b32.xlu2 %v6443_v12, %s6340_s15 }
  0x53   :  { %1065 = vrot.lane.b32.xlu1 %v6514_v26, %s6341_s16 }
  0x5a   :  { %903 = vrot.lane.b32.xlu0 %v6170_v27, %s6340_s15  ;;  %1225 = vrot.lane.b32.xlu2 %v6528_v28, %s6342_s23  ;;  %v6633_v27 = vld [vmem:[%s11076_s0 + $0x70] sm:$0xff] }
  0x5b   :  { %907 = vrot.lane.b32.xlu1 %v6172_v29, %s6340_s15 }
  0x5c   :  { %v574_v30 = vpop.permute.xlu2 %573 }
  0x62   :  { %585 = vrot.lane.b32.xlu0 %v6413_v8, %s6341_s16  ;;  %1067 = vrot.lane.b32.xlu2 %v6212_v31, %s6341_s16 }
  0x63   :  { %1063 = vrot.lane.b32.xlu1 %v6210_v32, %s6341_s16 }
  0x64   :  { %v734_v33 = vpop.permute.xlu2 %733 }
  0x6a   :  { %423 = vrot.lane.b32.xlu0 %v56_v36, %s6340_s15  ;;  %745 = vrot.lane.b32.xlu2 %v6424_v9, %s6342_s23  ;;  %v6656_v36 = vld [vmem:[%s11076_s0 + $0x61] sm:$0xff] }
  0x6b   :  { %427 = vrot.lane.b32.xlu1 %v58_v37, %s6340_s15 }
  0x6c   :  { %v6560_v40 = vpop.permute.xlu2 %1057 }
  0x72   :  { %1223 = vrot.lane.b32.xlu0 %v6250_v43, %s6342_s23  ;;  %583 = vrot.lane.b32.xlu2 %v96_v44, %s6341_s16 }
  0x73   :  { %1227 = vrot.lane.b32.xlu1 %v6252_v45, %s6342_s23  ;;  %v6214_v45 = vld [vmem:[%s11076_s0 + $0x68] sm:$0x3] }
  0x74   :  { %v894_v46 = vpop.permute.xlu0 %893  ;;  %v6574_v47 = vpop.permute.xlu2 %421 }
  0x75   :  { %v414_v48 = vpop.permute.xlu1 %413  ;;  %v1456_v54 = vsel %vm1333_vm0, %v6429_v10, %v894_v46  ;;  %v1338_v46 = vsel %vm1333_vm0, %v6382_v3, %v6574_v47 }
  0x76   :  { %v1334_v53 = vsel %vm1333_vm0, %v11_v49, %v414_v48 }
  0x77   :  { %v1375_v57 = vsel %vm1374_vm1, %v1334_v53, %v574_v30 }
  0x78   :  { %v1416_v0 = vsel %vm1415_vm2, %v1375_v57, %v734_v33 }
  0x7a   :  { %587 = vrot.lane.b32.xlu0 %v98_v50, %s6341_s16  ;;  %747 = vrot.lane.b32.xlu2 %v6092_v51, %s6342_s23 }
  0x7b   :  { %743 = vrot.lane.b32.xlu1 %v6090_v52, %s6342_s23  ;;  %v6692_v52 = vrot.slane %v6509_v25, 4 }
  0x7c   :  { %v1054_v55 = vpop.permute.xlu0 %1053  ;;  %v6594_v56 = vpop.permute.xlu2 %1217 }
  0x7d   :  { %v1496_v58 = vsel %vm1374_vm1, %v1456_v54, %v1054_v55  ;;  %v1214_v60 = vpop.permute.xlu1 %1213  ;;  %v60_v55 = vld [vmem:[%s11076_s0 + $0x49] sm:$0x3] }
  0x7e   :  { %v1536_v61 = vsel %vm1415_vm2, %v1496_v58, %v1214_v60 }
  0x7f   :  { %v1696_v62 = vrot.slane %v1536_v61, 6 }
  0x81   :  { %v1777_v6 = vsel %vm1776_vm3, %v1416_v0, %v1696_v62  ;;  %v1781_v10 = vsel %vm1780_vm4, %v1416_v0, %v1696_v62  ;;  %v1786_v11 = vsel %vm1785_vm5, %v1416_v0, %v1696_v62  ;;  %v1790_v13 = vsel %vm1789_vm6, %v1696_v62, %v1416_v0 }
  0x82   :  { %v1779_v15 = vsel %vm1778_vm7, %v1777_v6, %v1697_v59  ;;  %v1783_v16 = vsel %vm1782_vm8, %v1781_v10, %v1697_v59  ;;  %v1787_v17 = vsel %vm1778_vm7, %v1697_v59, %v1786_v11  ;;  %v1791_v18 = vsel %vm1782_vm8, %v1697_v59, %v1790_v13  ;;  %909 = vrot.lane.b32.xlu0 %v6603_v63, %s6340_s15 }
  0x83   :  { %v1784_v19 = vrot.slane %v1783_v16, 2  ;;  %v1788_v20 = vrot.slane %v1787_v17, 4  ;;  %v1792_v21 = vrot.slane %v1791_v18, 6  ;;  %2045 = vst [vmem:[#allocation1] ss:$4 sm:$0xff] %v1779_v15  ;;  %1069 = vrot.lane.b32.xlu2 %v6609_v1, %s6341_s16  ;;  %913 = vrot.lane.b32.xlu1 %v6614_v2, %s6340_s15 }
  0x84   :  { %v898_v22 = vpop.permute.xlu0 %897  ;;  %v582_v23 = vpop.permute.xlu2 %581  ;;  %v6254_v15 = vld [vmem:[%s11076_s0 + $0x69] sm:$0x3]  ;;  %v6094_v16 = vld [vmem:[%s11076_s0 + $0x58] sm:$0x3] }
  0x85   :  { %2047 = vst [vmem:[#allocation1 + $0x1] ss:$4 sm:$0xff] %v1784_v19  ;;  %v902_v24 = vpop.permute.xlu1 %901  ;;  %v1379_v3 = vsel %vm1374_vm1, %v1338_v46, %v582_v23  ;;  %v1458_v0 = vsel %vm1333_vm0, %v6392_v5, %v898_v22  ;;  %v100_v5 = vld [vmem:[%s11076_s0 + $0x4a] sm:$0x3] }
  0x86   :  { %2049 = vst [vmem:[#allocation1 + $0x2] ss:$4 sm:$0xff] %v1788_v20  ;;  %v1460_v48 = vsel %vm1333_vm0, %v6443_v12, %v902_v24  ;;  %v1498_v13 = vsel %vm1374_vm1, %v1458_v0, %v6560_v40  ;;  %v1701_v20 = vrot.slane %v6413_v8, 4 }
  0x87   :  { %2051 = vst [vmem:[#allocation1 + $0x3] ss:$4 sm:$0xff] %v1792_v21  ;;  %v1538_v17 = vsel %vm1415_vm2, %v1498_v13, %v6594_v56 }
  0x88   :  { %v1700_v21 = vrot.slane %v1538_v17, 6 }
  0x8a   :  { %1073 = vrot.lane.b32.xlu0 %v6633_v27, %s6341_s16 }
  0x8b   :  { %433 = vrot.lane.b32.xlu2 %v6528_v28, %s6340_s15  ;;  %429 = vrot.lane.b32.xlu1 %v6455_v14, %s6340_s15 }
  0x8c   :  { %v1062_v29 = vpop.permute.xlu0 %1061  ;;  %v6641_v30 = vpop.permute.xlu2 %415 }
  0x8d   :  { %v418_v31 = vpop.permute.xlu1 %417  ;;  %v1500_v49 = vsel %vm1374_vm1, %v1460_v48, %v1062_v29 }
  0x8e   :  { %v2060_v32 = vld.sshfl [vmem:[#allocation1] sm:$0xff pattern:$0x73625140]  ;;  %v6710_v58 = vld.sshfl [vmem:[#allocation1 + $0x8] sm:$0xff pattern:$0x73625140]  ;;  %v1336_v40 = vsel %vm1333_vm0, %v6387_v4, %v418_v31 }
  0x8f   :  { %v6643_v33 = vand.u32 4294901760, %v2060_v32  ;;  %v6712_v59 = vld.sshfl [vmem:[#allocation1 + $0x10] sm:$0xff pattern:$0x73625140] }
  0x90   :  { %11308 = vst [vmem:[#allocation2_spill] sm:$0xff] %v6712_v59  ;;  %v6757_v4 = vld [vmem:[%s11076_s0 + $0x72] sm:$0xff] }
  0x91   :  { %2570 = vmatmul.f32.vlgmr.msra.gmra.mxu1 %v6643_v33  ;;  %v6660_v37 = vsub.f32 %v2060_v32, %v6643_v33 }
  0x92   :  { %911 = vrot.lane.b32.xlu0 %v6174_v34, %s6340_s15 }
  0x93   :  { %1233 = vrot.lane.b32.xlu2 %v6651_v35, %s6342_s23  ;;  %1229 = vrot.lane.b32.xlu1 %v6656_v36, %s6342_s23  ;;  %v11085_v38 = vand.u32 4294901760, %v6660_v37 }
  0x94   :  { %v6668_v39 = vpop.permute.xlu0 %895  ;;  %v742_v41 = vpop.permute.xlu2 %741 }
  0x95   :  { %v6670_v42 = vpop.permute.xlu1 %899  ;;  %v2350_v43 = vsub.f32 %v6660_v37, %v11085_v38  ;;  %v6699_v12 = vsel %vm1415_vm2, %v1379_v3, %v742_v41 }
  0x97   :  { %v2351_v44 = vand.u32 4294901760, %v2350_v43 }
  0x99   :  { %2352 = vmatmul.f32.vlgmr.msra.gmra.mxu0 %v2351_v44  ;;  %v6766_v44 = vld [vmem:[%s11076_s0 + $0x80] sm:$0xff] }
  0x9a   :  { %589 = vrot.lane.b32.xlu0 %v6509_v25, %s6341_s16 }
  0x9b   :  { %1071 = vrot.lane.b32.xlu2 %v6214_v45, %s6341_s16  ;;  %593 = vrot.lane.b32.xlu1 %v6603_v63, %s6341_s16 }
  0x9c   :  { %v1222_v50 = vpop.permute.xlu0 %1221  ;;  %v6689_v51 = vpop.permute.xlu2 %575 }
  0x9d   :  { %v1540_v53 = vsel %vm1415_vm2, %v1500_v49, %v1222_v50  ;;  %v578_v54 = vpop.permute.xlu1 %577 }
  0x9e   :  { %v6696_v47 = vrot.slane %v1540_v53, 6  ;;  %v1377_v22 = vsel %vm1374_vm1, %v1336_v40, %v578_v54  ;;  %v6126_v53 = vld [vmem:[%s11076_s0 + $0x19] sm:$0x3]  ;;  %v6128_v54 = vld [vmem:[%s11076_s0 + $0x29] sm:$0x3] }
  0xa0   :  { %v1808_v57 = vsel %vm1776_vm3, %v6699_v12, %v6696_v47  ;;  %v1810_v25 = vsel %vm1780_vm4, %v6699_v12, %v6696_v47 }
  0xa1   :  { %v1809_v60 = vsel %vm1778_vm7, %v1808_v57, %v6692_v52  ;;  %v1811_v61 = vsel %vm1782_vm8, %v1810_v25, %v6692_v52  ;;  %v6176_v57 = vld [vmem:[%s11076_s0 + $0x6a] sm:$0x3]  ;;  %v1457_v25 = vsel %vm1333_vm0, %v6126_v53, %v6668_v39  ;;  %v14_v39 = vld [vmem:[%s11076_s0 + $0x18] sm:$0x3] }
  0xa2   :  { %v1812_v62 = vrot.slane %v1811_v61, 2  ;;  %2068 = vst [vmem:[#allocation1 + $0x2] ss:$4 sm:$0xff] %v1809_v60  ;;  %431 = vrot.lane.b32.xlu0 %v60_v55, %s6340_s15  ;;  %v12_v55 = vld [vmem:[%s11076_s0 + $0x8] sm:$0x3]  ;;  %v1459_v60 = vsel %vm1333_vm0, %v6128_v54, %v6670_v42 }
  0xa3   :  { %753 = vrot.lane.b32.xlu2 %v6609_v1, %s6342_s23  ;;  %749 = vrot.lane.b32.xlu1 %v6514_v26, %s6342_s23  ;;  %v6795_v61 = vld [vmem:[%s11076_s0 + $0x82] sm:$0xff]  ;;  %v6288_v42 = vld [vmem:[%s11076_s0 + $0x3a] sm:$0x3] }
  0xa4   :  { %2069 = vst [vmem:[#allocation1 + $0x3] ss:$4 sm:$0xff] %v1812_v62  ;;  %v1056_v6 = vpop.permute.xlu0 %1055  ;;  %v6725_v10 = vpop.permute.xlu2 %739  ;;  %v6178_v62 = vld [vmem:[%s11076_s0 + $0x7a] sm:$0x3]  ;;  %v1703_v17 = vrot.slane %v6288_v42, 4 }
  0xa5   :  { %v1060_v11 = vpop.permute.xlu1 %1059  ;;  %v1497_v0 = vsel %vm1374_vm1, %v1457_v25, %v1056_v6  ;;  %v6218_v54 = vld [vmem:[%s11076_s0 + $0x88] sm:$0x3] }
  0xa6   :  { %v1499_v13 = vsel %vm1374_vm1, %v1459_v60, %v1060_v11 }
  0xaa   :  { %1231 = vrot.lane.b32.xlu0 %v6254_v15, %s6342_s23  ;;  %v6286_v15 = vld [vmem:[%s11076_s0 + $0x2a] sm:$0x3] }
  0xab   :  { %751 = vrot.lane.b32.xlu2 %v6094_v16, %s6342_s23  ;;  %591 = vrot.lane.b32.xlu1 %v100_v5, %s6341_s16  ;;  %v1335_v16 = vsel %vm1333_vm0, %v12_v55, %v6641_v30 }
  0xac   :  { %v420_v18 = vpop.permute.xlu0 %419  ;;  %v6745_v19 = vpop.permute.xlu2 %425  ;;  %v1376_v30 = vsel %vm1374_vm1, %v1335_v16, %v6689_v51 }
  0xad   :  { %v738_v23 = vpop.permute.xlu1 %737  ;;  %v1337_v11 = vsel %vm1333_vm0, %v14_v39, %v420_v18 }
  0xae   :  { %v1418_v56 = vsel %vm1415_vm2, %v1377_v22, %v738_v23 }
  0xaf   :  { %v1795_v24 = vsel %vm1776_vm3, %v1418_v56, %v1700_v21  ;;  %v1797_v29 = vsel %vm1780_vm4, %v1418_v56, %v1700_v21  ;;  %v1800_v32 = vsel %vm1785_vm5, %v1418_v56, %v1700_v21  ;;  %v1803_v34 = vsel %vm1789_vm6, %v1700_v21, %v1418_v56 }
  0xb0   :  { %v1796_v8 = vsel %vm1778_vm7, %v1795_v24, %v1701_v20  ;;  %v1798_v31 = vsel %vm1782_vm8, %v1797_v29, %v1701_v20  ;;  %v1801_v41 = vsel %vm1778_vm7, %v1701_v20, %v1800_v32  ;;  %v1804_v43 = vsel %vm1782_vm8, %v1701_v20, %v1803_v34 }
  0xb1   :  { %v1799_v45 = vrot.slane %v1798_v31, 2  ;;  %v1802_v46 = vrot.slane %v1801_v41, 4  ;;  %v1805_v48 = vrot.slane %v1804_v43, 6  ;;  %2055 = vst [vmem:[#allocation1 + $0x21] ss:$4 sm:$0xff] %v1796_v8  ;;  %v1699_v21 = vrot.slane %v6286_v15, 4 }
  0xb2   :  { %917 = vrot.lane.b32.xlu0 %v6757_v4, %s6340_s15  ;;  %v6833_v8 = vld [vmem:[%s11076_s0 + $0x81] sm:$0xff]  ;;  %v6216_v41 = vld [vmem:[%s11076_s0 + $0x78] sm:$0x3]  ;;  %v1816_v43 = vsel %vm1789_vm6, %v6696_v47, %v6699_v12 }
  0xb3   :  { %2057 = vst [vmem:[#allocation1 + $0x22] ss:$4 sm:$0xff] %v1799_v45  ;;  %437 = vrot.lane.b32.xlu2 %v6656_v36, %s6340_s15  ;;  %1077 = vrot.lane.b32.xlu1 %v6766_v44, %s6341_s16  ;;  %v1817_v53 = vsel %vm1782_vm8, %v6692_v52, %v1816_v43 }
  0xb4   :  { %2059 = vst [vmem:[#allocation1 + $0x23] ss:$4 sm:$0xff] %v1802_v46  ;;  %v1216_v49 = vpop.permute.xlu0 %1215  ;;  %v6774_v50 = vpop.permute.xlu2 %1225 }
  0xb5   :  { %2066 = vst [vmem:[#allocation1] ss:$4 sm:$0xff] %v1805_v48  ;;  %v1220_v3 = vpop.permute.xlu1 %1219  ;;  %v1537_v5 = vsel %vm1415_vm2, %v1497_v0, %v1216_v49 }
  0xb6   :  { %v1539_v6 = vsel %vm1415_vm2, %v1499_v13, %v1220_v3  ;;  %v1698_v22 = vrot.slane %v1537_v5, 6 }
  0xb7   :  { %v1702_v23 = vrot.slane %v1539_v6, 6 }
  0xba   :  { %915 = vrot.lane.b32.xlu0 %v6176_v57, %s6340_s15  ;;  %v1818_v57 = vrot.slane %v1817_v53, 6 }
  0xbb   :  { %921 = vrot.lane.b32.xlu2 %v6795_v61, %s6340_s15  ;;  %919 = vrot.lane.b32.xlu1 %v6178_v62, %s6340_s15 }
  0xbc   :  { %v580_v40 = vpop.permute.xlu0 %579  ;;  %v6820_v20 = vpop.permute.xlu2 %1067 }
  0xbd   :  { %v1378_v56 = vsel %vm1374_vm1, %v1337_v11, %v580_v40  ;;  %v736_v24 = vpop.permute.xlu1 %735 }
  0xbe   :  { %v1419_v29 = vsel %vm1415_vm2, %v1378_v56, %v6725_v10  ;;  %v1417_v32 = vsel %vm1415_vm2, %v1376_v30, %v736_v24  ;;  %v1813_v10 = vsel %vm1785_vm5, %v6699_v12, %v6696_v47  ;;  %v62_v47 = vld [vmem:[%s11076_s0 + $0x59] sm:$0x3]  ;;  %v6864_v12 = vld [vmem:[%s11076_s0 + $0x90] sm:$0xff] }
  0xbf   :  { %v1806_v18 = vsel %vm1776_vm3, %v1419_v29, %v1702_v23  ;;  %v1793_v34 = vsel %vm1776_vm3, %v1417_v32, %v1698_v22  ;;  %v1814_v49 = vsel %vm1778_vm7, %v6692_v52, %v1813_v10  ;;  %v1340_v22 = vsel %vm1333_vm0, %v6408_v7, %v6745_v19 }
  0xc0   :  { %v1807_v51 = vsel %vm1778_vm7, %v1806_v18, %v1703_v17  ;;  %v1794_v31 = vsel %vm1778_vm7, %v1793_v34, %v1699_v21  ;;  %v1815_v55 = vrot.slane %v1814_v49, 4  ;;  %v1709_v23 = vrot.slane %v6603_v63, 4 }
  0xc1   :  { %2067 = vst [vmem:[#allocation1 + $0x1] ss:$4 sm:$0xff] %v1807_v51  ;;  %v6256_v51 = vld [vmem:[%s11076_s0 + $0x79] sm:$0x3] }
  0xc2   :  { %2053 = vst [vmem:[#allocation1 + $0x20] ss:$4 sm:$0xff] %v1794_v31  ;;  %1237 = vrot.lane.b32.xlu0 %v6833_v8, %s6342_s23 }
  0xc3   :  { %1075 = vrot.lane.b32.xlu2 %v6216_v41, %s6341_s16  ;;  %597 = vrot.lane.b32.xlu1 %v6614_v2, %s6341_s16 }
  0xc4   :  { %v906_v45 = vpop.permute.xlu0 %905  ;;  %v746_v46 = vpop.permute.xlu2 %745 }
  0xc5   :  { %v1066_v48 = vpop.permute.xlu1 %1065  ;;  %v1462_v13 = vsel %vm1333_vm0, %v6455_v14, %v906_v45  ;;  %v64_v14 = vld [vmem:[%s11076_s0 + $0x69] sm:$0x3]  ;;  %v6935_v45 = vld [vmem:[%s11076_s0 + $0x91] sm:$0xff] }
  0xc6   :  { %v1502_v6 = vsel %vm1374_vm1, %v1462_v13, %v1066_v48  ;;  %v102_v13 = vld [vmem:[%s11076_s0 + $0x5a] sm:$0x3] }
  0xc7   :  { %v1542_v40 = vsel %vm1415_vm2, %v1502_v6, %v6774_v50  ;;  %v104_v6 = vld [vmem:[%s11076_s0 + $0x6a] sm:$0x3] }
  0xc8   :  { %v2074_v3 = vld.sshfl [vmem:[#allocation1] sm:$0xff pattern:$0x73625140]  ;;  %v1708_v50 = vrot.slane %v1542_v40, 6  ;;  %v6130_v40 = vld [vmem:[%s11076_s0 + $0x39] sm:$0x3] }
  0xc9   :  { %v2063_v25 = vld.sshfl [vmem:[#allocation1 + $0x20] sm:$0xff pattern:$0x73625140]  ;;  %v6866_v60 = vld.sshfl [vmem:[#allocation1 + $0x28] sm:$0xff pattern:$0x73625140] }
  0xca   :  { %v6868_v52 = vld.sshfl [vmem:[#allocation1 + $0x30] sm:$0xff pattern:$0x73625140]  ;;  %1079 = vrot.lane.b32.xlu0 %v6218_v54, %s6341_s16  ;;  %v6874_v62 = vand.u32 4294901760, %v2063_v25  ;;  %v6876_v0 = vand.u32 4294901760, %v2074_v3 }
  0xcb   :  { %11309 = vst [vmem:[#allocation3_spill] sm:$0xff] %v6868_v52  ;;  %435 = vrot.lane.b32.xlu2 %v62_v47, %s6340_s15  ;;  %1081 = vrot.lane.b32.xlu1 %v6864_v12, %s6341_s16  ;;  %v6940_v54 = vld.sshfl [vmem:[#allocation1 + $0x8] sm:$0xff pattern:$0x73625140] }
  0xcc   :  { %2070 = vst [vmem:[#allocation1 + $0x20] ss:$4 sm:$0xff] %v1815_v55  ;;  %v6880_v39 = vpop.permute.xlu0 %903  ;;  %v6882_v42 = vpop.permute.xlu2 %583  ;;  %2574 = vmatmul.f32.gmra.mxu1 %v6874_v62  ;;  %v6888_v16 = vsub.f32 %v2063_v25, %v6874_v62  ;;  %v6891_v5 = vsub.f32 %v2074_v3, %v6876_v0  ;;  %v6942_v3 = vld.sshfl [vmem:[#allocation1 + $0x10] sm:$0xff pattern:$0x73625140] }
  0xcd   :  { %2071 = vst [vmem:[#allocation1 + $0x21] ss:$4 sm:$0xff] %v1818_v57  ;;  %v6885_v15 = vpop.permute.xlu1 %907 }
  0xce   :  { %v11084_v11 = vand.u32 4294901760, %v6888_v16  ;;  %v11083_v21 = vand.u32 4294901760, %v6891_v5  ;;  %11310 = vst [vmem:[#allocation4_spill] sm:$0xff] %v6942_v3 }
  0xd0   :  { %v2358_v17 = vsub.f32 %v6888_v16, %v11084_v11  ;;  %v2366_v18 = vsub.f32 %v6891_v5, %v11083_v21  ;;  %v7396_v21 = vld [vmem:[%s11076_s0 + $0xf1] sm:$0xff] }
  0xd2   :  { %439 = vrot.lane.b32.xlu0 %v64_v14, %s6340_s15  ;;  %v2359_v30 = vand.u32 4294901760, %v2358_v17  ;;  %v2367_v47 = vand.u32 4294901760, %v2366_v18  ;;  %v6132_v14 = vld [vmem:[%s11076_s0 + $0x49] sm:$0x3] }
  0xd3   :  { %757 = vrot.lane.b32.xlu2 %v6633_v27, %s6342_s23  ;;  %441 = vrot.lane.b32.xlu1 %v6651_v35, %s6340_s15 }
  0xd4   :  { %v586_v56 = vpop.permute.xlu0 %585  ;;  %v6913_v24 = vpop.permute.xlu2 %747  ;;  %2360 = vmatmul.f32.gmra.mxu0 %v2359_v30  ;;  %2578 = vmatmul.f32.gmra.mxu1 %v6876_v0 }
  0xd5   :  { %v1381_v29 = vsel %vm1374_vm1, %v1340_v22, %v586_v56  ;;  %v1064_v27 = vpop.permute.xlu1 %1063  ;;  %v16_v56 = vld [vmem:[%s11076_s0 + $0x28] sm:$0x3] }
  0xd6   :  { %v1422_v32 = vsel %vm1415_vm2, %v1381_v29, %v746_v46  ;;  %v6258_v46 = vld [vmem:[%s11076_s0 + $0x89] sm:$0x3]  ;;  %v1461_v29 = vsel %vm1333_vm0, %v6130_v40, %v6880_v39 }
  0xd7   :  { %v1821_v7 = vsel %vm1776_vm3, %v1422_v32, %v1708_v50  ;;  %v1823_v63 = vsel %vm1780_vm4, %v1422_v32, %v1708_v50  ;;  %v1826_v19 = vsel %vm1785_vm5, %v1422_v32, %v1708_v50  ;;  %v1829_v34 = vsel %vm1789_vm6, %v1708_v50, %v1422_v32  ;;  %v6096_v50 = vld [vmem:[%s11076_s0 + $0x68] sm:$0x3]  ;;  %v6098_v32 = vld [vmem:[%s11076_s0 + $0x78] sm:$0x3]  ;;  %v6290_v39 = vld [vmem:[%s11076_s0 + $0x4a] sm:$0x3] }
  0xd8   :  { %v1822_v31 = vsel %vm1778_vm7, %v1821_v7, %v1709_v23  ;;  %v1824_v41 = vsel %vm1782_vm8, %v1823_v63, %v1709_v23  ;;  %v1827_v10 = vsel %vm1778_vm7, %v1709_v23, %v1826_v19  ;;  %v1830_v43 = vsel %vm1782_vm8, %v1709_v23, %v1829_v34  ;;  %v6292_v63 = vld [vmem:[%s11076_s0 + $0x5a] sm:$0x3] }
  0xd9   :  { %v1825_v48 = vrot.slane %v1824_v41, 2  ;;  %v1828_v49 = vrot.slane %v1827_v10, 4  ;;  %v1831_v53 = vrot.slane %v1830_v43, 6  ;;  %2073 = vst [vmem:[#allocation1 + $0x23] ss:$4 sm:$0xff] %v1822_v31  ;;  %v1463_v23 = vsel %vm1333_vm0, %v6132_v14, %v6885_v15 }
  0xda   :  { %1235 = vrot.lane.b32.xlu0 %v6256_v51, %s6342_s23  ;;  %v1501_v18 = vsel %vm1374_vm1, %v1461_v29, %v1064_v27  ;;  %v18_v15 = vld [vmem:[%s11076_s0 + $0x38] sm:$0x3]  ;;  %v1503_v7 = vsel %vm1374_vm1, %v1463_v23, %v6820_v20  ;;  %v1711_v51 = vrot.slane %v6292_v63, 4  ;;  %v1707_v41 = vrot.slane %v6290_v39, 4  ;;  %v6180_v23 = vld [vmem:[%s11076_s0 + $0x8a] sm:$0x3] }
  0xdb   :  { %2080 = vst [vmem:[#allocation1] ss:$4 sm:$0xff] %v1825_v48  ;;  %1241 = vrot.lane.b32.xlu2 %v6935_v45, %s6342_s23  ;;  %1239 = vrot.lane.b32.xlu1 %v6258_v46, %s6342_s23 }
  0xdc   :  { %2081 = vst [vmem:[#allocation1 + $0x1] ss:$4 sm:$0xff] %v1828_v49  ;;  %v424_v55 = vpop.permute.xlu0 %423  ;;  %2368 = vmatmul.f32.gmra.mxu0 %v2367_v47 }
  0xdd   :  { %2082 = vst [vmem:[#allocation1 + $0x2] ss:$4 sm:$0xff] %v1831_v53  ;;  %v6948_v57 = vpop.permute.xlu2 %1069  ;;  %v428_v25 = vpop.permute.xlu1 %427  ;;  %v1339_v19 = vsel %vm1333_vm0, %v16_v56, %v424_v55 }
  0xde   :  { %v1341_v20 = vsel %vm1333_vm0, %v18_v15, %v428_v25  ;;  %v1380_v53 = vsel %vm1374_vm1, %v1339_v19, %v6882_v42  ;;  %v7019_v42 = vld [vmem:[%s11076_s0 + $0xa0] sm:$0xff]  ;;  %v6220_v19 = vld [vmem:[%s11076_s0 + $0x98] sm:$0x3] }
  0xe2   :  { %595 = vrot.lane.b32.xlu0 %v102_v13, %s6341_s16 }
  0xe3   :  { %601 = vrot.lane.b32.xlu2 %v6757_v4, %s6341_s16  ;;  %599 = vrot.lane.b32.xlu1 %v104_v6, %s6341_s16  ;;  %v7012_v6 = vld [vmem:[%s11076_s0 + $0x92] sm:$0xff] }
  0xe4   :  { %v1224_v17 = vpop.permute.xlu0 %1223 }
  0xe5   :  { %v6966_v30 = vpop.permute.xlu2 %433  ;;  %v1228_v22 = vpop.permute.xlu1 %1227  ;;  %v1541_v34 = vsel %vm1415_vm2, %v1501_v18, %v1224_v17 }
  0xe6   :  { %v1543_v27 = vsel %vm1415_vm2, %v1503_v7, %v1228_v22  ;;  %v1706_v10 = vrot.slane %v1541_v34, 6 }
  0xe7   :  { %v1710_v43 = vrot.slane %v1543_v27, 6 }
  0xea   :  { %755 = vrot.lane.b32.xlu0 %v6096_v50, %s6342_s23  ;;  %v7035_v50 = vld [vmem:[%s11076_s0 + $0xa1] sm:$0xff] }
  0xeb   :  { %761 = vrot.lane.b32.xlu2 %v6766_v44, %s6342_s23  ;;  %759 = vrot.lane.b32.xlu1 %v6098_v32, %s6342_s23 }
  0xec   :  { %v588_v31 = vpop.permute.xlu0 %587 }
  0xed   :  { %v1382_v46 = vsel %vm1374_vm1, %v1341_v20, %v588_v31  ;;  %v1234_v48 = vpop.permute.xlu2 %1233  ;;  %v744_v49 = vpop.permute.xlu1 %743  ;;  %v66_v20 = vld [vmem:[%s11076_s0 + $0x79] sm:$0x3] }
  0xee   :  { %v1423_v47 = vsel %vm1415_vm2, %v1382_v46, %v6913_v24  ;;  %v1421_v55 = vsel %vm1415_vm2, %v1380_v53, %v744_v49 }
  0xef   :  { %v1832_v13 = vsel %vm1776_vm3, %v1423_v47, %v1710_v43  ;;  %v1819_v25 = vsel %vm1776_vm3, %v1421_v55, %v1706_v10  ;;  %v6100_v55 = vld [vmem:[%s11076_s0 + $0x88] sm:$0x3] }
  0xf0   :  { %v1833_v14 = vsel %vm1778_vm7, %v1832_v13, %v1711_v51  ;;  %v1820_v17 = vsel %vm1778_vm7, %v1819_v25, %v1707_v41  ;;  %v106_v13 = vld [vmem:[%s11076_s0 + $0x7a] sm:$0x3] }
  0xf1   :  { %2083 = vst [vmem:[#allocation1 + $0x3] ss:$4 sm:$0xff] %v1833_v14 }
  0xf2   :  { %2072 = vst [vmem:[#allocation1 + $0x22] ss:$4 sm:$0xff] %v1820_v17  ;;  %925 = vrot.lane.b32.xlu0 %v7012_v6, %s6340_s15  ;;  %v1344_v17 = vsel %vm1333_vm0, %v6514_v26, %v6966_v30 }
  0xf3   :  { %445 = vrot.lane.b32.xlu2 %v6833_v8, %s6340_s15  ;;  %1085 = vrot.lane.b32.xlu1 %v7019_v42, %s6341_s16 }
  0xf4   :  { %v910_v24 = vpop.permute.xlu0 %909 }
  0xf5   :  { %v7027_v40 = vpop.permute.xlu2 %1071  ;;  %v914_v22 = vpop.permute.xlu1 %913 }
  0xf6   :  { %v1466_v49 = vsel %vm1333_vm0, %v6656_v36, %v914_v22 }
  0xf8   :  { %v2088_v56 = vld.sshfl [vmem:[#allocation1] sm:$0xff pattern:$0x73625140] }
  0xf9   :  { %v2077_v29 = vld.sshfl [vmem:[#allocation1 + $0x20] sm:$0xff pattern:$0x73625140]  ;;  %v7044_v18 = vand.u32 4294901760, %v2088_v56 }
  0xfa   :  { %923 = vrot.lane.b32.xlu0 %v6180_v23, %s6340_s15  ;;  %v7042_v32 = vand.u32 4294901760, %v2077_v29  ;;  %v7098_v23 = vrot.slane %v6757_v4, 4 }
  0xfb   :  { %605 = vrot.lane.b32.xlu2 %v6795_v61, %s6341_s16  ;;  %1245 = vrot.lane.b32.xlu1 %v7035_v50, %s6342_s23  ;;  %v7055_v27 = vsub.f32 %v2088_v56, %v7044_v18 }
  0xfc   :  { %v1074_v15 = vpop.permute.xlu0 %1073  ;;  %2582 = vmatmul.f32.gmra.mxu1 %v7042_v32  ;;  %v7048_v39 = vsub.f32 %v2077_v29, %v7042_v32 }
  0xfd   :  { %v754_v7 = vpop.permute.xlu2 %753  ;;  %v430_v63 = vpop.permute.xlu1 %429  ;;  %v11081_v41 = vand.u32 4294901760, %v7055_v27  ;;  %v1506_v47 = vsel %vm1374_vm1, %v1466_v49, %v1074_v15 }
  0xfe   :  { %v11082_v34 = vand.u32 4294901760, %v7048_v39  ;;  %v1546_v36 = vsel %vm1415_vm2, %v1506_v47, %v1234_v48  ;;  %v1464_v48 = vsel %vm1333_vm0, %v6528_v28, %v910_v24  ;;  %v6223_v28 = vld [vmem:[%s11076_s0 + $0xb0] sm:$0xff] }
  0xff   :  { %v2382_v53 = vsub.f32 %v7055_v27, %v11081_v41  ;;  %v1716_v29 = vrot.slane %v1546_v36, 6  ;;  %v7118_v24 = vld [vmem:[%s11076_s0 + $0xd2] sm:$0xff]  ;;  %v1721_v41 = vrot.slane %v6795_v61, 4 }
 0x100   :  { %v2374_v51 = vsub.f32 %v7048_v39, %v11082_v34  ;;  %v7282_v61 = vld [vmem:[%s11076_s0 + $0xd0] sm:$0xff]  ;;  %v6296_v34 = vld [vmem:[%s11076_s0 + $0x7a] sm:$0x3] }
 0x101   :  { %v2383_v25 = vand.u32 4294901760, %v2382_v53 }
 0x102   :  { %1083 = vrot.lane.b32.xlu0 %v6220_v19, %s6341_s16  ;;  %v2375_v31 = vand.u32 4294901760, %v2374_v51  ;;  %v7122_v51 = vld.sshfl [vmem:[#allocation1 + $0x10] sm:$0xff pattern:$0x73625140] }
 0x103   :  { %765 = vrot.lane.b32.xlu2 %v6864_v12, %s6342_s23  ;;  %443 = vrot.lane.b32.xlu1 %v66_v20, %s6340_s15  ;;  %v6260_v12 = vld [vmem:[%s11076_s0 + $0x99] sm:$0x3]  ;;  %v7107_v20 = vld [vmem:[%s11076_s0 + $0xa2] sm:$0xff]  ;;  %11311 = vst [vmem:[#allocation5_spill] sm:$0xff] %v7122_v51 }
 0x104   :  { %v7068_v10 = vpop.permute.xlu0 %911  ;;  %2376 = vmatmul.f32.gmra.mxu0 %v2375_v31  ;;  %2586 = vmatmul.f32.gmra.mxu1 %v7044_v18  ;;  %v1504_v31 = vsel %vm1374_vm1, %v1464_v48, %v6948_v57  ;;  %v1342_v57 = vsel %vm1333_vm0, %v6424_v9, %v430_v63 }
 0x105   :  { %v7071_v43 = vpop.permute.xlu2 %751  ;;  %v1230_v46 = vpop.permute.xlu1 %1229 }
 0x106   :  { %v1544_v47 = vsel %vm1415_vm2, %v1504_v31, %v1230_v46 }
 0x10a   :  { %1243 = vrot.lane.b32.xlu0 %v6260_v12, %s6342_s23 }
 0x10b   :  { %763 = vrot.lane.b32.xlu2 %v6100_v55, %s6342_s23  ;;  %603 = vrot.lane.b32.xlu1 %v106_v13, %s6341_s16 }
 0x10c   :  { %v590_v14 = vpop.permute.xlu0 %589  ;;  %2384 = vmatmul.f32.gmra.mxu0 %v2383_v25  ;;  %v1713_v25 = vrot.slane %v6614_v2, 4 }
 0x10d   :  { %v7095_v22 = vpop.permute.xlu2 %437  ;;  %v594_v56 = vpop.permute.xlu1 %593  ;;  %v1383_v46 = vsel %vm1374_vm1, %v1342_v57, %v590_v14 }
 0x10e   :  { %v1385_v15 = vsel %vm1374_vm1, %v1344_v17, %v594_v56  ;;  %v1712_v17 = vrot.slane %v1544_v47, 6  ;;  %v71_v47 = vld [vmem:[%s11076_s0 + $0xc1] sm:$0xff] }
 0x10f   :  { %v1426_v19 = vsel %vm1415_vm2, %v1385_v15, %v754_v7  ;;  %v7120_v7 = vld.sshfl [vmem:[#allocation1 + $0x8] sm:$0xff pattern:$0x73625140]  ;;  %v6134_v15 = vld [vmem:[%s11076_s0 + $0x59] sm:$0x3] }
 0x110   :  { %v1847_v26 = vsel %vm1776_vm3, %v1426_v19, %v1716_v29  ;;  %v1849_v30 = vsel %vm1780_vm4, %v1426_v19, %v1716_v29  ;;  %v1852_v4 = vsel %vm1785_vm5, %v1426_v19, %v1716_v29 }
 0x111   :  { %v1848_v49 = vsel %vm1778_vm7, %v1847_v26, %v7098_v23  ;;  %v1850_v12 = vsel %vm1782_vm8, %v1849_v30, %v7098_v23  ;;  %v1853_v53 = vsel %vm1778_vm7, %v7098_v23, %v1852_v4  ;;  %v7148_v30 = vld.sshfl [vmem:[#allocation1 + $0x28] sm:$0xff pattern:$0x73625140]  ;;  %v7157_v4 = vld [vmem:[%s11076_s0 + $0xe0] sm:$0xff] }
 0x112   :  { %v1851_v55 = vrot.slane %v1850_v12, 2  ;;  %v1854_v13 = vrot.slane %v1853_v53, 4  ;;  %2095 = vst [vmem:[#allocation1 + $0x1] ss:$4 sm:$0xff] %v1848_v49  ;;  %929 = vrot.lane.b32.xlu0 %v7107_v20, %s6340_s15 }
 0x113   :  { %1089 = vrot.lane.b32.xlu2 %v6223_v28, %s6341_s16  ;;  %933 = vrot.lane.b32.xlu1 %v7118_v24, %s6340_s15  ;;  %v7159_v28 = vld.sshfl [vmem:[#allocation1 + $0x30] sm:$0xff pattern:$0x73625140] }
 0x114   :  { %2096 = vst [vmem:[#allocation1 + $0x2] ss:$4 sm:$0xff] %v1851_v55  ;;  %v432_v36 = vpop.permute.xlu0 %431  ;;  %v1465_v55 = vsel %vm1333_vm0, %v6134_v15, %v7068_v10  ;;  %v1855_v15 = vsel %vm1789_vm6, %v1716_v29, %v1426_v19 }
 0x115   :  { %2097 = vst [vmem:[#allocation1 + $0x3] ss:$4 sm:$0xff] %v1854_v13  ;;  %v7142_v56 = vpop.permute.xlu2 %921  ;;  %v750_v48 = vpop.permute.xlu1 %749  ;;  %v1856_v29 = vsel %vm1782_vm8, %v7098_v23, %v1855_v15  ;;  %v111_v15 = vld [vmem:[%s11076_s0 + $0xc2] sm:$0xff] }
 0x116   :  { %v1424_v26 = vsel %vm1415_vm2, %v1383_v46, %v750_v48  ;;  %11312 = vst [vmem:[#allocation6_spill] sm:$0xff] %v7159_v28  ;;  %v20_v46 = vld [vmem:[%s11076_s0 + $0x48] sm:$0x3]  ;;  %v1505_v48 = vsel %vm1374_vm1, %v1465_v55, %v7027_v40  ;;  %v6182_v40 = vld [vmem:[%s11076_s0 + $0x9a] sm:$0x3] }
 0x117   :  { %v1834_v9 = vsel %vm1776_vm3, %v1424_v26, %v1712_v17  ;;  %v1836_v63 = vsel %vm1780_vm4, %v1424_v26, %v1712_v17  ;;  %v1839_v2 = vsel %vm1785_vm5, %v1424_v26, %v1712_v17  ;;  %v1842_v14 = vsel %vm1789_vm6, %v1712_v17, %v1424_v26  ;;  %v6230_v28 = vld [vmem:[%s11076_s0 + $0x108] sm:$0x3] }
 0x118   :  { %v1835_v31 = vsel %vm1778_vm7, %v1834_v9, %v1713_v25  ;;  %v1837_v49 = vsel %vm1782_vm8, %v1836_v63, %v1713_v25  ;;  %v1840_v12 = vsel %vm1778_vm7, %v1713_v25, %v1839_v2  ;;  %v1843_v53 = vsel %vm1782_vm8, %v1713_v25, %v1842_v14  ;;  %v6294_v25 = vld [vmem:[%s11076_s0 + $0x6a] sm:$0x3] }
 0x119   :  { %v1838_v13 = vrot.slane %v1837_v49, 2  ;;  %v1841_v57 = vrot.slane %v1840_v12, 4  ;;  %v1844_v17 = vrot.slane %v1843_v53, 6  ;;  %2084 = vst [vmem:[#allocation1 + $0x20] ss:$4 sm:$0xff] %v1835_v31  ;;  %v1343_v26 = vsel %vm1333_vm0, %v20_v46, %v432_v36  ;;  %v6263_v36 = vld [vmem:[%s11076_s0 + $0xb1] sm:$0xff] }
 0x11a   :  { %1093 = vrot.lane.b32.xlu0 %v7157_v4, %s6341_s16  ;;  %v1715_v2 = vrot.slane %v6294_v25, 4  ;;  %v6184_v53 = vld [vmem:[%s11076_s0 + $0xaa] sm:$0x3] }
 0x11b   :  { %2085 = vst [vmem:[#allocation1 + $0x21] ss:$4 sm:$0xff] %v1838_v13  ;;  %453 = vrot.lane.b32.xlu2 %v71_v47, %s6340_s15  ;;  %449 = vrot.lane.b32.xlu1 %v6935_v45, %s6340_s15 }
 0x11c   :  { %2086 = vst [vmem:[#allocation1 + $0x22] ss:$4 sm:$0xff] %v1841_v57  ;;  %v1232_v10 = vpop.permute.xlu0 %1231 }
 0x11d   :  { %2087 = vst [vmem:[#allocation1 + $0x23] ss:$4 sm:$0xff] %v1844_v17  ;;  %v1545_v9 = vsel %vm1415_vm2, %v1505_v48, %v1232_v10  ;;  %v7186_v63 = vpop.permute.xlu2 %1075  ;;  %v592_v14 = vpop.permute.xlu1 %591  ;;  %v7219_v10 = vld [vmem:[%s11076_s0 + $0xe1] sm:$0xff] }
 0x11e   :  { %v1714_v31 = vrot.slane %v1545_v9, 6  ;;  %v1384_v49 = vsel %vm1374_vm1, %v1343_v26, %v592_v14 }
 0x11f   :  { %v1425_v12 = vsel %vm1415_vm2, %v1384_v49, %v7071_v43  ;;  %v1857_v43 = vrot.slane %v1856_v29, 6 }
 0x120   :  { %v1845_v19 = vsel %vm1776_vm3, %v1425_v12, %v1714_v31 }
 0x121   :  { %v1846_v47 = vsel %vm1778_vm7, %v1845_v19, %v1715_v2 }
 0x122   :  { %2094 = vst [vmem:[#allocation1] ss:$4 sm:$0xff] %v1846_v47  ;;  %927 = vrot.lane.b32.xlu0 %v6182_v40, %s6340_s15  ;;  %v6224_v47 = vld [vmem:[%s11076_s0 + $0xb8] sm:$0x3] }
 0x123   :  { %1249 = vrot.lane.b32.xlu2 %v6263_v36, %s6342_s23  ;;  %931 = vrot.lane.b32.xlu1 %v6184_v53, %s6340_s15  ;;  %v6222_v36 = vld [vmem:[%s11076_s0 + $0xa8] sm:$0x3] }
 0x124   :  { %v2091_v23 = vld.sshfl [vmem:[#allocation1 + $0x20] sm:$0xff pattern:$0x73625140]  ;;  %v7207_v55 = vld.sshfl [vmem:[#allocation1 + $0x28] sm:$0xff pattern:$0x73625140]  ;;  %v918_v13 = vpop.permute.xlu0 %917 }
 0x125   :  { %v7209_v57 = vld.sshfl [vmem:[#allocation1 + $0x30] sm:$0xff pattern:$0x73625140]  ;;  %v7211_v17 = vpop.permute.xlu2 %435  ;;  %v1078_v46 = vpop.permute.xlu1 %1077  ;;  %v7213_v25 = vand.u32 4294901760, %v2091_v23  ;;  %v68_v53 = vld [vmem:[%s11076_s0 + $0x89] sm:$0x3] }
 0x126   :  { %11313 = vst [vmem:[#allocation7_spill] sm:$0xff] %v7209_v57 }
 0x127   :  { %2098 = vst [vmem:[#allocation1 + $0x20] ss:$4 sm:$0xff] %v1857_v43  ;;  %2590 = vmatmul.f32.gmra.mxu1 %v7213_v25  ;;  %v7222_v48 = vsub.f32 %v2091_v23, %v7213_v25  ;;  %v1468_v23 = vsel %vm1333_vm0, %v6651_v35, %v918_v13 }
 0x129   :  { %11314 = vst [vmem:[#allocation8_spill] sm:$0xff] %v7222_v48  ;;  %v2102_v26 = vld.sshfl [vmem:[#allocation1] sm:$0xff pattern:$0x73625140]  ;;  %v11079_v9 = vand.u32 4294901760, %v7222_v48 }
 0x12a   :  { %1253 = vrot.lane.b32.xlu0 %v7219_v10, %s6342_s23  ;;  %v7230_v2 = vand.u32 4294901760, %v2102_v26 }
 0x12b   :  { %613 = vrot.lane.b32.xlu2 %v111_v15, %s6341_s16  ;;  %609 = vrot.lane.b32.xlu1 %v7012_v6, %s6341_s16  ;;  %v2390_v31 = vsub.f32 %v7222_v48, %v11079_v9  ;;  %v1508_v15 = vsel %vm1374_vm1, %v1468_v23, %v1078_v46  ;;  %v70_v46 = vld [vmem:[%s11076_s0 + $0x99] sm:$0x3] }
 0x12c   :  { %v7235_v14 = vpop.permute.xlu0 %915  ;;  %v7241_v49 = vsub.f32 %v2102_v26, %v7230_v2 }
 0x12d   :  { %v758_v12 = vpop.permute.xlu2 %757  ;;  %v7243_v40 = vpop.permute.xlu1 %919  ;;  %v2391_v29 = vand.u32 4294901760, %v2390_v31 }
 0x12e   :  { %11315 = vst [vmem:[#allocation9_spill] sm:$0xff] %v7241_v49  ;;  %v11080_v19 = vand.u32 4294901760, %v7241_v49 }
 0x12f   :  { %2594 = vmatmul.f32.gmra.mxu1 %v7230_v2  ;;  %2392 = vmatmul.f32.gmra.mxu0 %v2391_v29  ;;  %v1346_v29 = vsel %vm1333_vm0, %v6609_v1, %v7095_v22 }
 0x130   :  { %v2398_v43 = vsub.f32 %v7241_v49, %v11080_v19 }
 0x132   :  { %1087 = vrot.lane.b32.xlu0 %v6222_v36, %s6341_s16  ;;  %v2399_v31 = vand.u32 4294901760, %v2398_v43 }
 0x133   :  { %447 = vrot.lane.b32.xlu2 %v68_v53, %s6340_s15  ;;  %1091 = vrot.lane.b32.xlu1 %v6224_v47, %s6341_s16 }
 0x134   :  { %v1238_v26 = vpop.permute.xlu0 %1237 }
 0x135   :  { %v1548_v9 = vsel %vm1415_vm2, %v1508_v15, %v1238_v26  ;;  %v1242_v19 = vpop.permute.xlu2 %1241  ;;  %v598_v35 = vpop.permute.xlu1 %597 }
 0x136   :  { %v1720_v13 = vrot.slane %v1548_v9, 6  ;;  %v1387_v36 = vsel %vm1374_vm1, %v1346_v29, %v598_v35 }
 0x137   :  { %v1428_v53 = vsel %vm1415_vm2, %v1387_v36, %v758_v12  ;;  %2400 = vmatmul.f32.gmra.mxu0 %v2399_v31  ;;  %v7289_v31 = vld.sshfl [vmem:[#allocation1 + $0x8] sm:$0xff pattern:$0x73625140] }
 0x138   :  { %v1860_v47 = vsel %vm1776_vm3, %v1428_v53, %v1720_v13  ;;  %v1862_v43 = vsel %vm1780_vm4, %v1428_v53, %v1720_v13  ;;  %v1865_v1 = vsel %vm1785_vm5, %v1428_v53, %v1720_v13  ;;  %v1868_v22 = vsel %vm1789_vm6, %v1720_v13, %v1428_v53  ;;  %v7295_v13 = vld.sshfl [vmem:[#allocation1 + $0x10] sm:$0xff pattern:$0x73625140] }
 0x139   :  { %v1861_v9 = vsel %vm1778_vm7, %v1860_v47, %v1721_v41  ;;  %v1863_v12 = vsel %vm1782_vm8, %v1862_v43, %v1721_v41  ;;  %v1866_v23 = vsel %vm1778_vm7, %v1721_v41, %v1865_v1  ;;  %v1869_v15 = vsel %vm1782_vm8, %v1721_v41, %v1868_v22  ;;  %11316 = vst [vmem:[#allocation10_spill] sm:$0xff] %v7295_v13  ;;  %v108_v43 = vld [vmem:[%s11076_s0 + $0x8a] sm:$0x3]  ;;  %v25_v22 = vld [vmem:[%s11076_s0 + $0x70] sm:$0xff] }
 0x13a   :  { %v1864_v26 = vrot.slane %v1863_v12, 2  ;;  %v1867_v29 = vrot.slane %v1866_v23, 4  ;;  %v1870_v35 = vrot.slane %v1869_v15, 6  ;;  %2100 = vst [vmem:[#allocation1 + $0x22] ss:$4 sm:$0xff] %v1861_v9  ;;  %451 = vrot.lane.b32.xlu0 %v70_v46, %s6340_s15  ;;  %v1470_v47 = vsel %vm1333_vm0, %v6833_v8, %v7142_v56 }
 0x13b   :  { %773 = vrot.lane.b32.xlu2 %v7282_v61, %s6342_s23  ;;  %769 = vrot.lane.b32.xlu1 %v7019_v42, %s6342_s23  ;;  %v6262_v46 = vld [vmem:[%s11076_s0 + $0xa9] sm:$0x3]  ;;  %v6264_v42 = vld [vmem:[%s11076_s0 + $0xb9] sm:$0x3]  ;;  %v7318_v23 = vrot.slane %v7012_v6, 4 }
 0x13c   :  { %2101 = vst [vmem:[#allocation1 + $0x23] ss:$4 sm:$0xff] %v1864_v26  ;;  %v1080_v36 = vpop.permute.xlu0 %1079  ;;  %v6104_v6 = vld [vmem:[%s11076_s0 + $0xa8] sm:$0x3] }
 0x13d   :  { %2108 = vst [vmem:[#allocation1] ss:$4 sm:$0xff] %v1867_v29  ;;  %v602_v41 = vpop.permute.xlu2 %601  ;;  %v1082_v53 = vpop.permute.xlu1 %1081 }
 0x13e   :  { %2109 = vst [vmem:[#allocation1 + $0x1] ss:$4 sm:$0xff] %v1870_v35  ;;  %v1510_v1 = vsel %vm1374_vm1, %v1470_v47, %v1082_v53  ;;  %v110_v35 = vld [vmem:[%s11076_s0 + $0x9a] sm:$0x3] }
 0x13f   :  { %v1550_v8 = vsel %vm1415_vm2, %v1510_v1, %v1242_v19  ;;  %v6102_v19 = vld [vmem:[%s11076_s0 + $0x98] sm:$0x3]  ;;  %v7349_v1 = vld [vmem:[%s11076_s0 + $0xe2] sm:$0xff] }
 0x140   :  { %v7321_v26 = vrot.slane %v1550_v8, 6  ;;  %v7359_v8 = vld [vmem:[%s11076_s0 + $0xd1] sm:$0xff] }
 0x142   :  { %1247 = vrot.lane.b32.xlu0 %v6262_v46, %s6342_s23 }
 0x143   :  { %1251 = vrot.lane.b32.xlu1 %v6264_v42, %s6342_s23  ;;  %607 = vrot.lane.b32.xlu2 %v108_v43, %s6341_s16 }
 0x144   :  { %v440_v56 = vpop.permute.xlu0 %439 }
 0x145   :  { %v762_v9 = vpop.permute.xlu2 %761  ;;  %v442_v12 = vpop.permute.xlu1 %441 }
 0x146   :  { %v1348_v15 = vsel %vm1333_vm0, %v25_v22, %v442_v12  ;;  %v7354_v22 = vld [vmem:[%s11076_s0 + $0xf0] sm:$0xff] }
 0x147   :  { %v1389_v29 = vsel %vm1374_vm1, %v1348_v15, %v602_v41 }
 0x148   :  { %v7328_v53 = vsel %vm1415_vm2, %v1389_v29, %v762_v9  ;;  %v6136_v9 = vld [vmem:[%s11076_s0 + $0x69] sm:$0x3]  ;;  %v6138_v29 = vld [vmem:[%s11076_s0 + $0x79] sm:$0x3] }
 0x149   :  { %v1873_v46 = vsel %vm1776_vm3, %v7328_v53, %v7321_v26  ;;  %v1467_v15 = vsel %vm1333_vm0, %v6136_v9, %v7235_v14  ;;  %v6188_v9 = vld [vmem:[%s11076_s0 + $0xea] sm:$0x3] }
 0x14a   :  { %v1874_v41 = vsel %vm1778_vm7, %v1873_v46, %v7318_v23  ;;  %611 = vrot.lane.b32.xlu0 %v110_v35, %s6341_s16  ;;  %v6186_v46 = vld [vmem:[%s11076_s0 + $0xda] sm:$0x3]  ;;  %v1507_v14 = vsel %vm1374_vm1, %v1467_v15, %v7186_v63  ;;  %v6298_v15 = vld [vmem:[%s11076_s0 + $0x8a] sm:$0x3] }
 0x14b   :  { %2111 = vst [vmem:[#allocation1 + $0x3] ss:$4 sm:$0xff] %v1874_v41  ;;  %767 = vrot.lane.b32.xlu1 %v6102_v19, %s6342_s23  ;;  %771 = vrot.lane.b32.xlu2 %v6104_v6, %s6342_s23  ;;  %v22_v6 = vld [vmem:[%s11076_s0 + $0x58] sm:$0x3]  ;;  %v1469_v41 = vsel %vm1333_vm0, %v6138_v29, %v7243_v40  ;;  %v24_v40 = vld [vmem:[%s11076_s0 + $0x68] sm:$0x3] }
 0x14c   :  { %v1236_v47 = vpop.permute.xlu0 %1235  ;;  %v1509_v11 = vsel %vm1374_vm1, %v1469_v41, %v1080_v36  ;;  %v1345_v38 = vsel %vm1333_vm0, %v22_v6, %v7211_v17  ;;  %v1719_v36 = vrot.slane %v6296_v34, 4  ;;  %v1347_v41 = vsel %vm1333_vm0, %v24_v40, %v440_v56  ;;  %v6228_v40 = vld [vmem:[%s11076_s0 + $0xf8] sm:$0x3] }
 0x14d   :  { %v7344_v42 = vpop.permute.xlu2 %445  ;;  %v1240_v43 = vpop.permute.xlu1 %1239  ;;  %v1547_v63 = vsel %vm1415_vm2, %v1507_v14, %v1236_v47  ;;  %v1723_v57 = vrot.slane %v6298_v15, 4 }
 0x14e   :  { %v1549_v29 = vsel %vm1415_vm2, %v1509_v11, %v1240_v43  ;;  %v1718_v47 = vrot.slane %v1547_v63, 6 }
 0x14f   :  { %v1722_v51 = vrot.slane %v1549_v29, 6 }
 0x152   :  { %937 = vrot.lane.b32.xlu0 %v7349_v1, %s6340_s15 }
 0x153   :  { %1097 = vrot.lane.b32.xlu1 %v7354_v22, %s6341_s16  ;;  %457 = vrot.lane.b32.xlu2 %v7359_v8, %s6340_s15 }
 0x154   :  { %v596_v12 = vpop.permute.xlu0 %595 }
 0x155   :  { %v7375_v35 = vpop.permute.xlu2 %605  ;;  %v600_v19 = vpop.permute.xlu1 %599  ;;  %v1386_v14 = vsel %vm1374_vm1, %v1345_v38, %v596_v12  ;;  %v1875_v38 = vsel %vm1780_vm4, %v7328_v53, %v7321_v26  ;;  %v1878_v12 = vsel %vm1785_vm5, %v7328_v53, %v7321_v26 }
 0x156   :  { %v1388_v11 = vsel %vm1374_vm1, %v1347_v41, %v600_v19  ;;  %v6226_v19 = vld [vmem:[%s11076_s0 + $0xe8] sm:$0x3]  ;;  %v1879_v63 = vsel %vm1778_vm7, %v7318_v23, %v1878_v12 }
 0x15a   :  { %935 = vrot.lane.b32.xlu0 %v6186_v46, %s6340_s15 }
 0x15b   :  { %939 = vrot.lane.b32.xlu1 %v6188_v9, %s6340_s15  ;;  %1257 = vrot.lane.b32.xlu2 %v7396_v21, %s6342_s23 }
 0x15c   :  { %v756_v13 = vpop.permute.xlu0 %755 }
 0x15d   :  { %v1427_v43 = vsel %vm1415_vm2, %v1386_v14, %v756_v13  ;;  %v766_v46 = vpop.permute.xlu2 %765  ;;  %v760_v17 = vpop.permute.xlu1 %759  ;;  %v72_v14 = vld [vmem:[%s11076_s0 + $0xc9] sm:$0x3] }
 0x15e   :  { %v1858_v6 = vsel %vm1776_vm3, %v1427_v43, %v1718_v47  ;;  %v1429_v34 = vsel %vm1415_vm2, %v1388_v11, %v760_v17 }
 0x15f   :  { %v1859_v9 = vsel %vm1778_vm7, %v1858_v6, %v1719_v36  ;;  %v1871_v56 = vsel %vm1776_vm3, %v1429_v34, %v1722_v51  ;;  %v1876_v51 = vsel %vm1782_vm8, %v1875_v38, %v7318_v23 }
 0x160   :  { %2099 = vst [vmem:[#allocation1 + $0x21] ss:$4 sm:$0xff] %v1859_v9  ;;  %v1872_v13 = vsel %vm1778_vm7, %v1871_v56, %v1723_v57  ;;  %v1881_v57 = vsel %vm1789_vm6, %v7321_v26, %v7328_v53  ;;  %v1877_v41 = vrot.slane %v1876_v51, 2  ;;  %v74_v26 = vld [vmem:[%s11076_s0 + $0xd9] sm:$0x3]  ;;  %v1729_v51 = vrot.slane %v7107_v20, 4 }
 0x161   :  { %2110 = vst [vmem:[#allocation1 + $0x2] ss:$4 sm:$0xff] %v1872_v13  ;;  %v1882_v47 = vsel %vm1782_vm8, %v7318_v23, %v1881_v57  ;;  %v1350_v23 = vsel %vm1333_vm0, %v6766_v44, %v7344_v42 }
 0x162   :  { %617 = vrot.lane.b32.xlu0 %v7118_v24, %s6341_s16  ;;  %v1880_v24 = vrot.slane %v1879_v63, 4  ;;  %v1883_v6 = vrot.slane %v1882_v47, 6 }
 0x163   :  { %1095 = vrot.lane.b32.xlu1 %v6226_v19, %s6341_s16  ;;  %1099 = vrot.lane.b32.xlu2 %v6228_v40, %s6341_s16 }
 0x164   :  { %v926_v15 = vpop.permute.xlu0 %925 }
 0x165   :  { %v7445_v29 = vpop.permute.xlu2 %763  ;;  %v1086_v36 = vpop.permute.xlu1 %1085  ;;  %v1472_v9 = vsel %vm1333_vm0, %v6935_v45, %v926_v15  ;;  %v1391_v45 = vsel %vm1374_vm1, %v1350_v23, %v7375_v35 }
 0x166   :  { %v1512_v42 = vsel %vm1374_vm1, %v1472_v9, %v1086_v36  ;;  %v1432_v15 = vsel %vm1415_vm2, %v1391_v45, %v766_v46  ;;  %v6268_v36 = vld [vmem:[%s11076_s0 + $0xf9] sm:$0x3] }
 0x167   :  { %v2105_v53 = vld.sshfl [vmem:[#allocation1 + $0x20] sm:$0xff pattern:$0x73625140]  ;;  %v7455_v11 = vld.sshfl [vmem:[#allocation1 + $0x28] sm:$0xff pattern:$0x73625140] }
 0x168   :  { %11317 = vst [vmem:[#allocation11_spill] sm:$0xff] %v7455_v11  ;;  %v7457_v43 = vld.sshfl [vmem:[#allocation1 + $0x30] sm:$0xff pattern:$0x73625140]  ;;  %v7459_v34 = vand.u32 4294901760, %v2105_v53 }
 0x169   :  { %11318 = vst [vmem:[#allocation12_spill] sm:$0xff] %v7457_v43  ;;  %v2116_v17 = vld.sshfl [vmem:[#allocation1] sm:$0xff pattern:$0x73625140] }
 0x16a   :  { %2113 = vst [vmem:[#allocation1 + $0x21] ss:$4 sm:$0xff] %v1880_v24  ;;  %455 = vrot.lane.b32.xlu0 %v72_v14, %s6340_s15  ;;  %v7467_v56 = vand.u32 4294901760, %v2116_v17  ;;  %2598 = vmatmul.f32.gmra.mxu1 %v7459_v34  ;;  %v7472_v38 = vsub.f32 %v2105_v53, %v7459_v34  ;;  %v7505_v53 = vld.sshfl [vmem:[#allocation1 + $0x8] sm:$0xff pattern:$0x73625140] }
 0x16b   :  { %2112 = vst [vmem:[#allocation1 + $0x20] ss:$4 sm:$0xff] %v1877_v41  ;;  %459 = vrot.lane.b32.xlu1 %v74_v26, %s6340_s15  ;;  %777 = vrot.lane.b32.xlu2 %v7157_v4, %s6342_s23  ;;  %v6266_v4 = vld [vmem:[%s11076_s0 + $0xe9] sm:$0x3] }
 0x16c   :  { %2114 = vst [vmem:[#allocation1 + $0x22] ss:$4 sm:$0xff] %v1883_v6  ;;  %v924_v12 = vpop.permute.xlu0 %923  ;;  %v7477_v44 = vsub.f32 %v2116_v17, %v7467_v56  ;;  %v11087_v40 = vand.u32 4294901760, %v7472_v38  ;;  %v112_v26 = vld [vmem:[%s11076_s0 + $0xca] sm:$0x3] }
 0x16d   :  { %11319 = vst [vmem:[#allocation13_spill] sm:$0xff] %v7472_v38  ;;  %v7482_v13 = vpop.permute.xlu2 %1089  ;;  %v1246_v19 = vpop.permute.xlu1 %1245  ;;  %v7507_v46 = vld.sshfl [vmem:[#allocation1 + $0x10] sm:$0xff pattern:$0x73625140] }
 0x16e   :  { %11320 = vst [vmem:[#allocation14_spill] sm:$0xff] %v7477_v44  ;;  %v1552_v63 = vsel %vm1415_vm2, %v1512_v42, %v1246_v19  ;;  %v2406_v35 = vsub.f32 %v7472_v38, %v11087_v40  ;;  %v11086_v41 = vand.u32 4294901760, %v7477_v44 }
 0x16f   :  { %v1728_v57 = vrot.slane %v1552_v63, 6  ;;  %11321 = vst [vmem:[#allocation15_spill] sm:$0xff] %v7505_v53 }
 0x170   :  { %11322 = vst [vmem:[#allocation16_spill] sm:$0xff] %v7507_v46  ;;  %v2407_v63 = vand.u32 4294901760, %v2406_v35  ;;  %v6140_v35 = vld [vmem:[%s11076_s0 + $0x89] sm:$0x3] }
 0x171   :  { %v1886_v20 = vsel %vm1776_vm3, %v1432_v15, %v1728_v57  ;;  %v1888_v24 = vsel %vm1780_vm4, %v1432_v15, %v1728_v57  ;;  %v1891_v47 = vsel %vm1785_vm5, %v1432_v15, %v1728_v57  ;;  %v1894_v14 = vsel %vm1789_vm6, %v1728_v57, %v1432_v15 }
 0x172   :  { %v1887_v17 = vsel %vm1778_vm7, %v1886_v20, %v1729_v51  ;;  %v1889_v6 = vsel %vm1782_vm8, %v1888_v24, %v1729_v51  ;;  %v1892_v23 = vsel %vm1778_vm7, %v1729_v51, %v1891_v47  ;;  %v1895_v9 = vsel %vm1782_vm8, %v1729_v51, %v1894_v14  ;;  %1255 = vrot.lane.b32.xlu0 %v6266_v4, %s6342_s23  ;;  %v114_v51 = vld [vmem:[%s11076_s0 + $0xda] sm:$0x3]  ;;  %v6108_v24 = vld [vmem:[%s11076_s0 + $0xe8] sm:$0x3]  ;;  %v26_v47 = vld [vmem:[%s11076_s0 + $0x78] sm:$0x3] }
 0x173   :  { %v1890_v45 = vrot.slane %v1889_v6, 2  ;;  %v1893_v42 = vrot.slane %v1892_v23, 4  ;;  %v1896_v19 = vrot.slane %v1895_v9, 6  ;;  %2122 = vst [vmem:[#allocation1] ss:$4 sm:$0xff] %v1887_v17  ;;  %1259 = vrot.lane.b32.xlu1 %v6268_v36, %s6342_s23  ;;  %2602 = vmatmul.f32.gmra.mxu1 %v7467_v56  ;;  %v2414_v4 = vsub.f32 %v7477_v44, %v11086_v41 }
 0x174   :  { %v1084_v57 = vpop.permute.xlu0 %1083  ;;  %615 = vrot.lane.b32.xlu2 %v112_v26, %s6341_s16  ;;  %2408 = vmatmul.f32.gmra.mxu0 %v2407_v63  ;;  %v6106_v36 = vld [vmem:[%s11076_s0 + $0xd8] sm:$0x3]  ;;  %v1471_v14 = vsel %vm1333_vm0, %v6140_v35, %v924_v12  ;;  %v6300_v17 = vld [vmem:[%s11076_s0 + $0x9a] sm:$0x3] }
 0x175   :  { %2123 = vst [vmem:[#allocation1 + $0x1] ss:$4 sm:$0xff] %v1890_v45  ;;  %v7517_v15 = vpop.permute.xlu2 %453  ;;  %v444_v20 = vpop.permute.xlu1 %443  ;;  %v2415_v26 = vand.u32 4294901760, %v2414_v4  ;;  %v1511_v6 = vsel %vm1374_vm1, %v1471_v14, %v1084_v57  ;;  %v7555_v57 = vld [vmem:[%s11076_s0 + $0xf2] sm:$0xff] }
 0x176   :  { %2124 = vst [vmem:[#allocation1 + $0x2] ss:$4 sm:$0xff] %v1893_v42  ;;  %v1349_v9 = vsel %vm1333_vm0, %v26_v47, %v444_v20  ;;  %v7560_v20 = vld [vmem:[%s11076_s0 + $0x102] sm:$0xff] }
 0x177   :  { %2125 = vst [vmem:[#allocation1 + $0x3] ss:$4 sm:$0xff] %v1896_v19  ;;  %v1727_v19 = vrot.slane %v6300_v17, 4 }
 0x17a   :  { %619 = vrot.lane.b32.xlu0 %v114_v51, %s6341_s16 }
 0x17b   :  { %775 = vrot.lane.b32.xlu1 %v6106_v36, %s6342_s23  ;;  %v7566_v36 = vld [vmem:[%s11076_s0 + $0x100] sm:$0xff] }
 0x17c   :  { %v1244_v23 = vpop.permute.xlu0 %1243  ;;  %779 = vrot.lane.b32.xlu2 %v6108_v24, %s6342_s23  ;;  %2416 = vmatmul.f32.gmra.mxu0 %v2415_v26  ;;  %v7580_v26 = vld [vmem:[%s11076_s0 + $0x110] sm:$0xff] }
 0x17d   :  { %v1551_v45 = vsel %vm1415_vm2, %v1511_v6, %v1244_v23  ;;  %v7547_v42 = vpop.permute.xlu2 %1249  ;;  %v604_v12 = vpop.permute.xlu1 %603 }
 0x17e   :  { %v1390_v63 = vsel %vm1374_vm1, %v1349_v9, %v604_v12  ;;  %v1726_v51 = vrot.slane %v1551_v45, 6  ;;  %v2130_v17 = vld.sshfl [vmem:[#allocation1] sm:$0xff pattern:$0x73625140] }
 0x17f   :  { %v1431_v4 = vsel %vm1415_vm2, %v1390_v63, %v7445_v29  ;;  %v7588_v9 = vand.u32 4294901760, %v2130_v17 }
 0x180   :  { %v1884_v35 = vsel %vm1776_vm3, %v1431_v4, %v1726_v51  ;;  %v6190_v51 = vld [vmem:[%s11076_s0 + $0xfa] sm:$0x3] }
 0x181   :  { %v1885_v24 = vsel %vm1778_vm7, %v1884_v35, %v1727_v19  ;;  %v7605_v35 = vsub.f32 %v2130_v17, %v7588_v9 }
 0x182   :  { %941 = vrot.lane.b32.xlu0 %v7555_v57, %s6340_s15  ;;  %2115 = vst [vmem:[#allocation1 + $0x23] ss:$4 sm:$0xff] %v1885_v24  ;;  %v7610_v24 = vld [vmem:[%s11076_s0 + $0x101] sm:$0xff] }
 0x183   :  { %945 = vrot.lane.b32.xlu1 %v7560_v20, %s6340_s15  ;;  %11324 = vst [vmem:[#allocation18_spill] sm:$0xff] %v7605_v35  ;;  %v11089_v40 = vand.u32 4294901760, %v7605_v35 }
 0x184   :  { %v7573_v29 = vpop.permute.xlu0 %929  ;;  %1101 = vrot.lane.b32.xlu2 %v7566_v36, %s6341_s16 }
 0x185   :  { %v614_v47 = vpop.permute.xlu2 %613  ;;  %v934_v14 = vpop.permute.xlu1 %933 }
 0x186   :  { %v1476_v3 = vsel %vm1333_vm0, %v7359_v8, %v934_v14 }
 0x189   :  { %v2119_v6 = vld.sshfl [vmem:[#allocation1 + $0x20] sm:$0xff pattern:$0x73625140] }
 0x18a   :  { %1105 = vrot.lane.b32.xlu0 %v7580_v26, %s6341_s16  ;;  %v7586_v23 = vand.u32 4294901760, %v2119_v6 }
 0x18b   :  { %461 = vrot.lane.b32.xlu1 %v7219_v10, %s6340_s15 }
 0x18c   :  { %v1094_v45 = vpop.permute.xlu0 %1093  ;;  %465 = vrot.lane.b32.xlu2 %v7396_v21, %s6340_s15  ;;  %2606 = vmatmul.f32.gmra.mxu1 %v7586_v23  ;;  %v7598_v63 = vsub.f32 %v2119_v6, %v7586_v23  ;;  %v7618_v6 = vld [vmem:[%s11076_s0 + $0x111] sm:$0xff] }
 0x18d   :  { %v7592_v12 = vpop.permute.xlu2 %447  ;;  %v7594_v19 = vpop.permute.xlu1 %449  ;;  %v1516_v52 = vsel %vm1374_vm1, %v1476_v3, %v1094_v45  ;;  %v76_v3 = vld [vmem:[%s11076_s0 + $0xe9] sm:$0x3]  ;;  %v1474_v45 = vsel %vm1333_vm0, %v7035_v50, %v7573_v29  ;;  %v29_v50 = vld [vmem:[%s11076_s0 + $0x90] sm:$0xff] }
 0x18e   :  { %11323 = vst [vmem:[#allocation17_spill] sm:$0xff] %v7598_v63  ;;  %v11088_v4 = vand.u32 4294901760, %v7598_v63  ;;  %v6303_v29 = vld [vmem:[%s11076_s0 + $0xb2] sm:$0xff] }
 0x190   :  { %v2422_v41 = vsub.f32 %v7598_v63, %v11088_v4 }
 0x192   :  { %943 = vrot.lane.b32.xlu0 %v6190_v51, %s6340_s15  ;;  %v2423_v17 = vand.u32 4294901760, %v2422_v41  ;;  %v2430_v51 = vsub.f32 %v7605_v35, %v11089_v40  ;;  %v31_v41 = vld [vmem:[%s11076_s0 + $0xc0] sm:$0xff]  ;;  %v7651_v35 = vrot.slane %v7349_v1, 4 }
 0x193   :  { %1261 = vrot.lane.b32.xlu1 %v7610_v24, %s6342_s23 }
 0x194   :  { %v7624_v46 = vpop.permute.xlu0 %927  ;;  %1265 = vrot.lane.b32.xlu2 %v7618_v6, %s6342_s23  ;;  %2424 = vmatmul.f32.gmra.mxu0 %v2423_v17  ;;  %v1354_v17 = vsel %vm1333_vm0, %v31_v41, %v7517_v15  ;;  %v2431_v40 = vand.u32 4294901760, %v2430_v51 }
 0x195   :  { %v774_v43 = vpop.permute.xlu2 %773  ;;  %v7628_v4 = vpop.permute.xlu1 %931  ;;  %2610 = vmatmul.f32.gmra.mxu1 %v7588_v9  ;;  %v1395_v8 = vsel %vm1374_vm1, %v1354_v17, %v614_v47 }
 0x196   :  { %v7660_v51 = vsel %vm1415_vm2, %v1395_v8, %v774_v43  ;;  %v1514_v8 = vsel %vm1374_vm1, %v1474_v45, %v7482_v13  ;;  %v6110_v13 = vld [vmem:[%s11076_s0 + $0xf8] sm:$0x3] }
 0x19a   :  { %621 = vrot.lane.b32.xlu0 %v7349_v1, %s6341_s16  ;;  %v7673_v1 = vld.sshfl [vmem:[#allocation1 + $0x10] sm:$0xff pattern:$0x73625140] }
 0x19b   :  { %625 = vrot.lane.b32.xlu1 %v7555_v57, %s6341_s16  ;;  %11326 = vst [vmem:[#allocation20_spill] sm:$0xff] %v7673_v1 }
 0x19c   :  { %v1254_v59 = vpop.permute.xlu0 %1253  ;;  %1103 = vrot.lane.b32.xlu2 %v6230_v28, %s6341_s16  ;;  %2432 = vmatmul.f32.gmra.mxu0 %v2431_v40 }
 0x19d   :  { %v1556_v63 = vsel %vm1415_vm2, %v1516_v52, %v1254_v59  ;;  %v610_v44 = vpop.permute.xlu1 %609  ;;  %v7654_v15 = vpop.permute.xlu2 %607  ;;  %v7671_v52 = vld.sshfl [vmem:[#allocation1 + $0x8] sm:$0xff pattern:$0x73625140] }
 0x19e   :  { %v7657_v14 = vrot.slane %v1556_v63, 6  ;;  %11325 = vst [vmem:[#allocation19_spill] sm:$0xff] %v7671_v52 }
 0x1a0   :  { %v1912_v28 = vsel %vm1776_vm3, %v7660_v51, %v7657_v14  ;;  %v1914_v59 = vsel %vm1780_vm4, %v7660_v51, %v7657_v14 }
 0x1a1   :  { %v1913_v43 = vsel %vm1778_vm7, %v1912_v28, %v7651_v35  ;;  %v1915_v40 = vsel %vm1782_vm8, %v1914_v59, %v7651_v35  ;;  %v116_v28 = vld [vmem:[%s11076_s0 + $0xea] sm:$0x3]  ;;  %v1554_v59 = vsel %vm1415_vm2, %v1514_v8, %v7547_v42 }
 0x1a2   :  { %v1916_v47 = vrot.slane %v1915_v40, 2  ;;  %2138 = vst [vmem:[#allocation1 + $0x2] ss:$4 sm:$0xff] %v1913_v43  ;;  %463 = vrot.lane.b32.xlu0 %v76_v3, %s6340_s15  ;;  %v6270_v3 = vld [vmem:[%s11076_s0 + $0x109] sm:$0x3]  ;;  %v1352_v43 = vsel %vm1333_vm0, %v29_v50, %v7594_v19  ;;  %v1732_v45 = vrot.slane %v1554_v59, 6 }
 0x1a3   :  { %781 = vrot.lane.b32.xlu1 %v7354_v22, %s6342_s23  ;;  %v1393_v1 = vsel %vm1374_vm1, %v1352_v43, %v610_v44  ;;  %v7717_v42 = vld.sshfl [vmem:[#allocation1 + $0x28] sm:$0xff pattern:$0x73625140]  ;;  %v7726_v50 = vld [vmem:[%s11076_s0 + $0x112] sm:$0xff]  ;;  %v7737_v59 = vld [vmem:[%s11076_s0 + $0x120] sm:$0xff] }
 0x1a4   :  { %2139 = vst [vmem:[#allocation1 + $0x3] ss:$4 sm:$0xff] %v1916_v47  ;;  %v1088_v63 = vpop.permute.xlu0 %1087  ;;  %785 = vrot.lane.b32.xlu2 %v7566_v36, %s6342_s23  ;;  %v1733_v47 = vrot.slane %v6303_v29, 4  ;;  %v7728_v44 = vld.sshfl [vmem:[#allocation1 + $0x30] sm:$0xff pattern:$0x73625140] }
 0x1a5   :  { %v1092_v41 = vpop.permute.xlu1 %1091  ;;  %v7687_v17 = vpop.permute.xlu2 %771  ;;  %11327 = vst [vmem:[#allocation21_spill] sm:$0xff] %v7717_v42 }
 0x1a6   :  { %11328 = vst [vmem:[#allocation22_spill] sm:$0xff] %v7728_v44  ;;  %v30_v44 = vld [vmem:[%s11076_s0 + $0x98] sm:$0x3] }
 0x1aa   :  { %1263 = vrot.lane.b32.xlu0 %v6270_v3, %s6342_s23 }
 0x1ab   :  { %623 = vrot.lane.b32.xlu1 %v116_v28, %s6341_s16 }
 0x1ac   :  { %v452_v40 = vpop.permute.xlu0 %451  ;;  %783 = vrot.lane.b32.xlu2 %v6110_v13, %s6342_s23 }
 0x1ad   :  { %v770_v52 = vpop.permute.xlu1 %769  ;;  %v7715_v53 = vpop.permute.xlu2 %457 }
 0x1ae   :  { %v1434_v38 = vsel %vm1415_vm2, %v1393_v1, %v770_v52 }
 0x1af   :  { %v1899_v8 = vsel %vm1776_vm3, %v1434_v38, %v1732_v45  ;;  %v1901_v3 = vsel %vm1780_vm4, %v1434_v38, %v1732_v45  ;;  %v1904_v19 = vsel %vm1785_vm5, %v1434_v38, %v1732_v45  ;;  %v1907_v28 = vsel %vm1789_vm6, %v1732_v45, %v1434_v38 }
 0x1b0   :  { %v1900_v52 = vsel %vm1778_vm7, %v1899_v8, %v1733_v47  ;;  %v1902_v1 = vsel %vm1782_vm8, %v1901_v3, %v1733_v47  ;;  %v1905_v29 = vsel %vm1778_vm7, %v1733_v47, %v1904_v19  ;;  %v1908_v13 = vsel %vm1782_vm8, %v1733_v47, %v1907_v28  ;;  %v6142_v47 = vld [vmem:[%s11076_s0 + $0x99] sm:$0x3]  ;;  %v6144_v3 = vld [vmem:[%s11076_s0 + $0xa9] sm:$0x3] }
 0x1b1   :  { %v1903_v38 = vrot.slane %v1902_v1, 2  ;;  %v1906_v43 = vrot.slane %v1905_v29, 4  ;;  %v1909_v45 = vrot.slane %v1908_v13, 6  ;;  %2127 = vst [vmem:[#allocation1 + $0x21] ss:$4 sm:$0xff] %v1900_v52  ;;  %v1473_v29 = vsel %vm1333_vm0, %v6142_v47, %v7624_v46 }
 0x1b2   :  { %949 = vrot.lane.b32.xlu0 %v7726_v50, %s6340_s15  ;;  %v28_v52 = vld [vmem:[%s11076_s0 + $0x88] sm:$0x3]  ;;  %v6192_v1 = vld [vmem:[%s11076_s0 + $0x10a] sm:$0x3]  ;;  %v1475_v13 = vsel %vm1333_vm0, %v6144_v3, %v7628_v4  ;;  %v6304_v46 = vld [vmem:[%s11076_s0 + $0xba] sm:$0x3] }
 0x1b3   :  { %2128 = vst [vmem:[#allocation1 + $0x22] ss:$4 sm:$0xff] %v1903_v38  ;;  %1109 = vrot.lane.b32.xlu1 %v7737_v59, %s6341_s16  ;;  %v7766_v38 = vld [vmem:[%s11076_s0 + $0x121] sm:$0xff]  ;;  %v6302_v4 = vld [vmem:[%s11076_s0 + $0xaa] sm:$0x3]  ;;  %v1351_v47 = vsel %vm1333_vm0, %v28_v52, %v7592_v12 }
 0x1b4   :  { %2129 = vst [vmem:[#allocation1 + $0x23] ss:$4 sm:$0xff] %v1906_v43  ;;  %v1248_v8 = vpop.permute.xlu0 %1247  ;;  %469 = vrot.lane.b32.xlu2 %v7610_v24, %s6340_s15  ;;  %v1513_v43 = vsel %vm1374_vm1, %v1473_v29, %v1088_v63  ;;  %v1735_v29 = vrot.slane %v6304_v46, 4  ;;  %v1731_v42 = vrot.slane %v6302_v4, 4  ;;  %v1392_v12 = vsel %vm1374_vm1, %v1351_v47, %v7654_v15  ;;  %v6232_v15 = vld [vmem:[%s11076_s0 + $0x118] sm:$0x3] }
 0x1b5   :  { %2136 = vst [vmem:[#allocation1] ss:$4 sm:$0xff] %v1909_v45  ;;  %v1252_v19 = vpop.permute.xlu1 %1251  ;;  %v7751_v28 = vpop.permute.xlu2 %1257  ;;  %v1515_v45 = vsel %vm1374_vm1, %v1475_v13, %v1092_v41  ;;  %v1553_v3 = vsel %vm1415_vm2, %v1513_v43, %v1248_v8  ;;  %v1353_v41 = vsel %vm1333_vm0, %v30_v44, %v452_v40 }
 0x1b6   :  { %v1555_v63 = vsel %vm1415_vm2, %v1515_v45, %v1252_v19  ;;  %v1730_v52 = vrot.slane %v1553_v3, 6  ;;  %v1917_v3 = vsel %vm1785_vm5, %v7660_v51, %v7657_v14 }
 0x1b7   :  { %v1734_v8 = vrot.slane %v1555_v63, 6  ;;  %v1920_v63 = vsel %vm1789_vm6, %v7657_v14, %v7660_v51  ;;  %v118_v51 = vld [vmem:[%s11076_s0 + $0xfa] sm:$0x3] }
 0x1ba   :  { %947 = vrot.lane.b32.xlu0 %v6192_v1, %s6340_s15 }
 0x1bb   :  { %1269 = vrot.lane.b32.xlu1 %v7766_v38, %s6342_s23 }
 0x1bc   :  { %v612_v13 = vpop.permute.xlu0 %611  ;;  %629 = vrot.lane.b32.xlu2 %v7560_v20, %s6341_s16 }
 0x1bd   :  { %v1394_v19 = vsel %vm1374_vm1, %v1353_v41, %v612_v13  ;;  %v768_v43 = vpop.permute.xlu1 %767  ;;  %v7795_v40 = vpop.permute.xlu2 %1099  ;;  %v1921_v13 = vsel %vm1782_vm8, %v7651_v35, %v1920_v63 }
 0x1be   :  { %v1435_v1 = vsel %vm1415_vm2, %v1394_v19, %v7687_v17  ;;  %v1433_v45 = vsel %vm1415_vm2, %v1392_v12, %v768_v43  ;;  %v78_v17 = vld [vmem:[%s11076_s0 + $0xf9] sm:$0x3]  ;;  %v1922_v19 = vrot.slane %v1921_v13, 6  ;;  %v6112_v43 = vld [vmem:[%s11076_s0 + $0x108] sm:$0x3] }
 0x1bf   :  { %v1910_v44 = vsel %vm1776_vm3, %v1435_v1, %v1734_v8  ;;  %v1897_v46 = vsel %vm1776_vm3, %v1433_v45, %v1730_v52  ;;  %v6272_v52 = vld [vmem:[%s11076_s0 + $0x119] sm:$0x3] }
 0x1c0   :  { %v1911_v4 = vsel %vm1778_vm7, %v1910_v44, %v1735_v29  ;;  %v1898_v47 = vsel %vm1778_vm7, %v1897_v46, %v1731_v42  ;;  %v1918_v42 = vsel %vm1778_vm7, %v7651_v35, %v1917_v3 }
 0x1c1   :  { %2137 = vst [vmem:[#allocation1 + $0x1] ss:$4 sm:$0xff] %v1911_v4  ;;  %v1919_v8 = vrot.slane %v1918_v42, 4  ;;  %v7864_v42 = vld [vmem:[%s11076_s0 + $0x122] sm:$0xff] }
 0x1c2   :  { %2126 = vst [vmem:[#allocation1 + $0x20] ss:$4 sm:$0xff] %v1898_v47  ;;  %1107 = vrot.lane.b32.xlu0 %v6232_v15, %s6341_s16 }
 0x1c3   :  { %467 = vrot.lane.b32.xlu1 %v78_v17, %s6340_s15 }
 0x1c4   :  { %v938_v41 = vpop.permute.xlu0 %937  ;;  %789 = vrot.lane.b32.xlu2 %v7580_v26, %s6342_s23 }
 0x1c5   :  { %v1098_v29 = vpop.permute.xlu1 %1097  ;;  %v778_v12 = vpop.permute.xlu2 %777  ;;  %v1478_v46 = vsel %vm1333_vm0, %v7219_v10, %v938_v41  ;;  %v6194_v10 = vld [vmem:[%s11076_s0 + $0x11a] sm:$0x3] }
 0x1c6   :  { %v1518_v63 = vsel %vm1374_vm1, %v1478_v46, %v1098_v29 }
 0x1c7   :  { %v1558_v29 = vsel %vm1415_vm2, %v1518_v63, %v7751_v28 }
 0x1c8   :  { %v2144_v14 = vld.sshfl [vmem:[#allocation1] sm:$0xff pattern:$0x73625140] }
 0x1c9   :  { %v2133_v26 = vld.sshfl [vmem:[#allocation1 + $0x20] sm:$0xff pattern:$0x73625140]  ;;  %v7830_v1 = vld.sshfl [vmem:[#allocation1 + $0x28] sm:$0xff pattern:$0x73625140] }
 0x1ca   :  { %11329 = vst [vmem:[#allocation23_spill] sm:$0xff] %v7830_v1  ;;  %v7832_v35 = vld.sshfl [vmem:[#allocation1 + $0x30] sm:$0xff pattern:$0x73625140]  ;;  %1267 = vrot.lane.b32.xlu0 %v6272_v52, %s6342_s23  ;;  %v7836_v45 = vand.u32 4294901760, %v2133_v26  ;;  %v7838_v44 = vand.u32 4294901760, %v2144_v14 }
 0x1cb   :  { %11330 = vst [vmem:[#allocation24_spill] sm:$0xff] %v7832_v35  ;;  %627 = vrot.lane.b32.xlu1 %v118_v51, %s6341_s16  ;;  %v6234_v52 = vld [vmem:[%s11076_s0 + $0x128] sm:$0x3]  ;;  %v1356_v51 = vsel %vm1333_vm0, %v7282_v61, %v7715_v53  ;;  %v7909_v35 = vld.sshfl [vmem:[#allocation1 + $0x10] sm:$0xff pattern:$0x73625140] }
 0x1cc   :  { %2140 = vst [vmem:[#allocation1 + $0x20] ss:$4 sm:$0xff] %v1919_v8  ;;  %v7842_v15 = vpop.permute.xlu0 %935  ;;  %787 = vrot.lane.b32.xlu2 %v6112_v43, %s6342_s23  ;;  %2614 = vmatmul.f32.gmra.mxu1 %v7836_v45  ;;  %v7849_v47 = vsub.f32 %v2133_v26, %v7836_v45  ;;  %v7854_v3 = vsub.f32 %v2144_v14, %v7838_v44  ;;  %v1740_v43 = vrot.slane %v1558_v29, 6  ;;  %v7898_v29 = vld [vmem:[%s11076_s0 + $0x130] sm:$0xff] }
 0x1cd   :  { %2141 = vst [vmem:[#allocation1 + $0x21] ss:$4 sm:$0xff] %v1922_v19  ;;  %v7846_v4 = vpop.permute.xlu1 %939  ;;  %v1741_v19 = vrot.slane %v7555_v57, 4 }
 0x1ce   :  { %11331 = vst [vmem:[#allocation25_spill] sm:$0xff] %v7849_v47  ;;  %v7851_v17 = vpop.permute.xlu2 %615  ;;  %v11102_v41 = vand.u32 4294901760, %v7849_v47  ;;  %v11101_v8 = vand.u32 4294901760, %v7854_v3 }
 0x1cf   :  { %11332 = vst [vmem:[#allocation26_spill] sm:$0xff] %v7854_v3 }
 0x1d0   :  { %v2438_v13 = vsub.f32 %v7849_v47, %v11102_v41  ;;  %11334 = vst [vmem:[#allocation28_spill] sm:$0xff] %v7909_v35  ;;  %v34_v35 = vld [vmem:[%s11076_s0 + $0xd8] sm:$0x3] }
 0x1d2   :  { %951 = vrot.lane.b32.xlu0 %v6194_v10, %s6340_s15  ;;  %v2439_v14 = vand.u32 4294901760, %v2438_v13  ;;  %v2446_v10 = vsub.f32 %v7854_v3, %v11101_v8 }
 0x1d3   :  { %953 = vrot.lane.b32.xlu1 %v7864_v42, %s6340_s15 }
 0x1d4   :  { %v618_v26 = vpop.permute.xlu0 %617  ;;  %1111 = vrot.lane.b32.xlu2 %v6234_v52, %s6341_s16  ;;  %2440 = vmatmul.f32.gmra.mxu0 %v2439_v14 }
 0x1d5   :  { %2618 = vmatmul.f32.gmra.mxu1 %v7838_v44  ;;  %v1397_v28 = vsel %vm1374_vm1, %v1356_v51, %v618_v26  ;;  %v1096_v46 = vpop.permute.xlu1 %1095 }
 0x1d6   :  { %v1438_v63 = vsel %vm1415_vm2, %v1397_v28, %v778_v12  ;;  %v7889_v13 = vpop.permute.xlu2 %779  ;;  %v80_v28 = vld [vmem:[%s11076_s0 + $0x109] sm:$0x3] }
 0x1d7   :  { %v1925_v61 = vsel %vm1776_vm3, %v1438_v63, %v1740_v43  ;;  %v1927_v53 = vsel %vm1780_vm4, %v1438_v63, %v1740_v43  ;;  %v1930_v57 = vsel %vm1785_vm5, %v1438_v63, %v1740_v43  ;;  %v1933_v52 = vsel %vm1789_vm6, %v1740_v43, %v1438_v63  ;;  %v7907_v63 = vld.sshfl [vmem:[#allocation1 + $0x8] sm:$0xff pattern:$0x73625140] }
 0x1d8   :  { %v1926_v12 = vsel %vm1778_vm7, %v1925_v61, %v1741_v19  ;;  %v1928_v14 = vsel %vm1782_vm8, %v1927_v53, %v1741_v19  ;;  %v1931_v51 = vsel %vm1778_vm7, %v1741_v19, %v1930_v57  ;;  %v1934_v26 = vsel %vm1782_vm8, %v1741_v19, %v1933_v52  ;;  %11333 = vst [vmem:[#allocation27_spill] sm:$0xff] %v7907_v63  ;;  %v6274_v52 = vld [vmem:[%s11076_s0 + $0x129] sm:$0x3] }
 0x1d9   :  { %v1929_v8 = vrot.slane %v1928_v14, 2  ;;  %v1932_v41 = vrot.slane %v1931_v51, 4  ;;  %v1935_v43 = vrot.slane %v1934_v26, 6  ;;  %2143 = vst [vmem:[#allocation1 + $0x23] ss:$4 sm:$0xff] %v1926_v12  ;;  %v2447_v61 = vand.u32 4294901760, %v2446_v10 }
 0x1da   :  { %1113 = vrot.lane.b32.xlu0 %v7898_v29, %s6341_s16  ;;  %v6148_v10 = vld [vmem:[%s11076_s0 + $0xe9] sm:$0x3]  ;;  %v6146_v14 = vld [vmem:[%s11076_s0 + $0xd9] sm:$0x3] }
 0x1db   :  { %2150 = vst [vmem:[#allocation1] ss:$4 sm:$0xff] %v1929_v8  ;;  %471 = vrot.lane.b32.xlu1 %v80_v28, %s6340_s15  ;;  %v7924_v8 = vld [vmem:[%s11076_s0 + $0x131] sm:$0xff]  ;;  %v1479_v26 = vsel %vm1333_vm0, %v6148_v10, %v7846_v4  ;;  %v6308_v10 = vld [vmem:[%s11076_s0 + $0xfa] sm:$0x3] }
 0x1dc   :  { %2151 = vst [vmem:[#allocation1 + $0x1] ss:$4 sm:$0xff] %v1932_v41  ;;  %v456_v19 = vpop.permute.xlu0 %455  ;;  %473 = vrot.lane.b32.xlu2 %v7618_v6, %s6340_s15  ;;  %2448 = vmatmul.f32.gmra.mxu0 %v2447_v61  ;;  %v120_v41 = vld [vmem:[%s11076_s0 + $0x10a] sm:$0x3]  ;;  %v1477_v61 = vsel %vm1333_vm0, %v6146_v14, %v7842_v15  ;;  %v1519_v4 = vsel %vm1374_vm1, %v1479_v26, %v7795_v40  ;;  %v1743_v26 = vrot.slane %v6308_v10, 4 }
 0x1dd   :  { %2152 = vst [vmem:[#allocation1 + $0x2] ss:$4 sm:$0xff] %v1935_v43  ;;  %v460_v53 = vpop.permute.xlu1 %459  ;;  %v32_v43 = vld [vmem:[%s11076_s0 + $0xc8] sm:$0x3]  ;;  %v6306_v15 = vld [vmem:[%s11076_s0 + $0xea] sm:$0x3] }
 0x1de   :  { %v7916_v57 = vpop.permute.xlu2 %1101  ;;  %v1355_v14 = vsel %vm1333_vm0, %v32_v43, %v456_v19  ;;  %v1357_v40 = vsel %vm1333_vm0, %v34_v35, %v460_v53  ;;  %v1739_v47 = vrot.slane %v6306_v15, 4  ;;  %v122_v15 = vld [vmem:[%s11076_s0 + $0x11a] sm:$0x3] }
 0x1e2   :  { %1271 = vrot.lane.b32.xlu0 %v6274_v52, %s6342_s23  ;;  %v6114_v52 = vld [vmem:[%s11076_s0 + $0x118] sm:$0x3] }
 0x1e3   :  { %1273 = vrot.lane.b32.xlu1 %v7924_v8, %s6342_s23 }
 0x1e4   :  { %v1256_v12 = vpop.permute.xlu0 %1255  ;;  %631 = vrot.lane.b32.xlu2 %v120_v41, %s6341_s16  ;;  %v1517_v41 = vsel %vm1374_vm1, %v1477_v61, %v1096_v46 }
 0x1e5   :  { %v1260_v51 = vpop.permute.xlu1 %1259  ;;  %v1557_v3 = vsel %vm1415_vm2, %v1517_v41, %v1256_v12 }
 0x1e6   :  { %v7941_v28 = vpop.permute.xlu2 %465  ;;  %v1559_v46 = vsel %vm1415_vm2, %v1519_v4, %v1260_v51  ;;  %v1738_v63 = vrot.slane %v1557_v3, 6  ;;  %v1396_v51 = vsel %vm1374_vm1, %v1355_v14, %v7851_v17  ;;  %v6236_v17 = vld [vmem:[%s11076_s0 + $0x138] sm:$0x3] }
 0x1e7   :  { %v1742_v1 = vrot.slane %v1559_v46, 6  ;;  %v6116_v46 = vld [vmem:[%s11076_s0 + $0x128] sm:$0x3] }
 0x1ea   :  { %633 = vrot.lane.b32.xlu0 %v7726_v50, %s6341_s16 }
 0x1eb   :  { %791 = vrot.lane.b32.xlu1 %v6114_v52, %s6342_s23 }
 0x1ec   :  { %v620_v61 = vpop.permute.xlu0 %619  ;;  %793 = vrot.lane.b32.xlu2 %v7737_v59, %s6342_s23  ;;  %v6196_v59 = vld [vmem:[%s11076_s0 + $0x12a] sm:$0x3] }
 0x1ed   :  { %v1398_v19 = vsel %vm1374_vm1, %v1357_v40, %v620_v61  ;;  %v776_v12 = vpop.permute.xlu1 %775 }
 0x1ee   :  { %v1439_v43 = vsel %vm1415_vm2, %v1398_v19, %v7889_v13  ;;  %v1437_v52 = vsel %vm1415_vm2, %v1396_v51, %v776_v12  ;;  %v1266_v35 = vpop.permute.xlu2 %1265  ;;  %v82_v13 = vld [vmem:[%s11076_s0 + $0x119] sm:$0x3] }
 0x1ef   :  { %v1936_v53 = vsel %vm1776_vm3, %v1439_v43, %v1742_v1  ;;  %v1923_v41 = vsel %vm1776_vm3, %v1437_v52, %v1738_v63  ;;  %v8019_v52 = vld [vmem:[%s11076_s0 + $0x132] sm:$0xff] }
 0x1f0   :  { %v1937_v3 = vsel %vm1778_vm7, %v1936_v53, %v1743_v26  ;;  %v1924_v4 = vsel %vm1778_vm7, %v1923_v41, %v1739_v47  ;;  %v6276_v47 = vld [vmem:[%s11076_s0 + $0x139] sm:$0x3] }
 0x1f1   :  { %2153 = vst [vmem:[#allocation1 + $0x3] ss:$4 sm:$0xff] %v1937_v3 }
 0x1f2   :  { %2142 = vst [vmem:[#allocation1 + $0x22] ss:$4 sm:$0xff] %v1924_v4  ;;  %955 = vrot.lane.b32.xlu0 %v6196_v59, %s6340_s15  ;;  %v8028_v59 = vld [vmem:[%s11076_s0 + $0x140] sm:$0xff] }
 0x1f3   :  { %1115 = vrot.lane.b32.xlu1 %v6236_v17, %s6341_s16 }
 0x1f4   :  { %v942_v1 = vpop.permute.xlu0 %941  ;;  %475 = vrot.lane.b32.xlu2 %v82_v13, %s6340_s15 }
 0x1f5   :  { %v946_v63 = vpop.permute.xlu1 %945 }
 0x1f6   :  { %v7994_v10 = vpop.permute.xlu2 %1103 }
 0x1f8   :  { %v2158_v14 = vld.sshfl [vmem:[#allocation1] sm:$0xff pattern:$0x73625140] }
 0x1f9   :  { %v2147_v40 = vld.sshfl [vmem:[#allocation1 + $0x20] sm:$0xff pattern:$0x73625140]  ;;  %v8009_v61 = vand.u32 4294901760, %v2158_v14 }
 0x1fa   :  { %1275 = vrot.lane.b32.xlu0 %v6276_v47, %s6342_s23  ;;  %v8007_v26 = vand.u32 4294901760, %v2147_v40 }
 0x1fb   :  { %635 = vrot.lane.b32.xlu1 %v122_v15, %s6341_s16  ;;  %v8023_v41 = vsub.f32 %v2158_v14, %v8009_v61  ;;  %v1482_v14 = vsel %vm1333_vm0, %v7610_v24, %v946_v63 }
 0x1fc   :  { %v1106_v19 = vpop.permute.xlu0 %1105  ;;  %795 = vrot.lane.b32.xlu2 %v6116_v46, %s6342_s23  ;;  %2622 = vmatmul.f32.gmra.mxu1 %v8007_v26  ;;  %v8014_v51 = vsub.f32 %v2147_v40, %v8007_v26  ;;  %v8050_v46 = vld [vmem:[%s11076_s0 + $0x141] sm:$0xff] }
 0x1fd   :  { %v462_v12 = vpop.permute.xlu1 %461  ;;  %11336 = vst [vmem:[#allocation30_spill] sm:$0xff] %v8023_v41  ;;  %v11110_v17 = vand.u32 4294901760, %v8023_v41 }
 0x1fe   :  { %11335 = vst [vmem:[#allocation29_spill] sm:$0xff] %v8014_v51  ;;  %v786_v43 = vpop.permute.xlu2 %785  ;;  %v11109_v53 = vand.u32 4294901760, %v8014_v51 }
 0x1ff   :  { %v2462_v40 = vsub.f32 %v8023_v41, %v11110_v17 }
 0x200   :  { %v2454_v3 = vsub.f32 %v8014_v51, %v11109_v53  ;;  %v1360_v53 = vsel %vm1333_vm0, %v7354_v22, %v7941_v28  ;;  %v8078_v51 = vld [vmem:[%s11076_s0 + $0x142] sm:$0xff] }
 0x201   :  { %v2463_v24 = vand.u32 4294901760, %v2462_v40  ;;  %v35_v22 = vld [vmem:[%s11076_s0 + $0xe0] sm:$0xff] }
 0x202   :  { %957 = vrot.lane.b32.xlu0 %v8019_v52, %s6340_s15  ;;  %v2455_v4 = vand.u32 4294901760, %v2454_v3  ;;  %v1522_v3 = vsel %vm1374_vm1, %v1482_v14, %v1106_v19  ;;  %v8067_v19 = vrot.slane %v7726_v50, 4 }
 0x203   :  { %1117 = vrot.lane.b32.xlu1 %v8028_v59, %s6341_s16 }
 0x204   :  { %v8038_v13 = vpop.permute.xlu0 %943  ;;  %477 = vrot.lane.b32.xlu2 %v7766_v38, %s6340_s15  ;;  %2456 = vmatmul.f32.gmra.mxu0 %v2455_v4  ;;  %v1562_v4 = vsel %vm1415_vm2, %v1522_v3, %v1266_v35  ;;  %v1480_v35 = vsel %vm1333_vm0, %v7396_v21, %v942_v1  ;;  %v8089_v1 = vld [vmem:[%s11076_s0 + $0x150] sm:$0xff] }
 0x205   :  { %2626 = vmatmul.f32.gmra.mxu1 %v8009_v61  ;;  %v1262_v47 = vpop.permute.xlu1 %1261  ;;  %v1748_v3 = vrot.slane %v1562_v4, 6 }
 0x206   :  { %v8043_v15 = vpop.permute.xlu2 %783 }
 0x20a   :  { %1277 = vrot.lane.b32.xlu0 %v8050_v46, %s6342_s23 }
 0x20b   :  { %637 = vrot.lane.b32.xlu1 %v7864_v42, %s6341_s16 }
 0x20c   :  { %v622_v63 = vpop.permute.xlu0 %621  ;;  %797 = vrot.lane.b32.xlu2 %v7898_v29, %s6342_s23  ;;  %2464 = vmatmul.f32.gmra.mxu0 %v2463_v24 }
 0x20d   :  { %v626_v14 = vpop.permute.xlu1 %625 }
 0x20e   :  { %v1401_v17 = vsel %vm1374_vm1, %v1360_v53, %v626_v14  ;;  %v8072_v40 = vpop.permute.xlu2 %469  ;;  %v8093_v53 = vld.sshfl [vmem:[#allocation1 + $0x10] sm:$0xff pattern:$0x73625140] }
 0x20f   :  { %v1442_v41 = vsel %vm1415_vm2, %v1401_v17, %v786_v43  ;;  %v8091_v43 = vld.sshfl [vmem:[#allocation1 + $0x8] sm:$0xff pattern:$0x73625140]  ;;  %11338 = vst [vmem:[#allocation32_spill] sm:$0xff] %v8093_v53  ;;  %v1520_v17 = vsel %vm1374_vm1, %v1480_v35, %v7916_v57  ;;  %v1358_v57 = vsel %vm1333_vm0, %v35_v22, %v462_v12  ;;  %v8137_v53 = vld [vmem:[%s11076_s0 + $0x151] sm:$0xff] }
 0x210   :  { %v1951_v50 = vsel %vm1776_vm3, %v1442_v41, %v1748_v3  ;;  %v1953_v21 = vsel %vm1780_vm4, %v1442_v41, %v1748_v3  ;;  %v1956_v28 = vsel %vm1785_vm5, %v1442_v41, %v1748_v3  ;;  %11337 = vst [vmem:[#allocation31_spill] sm:$0xff] %v8091_v43  ;;  %v1560_v49 = vsel %vm1415_vm2, %v1520_v17, %v1262_v47  ;;  %v6150_v17 = vld [vmem:[%s11076_s0 + $0xf9] sm:$0x3]  ;;  %v8128_v22 = vld.sshfl [vmem:[#allocation1 + $0x30] sm:$0xff pattern:$0x73625140] }
 0x211   :  { %v1952_v4 = vsel %vm1778_vm7, %v1951_v50, %v8067_v19  ;;  %v1954_v24 = vsel %vm1782_vm8, %v1953_v21, %v8067_v19  ;;  %v1957_v14 = vsel %vm1778_vm7, %v8067_v19, %v1956_v28  ;;  %v1745_v50 = vrot.slane %v7560_v20, 4  ;;  %11340 = vst [vmem:[#allocation34_spill] sm:$0xff] %v8128_v22 }
 0x212   :  { %v1955_v11 = vrot.slane %v1954_v24, 2  ;;  %v1958_v48 = vrot.slane %v1957_v14, 4  ;;  %2165 = vst [vmem:[#allocation1 + $0x1] ss:$4 sm:$0xff] %v1952_v4  ;;  %961 = vrot.lane.b32.xlu0 %v8078_v51, %s6340_s15  ;;  %v1744_v21 = vrot.slane %v1560_v49, 6  ;;  %v1399_v47 = vsel %vm1374_vm1, %v1358_v57, %v622_v63 }
 0x213   :  { %1121 = vrot.lane.b32.xlu1 %v8089_v1, %s6341_s16 }
 0x214   :  { %2166 = vst [vmem:[#allocation1 + $0x2] ss:$4 sm:$0xff] %v1955_v11  ;;  %v464_v35 = vpop.permute.xlu0 %463  ;;  %481 = vrot.lane.b32.xlu2 %v7924_v8, %s6340_s15  ;;  %v8119_v11 = vld.sshfl [vmem:[#allocation1 + $0x28] sm:$0xff pattern:$0x73625140] }
 0x215   :  { %2167 = vst [vmem:[#allocation1 + $0x3] ss:$4 sm:$0xff] %v1958_v48  ;;  %v782_v28 = vpop.permute.xlu1 %781  ;;  %v6198_v48 = vld [vmem:[%s11076_s0 + $0x13a] sm:$0x3] }
 0x216   :  { %v1440_v4 = vsel %vm1415_vm2, %v1399_v47, %v782_v28  ;;  %v8117_v24 = vpop.permute.xlu2 %629  ;;  %11339 = vst [vmem:[#allocation33_spill] sm:$0xff] %v8119_v11 }
 0x217   :  { %v1938_v20 = vsel %vm1776_vm3, %v1440_v4, %v1744_v21  ;;  %v1940_v12 = vsel %vm1780_vm4, %v1440_v4, %v1744_v21  ;;  %v1943_v49 = vsel %vm1785_vm5, %v1440_v4, %v1744_v21  ;;  %v1946_v63 = vsel %vm1789_vm6, %v1744_v21, %v1440_v4 }
 0x218   :  { %v1939_v14 = vsel %vm1778_vm7, %v1938_v20, %v1745_v50  ;;  %v1941_v57 = vsel %vm1782_vm8, %v1940_v12, %v1745_v50  ;;  %v1944_v47 = vsel %vm1778_vm7, %v1745_v50, %v1943_v49  ;;  %v1947_v28 = vsel %vm1782_vm8, %v1745_v50, %v1946_v63  ;;  %v36_v20 = vld [vmem:[%s11076_s0 + $0xe8] sm:$0x3]  ;;  %v6310_v50 = vld [vmem:[%s11076_s0 + $0x10a] sm:$0x3] }
 0x219   :  { %v1481_v21 = vsel %vm1333_vm0, %v6150_v17, %v8038_v13  ;;  %v1942_v4 = vrot.slane %v1941_v57, 2  ;;  %v1945_v43 = vrot.slane %v1944_v47, 4  ;;  %v1948_v11 = vrot.slane %v1947_v28, 6  ;;  %2154 = vst [vmem:[#allocation1 + $0x20] ss:$4 sm:$0xff] %v1939_v14  ;;  %v8157_v57 = vpop.f32.mrf.mxu1 }
 0x21a   :  { %959 = vrot.lane.b32.xlu0 %v6198_v48, %s6340_s15  ;;  %v1521_v17 = vsel %vm1374_vm1, %v1481_v21, %v7994_v10  ;;  %v1959_v12 = vsel %vm1789_vm6, %v1748_v3, %v1442_v41  ;;  %v1359_v49 = vsel %vm1333_vm0, %v36_v20, %v464_v35  ;;  %v1747_v48 = vrot.slane %v6310_v50, 4  ;;  %11341 = vst [vmem:[#allocation35_spill] sm:$0xff] %v8157_v57  ;;  %v6238_v41 = vld [vmem:[%s11076_s0 + $0x148] sm:$0x3] }
 0x21b   :  { %2155 = vst [vmem:[#allocation1 + $0x21] ss:$4 sm:$0xff] %v1942_v4  ;;  %1281 = vrot.lane.b32.xlu1 %v8137_v53, %s6342_s23  ;;  %v1960_v3 = vsel %vm1782_vm8, %v8067_v19, %v1959_v12  ;;  %v8178_v19 = vpop.f32.mrf.mxu0 }
 0x21c   :  { %2156 = vst [vmem:[#allocation1 + $0x22] ss:$4 sm:$0xff] %v1945_v43  ;;  %v1264_v13 = vpop.permute.xlu0 %1263  ;;  %641 = vrot.lane.b32.xlu2 %v8019_v52, %s6341_s16  ;;  %v1961_v4 = vrot.slane %v1960_v3, 6  ;;  %v1362_v3 = vsel %vm1333_vm0, %v7566_v36, %v8072_v40 }
 0x21d   :  { %2157 = vst [vmem:[#allocation1 + $0x23] ss:$4 sm:$0xff] %v1948_v11  ;;  %v1561_v63 = vsel %vm1415_vm2, %v1521_v17, %v1264_v13  ;;  %v624_v14 = vpop.permute.xlu1 %623  ;;  %v84_v11 = vld [vmem:[%s11076_s0 + $0x129] sm:$0x3]  ;;  %v1403_v36 = vsel %vm1374_vm1, %v1362_v3, %v8117_v24  ;;  %v8232_v24 = vld [vmem:[%s11076_s0 + $0x152] sm:$0xff] }
 0x21e   :  { %v1746_v47 = vrot.slane %v1561_v63, 6  ;;  %v1400_v43 = vsel %vm1374_vm1, %v1359_v49, %v624_v14  ;;  %v790_v28 = vpop.permute.xlu2 %789  ;;  %11342 = vst [vmem:[#allocation36_spill] sm:$0xff] %v8178_v19  ;;  %v6314_v19 = vld [vmem:[%s11076_s0 + $0x12a] sm:$0x3] }
 0x21f   :  { %v1441_v10 = vsel %vm1415_vm2, %v1400_v43, %v8043_v15 }
 0x220   :  { %v1949_v35 = vsel %vm1776_vm3, %v1441_v10, %v1746_v47  ;;  %v124_v47 = vld [vmem:[%s11076_s0 + $0x12a] sm:$0x3] }
 0x221   :  { %v1950_v21 = vsel %vm1778_vm7, %v1949_v35, %v1747_v48  ;;  %v8184_v49 = vpop.f32.mrf.mxu1  ;;  %v6278_v48 = vld [vmem:[%s11076_s0 + $0x149] sm:$0x3] }
 0x222   :  { %2164 = vst [vmem:[#allocation1] ss:$4 sm:$0xff] %v1950_v21  ;;  %1119 = vrot.lane.b32.xlu0 %v6238_v41, %s6341_s16  ;;  %v6118_v41 = vld [vmem:[%s11076_s0 + $0x138] sm:$0x3] }
 0x223   :  { %479 = vrot.lane.b32.xlu1 %v84_v11, %s6340_s15  ;;  %11344 = vst [vmem:[#allocation38_spill] sm:$0xff] %v8184_v49 }
 0x224   :  { %v950_v15 = vpop.permute.xlu0 %949  ;;  %v2161_v20 = vld.sshfl [vmem:[#allocation1 + $0x20] sm:$0xff pattern:$0x73625140]  ;;  %v8174_v50 = vld.sshfl [vmem:[#allocation1 + $0x28] sm:$0xff pattern:$0x73625140]  ;;  %801 = vrot.lane.b32.xlu2 %v8028_v59, %s6342_s23 }
 0x225   :  { %v1110_v13 = vpop.permute.xlu1 %1109  ;;  %v8180_v17 = vld.sshfl [vmem:[#allocation1 + $0x30] sm:$0xff pattern:$0x73625140]  ;;  %v8182_v12 = vand.u32 4294901760, %v2161_v20  ;;  %v1484_v35 = vsel %vm1333_vm0, %v7618_v6, %v950_v15 }
 0x226   :  { %11343 = vst [vmem:[#allocation37_spill] sm:$0xff] %v8180_v17  ;;  %v8186_v63 = vpop.permute.xlu2 %787  ;;  %v1524_v6 = vsel %vm1374_vm1, %v1484_v35, %v1110_v13 }
 0x227   :  { %2168 = vst [vmem:[#allocation1 + $0x20] ss:$4 sm:$0xff] %v1961_v4  ;;  %2630 = vmatmul.f32.gmra.mxu1 %v8182_v12  ;;  %v8193_v14 = vsub.f32 %v2161_v20, %v8182_v12  ;;  %v8215_v20 = vpop.f32.mrf.mxu0 }
 0x228   :  { %11345 = vst [vmem:[#allocation39_spill] sm:$0xff] %v8215_v20 }
 0x229   :  { %v11122_v43 = vand.u32 4294901760, %v8193_v14  ;;  %v2172_v10 = vld.sshfl [vmem:[#allocation1] sm:$0xff pattern:$0x73625140]  ;;  %v8235_v3 = vpop.f32.mrf.mxu1 }
 0x22a   :  { %1279 = vrot.lane.b32.xlu0 %v6278_v48, %s6342_s23  ;;  %v8212_v21 = vand.u32 4294901760, %v2172_v10  ;;  %11346 = vst [vmem:[#allocation40_spill] sm:$0xff] %v8235_v3 }
 0x22b   :  { %639 = vrot.lane.b32.xlu1 %v124_v47, %s6341_s16  ;;  %v2470_v11 = vsub.f32 %v8193_v14, %v11122_v43  ;;  %v1753_v47 = vrot.slane %v7864_v42, 4  ;;  %v8241_v42 = vld [vmem:[%s11076_s0 + $0x160] sm:$0xff] }
 0x22c   :  { %v948_v4 = vpop.permute.xlu0 %947  ;;  %799 = vrot.lane.b32.xlu2 %v6118_v41, %s6342_s23  ;;  %2634 = vmatmul.f32.vlgmr.msra.gmra.mxu3 %v8212_v21  ;;  %v8222_v48 = vsub.f32 %v2172_v10, %v8212_v21  ;;  %v1444_v10 = vsel %vm1415_vm2, %v1403_v36, %v790_v28 }
 0x22d   :  { %v1270_v40 = vpop.permute.xlu1 %1269  ;;  %v2471_v15 = vand.u32 4294901760, %v2470_v11 }
 0x22e   :  { %v1564_v43 = vsel %vm1415_vm2, %v1524_v6, %v1270_v40  ;;  %v8226_v17 = vpop.permute.xlu2 %1111 }
 0x22f   :  { %v1752_v41 = vrot.slane %v1564_v43, 6  ;;  %2472 = vmatmul.f32.gmra.mxu0 %v2471_v15  ;;  %3120 = vmatmul.f32.vlgmr.msrb.gmra.mxu1 %v6643_v33 }
 0x231   :  { %v1964_v43 = vsel %vm1776_vm3, %v1444_v10, %v1752_v41  ;;  %v1966_v35 = vsel %vm1780_vm4, %v1444_v10, %v1752_v41  ;;  %v1969_v11 = vsel %vm1785_vm5, %v1444_v10, %v1752_v41  ;;  %v1972_v6 = vsel %vm1789_vm6, %v1752_v41, %v1444_v10 }
 0x232   :  { %v1965_v40 = vsel %vm1778_vm7, %v1964_v43, %v1753_v47  ;;  %v1967_v15 = vsel %vm1782_vm8, %v1966_v35, %v1753_v47  ;;  %v1970_v13 = vsel %vm1778_vm7, %v1753_v47, %v1969_v11  ;;  %v1973_v28 = vsel %vm1782_vm8, %v1753_v47, %v1972_v6  ;;  %965 = vrot.lane.b32.xlu0 %v8232_v24, %s6340_s15  ;;  %v8258_v43 = vld.sshfl [vmem:[#allocation1 + $0x8] sm:$0xff pattern:$0x73625140]  ;;  %v8262_v47 = vld.sshfl [vmem:[#allocation1 + $0x10] sm:$0xff pattern:$0x73625140] }
 0x233   :  { %v1968_v36 = vrot.slane %v1967_v15, 2  ;;  %v1971_v22 = vrot.slane %v1970_v13, 4  ;;  %v1974_v3 = vrot.slane %v1973_v28, 6  ;;  %2170 = vst [vmem:[#allocation1 + $0x22] ss:$4 sm:$0xff] %v1965_v40  ;;  %1125 = vrot.lane.b32.xlu1 %v8241_v42, %s6341_s16  ;;  %v11347_v41 = vand.u32 4294901760, %v8222_v48  ;;  %v8266_v40 = vpop.f32.mrf.mxu0  ;;  %v8272_v28 = vpop.f32.mrf.mxu1 }
 0x234   :  { %v1108_v35 = vpop.permute.xlu0 %1107  ;;  %485 = vrot.lane.b32.xlu2 %v8050_v46, %s6340_s15  ;;  %11348 = vst [vmem:[#allocation41_spill] sm:$0xff] %v8262_v47  ;;  %v6200_v15 = vld [vmem:[%s11076_s0 + $0x14a] sm:$0x3] }
 0x235   :  { %v2478_v10 = vsub.f32 %v8222_v48, %v11347_v41  ;;  %2171 = vst [vmem:[#allocation1 + $0x23] ss:$4 sm:$0xff] %v1968_v36  ;;  %v468_v11 = vpop.permute.xlu1 %467  ;;  %v6152_v36 = vld [vmem:[%s11076_s0 + $0x109] sm:$0x3] }
 0x236   :  { %2178 = vst [vmem:[#allocation1] ss:$4 sm:$0xff] %v1971_v22  ;;  %v8264_v6 = vpop.permute.xlu2 %473  ;;  %v8281_v22 = vld [vmem:[%s11076_s0 + $0x161] sm:$0xff]  ;;  %v1483_v41 = vsel %vm1333_vm0, %v6152_v36, %v948_v4 }
 0x237   :  { %v2479_v13 = vand.u32 4294901760, %v2478_v10  ;;  %11349 = vst [vmem:[#allocation42_spill] sm:$0xff] %v8266_v40  ;;  %3002 = vmatmul.f32.vlgmr.msrb.gmra.mxu0 %v6643_v33  ;;  %3124 = vmatmul.f32.gmra.mxu1 %v6874_v62  ;;  %v38_v33 = vld [vmem:[%s11076_s0 + $0xf8] sm:$0x3]  ;;  %v1523_v10 = vsel %vm1374_vm1, %v1483_v41, %v1108_v35 }
 0x238   :  { %2179 = vst [vmem:[#allocation1 + $0x1] ss:$4 sm:$0xff] %v1974_v3  ;;  %v6312_v3 = vld [vmem:[%s11076_s0 + $0x11a] sm:$0x3]  ;;  %v1361_v47 = vsel %vm1333_vm0, %v38_v33, %v468_v11  ;;  %v6240_v11 = vld [vmem:[%s11076_s0 + $0x158] sm:$0x3] }
 0x239   :  { %2480 = vmatmul.f32.vlgmr.msra.gmra.mxu2 %v2479_v13  ;;  %11350 = vst [vmem:[#allocation43_spill] sm:$0xff] %v8272_v28  ;;  %v126_v33 = vld [vmem:[%s11076_s0 + $0x13a] sm:$0x3] }
 0x23a   :  { %963 = vrot.lane.b32.xlu0 %v6200_v15, %s6340_s15  ;;  %v1751_v15 = vrot.slane %v6312_v3, 4 }
 0x23b   :  { %1285 = vrot.lane.b32.xlu1 %v8281_v22, %s6342_s23  ;;  %v8301_v4 = vpop.f32.mrf.mxu0 }
 0x23c   :  { %v1268_v13 = vpop.permute.xlu0 %1267  ;;  %645 = vrot.lane.b32.xlu2 %v8078_v51, %s6341_s16  ;;  %11351 = vst [vmem:[#allocation44_spill] sm:$0xff] %v8301_v4 }
 0x23d   :  { %v1563_v28 = vsel %vm1415_vm2, %v1523_v10, %v1268_v13  ;;  %v628_v40 = vpop.permute.xlu1 %627 }
 0x23e   :  { %v1750_v49 = vrot.slane %v1563_v28, 6  ;;  %v1402_v20 = vsel %vm1374_vm1, %v1361_v47, %v628_v40  ;;  %v8299_v57 = vpop.permute.xlu2 %631  ;;  %v86_v47 = vld [vmem:[%s11076_s0 + $0x139] sm:$0x3]  ;;  %v8315_v28 = vpop.f32.mrf.mxu1 }
 0x23f   :  { %v1443_v35 = vsel %vm1415_vm2, %v1402_v20, %v8186_v63  ;;  %3006 = vmatmul.f32.gmra.mxu0 %v6874_v62  ;;  %3128 = vmatmul.f32.gmra.mxu1 %v6876_v0  ;;  %11352 = vst [vmem:[#allocation45_spill] sm:$0xff] %v8315_v28  ;;  %v6280_v20 = vld [vmem:[%s11076_s0 + $0x159] sm:$0x3] }
 0x240   :  { %v1962_v36 = vsel %vm1776_vm3, %v1443_v35, %v1750_v49 }
 0x241   :  { %v1963_v40 = vsel %vm1778_vm7, %v1962_v36, %v1751_v15 }
 0x242   :  { %2169 = vst [vmem:[#allocation1 + $0x21] ss:$4 sm:$0xff] %v1963_v40  ;;  %1123 = vrot.lane.b32.xlu0 %v6240_v11, %s6341_s16  ;;  %v8358_v40 = vld [vmem:[%s11076_s0 + $0x162] sm:$0xff] }
 0x243   :  { %483 = vrot.lane.b32.xlu1 %v86_v47, %s6340_s15  ;;  %v8331_v3 = vpop.f32.mrf.mxu0  ;;  %v6202_v47 = vld [vmem:[%s11076_s0 + $0x15a] sm:$0x3] }
 0x244   :  { %v952_v62 = vpop.permute.xlu0 %951  ;;  %805 = vrot.lane.b32.xlu2 %v8089_v1, %s6342_s23  ;;  %11353 = vst [vmem:[#allocation46_spill] sm:$0xff] %v8331_v3  ;;  %v6120_v1 = vld [vmem:[%s11076_s0 + $0x148] sm:$0x3] }
 0x245   :  { %v954_v49 = vpop.permute.xlu1 %953 }
 0x246   :  { %v8321_v63 = vpop.permute.xlu2 %793  ;;  %v8336_v10 = vpop.f32.mrf.mxu1 }
 0x247   :  { %3010 = vmatmul.f32.gmra.mxu0 %v6876_v0  ;;  %3132 = vmatmul.f32.gmra.mxu1 %v7042_v32  ;;  %11354 = vst [vmem:[#allocation47_spill] sm:$0xff] %v8336_v10  ;;  %v6154_v10 = vld [vmem:[%s11076_s0 + $0x119] sm:$0x3] }
 0x248   :  { %v1485_v3 = vsel %vm1333_vm0, %v6154_v10, %v952_v62  ;;  %v41_v62 = vld [vmem:[%s11076_s0 + $0x110] sm:$0xff] }
 0x249   :  { %v2175_v41 = vld.sshfl [vmem:[#allocation1 + $0x20] sm:$0xff pattern:$0x73625140] }
 0x24a   :  { %1283 = vrot.lane.b32.xlu0 %v6280_v20, %s6342_s23  ;;  %v8339_v0 = vand.u32 4294901760, %v2175_v41 }
 0x24b   :  { %643 = vrot.lane.b32.xlu1 %v126_v33, %s6341_s16  ;;  %v8363_v33 = vpop.f32.mrf.mxu0 }
 0x24c   :  { %v1114_v13 = vpop.permute.xlu0 %1113  ;;  %2638 = vmatmul.f32.gmra.mxu3 %v8339_v0  ;;  %v8344_v15 = vsub.f32 %v2175_v41, %v8339_v0  ;;  %803 = vrot.lane.b32.xlu2 %v6120_v1, %s6342_s23  ;;  %11355 = vst [vmem:[#allocation48_spill] sm:$0xff] %v8363_v33 }
 0x24d   :  { %v472_v35 = vpop.permute.xlu1 %471 }
 0x24e   :  { %v11123_v11 = vand.u32 4294901760, %v8344_v15  ;;  %v8348_v36 = vpop.permute.xlu2 %475  ;;  %v8371_v1 = vpop.f32.mrf.mxu1 }
 0x24f   :  { %3014 = vmatmul.f32.gmra.mxu0 %v7042_v32  ;;  %3136 = vmatmul.f32.gmra.mxu1 %v7044_v18  ;;  %v6242_v32 = vld [vmem:[%s11076_s0 + $0x168] sm:$0x3]  ;;  %11356 = vst [vmem:[#allocation49_spill] sm:$0xff] %v8371_v1  ;;  %v1525_v1 = vsel %vm1374_vm1, %v1485_v3, %v8226_v17  ;;  %v1757_v17 = vrot.slane %v8019_v52, 4 }
 0x250   :  { %v2486_v20 = vsub.f32 %v8344_v15, %v11123_v11 }
 0x252   :  { %967 = vrot.lane.b32.xlu0 %v6202_v47, %s6340_s15  ;;  %v2487_v41 = vand.u32 4294901760, %v2486_v20  ;;  %v40_v47 = vld [vmem:[%s11076_s0 + $0x108] sm:$0x3]  ;;  %v6243_v20 = vld [vmem:[%s11076_s0 + $0x170] sm:$0xff] }
 0x253   :  { %969 = vrot.lane.b32.xlu1 %v8358_v40, %s6340_s15 }
 0x254   :  { %v1272_v28 = vpop.permute.xlu0 %1271  ;;  %2488 = vmatmul.f32.gmra.mxu2 %v2487_v41  ;;  %1127 = vrot.lane.b32.xlu2 %v6242_v32, %s6341_s16  ;;  %v1486_v41 = vsel %vm1333_vm0, %v7766_v38, %v954_v49  ;;  %v88_v32 = vld [vmem:[%s11076_s0 + $0x149] sm:$0x3]  ;;  %v8402_v38 = vpop.f32.mrf.mxu0 }
 0x255   :  { %v1274_v11 = vpop.permute.xlu1 %1273  ;;  %v1526_v10 = vsel %vm1374_vm1, %v1486_v41, %v1114_v13  ;;  %v1565_v49 = vsel %vm1415_vm2, %v1525_v1, %v1272_v28 }
 0x256   :  { %v8377_v33 = vpop.permute.xlu2 %795  ;;  %v1566_v4 = vsel %vm1415_vm2, %v1526_v10, %v1274_v11  ;;  %v8409_v13 = vpop.f32.mrf.mxu1 }
 0x257   :  { %3018 = vmatmul.f32.gmra.mxu0 %v7044_v18  ;;  %3140 = vmatmul.f32.gmra.mxu1 %v7213_v25  ;;  %v1363_v18 = vsel %vm1333_vm0, %v40_v47, %v472_v35  ;;  %v1364_v35 = vsel %vm1333_vm0, %v41_v62, %v8264_v6  ;;  %v1756_v11 = vrot.slane %v1566_v4, 6 }
 0x258   :  { %v1404_v47 = vsel %vm1374_vm1, %v1363_v18, %v8299_v57  ;;  %v6282_v57 = vld [vmem:[%s11076_s0 + $0x169] sm:$0x3] }
 0x25a   :  { %1129 = vrot.lane.b32.xlu0 %v6243_v20, %s6341_s16  ;;  %v1754_v20 = vrot.slane %v1565_v49, 6 }
 0x25b   :  { %487 = vrot.lane.b32.xlu1 %v88_v32, %s6340_s15  ;;  %v1755_v32 = vrot.slane %v6314_v19, 4 }
 0x25c   :  { %v634_v3 = vpop.permute.xlu0 %633  ;;  %489 = vrot.lane.b32.xlu2 %v8137_v53, %s6340_s15 }
 0x25d   :  { %v1405_v28 = vsel %vm1374_vm1, %v1364_v35, %v634_v3  ;;  %v792_v1 = vpop.permute.xlu1 %791  ;;  %v6283_v3 = vld [vmem:[%s11076_s0 + $0x171] sm:$0xff] }
 0x25e   :  { %v1446_v41 = vsel %vm1415_vm2, %v1405_v28, %v8321_v63  ;;  %v1445_v6 = vsel %vm1415_vm2, %v1404_v47, %v792_v1  ;;  %v8422_v62 = vpop.permute.xlu2 %477 }
 0x25f   :  { %v1977_v52 = vsel %vm1776_vm3, %v1446_v41, %v1756_v11  ;;  %v1979_v10 = vsel %vm1780_vm4, %v1446_v41, %v1756_v11  ;;  %v1982_v4 = vsel %vm1785_vm5, %v1446_v41, %v1756_v11  ;;  %v1985_v35 = vsel %vm1789_vm6, %v1756_v11, %v1446_v41  ;;  %3022 = vmatmul.f32.gmra.mxu0 %v7213_v25  ;;  %v128_v25 = vld [vmem:[%s11076_s0 + $0x14a] sm:$0x3] }
 0x260   :  { %v1978_v19 = vsel %vm1778_vm7, %v1977_v52, %v1757_v17  ;;  %v1980_v63 = vsel %vm1782_vm8, %v1979_v10, %v1757_v17  ;;  %v1983_v18 = vsel %vm1778_vm7, %v1757_v17, %v1982_v4  ;;  %v1986_v49 = vsel %vm1782_vm8, %v1757_v17, %v1985_v35  ;;  %3144 = vmatmul.f32.gmra.mxu1 %v7230_v2  ;;  %v8444_v41 = vld.sshfl [vmem:[#allocation1 + $0x28] sm:$0xff pattern:$0x73625140]  ;;  %v8446_v52 = vld.sshfl [vmem:[#allocation1 + $0x30] sm:$0xff pattern:$0x73625140]  ;;  %v8449_v17 = vpop.f32.mrf.mxu0 }
 0x261   :  { %v1981_v11 = vrot.slane %v1980_v63, 2  ;;  %v1984_v28 = vrot.slane %v1983_v18, 4  ;;  %v1987_v1 = vrot.slane %v1986_v49, 6  ;;  %2181 = vst [vmem:[#allocation1 + $0x3] ss:$4 sm:$0xff] %v1978_v19  ;;  %v1975_v47 = vsel %vm1776_vm3, %v1445_v6, %v1754_v20  ;;  %v8454_v20 = vpop.f32.mrf.mxu1 }
 0x262   :  { %11357 = vst [vmem:[#allocation50_spill] sm:$0xff] %v8446_v52  ;;  %1287 = vrot.lane.b32.xlu0 %v6282_v57, %s6342_s23  ;;  %v1976_v10 = vsel %vm1778_vm7, %v1975_v47, %v1755_v32  ;;  %v6156_v6 = vld [vmem:[%s11076_s0 + $0x129] sm:$0x3]  ;;  %v6122_v32 = vld [vmem:[%s11076_s0 + $0x158] sm:$0x3] }
 0x263   :  { %2182 = vst [vmem:[#allocation1 + $0x20] ss:$4 sm:$0xff] %v1981_v11  ;;  %1289 = vrot.lane.b32.xlu1 %v6283_v3, %s6342_s23  ;;  %v42_v63 = vld [vmem:[%s11076_s0 + $0x118] sm:$0x3]  ;;  %v6316_v18 = vld [vmem:[%s11076_s0 + $0x13a] sm:$0x3] }
 0x264   :  { %2183 = vst [vmem:[#allocation1 + $0x21] ss:$4 sm:$0xff] %v1984_v28  ;;  %v956_v4 = vpop.permute.xlu0 %955  ;;  %647 = vrot.lane.b32.xlu2 %v128_v25, %s6341_s16  ;;  %v1365_v25 = vsel %vm1333_vm0, %v42_v63, %v8348_v36  ;;  %v6204_v36 = vld [vmem:[%s11076_s0 + $0x16a] sm:$0x3]  ;;  %v6244_v63 = vld [vmem:[%s11076_s0 + $0x178] sm:$0x3] }
 0x265   :  { %2184 = vst [vmem:[#allocation1 + $0x22] ss:$4 sm:$0xff] %v1987_v1  ;;  %v1116_v35 = vpop.permute.xlu1 %1115  ;;  %v1487_v19 = vsel %vm1333_vm0, %v6156_v6, %v956_v4  ;;  %v1759_v1 = vrot.slane %v6316_v18, 4 }
 0x266   :  { %2180 = vst [vmem:[#allocation1 + $0x2] ss:$4 sm:$0xff] %v1976_v10  ;;  %v8459_v57 = vpop.permute.xlu2 %797 }
 0x267   :  { %3026 = vmatmul.f32.gmra.mxu0 %v7230_v2  ;;  %v1527_v2 = vsel %vm1374_vm1, %v1487_v19, %v1116_v35 }
 0x268   :  { %3148 = vmatmul.f32.gmra.mxu1 %v7459_v34  ;;  %v8479_v3 = vpop.f32.mrf.mxu0 }
 0x269   :  { %v8484_v10 = vpop.f32.mrf.mxu1 }
 0x26a   :  { %649 = vrot.lane.b32.xlu0 %v8232_v24, %s6341_s16 }
 0x26b   :  { %807 = vrot.lane.b32.xlu1 %v6122_v32, %s6342_s23 }
 0x26c   :  { %v1276_v49 = vpop.permute.xlu0 %1275  ;;  %809 = vrot.lane.b32.xlu2 %v8241_v42, %s6342_s23 }
 0x26d   :  { %v2186_v11 = vld.sshfl [vmem:[#allocation1] sm:$0xff pattern:$0x73625140]  ;;  %v1567_v28 = vsel %vm1415_vm2, %v1527_v2, %v1276_v49  ;;  %v636_v47 = vpop.permute.xlu1 %635 }
 0x26e   :  { %v8486_v4 = vand.u32 4294901760, %v2186_v11  ;;  %v1758_v6 = vrot.slane %v1567_v28, 6  ;;  %v1406_v35 = vsel %vm1374_vm1, %v1365_v25, %v636_v47  ;;  %v8489_v32 = vpop.permute.xlu2 %481  ;;  %v6284_v47 = vld [vmem:[%s11076_s0 + $0x179] sm:$0x3] }
 0x26f   :  { %v1447_v42 = vsel %vm1415_vm2, %v1406_v35, %v8377_v33  ;;  %3030 = vmatmul.f32.gmra.mxu0 %v7459_v34  ;;  %v90_v34 = vld [vmem:[%s11076_s0 + $0x159] sm:$0x3] }
 0x270   :  { %2642 = vmatmul.f32.gmra.mxu3 %v8486_v4  ;;  %v1988_v19 = vsel %vm1776_vm3, %v1447_v42, %v1758_v6  ;;  %3152 = vmatmul.f32.gmra.mxu1 %v7467_v56  ;;  %v8504_v18 = vsub.f32 %v2186_v11, %v8486_v4  ;;  %v8517_v11 = vpop.f32.mrf.mxu0  ;;  %v130_v35 = vld [vmem:[%s11076_s0 + $0x15a] sm:$0x3] }
 0x271   :  { %v1989_v33 = vsel %vm1778_vm7, %v1988_v19, %v1759_v1  ;;  %v8523_v6 = vpop.f32.mrf.mxu1 }
 0x272   :  { %2185 = vst [vmem:[#allocation1 + $0x23] ss:$4 sm:$0xff] %v1989_v33  ;;  %971 = vrot.lane.b32.xlu0 %v6204_v36, %s6340_s15  ;;  %v11124_v2 = vand.u32 4294901760, %v8504_v18 }
 0x273   :  { %1131 = vrot.lane.b32.xlu1 %v6244_v63, %s6341_s16  ;;  %11358 = vst [vmem:[#allocation51_spill] sm:$0xff] %v8523_v6  ;;  %v43_v63 = vld [vmem:[%s11076_s0 + $0x120] sm:$0xff] }
 0x274   :  { %v2494_v49 = vsub.f32 %v8504_v18, %v11124_v2  ;;  %v958_v25 = vpop.permute.xlu0 %957  ;;  %491 = vrot.lane.b32.xlu2 %v90_v34, %s6340_s15 }
 0x275   :  { %v1118_v28 = vpop.permute.xlu1 %1117  ;;  %v1488_v36 = vsel %vm1333_vm0, %v7924_v8, %v958_v25  ;;  %v1366_v25 = vsel %vm1333_vm0, %v43_v63, %v8422_v62 }
 0x276   :  { %v2495_v1 = vand.u32 4294901760, %v2494_v49  ;;  %v642_v42 = vpop.permute.xlu2 %641  ;;  %v1528_v34 = vsel %vm1374_vm1, %v1488_v36, %v1118_v28 }
 0x277   :  { %3034 = vmatmul.f32.gmra.mxu0 %v7467_v56  ;;  %v6124_v56 = vld [vmem:[%s11076_s0 + $0x168] sm:$0x3] }
 0x278   :  { %2496 = vmatmul.f32.gmra.mxu2 %v2495_v1  ;;  %3156 = vmatmul.f32.gmra.mxu1 %v7586_v23  ;;  %v8553_v36 = vpop.f32.mrf.mxu0 }
 0x279   :  { %v2189_v19 = vld.sshfl [vmem:[#allocation1 + $0x20] sm:$0xff pattern:$0x73625140]  ;;  %11359 = vst [vmem:[#allocation52_spill] sm:$0xff] %v8553_v36 }
 0x27a   :  { %1291 = vrot.lane.b32.xlu0 %v6284_v47, %s6342_s23  ;;  %v8538_v33 = vand.u32 4294901760, %v2189_v19  ;;  %v1761_v47 = vrot.slane %v8078_v51, 4 }
 0x27b   :  { %651 = vrot.lane.b32.xlu1 %v130_v35, %s6341_s16 }
 0x27c   :  { %v1278_v49 = vpop.permute.xlu0 %1277  ;;  %2646 = vmatmul.f32.gmra.mxu3 %v8538_v33  ;;  %v8544_v8 = vsub.f32 %v2189_v19, %v8538_v33  ;;  %811 = vrot.lane.b32.xlu2 %v6124_v56, %s6342_s23  ;;  %v8558_v56 = vpop.f32.mrf.mxu1 }
 0x27d   :  { %v1568_v1 = vsel %vm1415_vm2, %v1528_v34, %v1278_v49  ;;  %v638_v2 = vpop.permute.xlu1 %637  ;;  %11360 = vst [vmem:[#allocation53_spill] sm:$0xff] %v8558_v56  ;;  %v8567_v49 = vld.sshfl [vmem:[#allocation1 + $0x10] sm:$0xff pattern:$0x73625140] }
 0x27e   :  { %v1760_v52 = vrot.slane %v1568_v1, 6  ;;  %v1407_v35 = vsel %vm1374_vm1, %v1366_v25, %v638_v2  ;;  %v8565_v2 = vld.sshfl [vmem:[#allocation1 + $0x8] sm:$0xff pattern:$0x73625140]  ;;  %11361 = vst [vmem:[#allocation54_spill] sm:$0xff] %v8567_v49  ;;  %v802_v6 = vpop.permute.xlu2 %801 }
 0x27f   :  { %v1448_v19 = vsel %vm1415_vm2, %v1407_v35, %v8459_v57  ;;  %3038 = vmatmul.f32.gmra.mxu0 %v7586_v23 }
 0x280   :  { %v1990_v62 = vsel %vm1776_vm3, %v1448_v19, %v1760_v52  ;;  %v1992_v63 = vsel %vm1780_vm4, %v1448_v19, %v1760_v52  ;;  %v1995_v51 = vsel %vm1785_vm5, %v1448_v19, %v1760_v52  ;;  %v1998_v34 = vsel %vm1789_vm6, %v1760_v52, %v1448_v19  ;;  %3160 = vmatmul.f32.gmra.mxu1 %v7588_v9 }
 0x281   :  { %v1991_v57 = vsel %vm1778_vm7, %v1990_v62, %v1761_v47  ;;  %v1993_v23 = vsel %vm1782_vm8, %v1992_v63, %v1761_v47  ;;  %v1996_v25 = vsel %vm1778_vm7, %v1761_v47, %v1995_v51  ;;  %v1999_v1 = vsel %vm1782_vm8, %v1761_v47, %v1998_v34  ;;  %v8576_v63 = vpop.f32.mrf.mxu0 }
 0x282   :  { %v1994_v35 = vrot.slane %v1993_v23, 2  ;;  %v1997_v28 = vrot.slane %v1996_v25, 4  ;;  %v2000_v56 = vrot.slane %v1999_v1, 6  ;;  %2192 = vst [vmem:[#allocation1] ss:$4 sm:$0xff] %v1991_v57  ;;  %v11362_v52 = vand.u32 4294901760, %v8544_v8 }
 0x283   :  { %v1368_v51 = vsel %vm1333_vm0, %v7898_v29, %v8489_v32 }
 0x284   :  { %v2502_v19 = vsub.f32 %v8544_v8, %v11362_v52  ;;  %2193 = vst [vmem:[#allocation1 + $0x1] ss:$4 sm:$0xff] %v1994_v35  ;;  %v962_v36 = vpop.permute.xlu0 %961  ;;  %v8580_v47 = vpop.f32.mrf.mxu1 }
 0x285   :  { %2194 = vst [vmem:[#allocation1 + $0x2] ss:$4 sm:$0xff] %v1997_v28  ;;  %v1122_v62 = vpop.permute.xlu1 %1121  ;;  %v1490_v34 = vsel %vm1333_vm0, %v8050_v46, %v962_v36 }
 0x286   :  { %v2503_v49 = vand.u32 4294901760, %v2502_v19  ;;  %2195 = vst [vmem:[#allocation1 + $0x3] ss:$4 sm:$0xff] %v2000_v56  ;;  %v800_v28 = vpop.permute.xlu2 %799  ;;  %v1409_v56 = vsel %vm1374_vm1, %v1368_v51, %v642_v42 }
 0x287   :  { %3042 = vmatmul.f32.gmra.mxu0 %v7588_v9  ;;  %11363 = vst [vmem:[#allocation55_spill] sm:$0xff] %v8580_v47  ;;  %v1765_v9 = vrot.slane %v8232_v24, 4  ;;  %v1450_v29 = vsel %vm1415_vm2, %v1409_v56, %v802_v6  ;;  %v8608_v6 = vld.sshfl [vmem:[#allocation1 + $0x28] sm:$0xff pattern:$0x73625140] }
 0x288   :  { %2504 = vmatmul.f32.gmra.mxu2 %v2503_v49  ;;  %3164 = vmatmul.f32.gmra.mxu1 %v7836_v45  ;;  %v1530_v49 = vsel %vm1374_vm1, %v1490_v34, %v1122_v62  ;;  %v8610_v62 = vld.sshfl [vmem:[#allocation1 + $0x30] sm:$0xff pattern:$0x73625140] }
 0x289   :  { %v8600_v32 = vpop.f32.mrf.mxu0  ;;  %11365 = vst [vmem:[#allocation57_spill] sm:$0xff] %v8610_v62 }
 0x28c   :  { %v960_v57 = vpop.permute.xlu0 %959 }
 0x28d   :  { %v1282_v23 = vpop.permute.xlu1 %1281  ;;  %v2200_v25 = vld.sshfl [vmem:[#allocation1] sm:$0xff pattern:$0x73625140] }
 0x28e   :  { %v1570_v1 = vsel %vm1415_vm2, %v1530_v49, %v1282_v23  ;;  %v8591_v35 = vand.u32 4294901760, %v2200_v25 }
 0x28f   :  { %v1764_v52 = vrot.slane %v1570_v1, 6  ;;  %3046 = vmatmul.f32.gmra.mxu0 %v7836_v45  ;;  %v8606_v45 = vpop.f32.mrf.mxu1 }
 0x290   :  { %3168 = vmatmul.f32.gmra.mxu1 %v7838_v44  ;;  %2650 = vmatmul.f32.gmra.mxu3 %v8591_v35  ;;  %v8598_v46 = vsub.f32 %v2200_v25, %v8591_v35  ;;  %11364 = vst [vmem:[#allocation56_spill] sm:$0xff] %v8606_v45  ;;  %v8617_v45 = vld.sshfl [vmem:[#allocation1 + $0x8] sm:$0xff pattern:$0x73625140] }
 0x291   :  { %v2003_v24 = vsel %vm1776_vm3, %v1450_v29, %v1764_v52  ;;  %v2005_v42 = vsel %vm1780_vm4, %v1450_v29, %v1764_v52  ;;  %v2008_v36 = vsel %vm1785_vm5, %v1450_v29, %v1764_v52  ;;  %v2011_v19 = vsel %vm1789_vm6, %v1764_v52, %v1450_v29 }
 0x292   :  { %v2004_v51 = vsel %vm1778_vm7, %v2003_v24, %v1765_v9  ;;  %v2006_v34 = vsel %vm1782_vm8, %v2005_v42, %v1765_v9  ;;  %v2009_v56 = vsel %vm1778_vm7, %v1765_v9, %v2008_v36  ;;  %v2012_v49 = vsel %vm1782_vm8, %v1765_v9, %v2011_v19  ;;  %v8622_v42 = vld.sshfl [vmem:[#allocation1 + $0x10] sm:$0xff pattern:$0x73625140]  ;;  %v486_v36 = vpop.permute.xlu2 %485  ;;  %v6158_v19 = vld [vmem:[%s11076_s0 + $0x139] sm:$0x3] }
 0x293   :  { %v2007_v23 = vrot.slane %v2006_v34, 2  ;;  %v2010_v25 = vrot.slane %v2009_v56, 4  ;;  %v2013_v1 = vrot.slane %v2012_v49, 6  ;;  %2197 = vst [vmem:[#allocation1 + $0x21] ss:$4 sm:$0xff] %v2004_v51  ;;  %v11125_v52 = vand.u32 4294901760, %v8598_v46  ;;  %v8629_v51 = vpop.f32.mrf.mxu0 }
 0x294   :  { %v1120_v29 = vpop.permute.xlu0 %1119  ;;  %11366 = vst [vmem:[#allocation58_spill] sm:$0xff] %v8622_v42  ;;  %v44_v34 = vld [vmem:[%s11076_s0 + $0x128] sm:$0x3]  ;;  %v6318_v56 = vld [vmem:[%s11076_s0 + $0x14a] sm:$0x3] }
 0x295   :  { %2198 = vst [vmem:[#allocation1 + $0x22] ss:$4 sm:$0xff] %v2007_v23  ;;  %v480_v47 = vpop.permute.xlu1 %479  ;;  %v2510_v24 = vsub.f32 %v8598_v46, %v11125_v52 }
 0x296   :  { %2199 = vst [vmem:[#allocation1 + $0x23] ss:$4 sm:$0xff] %v2010_v25 }
 0x297   :  { %2206 = vst [vmem:[#allocation1] ss:$4 sm:$0xff] %v2013_v1  ;;  %3050 = vmatmul.f32.gmra.mxu0 %v7838_v44  ;;  %v2511_v9 = vand.u32 4294901760, %v2510_v24  ;;  %v1489_v44 = vsel %vm1333_vm0, %v6158_v19, %v960_v57  ;;  %v8638_v49 = vpop.f32.mrf.mxu1  ;;  %v1367_v1 = vsel %vm1333_vm0, %v44_v34, %v480_v47 }
 0x298   :  { %3172 = vmatmul.f32.gmra.mxu1 %v8007_v26  ;;  %11367 = vst [vmem:[#allocation59_spill] sm:$0xff] %v8629_v51  ;;  %v1529_v23 = vsel %vm1374_vm1, %v1489_v44, %v1120_v29 }
 0x299   :  { %2512 = vmatmul.f32.gmra.mxu2 %v2511_v9  ;;  %11368 = vst [vmem:[#allocation60_spill] sm:$0xff] %v8638_v49  ;;  %v1763_v9 = vrot.slane %v6318_v56, 4 }
 0x29a   :  { %v646_v19 = vpop.permute.xlu2 %645 }
 0x29b   :  { %v8649_v47 = vpop.f32.mrf.mxu0 }
 0x29c   :  { %v1280_v25 = vpop.permute.xlu0 %1279 }
 0x29d   :  { %v1569_v24 = vsel %vm1415_vm2, %v1529_v23, %v1280_v25  ;;  %v640_v52 = vpop.permute.xlu1 %639 }
 0x29e   :  { %v1762_v42 = vrot.slane %v1569_v24, 6  ;;  %v1408_v62 = vsel %vm1374_vm1, %v1367_v1, %v640_v52 }
 0x29f   :  { %v1449_v51 = vsel %vm1415_vm2, %v1408_v62, %v800_v28  ;;  %3054 = vmatmul.f32.gmra.mxu0 %v8007_v26  ;;  %v1370_v26 = vsel %vm1333_vm0, %v8028_v59, %v486_v36 }
 0x2a0   :  { %v2001_v57 = vsel %vm1776_vm3, %v1449_v51, %v1762_v42  ;;  %3176 = vmatmul.f32.gmra.mxu1 %v8009_v61  ;;  %v1411_v25 = vsel %vm1374_vm1, %v1370_v26, %v646_v19 }
 0x2a1   :  { %v2002_v29 = vsel %vm1778_vm7, %v2001_v57, %v1763_v9 }
 0x2a2   :  { %2196 = vst [vmem:[#allocation1 + $0x20] ss:$4 sm:$0xff] %v2002_v29  ;;  %v806_v52 = vpop.permute.xlu2 %805 }
 0x2a3   :  { %v1452_v29 = vsel %vm1415_vm2, %v1411_v25, %v806_v52 }
 0x2a4   :  { %v8651_v34 = vpop.f32.mrf.mxu1  ;;  %v966_v56 = vpop.permute.xlu0 %965 }
 0x2a5   :  { %11369 = vst [vmem:[#allocation61_spill] sm:$0xff] %v8651_v34  ;;  %v1126_v44 = vpop.permute.xlu1 %1125  ;;  %v1492_v62 = vsel %vm1333_vm0, %v8137_v53, %v966_v56  ;;  %v1769_v53 = vrot.slane %v8358_v40, 4 }
 0x2a6   :  { %v1532_v1 = vsel %vm1374_vm1, %v1492_v62, %v1126_v44 }
 0x2a7   :  { %3058 = vmatmul.f32.gmra.mxu0 %v8009_v61 }
 0x2a8   :  { %3180 = vmatmul.f32.gmra.mxu1 %v8182_v12 }
 0x2a9   :  { %v2203_v28 = vld.sshfl [vmem:[#allocation1 + $0x20] sm:$0xff pattern:$0x73625140] }
 0x2aa   :  { %v8659_v42 = vand.u32 4294901760, %v2203_v28  ;;  %v804_v25 = vpop.permute.xlu2 %803 }
 0x2ac   :  { %v8661_v51 = vpop.f32.mrf.mxu0  ;;  %v8663_v23 = vpop.f32.mrf.mxu1  ;;  %2654 = vmatmul.f32.gmra.mxu3 %v8659_v42  ;;  %v8667_v61 = vsub.f32 %v2203_v28, %v8659_v42 }
 0x2ad   :  { %11370 = vst [vmem:[#allocation62_spill] sm:$0xff] %v8661_v51  ;;  %v964_v59 = vpop.permute.xlu0 %963  ;;  %v1286_v36 = vpop.permute.xlu1 %1285 }
 0x2ae   :  { %11371 = vst [vmem:[#allocation63_spill] sm:$0xff] %v8663_v23  ;;  %v1572_v24 = vsel %vm1415_vm2, %v1532_v1, %v1286_v36  ;;  %v11126_v9 = vand.u32 4294901760, %v8667_v61  ;;  %v8688_v23 = vld.sshfl [vmem:[#allocation1 + $0x28] sm:$0xff pattern:$0x73625140] }
 0x2af   :  { %v1768_v57 = vrot.slane %v1572_v24, 6  ;;  %3062 = vmatmul.f32.gmra.mxu0 %v8182_v12 }
 0x2b0   :  { %3184 = vmatmul.f32.gmra.mxu1 %v8212_v21  ;;  %v2518_v19 = vsub.f32 %v8667_v61, %v11126_v9 }
 0x2b1   :  { %v2016_v56 = vsel %vm1776_vm3, %v1452_v29, %v1768_v57  ;;  %v2018_v44 = vsel %vm1780_vm4, %v1452_v29, %v1768_v57  ;;  %v2021_v40 = vsel %vm1785_vm5, %v1452_v29, %v1768_v57  ;;  %v2024_v28 = vsel %vm1789_vm6, %v1768_v57, %v1452_v29  ;;  %v8692_v57 = vld.sshfl [vmem:[#allocation1 + $0x30] sm:$0xff pattern:$0x73625140] }
 0x2b2   :  { %v2017_v26 = vsel %vm1778_vm7, %v2016_v56, %v1769_v53  ;;  %v2019_v12 = vsel %vm1782_vm8, %v2018_v44, %v1769_v53  ;;  %v2022_v62 = vsel %vm1778_vm7, %v1769_v53, %v2021_v40  ;;  %v2025_v52 = vsel %vm1782_vm8, %v1769_v53, %v2024_v28  ;;  %11373 = vst [vmem:[#allocation65_spill] sm:$0xff] %v8692_v57  ;;  %v6160_v53 = vld [vmem:[%s11076_s0 + $0x149] sm:$0x3]  ;;  %v6320_v40 = vld [vmem:[%s11076_s0 + $0x15a] sm:$0x3] }
 0x2b3   :  { %v2020_v1 = vrot.slane %v2019_v12, 2  ;;  %v2023_v36 = vrot.slane %v2022_v62, 4  ;;  %v2026_v24 = vrot.slane %v2025_v52, 6  ;;  %2208 = vst [vmem:[#allocation1 + $0x2] ss:$4 sm:$0xff] %v2017_v26  ;;  %v2519_v9 = vand.u32 4294901760, %v2518_v19  ;;  %v1128_v26 = vpop.permute.xlu2 %1127 }
 0x2b4   :  { %v8690_v34 = vpop.f32.mrf.mxu0  ;;  %v8694_v29 = vpop.f32.mrf.mxu1  ;;  %v46_v19 = vld [vmem:[%s11076_s0 + $0x138] sm:$0x3] }
 0x2b5   :  { %11372 = vst [vmem:[#allocation64_spill] sm:$0xff] %v8690_v34  ;;  %v1124_v56 = vpop.permute.xlu0 %1123  ;;  %2520 = vmatmul.f32.gmra.mxu2 %v2519_v9  ;;  %v484_v44 = vpop.permute.xlu1 %483  ;;  %v1491_v9 = vsel %vm1333_vm0, %v6160_v53, %v964_v59 }
 0x2b6   :  { %2209 = vst [vmem:[#allocation1 + $0x3] ss:$4 sm:$0xff] %v2020_v1  ;;  %v1369_v52 = vsel %vm1333_vm0, %v46_v19, %v484_v44 }
 0x2b7   :  { %11374 = vst [vmem:[#allocation66_spill] sm:$0xff] %v8694_v29  ;;  %3066 = vmatmul.f32.gmra.mxu0 %v8212_v21  ;;  %v1531_v21 = vsel %vm1374_vm1, %v1491_v9, %v1124_v56 }
 0x2b8   :  { %2210 = vst [vmem:[#allocation1 + $0x20] ss:$4 sm:$0xff] %v2023_v36  ;;  %3188 = vmatmul.f32.gmra.mxu1 %v8339_v0  ;;  %v1767_v36 = vrot.slane %v6320_v40, 4 }
 0x2b9   :  { %2211 = vst [vmem:[#allocation1 + $0x21] ss:$4 sm:$0xff] %v2026_v24 }
 0x2bc   :  { %v8708_v28 = vpop.f32.mrf.mxu0  ;;  %v8711_v12 = vpop.f32.mrf.mxu1 }
 0x2bd   :  { %11375 = vst [vmem:[#allocation67_spill] sm:$0xff] %v8708_v28  ;;  %v1284_v62 = vpop.permute.xlu0 %1283  ;;  %v644_v24 = vpop.permute.xlu1 %643 }
 0x2be   :  { %11376 = vst [vmem:[#allocation68_spill] sm:$0xff] %v8711_v12  ;;  %v1571_v1 = vsel %vm1415_vm2, %v1531_v21, %v1284_v62  ;;  %v1410_v29 = vsel %vm1374_vm1, %v1369_v52, %v644_v24  ;;  %v490_v21 = vpop.permute.xlu2 %489 }
 0x2bf   :  { %v1766_v57 = vrot.slane %v1571_v1, 6  ;;  %3070 = vmatmul.f32.gmra.mxu0 %v8339_v0  ;;  %v1451_v59 = vsel %vm1415_vm2, %v1410_v29, %v804_v25 }
 0x2c0   :  { %3192 = vmatmul.f32.gmra.mxu1 %v8486_v4 }
 0x2c1   :  { %v2014_v56 = vsel %vm1776_vm3, %v1451_v59, %v1766_v57 }
 0x2c2   :  { %v2015_v53 = vsel %vm1778_vm7, %v2014_v56, %v1767_v36  ;;  %v6162_v56 = vld [vmem:[%s11076_s0 + $0x159] sm:$0x3] }
 0x2c3   :  { %2207 = vst [vmem:[#allocation1 + $0x1] ss:$4 sm:$0xff] %v2015_v53 }
 0x2c4   :  { %v8721_v9 = vpop.f32.mrf.mxu0  ;;  %v8723_v44 = vpop.f32.mrf.mxu1 }
 0x2c5   :  { %11377 = vst [vmem:[#allocation69_spill] sm:$0xff] %v8721_v9  ;;  %v968_v19 = vpop.permute.xlu0 %967  ;;  %v970_v40 = vpop.permute.xlu1 %969 }
 0x2c6   :  { %11378 = vst [vmem:[#allocation70_spill] sm:$0xff] %v8723_v44  ;;  %v648_v36 = vpop.permute.xlu2 %647  ;;  %v1493_v44 = vsel %vm1333_vm0, %v6162_v56, %v968_v19  ;;  %v6323_v56 = vld [vmem:[%s11076_s0 + $0x172] sm:$0xff] }
 0x2c7   :  { %3074 = vmatmul.f32.gmra.mxu0 %v8486_v4  ;;  %v1533_v19 = vsel %vm1374_vm1, %v1493_v44, %v1128_v26  ;;  %v1773_v9 = vrot.slane %v6323_v56, 4  ;;  %v2043_v56 = vld [vmem:[%s11077_s1 + $0x8] sm:$0xff] }
 0x2c8   :  { %3196 = vmatmul.f32.gmra.mxu1 %v8538_v33 }
 0x2ca   :  { %v2214_v0 = vld.sshfl [vmem:[#allocation1] sm:$0xff pattern:$0x73625140] }
 0x2cb   :  { %v8727_v25 = vand.u32 4294901760, %v2214_v0 }
 0x2cc   :  { %v8729_v29 = vpop.f32.mrf.mxu0  ;;  %v8731_v57 = vpop.f32.mrf.mxu1 }
 0x2cd   :  { %11379 = vst [vmem:[#allocation71_spill] sm:$0xff] %v8729_v29  ;;  %v1130_v62 = vpop.permute.xlu0 %1129  ;;  %2658 = vmatmul.f32.gmra.mxu3 %v8727_v25  ;;  %v8735_v52 = vsub.f32 %v2214_v0, %v8727_v25  ;;  %v488_v1 = vpop.permute.xlu1 %487  ;;  %v1494_v29 = vsel %vm1333_vm0, %v8281_v22, %v970_v40 }
 0x2ce   :  { %11380 = vst [vmem:[#allocation72_spill] sm:$0xff] %v8731_v57 }
 0x2cf   :  { %3078 = vmatmul.f32.gmra.mxu0 %v8538_v33  ;;  %v11127_v4 = vand.u32 4294901760, %v8735_v52 }
 0x2d0   :  { %3200 = vmatmul.f32.gmra.mxu1 %v8591_v35 }
 0x2d1   :  { %v2526_v24 = vsub.f32 %v8735_v52, %v11127_v4  ;;  %v48_v4 = vld [vmem:[%s11076_s0 + $0x148] sm:$0x3] }
 0x2d3   :  { %v2527_v59 = vand.u32 4294901760, %v2526_v24  ;;  %v810_v24 = vpop.permute.xlu2 %809 }
 0x2d4   :  { %v8746_v53 = vpop.f32.mrf.mxu0  ;;  %v8748_v0 = vpop.f32.mrf.mxu1 }
 0x2d5   :  { %11381 = vst [vmem:[#allocation73_spill] sm:$0xff] %v8746_v53  ;;  %v1288_v57 = vpop.permute.xlu0 %1287  ;;  %2528 = vmatmul.f32.gmra.mxu2 %v2527_v59  ;;  %v1290_v33 = vpop.permute.xlu1 %1289  ;;  %v1534_v59 = vsel %vm1374_vm1, %v1494_v29, %v1130_v62  ;;  %v1371_v53 = vsel %vm1333_vm0, %v48_v4, %v488_v1 }
 0x2d6   :  { %11382 = vst [vmem:[#allocation74_spill] sm:$0xff] %v8748_v0  ;;  %v49_v0 = vld [vmem:[%s11076_s0 + $0x150] sm:$0xff]  ;;  %v1573_v22 = vsel %vm1415_vm2, %v1533_v19, %v1288_v57  ;;  %v1574_v40 = vsel %vm1415_vm2, %v1534_v59, %v1290_v33  ;;  %v1412_v28 = vsel %vm1374_vm1, %v1371_v53, %v648_v36  ;;  %v8787_v53 = vld.sshfl [vmem:[#allocation1 + $0x8] sm:$0xff pattern:$0x73625140] }
 0x2d7   :  { %3082 = vmatmul.f32.gmra.mxu0 %v8591_v35  ;;  %v6322_v35 = vld [vmem:[%s11076_s0 + $0x16a] sm:$0x3]  ;;  %v1372_v29 = vsel %vm1333_vm0, %v49_v0, %v490_v21  ;;  %v1770_v34 = vrot.slane %v1573_v22, 6  ;;  %v1772_v51 = vrot.slane %v1574_v40, 6 }
 0x2d8   :  { %3204 = vmatmul.f32.gmra.mxu1 %v8659_v42  ;;  %v1771_v44 = vrot.slane %v6322_v35, 4  ;;  %v8797_v22 = vld.sshfl [vmem:[#allocation1 + $0x10] sm:$0xff pattern:$0x73625140] }
 0x2d9   :  { %11385 = vst [vmem:[#allocation77_spill] sm:$0xff] %v8797_v22 }
 0x2db   :  { %v492_v35 = vpop.permute.xlu2 %491 }
 0x2dc   :  { %v8772_v12 = vpop.f32.mrf.mxu0 }
 0x2dd   :  { %11383 = vst [vmem:[#allocation75_spill] sm:$0xff] %v8772_v12  ;;  %v8775_v62 = vpop.f32.mrf.mxu1  ;;  %v650_v26 = vpop.permute.xlu0 %649 }
 0x2de   :  { %11384 = vst [vmem:[#allocation76_spill] sm:$0xff] %v8775_v62  ;;  %v1413_v49 = vsel %vm1374_vm1, %v1372_v29, %v650_v26  ;;  %v808_v1 = vpop.permute.xlu1 %807  ;;  %v8800_v29 = vand.u32 4294901760, %v2043_v56 }
 0x2df   :  { %v1453_v57 = vsel %vm1415_vm2, %v1412_v28, %v808_v1  ;;  %3086 = vmatmul.f32.gmra.mxu0 %v8659_v42  ;;  %v1454_v4 = vsel %vm1415_vm2, %v1413_v49, %v810_v24 }
 0x2e0   :  { %v2027_v21 = vsel %vm1776_vm3, %v1453_v57, %v1770_v34  ;;  %3208 = vmatmul.f32.gmra.mxu1 %v8727_v25  ;;  %v2029_v0 = vsel %vm1776_vm3, %v1454_v4, %v1772_v51  ;;  %v2031_v33 = vsel %vm1780_vm4, %v1454_v4, %v1772_v51  ;;  %v2034_v36 = vsel %vm1785_vm5, %v1454_v4, %v1772_v51 }
 0x2e1   :  { %v2028_v59 = vsel %vm1778_vm7, %v2027_v21, %v1771_v44  ;;  %v2030_v28 = vsel %vm1778_vm7, %v2029_v0, %v1773_v9  ;;  %v2032_v42 = vsel %vm1782_vm8, %v2031_v33, %v1773_v9  ;;  %v2035_v49 = vsel %vm1778_vm7, %v1773_v9, %v2034_v36  ;;  %3720 = vmatpush.xpose.msra.mxu1 %v8800_v29  ;;  %v50_v33 = vld [vmem:[%s11076_s0 + $0x158] sm:$0x3] }
 0x2e2   :  { %2212 = vst [vmem:[#allocation1 + $0x22] ss:$4 sm:$0xff] %v2028_v59  ;;  %v2033_v34 = vrot.slane %v2032_v42, 2  ;;  %v2036_v24 = vrot.slane %v2035_v49, 4  ;;  %v2037_v19 = vsel %vm1789_vm6, %v1772_v51, %v1454_v4  ;;  %v8807_v57 = vsub.f32 %v2043_v56, %v8800_v29  ;;  %3236 = vmatpush.xpose.msra.mxu2 %v8800_v29  ;;  %v6164_v4 = vld [vmem:[%s11076_s0 + $0x169] sm:$0x3] }
 0x2e3   :  { %v2038_v40 = vsel %vm1782_vm8, %v1773_v9, %v2037_v19  ;;  %2213 = vst [vmem:[#allocation1 + $0x23] ss:$4 sm:$0xff] %v2030_v28  ;;  %v6324_v59 = vld [vmem:[%s11076_s0 + $0x17a] sm:$0x3]  ;;  %v812_v42 = vpop.permute.xlu2 %811  ;;  %v1373_v19 = vsel %vm1333_vm0, %v50_v33, %v492_v35  ;;  %vm5589_vm4 = vcmask 195584   ;;  %vm5598_vm5 = vcmask 326656  }
 0x2e4   :  { %v2039_v26 = vrot.slane %v2038_v40, 6  ;;  %2220 = vst [vmem:[#allocation1] ss:$4 sm:$0xff] %v2033_v34  ;;  %v8802_v44 = vpop.f32.mrf.mxu0  ;;  %3577 = vmatpush.xpose.msra.mxu0 %v8807_v57  ;;  %vm5603_vm8 = vcmask 392192  }
 0x2e5   :  { %11386 = vst [vmem:[#allocation78_spill] sm:$0xff] %v8802_v44  ;;  %v8804_v1 = vpop.f32.mrf.mxu1  ;;  %v972_v51 = vpop.permute.xlu0 %971 }
 0x2e6   :  { %2221 = vst [vmem:[#allocation1 + $0x1] ss:$4 sm:$0xff] %v2036_v24  ;;  %v1132_v9 = vpop.permute.xlu1 %1131  ;;  %v1495_v21 = vsel %vm1333_vm0, %v6164_v4, %v972_v51  ;;  %v3455_v51 = vand.u32 4294901760, %v8807_v57 }
 0x2e7   :  { %11387 = vst [vmem:[#allocation79_spill] sm:$0xff] %v8804_v1  ;;  %3090 = vmatmul.f32.gmra.mxu0 %v8727_v25  ;;  %v1535_v49 = vsel %vm1374_vm1, %v1495_v21, %v1132_v9 }
 0x2e8   :  { %2222 = vst [vmem:[#allocation1 + $0x2] ss:$4 sm:$0xff] %v2039_v26  ;;  %v1775_v26 = vrot.slane %v6324_v59, 4 }
 0x2ea   :  { %v2217_v0 = vld.sshfl [vmem:[#allocation1 + $0x20] sm:$0xff pattern:$0x73625140] }
 0x2eb   :  { %v2531_v36 = vand.u32 4294901760, %v2217_v0 }
 0x2ec   :  { %v8823_v28 = vpop.f32.mrf.mxu0 }
 0x2ed   :  { %11388 = vst [vmem:[#allocation80_spill] sm:$0xff] %v8823_v28  ;;  %v8826_v25 = vpop.f32.mrf.mxu1  ;;  %2662 = vmatmul.f32.gmra.mxu3 %v2531_v36  ;;  %3212 = vmatmul.f32.gmra.mxu1 %v2531_v36  ;;  %v1292_v34 = vpop.permute.xlu0 %1291  ;;  %v8828_v24 = vsub.f32 %v2217_v0, %v2531_v36 }
 0x2ee   :  { %11389 = vst [vmem:[#allocation81_spill] sm:$0xff] %v8826_v25  ;;  %v1575_v56 = vsel %vm1415_vm2, %v1535_v49, %v1292_v34  ;;  %v652_v40 = vpop.permute.xlu1 %651  ;;  %v3456_v25 = vsub.f32 %v8807_v57, %v3455_v51 }
 0x2ef   :  { %v1774_v4 = vrot.slane %v1575_v56, 6  ;;  %v1414_v1 = vsel %vm1374_vm1, %v1373_v19, %v652_v40  ;;  %3094 = vmatmul.f32.gmra.mxu0 %v2531_v36  ;;  %v11131_v9 = vand.u32 4294901760, %v8828_v24  ;;  %v8849_v19 = vand.u32 4294901760, %v6710_v58 }
 0x2f0   :  { %v1455_v21 = vsel %vm1415_vm2, %v1414_v1, %v812_v42  ;;  %v3457_v59 = vand.u32 4294901760, %v3456_v25  ;;  %vm5579_vm2 = vcmask 64512  }
 0x2f1   :  { %v2040_v0 = vsel %vm1776_vm3, %v1455_v21, %v1774_v4  ;;  %v2534_v35 = vsub.f32 %v8828_v24, %v11131_v9  ;;  %v8921_v9 = vand.u32 4294901760, %v7120_v7  ;;  %vm5584_vm3 = vcmask 130048  }
 0x2f2   :  { %v2041_v33 = vsel %vm1778_vm7, %v2040_v0, %v1775_v26  ;;  %3458 = vmatpush.xpose.msra.mxu3 %v3457_v59  ;;  %v8858_v26 = vsub.f32 %v6710_v58, %v8849_v19 }
 0x2f3   :  { %2223 = vst [vmem:[#allocation1 + $0x3] ss:$4 sm:$0xff] %v2041_v33  ;;  %v2535_v49 = vand.u32 4294901760, %v2534_v35  ;;  %v8867_v33 = vand.u32 4294901760, %v6866_v60 }
 0x2f4   :  { %v8842_v34 = vpop.f32.mrf.mxu0  ;;  %v11128_v35 = vand.u32 4294901760, %v8858_v26 }
 0x2f5   :  { %11390 = vst [vmem:[#allocation82_spill] sm:$0xff] %v8842_v34  ;;  %v8844_v36 = vpop.f32.mrf.mxu1  ;;  %2536 = vmatmul.f32.gmra.mxu2 %v2535_v49  ;;  %v11396_v49 = vand.u32 4294901760, %v6660_v37  ;;  %v8879_v58 = vsub.f32 %v6866_v60, %v8867_v33 }
 0x2f6   :  { %11391 = vst [vmem:[#allocation83_spill] sm:$0xff] %v8844_v36 }
 0x2fa   :  { %v2224_v1 = vld.sshfl [vmem:[#allocation1] sm:$0xff pattern:$0x73625140] }
 0x2fb   :  { %v2539_v42 = vand.u32 4294901760, %v2224_v1 }
 0x2fc   :  { %v8846_v57 = vpop.f32.mrf.mxu0 }
 0x2fd   :  { %11392 = vst [vmem:[#allocation84_spill] sm:$0xff] %v8846_v57  ;;  %v8851_v56 = vpop.f32.mrf.mxu1  ;;  %2666 = vmatmul.f32.gmra.mxu3 %v2539_v42  ;;  %3098 = vmatmul.f32.gmra.mxu0 %v2539_v42  ;;  %v8853_v25 = vsub.f32 %v2224_v1, %v2539_v42  ;;  %v11429_v57 = vld [vmem:[#allocation19_spill] sm:$0xff] }
 0x2fe   :  { %11393 = vst [vmem:[#allocation85_spill] sm:$0xff] %v8851_v56  ;;  %3216 = vmatmul.f32.gmra.mxu1 %v2539_v42  ;;  %v11130_v42 = vand.u32 4294901760, %v8879_v58  ;;  %v11424_v56 = vld [vmem:[#allocation21_spill] sm:$0xff]  ;;  %v9033_v34 = vand.u32 4294901760, %v11429_v57 }
 0x2ff   :  { %v11129_v40 = vand.u32 4294901760, %v8853_v25 }
 0x300   :  { %11430 = vst [vmem:[#allocation19_spill] sm:$0xff] %v9033_v34  ;;  %v9049_v62 = vsub.f32 %v11429_v57, %v9033_v34  ;;  %v11445_v34 = vld [vmem:[#allocation27_spill] sm:$0xff] }
 0x301   :  { %v2542_v4 = vsub.f32 %v8853_v25, %v11129_v40  ;;  %v8903_v40 = vand.u32 4294901760, %v7148_v30 }
 0x302   :  { %11435 = vst [vmem:[#allocation99_spill] sm:$0xff] %v9049_v62 }
 0x303   :  { %v2543_v21 = vand.u32 4294901760, %v2542_v4  ;;  %v8885_v4 = vand.u32 4294901760, %v6940_v54 }
 0x304   :  { %v8863_v0 = vpop.f32.mrf.mxu0 }
 0x305   :  { %11394 = vst [vmem:[#allocation86_spill] sm:$0xff] %v8863_v0  ;;  %v8869_v59 = vpop.f32.mrf.mxu1  ;;  %2544 = vmatmul.f32.gmra.mxu2 %v2543_v21  ;;  %2834 = vmatmul.f32.vlgmr.msrb.gmra.mxu3 %v11396_v49  ;;  %v11399_v49 = vand.u32 4294901760, %v6888_v16  ;;  %v8897_v60 = vsub.f32 %v6940_v54, %v8885_v4  ;;  %v8915_v54 = vsub.f32 %v7148_v30, %v8903_v40  ;;  %v9013_v0 = vand.u32 4294901760, %v11424_v56 }
 0x306   :  { %11395 = vst [vmem:[#allocation87_spill] sm:$0xff] %v8869_v59  ;;  %3580 = vmatmul.f32.vlgmr.msra.gmra.mxu0 %v8858_v26  ;;  %3724 = vmatmul.f32.vlgmr.msra.gmra.mxu1 %v11128_v35  ;;  %v8933_v30 = vsub.f32 %v7120_v7, %v8921_v9  ;;  %v11419_v59 = vld [vmem:[#allocation15_spill] sm:$0xff] }
 0x307   :  { %4008 = vmatpush.xpose.msrb.mxu3 %v8800_v29  ;;  %v11132_v35 = vand.u32 4294901760, %v8897_v60 }
 0x30c   :  { %v8881_v1 = vpop.f32.mrf.mxu0 }
 0x30d   :  { %11397 = vst [vmem:[#allocation88_spill] sm:$0xff] %v8881_v1  ;;  %v8887_v21 = vpop.f32.mrf.mxu1  ;;  %2690 = vmatmul.f32.vlgmr.msrb.gmra.mxu2 %v6660_v37  ;;  %2840 = vmatmul.f32.gmra.mxu3 %v11399_v49  ;;  %v11402_v49 = vand.u32 4294901760, %v6891_v5 }
 0x30e   :  { %11398 = vst [vmem:[#allocation89_spill] sm:$0xff] %v8887_v21  ;;  %3585 = vmatmul.f32.gmra.mxu0 %v8879_v58  ;;  %3730 = vmatmul.f32.gmra.mxu1 %v11130_v42  ;;  %v11133_v42 = vand.u32 4294901760, %v8915_v54  ;;  %v11414_v21 = vld [vmem:[#allocation11_spill] sm:$0xff] }
 0x30f   :  { %3890 = vmatpush.xpose.msrb.mxu2 %v3455_v51 }
 0x314   :  { %v8899_v29 = vpop.f32.mrf.mxu0 }
 0x315   :  { %11400 = vst [vmem:[#allocation90_spill] sm:$0xff] %v8899_v29  ;;  %v8905_v37 = vpop.f32.mrf.mxu1  ;;  %2695 = vmatmul.f32.gmra.mxu2 %v6888_v16  ;;  %2846 = vmatmul.f32.gmra.mxu3 %v11402_v49  ;;  %v11405_v49 = vand.u32 4294901760, %v7048_v39 }
 0x316   :  { %11401 = vst [vmem:[#allocation91_spill] sm:$0xff] %v8905_v37  ;;  %3590 = vmatmul.f32.gmra.mxu0 %v8897_v60  ;;  %3736 = vmatmul.f32.gmra.mxu1 %v11132_v35  ;;  %v11134_v37 = vand.u32 4294901760, %v8933_v30 }
 0x31c   :  { %v8917_v51 = vpop.f32.mrf.mxu0 }
 0x31d   :  { %11403 = vst [vmem:[#allocation92_spill] sm:$0xff] %v8917_v51  ;;  %v8923_v16 = vpop.f32.mrf.mxu1  ;;  %2700 = vmatmul.f32.gmra.mxu2 %v6891_v5  ;;  %2852 = vmatmul.f32.gmra.mxu3 %v11405_v49  ;;  %v11408_v49 = vand.u32 4294901760, %v7055_v27 }
 0x31e   :  { %11404 = vst [vmem:[#allocation93_spill] sm:$0xff] %v8923_v16  ;;  %3595 = vmatmul.f32.gmra.mxu0 %v8915_v54  ;;  %3742 = vmatmul.f32.gmra.mxu1 %v11133_v42  ;;  %v8939_v16 = vand.u32 4294901760, %v7207_v55 }
 0x320   :  { %v8951_v7 = vsub.f32 %v7207_v55, %v8939_v16 }
 0x324   :  { %v8935_v35 = vpop.f32.mrf.mxu0 }
 0x325   :  { %11406 = vst [vmem:[#allocation94_spill] sm:$0xff] %v8935_v35  ;;  %v8941_v5 = vpop.f32.mrf.mxu1  ;;  %2705 = vmatmul.f32.gmra.mxu2 %v7048_v39  ;;  %2858 = vmatmul.f32.gmra.mxu3 %v11408_v49  ;;  %v11135_v35 = vand.u32 4294901760, %v8951_v7  ;;  %v11410_v39 = vld [vmem:[#allocation8_spill] sm:$0xff] }
 0x326   :  { %11407 = vst [vmem:[#allocation95_spill] sm:$0xff] %v8941_v5  ;;  %3600 = vmatmul.f32.gmra.mxu0 %v8933_v30  ;;  %3748 = vmatmul.f32.gmra.mxu1 %v11134_v37  ;;  %v8957_v5 = vand.u32 4294901760, %v7289_v31  ;;  %v11411_v49 = vand.u32 4294901760, %v11410_v39 }
 0x328   :  { %v8969_v55 = vsub.f32 %v7289_v31, %v8957_v5 }
 0x32a   :  { %v11136_v51 = vand.u32 4294901760, %v8969_v55 }
 0x32c   :  { %v8953_v42 = vpop.f32.mrf.mxu0 }
 0x32d   :  { %11409 = vst [vmem:[#allocation96_spill] sm:$0xff] %v8953_v42  ;;  %2710 = vmatmul.f32.gmra.mxu2 %v7055_v27  ;;  %2864 = vmatmul.f32.gmra.mxu3 %v11411_v49  ;;  %v8965_v37 = vpop.f32.mrf.mxu1  ;;  %v8975_v27 = vand.u32 4294901760, %v11414_v21  ;;  %v11415_v49 = vld [vmem:[#allocation9_spill] sm:$0xff] }
 0x32e   :  { %3605 = vmatmul.f32.gmra.mxu0 %v8951_v7  ;;  %3754 = vmatmul.f32.gmra.mxu1 %v11135_v35  ;;  %11412 = vst [vmem:[#allocation8_spill] sm:$0xff] %v8965_v37  ;;  %v11416_v29 = vand.u32 4294901760, %v11415_v49 }
 0x32f   :  { %v8985_v31 = vsub.f32 %v11414_v21, %v8975_v27  ;;  %v9001_v21 = vpop.f32.mrf.mxu3 }
 0x334   :  { %v8971_v42 = vpop.f32.mrf.mxu0 }
 0x335   :  { %11413 = vst [vmem:[#allocation97_spill] sm:$0xff] %v8971_v42  ;;  %2715 = vmatmul.f32.gmra.mxu2 %v11410_v39  ;;  %2870 = vmatmul.f32.gmra.mxu3 %v11416_v29  ;;  %v8987_v35 = vpop.f32.mrf.mxu1  ;;  %v11137_v42 = vand.u32 4294901760, %v8985_v31  ;;  %v8993_v39 = vand.u32 4294901760, %v11419_v59  ;;  %v11420_v29 = vld [vmem:[#allocation13_spill] sm:$0xff] }
 0x336   :  { %3610 = vmatmul.f32.gmra.mxu0 %v8969_v55  ;;  %3760 = vmatmul.f32.gmra.mxu1 %v11136_v51  ;;  %11417 = vst [vmem:[#allocation11_spill] sm:$0xff] %v8987_v35  ;;  %v11421_v1 = vand.u32 4294901760, %v11420_v29 }
 0x337   :  { %v9005_v51 = vsub.f32 %v11419_v59, %v8993_v39  ;;  %v9021_v59 = vpop.f32.mrf.mxu2 }
 0x33c   :  { %v8989_v37 = vpop.f32.mrf.mxu0 }
 0x33d   :  { %11418 = vst [vmem:[#allocation9_spill] sm:$0xff] %v8989_v37  ;;  %2720 = vmatmul.f32.gmra.mxu2 %v11415_v49  ;;  %2876 = vmatmul.f32.gmra.mxu3 %v11421_v1  ;;  %v9007_v35 = vpop.f32.mrf.mxu1  ;;  %v11138_v49 = vand.u32 4294901760, %v9005_v51  ;;  %v11425_v1 = vld [vmem:[#allocation14_spill] sm:$0xff] }
 0x33e   :  { %3615 = vmatmul.f32.gmra.mxu0 %v8985_v31  ;;  %3766 = vmatmul.f32.gmra.mxu1 %v11137_v42  ;;  %11422 = vst [vmem:[#allocation15_spill] sm:$0xff] %v9007_v35  ;;  %v11426_v36 = vand.u32 4294901760, %v11425_v1  ;;  %v9023_v42 = vpop.f32.mrf.mxu3  ;;  %v9027_v35 = vsub.f32 %v11424_v56, %v9013_v0 }
 0x33f   :  { %v9043_v56 = vpop.f32.mrf.mxu2 }
 0x340   :  { %11427 = vst [vmem:[#allocation21_spill] sm:$0xff] %v9027_v35 }
 0x344   :  { %v9009_v37 = vpop.f32.mrf.mxu0 }
 0x345   :  { %11423 = vst [vmem:[#allocation13_spill] sm:$0xff] %v9009_v37  ;;  %2725 = vmatmul.f32.gmra.mxu2 %v11420_v29  ;;  %2882 = vmatmul.f32.gmra.mxu3 %v11426_v36  ;;  %v11139_v29 = vand.u32 4294901760, %v9027_v35  ;;  %v9035_v36 = vpop.f32.mrf.mxu1 }
 0x346   :  { %3620 = vmatmul.f32.gmra.mxu0 %v9005_v51  ;;  %3772 = vmatmul.f32.gmra.mxu1 %v11138_v49  ;;  %11431 = vst [vmem:[#allocation98_spill] sm:$0xff] %v9035_v36  ;;  %v11432_v49 = vld [vmem:[#allocation17_spill] sm:$0xff]  ;;  %v11437_v36 = vld [vmem:[#allocation23_spill] sm:$0xff] }
 0x347   :  { %v11433_v28 = vand.u32 4294901760, %v11432_v49  ;;  %v9055_v12 = vand.u32 4294901760, %v11437_v36 }
 0x349   :  { %11438 = vst [vmem:[#allocation23_spill] sm:$0xff] %v9055_v12 }
 0x34c   :  { %v9029_v37 = vpop.f32.mrf.mxu0 }
 0x34d   :  { %11428 = vst [vmem:[#allocation14_spill] sm:$0xff] %v9029_v37  ;;  %2730 = vmatmul.f32.gmra.mxu2 %v11425_v1  ;;  %2888 = vmatmul.f32.gmra.mxu3 %v11433_v28  ;;  %v9045_v37 = vpop.f32.mrf.mxu3  ;;  %v11146_v1 = vand.u32 4294901760, %v9049_v62  ;;  %v11439_v28 = vld [vmem:[#allocation18_spill] sm:$0xff]  ;;  %v9065_v57 = vpop.f32.mrf.mxu1 }
 0x34e   :  { %3625 = vmatmul.f32.gmra.mxu0 %v9027_v35  ;;  %3778 = vmatmul.f32.gmra.mxu1 %v11139_v29  ;;  %11434 = vst [vmem:[#allocation17_spill] sm:$0xff] %v9045_v37  ;;  %v11440_v22 = vand.u32 4294901760, %v11439_v28  ;;  %v9063_v29 = vpop.f32.mrf.mxu2  ;;  %v9071_v37 = vsub.f32 %v11437_v36, %v9055_v12  ;;  %v9075_v35 = vand.u32 4294901760, %v11445_v34 }
 0x34f   :  { %11441 = vst [vmem:[#allocation18_spill] sm:$0xff] %v9063_v29 }
 0x350   :  { %11442 = vst [vmem:[#allocation101_spill] sm:$0xff] %v9065_v57 }
 0x351   :  { %11444 = vst [vmem:[#allocation103_spill] sm:$0xff] %v9071_v37 }
 0x352   :  { %11446 = vst [vmem:[#allocation27_spill] sm:$0xff] %v9075_v35 }
 0x354   :  { %v9051_v44 = vpop.f32.mrf.mxu0 }
 0x355   :  { %11436 = vst [vmem:[#allocation100_spill] sm:$0xff] %v9051_v44  ;;  %2735 = vmatmul.f32.gmra.mxu2 %v11432_v49  ;;  %2894 = vmatmul.f32.gmra.mxu3 %v11440_v22  ;;  %v9067_v44 = vpop.f32.mrf.mxu3  ;;  %v11151_v49 = vand.u32 4294901760, %v9071_v37  ;;  %v11447_v22 = vld [vmem:[#allocation25_spill] sm:$0xff]  ;;  %v9093_v12 = vpop.f32.mrf.mxu1 }
 0x356   :  { %3630 = vmatmul.f32.gmra.mxu0 %v9049_v62  ;;  %3784 = vmatmul.f32.gmra.mxu1 %v11146_v1  ;;  %11443 = vst [vmem:[#allocation102_spill] sm:$0xff] %v9067_v44  ;;  %v11448_v62 = vand.u32 4294901760, %v11447_v22  ;;  %v9085_v57 = vpop.f32.mrf.mxu2  ;;  %v9091_v44 = vsub.f32 %v11445_v34, %v9075_v35 }
 0x357   :  { %11450 = vst [vmem:[#allocation104_spill] sm:$0xff] %v9085_v57 }
 0x358   :  { %11452 = vst [vmem:[#allocation106_spill] sm:$0xff] %v9091_v44 }
 0x359   :  { %11453 = vst [vmem:[#allocation107_spill] sm:$0xff] %v9093_v12 }
 0x35c   :  { %v9080_v1 = vpop.f32.mrf.mxu0 }
 0x35d   :  { %2740 = vmatmul.f32.gmra.mxu2 %v11439_v28  ;;  %2900 = vmatmul.f32.gmra.mxu3 %v11448_v62  ;;  %11449 = vst [vmem:[#allocation25_spill] sm:$0xff] %v9080_v1  ;;  %v9087_v36 = vpop.f32.mrf.mxu3  ;;  %v11154_v28 = vand.u32 4294901760, %v9091_v44  ;;  %v11454_v62 = vld [vmem:[#allocation33_spill] sm:$0xff]  ;;  %v11456_v1 = vld [vmem:[#allocation26_spill] sm:$0xff]  ;;  %v9115_v35 = vpop.f32.mrf.mxu1 }
 0x35e   :  { %3635 = vmatmul.f32.gmra.mxu0 %v9071_v37  ;;  %3790 = vmatmul.f32.gmra.mxu1 %v11151_v49  ;;  %11451 = vst [vmem:[#allocation105_spill] sm:$0xff] %v9087_v36  ;;  %v9097_v29 = vand.u32 4294901760, %v11454_v62  ;;  %v11457_v37 = vand.u32 4294901760, %v11456_v1  ;;  %v9105_v49 = vpop.f32.mrf.mxu2 }
 0x35f   :  { %11461 = vst [vmem:[#allocation110_spill] sm:$0xff] %v9115_v35 }
 0x360   :  { %11455 = vst [vmem:[#allocation33_spill] sm:$0xff] %v9097_v29  ;;  %v9113_v36 = vsub.f32 %v11454_v62, %v9097_v29 }
 0x362   :  { %11460 = vst [vmem:[#allocation109_spill] sm:$0xff] %v9113_v36 }
 0x364   :  { %v9109_v12 = vpop.f32.mrf.mxu0 }
 0x365   :  { %2745 = vmatmul.f32.gmra.mxu2 %v11447_v22  ;;  %2906 = vmatmul.f32.gmra.mxu3 %v11457_v37  ;;  %v9107_v34 = vpop.f32.mrf.mxu3  ;;  %11459 = vst [vmem:[#allocation108_spill] sm:$0xff] %v9109_v12  ;;  %v11159_v22 = vand.u32 4294901760, %v9113_v36  ;;  %v11462_v37 = vld [vmem:[#allocation31_spill] sm:$0xff] }
 0x366   :  { %3640 = vmatmul.f32.gmra.mxu0 %v9091_v44  ;;  %3796 = vmatmul.f32.gmra.mxu1 %v11154_v28  ;;  %11458 = vst [vmem:[#allocation26_spill] sm:$0xff] %v9107_v34  ;;  %v9119_v57 = vand.u32 4294901760, %v11462_v37  ;;  %v11464_v28 = vld [vmem:[#allocation29_spill] sm:$0xff]  ;;  %v9127_v12 = vpop.f32.mrf.mxu2 }
 0x367   :  { %v11465_v44 = vand.u32 4294901760, %v11464_v28 }
 0x368   :  { %11463 = vst [vmem:[#allocation31_spill] sm:$0xff] %v9119_v57  ;;  %v9133_v35 = vsub.f32 %v11462_v37, %v9119_v57 }
 0x36a   :  { %11467 = vst [vmem:[#allocation111_spill] sm:$0xff] %v9133_v35  ;;  %v9137_v29 = vpop.f32.mrf.mxu1 }
 0x36b   :  { %11469 = vst [vmem:[#allocation113_spill] sm:$0xff] %v9137_v29 }
 0x36c   :  { %v9135_v34 = vpop.f32.mrf.mxu0 }
 0x36d   :  { %2750 = vmatmul.f32.gmra.mxu2 %v11456_v1  ;;  %2912 = vmatmul.f32.gmra.mxu3 %v11465_v44  ;;  %v9129_v62 = vpop.f32.mrf.mxu3  ;;  %11468 = vst [vmem:[#allocation112_spill] sm:$0xff] %v9135_v34  ;;  %v11164_v1 = vand.u32 4294901760, %v9133_v35  ;;  %v9141_v44 = vand.u32 4294901760, %v8174_v50 }
 0x36e   :  { %3645 = vmatmul.f32.gmra.mxu0 %v9113_v36  ;;  %3802 = vmatmul.f32.gmra.mxu1 %v11159_v22  ;;  %11466 = vst [vmem:[#allocation29_spill] sm:$0xff] %v9129_v62  ;;  %v11471_v22 = vld [vmem:[#allocation30_spill] sm:$0xff]  ;;  %v9149_v37 = vpop.f32.mrf.mxu2 }
 0x36f   :  { %11470 = vst [vmem:[#allocation114_spill] sm:$0xff] %v9141_v44  ;;  %v11472_v36 = vand.u32 4294901760, %v11471_v22  ;;  %v9155_v29 = vsub.f32 %v8174_v50, %v9141_v44 }
 0x371   :  { %11474 = vst [vmem:[#allocation115_spill] sm:$0xff] %v9155_v29 }
 0x375   :  { %2755 = vmatmul.f32.gmra.mxu2 %v11464_v28  ;;  %2918 = vmatmul.f32.gmra.mxu3 %v11472_v36  ;;  %v9151_v34 = vpop.f32.mrf.mxu3  ;;  %v11167_v28 = vand.u32 4294901760, %v9155_v29  ;;  %v9163_v36 = vand.u32 4294901760, %v8258_v43 }
 0x376   :  { %3650 = vmatmul.f32.gmra.mxu0 %v9133_v35  ;;  %3808 = vmatmul.f32.gmra.mxu1 %v11164_v1  ;;  %11473 = vst [vmem:[#allocation30_spill] sm:$0xff] %v9151_v34  ;;  %v11478_v1 = vand.u32 4294901760, %v8193_v14 }
 0x377   :  { %11477 = vst [vmem:[#allocation118_spill] sm:$0xff] %v9163_v36 }
 0x378   :  { %v9171_v50 = vpop.f32.mrf.mxu2 }
 0x379   :  { %11479 = vst [vmem:[#allocation119_spill] sm:$0xff] %v9171_v50 }
 0x37a   :  { %v9157_v62 = vpop.f32.mrf.mxu0 }
 0x37b   :  { %11475 = vst [vmem:[#allocation116_spill] sm:$0xff] %v9157_v62  ;;  %v9159_v57 = vpop.f32.mrf.mxu1 }
 0x37c   :  { %11476 = vst [vmem:[#allocation117_spill] sm:$0xff] %v9159_v57  ;;  %v9175_v57 = vsub.f32 %v8258_v43, %v9163_v36 }
 0x37d   :  { %2760 = vmatmul.f32.gmra.mxu2 %v11471_v22  ;;  %2924 = vmatmul.f32.gmra.mxu3 %v11478_v1  ;;  %v9183_v1 = vand.u32 4294901760, %v8444_v41 }
 0x37e   :  { %3655 = vmatmul.f32.gmra.mxu0 %v9155_v29  ;;  %3814 = vmatmul.f32.gmra.mxu1 %v11167_v28  ;;  %11480 = vst [vmem:[#allocation120_spill] sm:$0xff] %v9175_v57  ;;  %v11172_v22 = vand.u32 4294901760, %v9175_v57  ;;  %v11484_v28 = vand.u32 4294901760, %v8222_v48 }
 0x37f   :  { %11483 = vst [vmem:[#allocation123_spill] sm:$0xff] %v9183_v1 }
 0x380   :  { %v2667_v62 = vpop.f32.mrf.mxu3 }
 0x383   :  { %v9177_v34 = vpop.f32.mrf.mxu0  ;;  %v9179_v44 = vpop.f32.mrf.mxu1 }
 0x384   :  { %11481 = vst [vmem:[#allocation121_spill] sm:$0xff] %v9177_v34 }
 0x385   :  { %11482 = vst [vmem:[#allocation122_spill] sm:$0xff] %v9179_v44  ;;  %2765 = vmatmul.f32.gmra.mxu2 %v8193_v14  ;;  %2930 = vmatmul.f32.gmra.mxu3 %v11484_v28  ;;  %v9193_v44 = vsub.f32 %v8444_v41, %v9183_v1  ;;  %v9203_v28 = vand.u32 4294901760, %v8565_v2  ;;  %v11490_v41 = vld [vmem:[#allocation36_spill] sm:$0xff] }
 0x386   :  { %3660 = vmatmul.f32.gmra.mxu0 %v9175_v57  ;;  %3820 = vmatmul.f32.gmra.mxu1 %v11172_v22  ;;  %v11489_v22 = vand.u32 4294901760, %v8344_v15 }
 0x387   :  { %v11179_v14 = vand.u32 4294901760, %v9193_v44  ;;  %11488 = vst [vmem:[#allocation127_spill] sm:$0xff] %v9203_v28  ;;  %v9215_v1 = vsub.f32 %v8565_v2, %v9203_v28  ;;  %v11496_v2 = vld [vmem:[#allocation39_spill] sm:$0xff] }
 0x388   :  { %v2545_v43 = vpop.f32.mrf.mxu2  ;;  %v2835_v36 = vpop.f32.mrf.mxu3 }
 0x389   :  { %v9195_v34 = vadd.f32 %v2667_v62, %v2545_v43  ;;  %v11491_v62 = vld [vmem:[#allocation35_spill] sm:$0xff]  ;;  %v11182_v35 = vand.u32 4294901760, %v9215_v1 }
 0x38a   :  { %v2572_v43 = vadd.f32 %v11491_v62, %v11490_v41  ;;  %v11495_v41 = vand.u32 4294901760, %v8504_v18 }
 0x38b   :  { %11485 = vst [vmem:[#allocation124_spill] sm:$0xff] %v9195_v34  ;;  %v9197_v29 = vpop.f32.mrf.mxu0  ;;  %v9199_v50 = vpop.f32.mrf.mxu1 }
 0x38c   :  { %11486 = vst [vmem:[#allocation125_spill] sm:$0xff] %v9197_v29 }
 0x38d   :  { %11487 = vst [vmem:[#allocation126_spill] sm:$0xff] %v9199_v50  ;;  %2770 = vmatmul.f32.gmra.mxu2 %v8222_v48  ;;  %2936 = vmatmul.f32.gmra.mxu3 %v11489_v22 }
 0x38e   :  { %3665 = vmatmul.f32.gmra.mxu0 %v9193_v44  ;;  %3826 = vmatmul.f32.gmra.mxu1 %v11179_v14  ;;  %v9225_v14 = vand.u32 4294901760, %v8608_v6 }
 0x390   :  { %v2691_v29 = vpop.f32.mrf.mxu2  ;;  %v2841_v50 = vpop.f32.mrf.mxu3  ;;  %11494 = vst [vmem:[#allocation128_spill] sm:$0xff] %v9225_v14 }
 0x391   :  { %v2692_v34 = vadd.f32 %v2691_v29, %v2572_v43  ;;  %v11497_v29 = vld [vmem:[#allocation38_spill] sm:$0xff]  ;;  %v9237_v43 = vsub.f32 %v8608_v6, %v9225_v14 }
 0x392   :  { %v11503_v6 = vld [vmem:[#allocation42_spill] sm:$0xff] }
 0x393   :  { %v9217_v57 = vadd.f32 %v2835_v36, %v2692_v34  ;;  %v9219_v48 = vpop.f32.mrf.mxu0  ;;  %v9221_v22 = vpop.f32.mrf.mxu1  ;;  %v2576_v34 = vadd.f32 %v11497_v29, %v11496_v2  ;;  %11498 = vst [vmem:[#allocation39_spill] sm:$0xff] %v9237_v43  ;;  %v11183_v28 = vand.u32 4294901760, %v9237_v43  ;;  %v11502_v2 = vand.u32 4294901760, %v8544_v8 }
 0x394   :  { %11492 = vst [vmem:[#allocation36_spill] sm:$0xff] %v9219_v48 }
 0x395   :  { %11493 = vst [vmem:[#allocation35_spill] sm:$0xff] %v9221_v22  ;;  %2775 = vmatmul.f32.gmra.mxu2 %v8344_v15  ;;  %2942 = vmatmul.f32.gmra.mxu3 %v11495_v41 }
 0x396   :  { %3670 = vmatmul.f32.gmra.mxu0 %v9215_v1  ;;  %3832 = vmatmul.f32.gmra.mxu1 %v11182_v35  ;;  %v9247_v35 = vand.u32 4294901760, %v8617_v45 }
 0x398   :  { %v2696_v36 = vpop.f32.mrf.mxu2  ;;  %v2847_v62 = vpop.f32.mrf.mxu3  ;;  %11501 = vst [vmem:[#allocation130_spill] sm:$0xff] %v9247_v35 }
 0x399   :  { %v2697_v22 = vadd.f32 %v2696_v36, %v2576_v34  ;;  %v9259_v36 = vsub.f32 %v8617_v45, %v9247_v35  ;;  %v11509_v45 = vand.u32 4294901760, %v8598_v46 }
 0x39b   :  { %v9239_v48 = vadd.f32 %v2841_v50, %v2697_v22  ;;  %v9241_v15 = vpop.f32.mrf.mxu0  ;;  %v9243_v41 = vpop.f32.mrf.mxu1  ;;  %v11504_v50 = vld [vmem:[#allocation40_spill] sm:$0xff]  ;;  %11505 = vst [vmem:[#allocation42_spill] sm:$0xff] %v9259_v36 }
 0x39c   :  { %11499 = vst [vmem:[#allocation38_spill] sm:$0xff] %v9241_v15  ;;  %v2580_v22 = vadd.f32 %v11504_v50, %v11503_v6  ;;  %v9272_v6 = vand.u32 4294901760, %v8688_v23 }
 0x39d   :  { %11500 = vst [vmem:[#allocation129_spill] sm:$0xff] %v9243_v41  ;;  %2780 = vmatmul.f32.gmra.mxu2 %v8504_v18  ;;  %2948 = vmatmul.f32.gmra.mxu3 %v11502_v2 }
 0x39e   :  { %3675 = vmatmul.f32.gmra.mxu0 %v9237_v43  ;;  %3838 = vmatmul.f32.gmra.mxu1 %v11183_v28  ;;  %v2044_v28 = vld [vmem:[%s11077_s1 + $0x10] sm:$0xff]  ;;  %v11190_v43 = vand.u32 4294901760, %v9259_v36  ;;  %11508 = vst [vmem:[#allocation132_spill] sm:$0xff] %v9272_v6 }
 0x39f   :  { %v2328_v50 = vsel %vm1333_vm0, %v2044_v28, 0 }
 0x3a0   :  { %v2701_v29 = vpop.f32.mrf.mxu2  ;;  %v2853_v34 = vpop.f32.mrf.mxu3 }
 0x3a1   :  { %v2702_v41 = vadd.f32 %v2701_v29, %v2580_v22  ;;  %v11511_v22 = vld [vmem:[#allocation43_spill] sm:$0xff] }
 0x3a3   :  { %v9261_v15 = vadd.f32 %v2847_v62, %v2702_v41  ;;  %v9263_v18 = vpop.f32.mrf.mxu0  ;;  %v9265_v2 = vpop.f32.mrf.mxu1  ;;  %v9278_v62 = vand.u32 4294901760, %v2328_v50  ;;  %v11510_v41 = vld [vmem:[#allocation44_spill] sm:$0xff] }
 0x3a4   :  { %11506 = vst [vmem:[#allocation40_spill] sm:$0xff] %v9263_v18  ;;  %v2584_v29 = vadd.f32 %v11511_v22, %v11510_v41  ;;  %v9303_v22 = vand.u32 4294901760, %v8787_v53 }
 0x3a5   :  { %11507 = vst [vmem:[#allocation131_spill] sm:$0xff] %v9265_v2  ;;  %2785 = vmatmul.f32.gmra.mxu2 %v8544_v8  ;;  %2954 = vmatmul.f32.gmra.mxu3 %v11509_v45  ;;  %v9287_v2 = vsub.f32 %v2328_v50, %v9278_v62  ;;  %v9291_v45 = vsub.f32 %v8688_v23, %v9272_v6  ;;  %v11517_v23 = vand.u32 4294901760, %v8667_v61 }
 0x3a6   :  { %3680 = vmatmul.f32.gmra.mxu0 %v9259_v36  ;;  %3844 = vmatmul.f32.gmra.mxu1 %v11190_v43  ;;  %11516 = vst [vmem:[#allocation135_spill] sm:$0xff] %v9303_v22 }
 0x3a7   :  { %4126 = vmatpush.xpose.msrb.mxu0 %v9278_v62  ;;  %11512 = vst [vmem:[#allocation44_spill] sm:$0xff] %v9291_v45  ;;  %v4345_v35 = vand.u32 4294901760, %v9287_v2  ;;  %v11197_v50 = vand.u32 4294901760, %v9291_v45 }
 0x3a8   :  { %v2706_v28 = vpop.f32.mrf.mxu2  ;;  %v2859_v8 = vpop.f32.mrf.mxu3 }
 0x3a9   :  { %v2707_v18 = vadd.f32 %v2706_v28, %v2584_v29  ;;  %v4346_v41 = vsub.f32 %v9287_v2, %v4345_v35 }
 0x3ab   :  { %v9294_v14 = vadd.f32 %v2853_v34, %v2707_v18  ;;  %v9296_v43 = vpop.f32.mrf.mxu0  ;;  %v9298_v36 = vpop.f32.mrf.mxu1  ;;  %4780 = vmatpush.xpose.msra.mxu0 %v4345_v35  ;;  %v4347_v29 = vand.u32 4294901760, %v4346_v41  ;;  %v11518_v34 = vld [vmem:[#allocation46_spill] sm:$0xff]  ;;  %v11519_v18 = vld [vmem:[#allocation45_spill] sm:$0xff] }
 0x3ac   :  { %11514 = vst [vmem:[#allocation133_spill] sm:$0xff] %v9296_v43  ;;  %v2588_v28 = vadd.f32 %v11519_v18, %v11518_v34  ;;  %v9315_v43 = vsub.f32 %v8787_v53, %v9303_v22  ;;  %v11526_v53 = vld [vmem:[#allocation48_spill] sm:$0xff]  ;;  %v11529_v22 = vld [vmem:[#allocation2_spill] sm:$0xff] }
 0x3ad   :  { %11513 = vst [vmem:[#allocation43_spill] sm:$0xff] %v9294_v14  ;;  %2790 = vmatmul.f32.gmra.mxu2 %v8598_v46  ;;  %2960 = vmatmul.f32.gmra.mxu3 %v11517_v23  ;;  %v2218_v23 = vld.sshfl [vmem:[#allocation1 + $0x28] sm:$0xff pattern:$0x73625140] }
 0x3ae   :  { %11515 = vst [vmem:[#allocation134_spill] sm:$0xff] %v9298_v36  ;;  %3685 = vmatmul.f32.gmra.mxu0 %v9291_v45  ;;  %3850 = vmatmul.f32.gmra.mxu1 %v11197_v50  ;;  %v11200_v50 = vand.u32 4294901760, %v9315_v43  ;;  %v9325_v34 = vand.u32 4294901760, %v2218_v23 }
 0x3af   :  { %4348 = vmatpush.xpose.msrb.mxu1 %v4347_v29  ;;  %11520 = vst [vmem:[#allocation46_spill] sm:$0xff] %v9315_v43  ;;  %v11525_v29 = vand.u32 4294901760, %v8735_v52 }
 0x3b0   :  { %v2711_v35 = vpop.f32.mrf.mxu2  ;;  %v2865_v36 = vpop.f32.mrf.mxu3  ;;  %11524 = vst [vmem:[#allocation138_spill] sm:$0xff] %v9325_v34 }
 0x3b1   :  { %v2712_v46 = vadd.f32 %v2711_v35, %v2588_v28 }
 0x3b3   :  { %4898 = vmatpush.xpose.msra.mxu1 %v9278_v62  ;;  %v9318_v41 = vadd.f32 %v2859_v8, %v2712_v46  ;;  %v9320_v6 = vpop.f32.mrf.mxu0  ;;  %v9322_v45 = vpop.f32.mrf.mxu1  ;;  %v11527_v8 = vld [vmem:[#allocation47_spill] sm:$0xff]  ;;  %v9336_v46 = vsub.f32 %v2218_v23, %v9325_v34  ;;  %v11532_v23 = vand.u32 4294901760, %v8828_v24 }
 0x3b4   :  { %11522 = vst [vmem:[#allocation136_spill] sm:$0xff] %v9320_v6  ;;  %v2592_v18 = vadd.f32 %v11527_v8, %v11526_v53  ;;  %v2225_v6 = vld.sshfl [vmem:[#allocation1 + $0x8] sm:$0xff pattern:$0x73625140] }
 0x3b5   :  { %11521 = vst [vmem:[#allocation45_spill] sm:$0xff] %v9318_v41  ;;  %2795 = vmatmul.f32.gmra.mxu2 %v8667_v61  ;;  %2966 = vmatmul.f32.gmra.mxu3 %v11525_v29  ;;  %v2277_v61 = vsel %vm1333_vm0, %v11529_v22, 0 }
 0x3b6   :  { %11523 = vst [vmem:[#allocation137_spill] sm:$0xff] %v9322_v45  ;;  %3690 = vmatmul.f32.gmra.mxu0 %v9315_v43  ;;  %3856 = vmatmul.f32.gmra.mxu1 %v11200_v50  ;;  %v11205_v50 = vand.u32 4294901760, %v9336_v46  ;;  %v9347_v43 = vand.u32 4294901760, %v2225_v6  ;;  %v9349_v53 = vand.u32 4294901760, %v2277_v61 }
 0x3b7   :  { %11528 = vst [vmem:[#allocation48_spill] sm:$0xff] %v9336_v46 }
 0x3b8   :  { %v2716_v28 = vpop.f32.mrf.mxu2  ;;  %v2871_v35 = vpop.f32.mrf.mxu3 }
 0x3b9   :  { %v2717_v45 = vadd.f32 %v2716_v28, %v2592_v18  ;;  %v9360_v18 = vsub.f32 %v2225_v6, %v9347_v43  ;;  %v9363_v28 = vsub.f32 %v2277_v61, %v9349_v53  ;;  %v11539_v6 = vand.u32 4294901760, %v8853_v25 }
 0x3bb   :  { %v9340_v41 = vadd.f32 %v2865_v36, %v2717_v45  ;;  %v9342_v29 = vpop.f32.mrf.mxu0  ;;  %v9344_v14 = vpop.f32.mrf.mxu1  ;;  %v11533_v36 = vld [vmem:[#allocation49_spill] sm:$0xff]  ;;  %11535 = vst [vmem:[#allocation139_spill] sm:$0xff] %v9363_v28 }
 0x3bc   :  { %11530 = vst [vmem:[#allocation47_spill] sm:$0xff] %v9342_v29  ;;  %v2596_v45 = vadd.f32 %v11533_v36, %v8402_v38  ;;  %v11208_v38 = vand.u32 4294901760, %v9360_v18  ;;  %v11211_v36 = vand.u32 4294901760, %v9363_v28 }
 0x3bd   :  { %11531 = vst [vmem:[#allocation2_spill] sm:$0xff] %v9344_v14  ;;  %2800 = vmatmul.f32.gmra.mxu2 %v8735_v52  ;;  %2972 = vmatmul.f32.gmra.mxu3 %v11532_v23  ;;  %v11536_v14 = vld [vmem:[#allocation3_spill] sm:$0xff] }
 0x3be   :  { %3695 = vmatmul.f32.gmra.mxu0 %v9336_v46  ;;  %3862 = vmatmul.f32.gmra.mxu1 %v11205_v50  ;;  %11534 = vst [vmem:[#allocation49_spill] sm:$0xff] %v9360_v18  ;;  %v2279_v23 = vsel %vm1333_vm0, %v11536_v14, 0  ;;  %v2600_v14 = vadd.f32 %v8409_v13, %v8449_v17 }
 0x3bf   :  { %v9375_v46 = vand.u32 4294901760, %v2279_v23 }
 0x3c0   :  { %v2721_v22 = vpop.f32.mrf.mxu2  ;;  %v2877_v8 = vpop.f32.mrf.mxu3 }
 0x3c1   :  { %v2722_v52 = vadd.f32 %v2721_v22, %v2596_v45  ;;  %v4130_v45 = vsub.f32 %v9363_v28, %v11211_v36  ;;  %v9389_v22 = vsub.f32 %v2279_v23, %v9375_v46  ;;  %v11544_v23 = vand.u32 4294901760, %v8858_v26 }
 0x3c3   :  { %v9367_v29 = vadd.f32 %v2871_v35, %v2722_v52  ;;  %v9369_v34 = vpop.f32.mrf.mxu0  ;;  %v9371_v50 = vpop.f32.mrf.mxu1  ;;  %11540 = vst [vmem:[#allocation141_spill] sm:$0xff] %v9389_v22  ;;  %v11541_v52 = vld [vmem:[#allocation4_spill] sm:$0xff]  ;;  %v4131_v13 = vand.u32 4294901760, %v4130_v45  ;;  %v11212_v17 = vand.u32 4294901760, %v9389_v22 }
 0x3c4   :  { %11537 = vst [vmem:[#allocation3_spill] sm:$0xff] %v9369_v34 }
 0x3c5   :  { %11538 = vst [vmem:[#allocation140_spill] sm:$0xff] %v9371_v50  ;;  %2805 = vmatmul.f32.gmra.mxu2 %v8828_v24  ;;  %2978 = vmatmul.f32.gmra.mxu3 %v11539_v6  ;;  %v2281_v6 = vsel %vm1333_vm0, %v11541_v52, 0 }
 0x3c6   :  { %3700 = vmatmul.f32.gmra.mxu0 %v9360_v18  ;;  %3868 = vmatmul.f32.gmra.mxu1 %v11208_v38  ;;  %v9400_v18 = vand.u32 4294901760, %v2281_v6 }
 0x3c8   :  { %v2726_v35 = vpop.f32.mrf.mxu2  ;;  %v2883_v61 = vpop.f32.mrf.mxu3 }
 0x3c9   :  { %v2727_v24 = vadd.f32 %v2726_v35, %v2600_v14  ;;  %v3240_v14 = vsub.f32 %v8858_v26, %v11544_v23 }
 0x3cb   :  { %v9393_v50 = vadd.f32 %v2877_v8, %v2727_v24  ;;  %v9395_v34 = vpop.f32.mrf.mxu0  ;;  %v9397_v38 = vpop.f32.mrf.mxu1  ;;  %v2604_v8 = vadd.f32 %v8454_v20, %v8479_v3  ;;  %v9415_v24 = vsub.f32 %v2281_v6, %v9400_v18  ;;  %v11549_v6 = vand.u32 4294901760, %v8879_v58 }
 0x3cc   :  { %11542 = vst [vmem:[#allocation4_spill] sm:$0xff] %v9395_v34 }
 0x3cd   :  { %11543 = vst [vmem:[#allocation142_spill] sm:$0xff] %v9397_v38  ;;  %2810 = vmatmul.f32.gmra.mxu2 %v8853_v25  ;;  %3460 = vmatmul.f32.vlgmr.msra.gmra.mxu3 %v8849_v19  ;;  %v4138_v25 = vsub.f32 %v9389_v22, %v11212_v17  ;;  %v11213_v38 = vand.u32 4294901760, %v9415_v24 }
 0x3ce   :  { %4132 = vmatmul.f32.vlgmr.msrb.gmra.mxu0 %v4131_v13  ;;  %4350 = vmatmul.f32.vlgmr.msrb.gmra.mxu1 %v9349_v53  ;;  %11545 = vst [vmem:[#allocation143_spill] sm:$0xff] %v9415_v24  ;;  %v11546_v13 = vld [vmem:[#allocation6_spill] sm:$0xff] }
 0x3cf   :  { %4610 = vmatpush.xpose.msra.mxu3 %v9278_v62  ;;  %v2283_v36 = vsel %vm1333_vm0, %v11546_v13, 0  ;;  %v3241_v62 = vand.u32 4294901760, %v3240_v14  ;;  %v4139_v23 = vand.u32 4294901760, %v4138_v25  ;;  %v4146_v25 = vsub.f32 %v9415_v24, %v11213_v38 }
 0x3d0   :  { %v2731_v35 = vpop.f32.mrf.mxu2  ;;  %v2889_v45 = vpop.f32.mrf.mxu3  ;;  %v9426_v34 = vand.u32 4294901760, %v2283_v36 }
 0x3d1   :  { %v2732_v52 = vadd.f32 %v2731_v35, %v2604_v8  ;;  %v3248_v8 = vsub.f32 %v8879_v58, %v11549_v6  ;;  %v4147_v6 = vand.u32 4294901760, %v4146_v25 }
 0x3d3   :  { %v9419_v20 = vadd.f32 %v2883_v61, %v2732_v52  ;;  %v9421_v3 = vpop.f32.mrf.mxu0  ;;  %v9423_v26 = vpop.f32.mrf.mxu1  ;;  %v2608_v61 = vadd.f32 %v8484_v10, %v8517_v11  ;;  %v9440_v52 = vsub.f32 %v2283_v36, %v9426_v34  ;;  %v11554_v36 = vld [vmem:[#allocation52_spill] sm:$0xff] }
 0x3d4   :  { %11547 = vst [vmem:[#allocation6_spill] sm:$0xff] %v9421_v3 }
 0x3d5   :  { %11548 = vst [vmem:[#allocation144_spill] sm:$0xff] %v9423_v26  ;;  %3242 = vmatmul.f32.vlgmr.msra.gmra.mxu2 %v3241_v62  ;;  %3464 = vmatmul.f32.gmra.mxu3 %v8867_v33  ;;  %v11551_v62 = vld [vmem:[#allocation5_spill] sm:$0xff]  ;;  %v11216_v17 = vand.u32 4294901760, %v9440_v52 }
 0x3d6   :  { %4140 = vmatmul.f32.gmra.mxu0 %v4139_v23  ;;  %4354 = vmatmul.f32.gmra.mxu1 %v9375_v46  ;;  %11550 = vst [vmem:[#allocation145_spill] sm:$0xff] %v9440_v52  ;;  %v2285_v23 = vsel %vm1333_vm0, %v11551_v62, 0 }
 0x3d7   :  { %4467 = vmatpush.xpose.msra.mxu2 %v9287_v2  ;;  %v3249_v2 = vand.u32 4294901760, %v3248_v8  ;;  %v9451_v26 = vand.u32 4294901760, %v2285_v23  ;;  %v4154_v25 = vsub.f32 %v9440_v52, %v11216_v17 }
 0x3d8   :  { %v2736_v14 = vpop.f32.mrf.mxu2  ;;  %v2895_v35 = vpop.f32.mrf.mxu3 }
 0x3d9   :  { %v2737_v13 = vadd.f32 %v2736_v14, %v2608_v61  ;;  %v11555_v61 = vld [vmem:[#allocation51_spill] sm:$0xff]  ;;  %v11556_v14 = vand.u32 4294901760, %v8897_v60 }
 0x3db   :  { %v9444_v10 = vadd.f32 %v2889_v45, %v2737_v13  ;;  %v9446_v11 = vpop.f32.mrf.mxu0  ;;  %v9448_v58 = vpop.f32.mrf.mxu1  ;;  %v2612_v45 = vadd.f32 %v11555_v61, %v11554_v36  ;;  %v3256_v13 = vsub.f32 %v8897_v60, %v11556_v14  ;;  %v4155_v14 = vand.u32 4294901760, %v4154_v25 }
 0x3dc   :  { %11552 = vst [vmem:[#allocation5_spill] sm:$0xff] %v9446_v11 }
 0x3dd   :  { %11553 = vst [vmem:[#allocation146_spill] sm:$0xff] %v9448_v58  ;;  %3250 = vmatmul.f32.gmra.mxu2 %v3249_v2  ;;  %3468 = vmatmul.f32.gmra.mxu3 %v8885_v4  ;;  %v9464_v2 = vsub.f32 %v2285_v23, %v9451_v26  ;;  %v3257_v60 = vand.u32 4294901760, %v3256_v13  ;;  %v11561_v23 = vld [vmem:[#allocation53_spill] sm:$0xff] }
 0x3de   :  { %4148 = vmatmul.f32.gmra.mxu0 %v4147_v6  ;;  %4358 = vmatmul.f32.gmra.mxu1 %v9400_v18  ;;  %v11558_v6 = vld [vmem:[#allocation7_spill] sm:$0xff] }
 0x3df   :  { %11557 = vst [vmem:[#allocation52_spill] sm:$0xff] %v9464_v2  ;;  %v2287_v58 = vsel %vm1333_vm0, %v11558_v6, 0  ;;  %v11219_v24 = vand.u32 4294901760, %v9464_v2 }
 0x3e0   :  { %v2741_v62 = vpop.f32.mrf.mxu2  ;;  %v2901_v8 = vpop.f32.mrf.mxu3  ;;  %v9475_v3 = vand.u32 4294901760, %v2287_v58 }
 0x3e1   :  { %v2742_v38 = vadd.f32 %v2741_v62, %v2612_v45  ;;  %v4162_v25 = vsub.f32 %v9464_v2, %v11219_v24 }
 0x3e2   :  { %v9488_v6 = vsub.f32 %v2287_v58, %v9475_v3  ;;  %v11567_v58 = vld [vmem:[#allocation55_spill] sm:$0xff] }
 0x3e3   :  { %v9468_v11 = vadd.f32 %v2895_v35, %v2742_v38  ;;  %v9470_v36 = vpop.f32.mrf.mxu0  ;;  %v9472_v61 = vpop.f32.mrf.mxu1  ;;  %v2616_v38 = vadd.f32 %v11561_v23, %v8576_v63  ;;  %v11562_v35 = vand.u32 4294901760, %v8915_v54 }
 0x3e4   :  { %11559 = vst [vmem:[#allocation51_spill] sm:$0xff] %v9470_v36  ;;  %v11222_v36 = vand.u32 4294901760, %v9488_v6 }
 0x3e5   :  { %11560 = vst [vmem:[#allocation7_spill] sm:$0xff] %v9472_v61  ;;  %3258 = vmatmul.f32.gmra.mxu2 %v3257_v60  ;;  %3472 = vmatmul.f32.gmra.mxu3 %v8903_v40  ;;  %v3264_v45 = vsub.f32 %v8915_v54, %v11562_v35  ;;  %v4163_v35 = vand.u32 4294901760, %v4162_v25 }
 0x3e6   :  { %4156 = vmatmul.f32.gmra.mxu0 %v4155_v14  ;;  %4362 = vmatmul.f32.gmra.mxu1 %v9426_v34  ;;  %11563 = vst [vmem:[#allocation53_spill] sm:$0xff] %v9488_v6  ;;  %v11564_v14 = vld [vmem:[#allocation10_spill] sm:$0xff]  ;;  %v4170_v25 = vsub.f32 %v9488_v6, %v11222_v36 }
 0x3e7   :  { %v2289_v17 = vsel %vm1333_vm0, %v11564_v14, 0  ;;  %v3265_v54 = vand.u32 4294901760, %v3264_v45 }
 0x3e8   :  { %v2746_v62 = vpop.f32.mrf.mxu2  ;;  %v2907_v13 = vpop.f32.mrf.mxu3  ;;  %v9499_v52 = vand.u32 4294901760, %v2289_v17 }
 0x3e9   :  { %v2747_v60 = vadd.f32 %v2746_v62, %v2616_v38  ;;  %v11568_v38 = vand.u32 4294901760, %v8933_v30 }
 0x3ea   :  { %v9512_v14 = vsub.f32 %v2289_v17, %v9499_v52  ;;  %v11573_v17 = vld [vmem:[#allocation59_spill] sm:$0xff] }
 0x3eb   :  { %v9492_v61 = vadd.f32 %v2901_v8, %v2747_v60  ;;  %v9494_v63 = vpop.f32.mrf.mxu0  ;;  %v9496_v23 = vpop.f32.mrf.mxu1  ;;  %v2620_v8 = vadd.f32 %v11567_v58, %v8600_v32  ;;  %v3272_v62 = vsub.f32 %v8933_v30, %v11568_v38  ;;  %v4171_v38 = vand.u32 4294901760, %v4170_v25 }
 0x3ec   :  { %11565 = vst [vmem:[#allocation10_spill] sm:$0xff] %v9494_v63  ;;  %v11227_v63 = vand.u32 4294901760, %v9512_v14 }
 0x3ed   :  { %11566 = vst [vmem:[#allocation147_spill] sm:$0xff] %v9496_v23  ;;  %3266 = vmatmul.f32.gmra.mxu2 %v3265_v54  ;;  %3476 = vmatmul.f32.gmra.mxu3 %v8921_v9  ;;  %v3273_v30 = vand.u32 4294901760, %v3272_v62 }
 0x3ee   :  { %4164 = vmatmul.f32.gmra.mxu0 %v4163_v35  ;;  %4366 = vmatmul.f32.gmra.mxu1 %v9451_v26  ;;  %11569 = vst [vmem:[#allocation55_spill] sm:$0xff] %v9512_v14  ;;  %v11570_v35 = vld [vmem:[#allocation12_spill] sm:$0xff]  ;;  %v4178_v25 = vsub.f32 %v9512_v14, %v11227_v63 }
 0x3ef   :  { %v2291_v24 = vsel %vm1333_vm0, %v11570_v35, 0 }
 0x3f0   :  { %v2751_v60 = vpop.f32.mrf.mxu2  ;;  %v2913_v45 = vpop.f32.mrf.mxu3  ;;  %v9523_v2 = vand.u32 4294901760, %v2291_v24 }
 0x3f1   :  { %v2752_v54 = vadd.f32 %v2751_v60, %v2620_v8  ;;  %v11574_v8 = vld [vmem:[#allocation56_spill] sm:$0xff]  ;;  %v11575_v60 = vand.u32 4294901760, %v8951_v7 }
 0x3f3   :  { %v9516_v23 = vadd.f32 %v2907_v13, %v2752_v54  ;;  %v9518_v32 = vpop.f32.mrf.mxu0  ;;  %v9520_v58 = vpop.f32.mrf.mxu1  ;;  %v2624_v13 = vadd.f32 %v11574_v8, %v11573_v17  ;;  %v3280_v54 = vsub.f32 %v8951_v7, %v11575_v60  ;;  %v4179_v60 = vand.u32 4294901760, %v4178_v25 }
 0x3f4   :  { %11571 = vst [vmem:[#allocation12_spill] sm:$0xff] %v9518_v32 }
 0x3f5   :  { %11572 = vst [vmem:[#allocation148_spill] sm:$0xff] %v9520_v58  ;;  %3274 = vmatmul.f32.gmra.mxu2 %v3273_v30  ;;  %3480 = vmatmul.f32.gmra.mxu3 %v8939_v16  ;;  %v9536_v30 = vsub.f32 %v2291_v24, %v9523_v2  ;;  %v3281_v7 = vand.u32 4294901760, %v3280_v54  ;;  %v11580_v24 = vld [vmem:[#allocation60_spill] sm:$0xff] }
 0x3f6   :  { %4172 = vmatmul.f32.gmra.mxu0 %v4171_v38  ;;  %4370 = vmatmul.f32.gmra.mxu1 %v9475_v3  ;;  %v11577_v38 = vld [vmem:[#allocation16_spill] sm:$0xff] }
 0x3f7   :  { %11576 = vst [vmem:[#allocation59_spill] sm:$0xff] %v9536_v30  ;;  %v2293_v58 = vsel %vm1333_vm0, %v11577_v38, 0  ;;  %v11230_v6 = vand.u32 4294901760, %v9536_v30 }
 0x3f8   :  { %v2756_v35 = vpop.f32.mrf.mxu2  ;;  %v2919_v62 = vpop.f32.mrf.mxu3  ;;  %v9547_v22 = vand.u32 4294901760, %v2293_v58 }
 0x3f9   :  { %v2757_v36 = vadd.f32 %v2756_v35, %v2624_v13  ;;  %v4186_v25 = vsub.f32 %v9536_v30, %v11230_v6 }
 0x3fa   :  { %v9560_v38 = vsub.f32 %v2293_v58, %v9547_v22  ;;  %v11586_v58 = vld [vmem:[#allocation62_spill] sm:$0xff] }
 0x3fb   :  { %v9540_v32 = vadd.f32 %v2913_v45, %v2757_v36  ;;  %v9542_v17 = vpop.f32.mrf.mxu0  ;;  %v9544_v8 = vpop.f32.mrf.mxu1  ;;  %v2628_v36 = vadd.f32 %v11580_v24, %v8649_v47  ;;  %v11581_v45 = vand.u32 4294901760, %v8969_v55 }
 0x3fc   :  { %11578 = vst [vmem:[#allocation56_spill] sm:$0xff] %v9542_v17  ;;  %v11235_v17 = vand.u32 4294901760, %v9560_v38 }
 0x3fd   :  { %11579 = vst [vmem:[#allocation16_spill] sm:$0xff] %v9544_v8  ;;  %3282 = vmatmul.f32.gmra.mxu2 %v3281_v7  ;;  %3484 = vmatmul.f32.gmra.mxu3 %v8957_v5  ;;  %v3288_v13 = vsub.f32 %v8969_v55, %v11581_v45  ;;  %v4187_v45 = vand.u32 4294901760, %v4186_v25 }
 0x3fe   :  { %4180 = vmatmul.f32.gmra.mxu0 %v4179_v60  ;;  %4374 = vmatmul.f32.gmra.mxu1 %v9499_v52  ;;  %11582 = vst [vmem:[#allocation60_spill] sm:$0xff] %v9560_v38  ;;  %v11583_v60 = vld [vmem:[#allocation22_spill] sm:$0xff]  ;;  %v4194_v25 = vsub.f32 %v9560_v38, %v11235_v17 }
 0x3ff   :  { %v2295_v63 = vsel %vm1333_vm0, %v11583_v60, 0  ;;  %v3289_v55 = vand.u32 4294901760, %v3288_v13  ;;  %v11614_v38 = vld [vmem:[#allocation34_spill] sm:$0xff] }
 0x400   :  { %v2761_v35 = vpop.f32.mrf.mxu2  ;;  %v2925_v54 = vpop.f32.mrf.mxu3  ;;  %v9571_v14 = vand.u32 4294901760, %v2295_v63 }
 0x401   :  { %v2762_v7 = vadd.f32 %v2761_v35, %v2628_v36  ;;  %v11587_v36 = vld [vmem:[#allocation61_spill] sm:$0xff]  ;;  %v11588_v35 = vand.u32 4294901760, %v8985_v31 }
 0x403   :  { %v9564_v8 = vadd.f32 %v2919_v62, %v2762_v7  ;;  %v9566_v47 = vpop.f32.mrf.mxu0  ;;  %v9568_v24 = vpop.f32.mrf.mxu1  ;;  %v2632_v62 = vadd.f32 %v11587_v36, %v11586_v58  ;;  %v3296_v7 = vsub.f32 %v8985_v31, %v11588_v35  ;;  %v4195_v35 = vand.u32 4294901760, %v4194_v25 }
 0x404   :  { %11584 = vst [vmem:[#allocation22_spill] sm:$0xff] %v9566_v47 }
 0x405   :  { %11585 = vst [vmem:[#allocation149_spill] sm:$0xff] %v9568_v24  ;;  %3290 = vmatmul.f32.gmra.mxu2 %v3289_v55  ;;  %3488 = vmatmul.f32.gmra.mxu3 %v8975_v27  ;;  %v9584_v55 = vsub.f32 %v2295_v63, %v9571_v14  ;;  %v3297_v31 = vand.u32 4294901760, %v3296_v7  ;;  %v11594_v63 = vand.u32 4294901760, %v9005_v51 }
 0x406   :  { %4188 = vmatmul.f32.gmra.mxu0 %v4187_v45  ;;  %4378 = vmatmul.f32.gmra.mxu1 %v9523_v2  ;;  %v11590_v45 = vld [vmem:[#allocation20_spill] sm:$0xff] }
 0x407   :  { %11589 = vst [vmem:[#allocation62_spill] sm:$0xff] %v9584_v55  ;;  %v2297_v24 = vsel %vm1333_vm0, %v11590_v45, 0  ;;  %v11236_v30 = vand.u32 4294901760, %v9584_v55 }
 0x408   :  { %v2766_v60 = vpop.f32.mrf.mxu2  ;;  %v2931_v13 = vpop.f32.mrf.mxu3  ;;  %v9595_v28 = vand.u32 4294901760, %v2297_v24 }
 0x409   :  { %v2767_v6 = vadd.f32 %v2766_v60, %v2632_v62  ;;  %v4202_v60 = vsub.f32 %v9584_v55, %v11236_v30 }
 0x40a   :  { %11593 = vst [vmem:[#allocation150_spill] sm:$0xff] %v9595_v28  ;;  %v9608_v25 = vsub.f32 %v2297_v24, %v9595_v28  ;;  %v2640_v24 = vadd.f32 %v9023_v42, %v9043_v56 }
 0x40b   :  { %v9588_v47 = vadd.f32 %v2925_v54, %v2767_v6  ;;  %v9590_v58 = vpop.f32.mrf.mxu0  ;;  %v9592_v36 = vpop.f32.mrf.mxu1  ;;  %v2636_v6 = vadd.f32 %v9001_v21, %v9021_v59  ;;  %v3304_v54 = vsub.f32 %v9005_v51, %v11594_v63  ;;  %v4203_v59 = vand.u32 4294901760, %v4202_v60 }
 0x40c   :  { %11591 = vst [vmem:[#allocation61_spill] sm:$0xff] %v9590_v58 }
 0x40d   :  { %11592 = vst [vmem:[#allocation20_spill] sm:$0xff] %v9592_v36  ;;  %3298 = vmatmul.f32.gmra.mxu2 %v3297_v31  ;;  %3492 = vmatmul.f32.gmra.mxu3 %v8993_v39  ;;  %v11596_v31 = vld [vmem:[#allocation24_spill] sm:$0xff]  ;;  %v3305_v21 = vand.u32 4294901760, %v3304_v54  ;;  %v11237_v36 = vand.u32 4294901760, %v9608_v25 }
 0x40e   :  { %4196 = vmatmul.f32.gmra.mxu0 %v4195_v35  ;;  %4382 = vmatmul.f32.gmra.mxu1 %v9547_v22  ;;  %11595 = vst [vmem:[#allocation151_spill] sm:$0xff] %v9608_v25  ;;  %v2299_v35 = vsel %vm1333_vm0, %v11596_v31, 0 }
 0x40f   :  { %v9615_v51 = vand.u32 4294901760, %v2299_v35 }
 0x410   :  { %v2771_v62 = vpop.f32.mrf.mxu2  ;;  %v2937_v7 = vpop.f32.mrf.mxu3 }
 0x411   :  { %v2772_v45 = vadd.f32 %v2771_v62, %v2636_v6  ;;  %11597 = vst [vmem:[#allocation24_spill] sm:$0xff] %v9615_v51  ;;  %v9632_v31 = vsub.f32 %v2299_v35, %v9615_v51  ;;  %v11606_v35 = vld [vmem:[#allocation18_spill] sm:$0xff] }
 0x413   :  { %v9612_v17 = vadd.f32 %v2931_v13, %v2772_v45  ;;  %v9617_v63 = vpop.f32.mrf.mxu0  ;;  %v9619_v58 = vpop.f32.mrf.mxu1  ;;  %v11600_v13 = vld [vmem:[#allocation21_spill] sm:$0xff]  ;;  %v4210_v45 = vsub.f32 %v9608_v25, %v11237_v36 }
 0x414   :  { %11598 = vst [vmem:[#allocation152_spill] sm:$0xff] %v9617_v63  ;;  %v11601_v6 = vand.u32 4294901760, %v11600_v13  ;;  %v11607_v36 = vld [vmem:[#allocation17_spill] sm:$0xff] }
 0x415   :  { %11599 = vst [vmem:[#allocation153_spill] sm:$0xff] %v9619_v58  ;;  %3306 = vmatmul.f32.gmra.mxu2 %v3305_v21  ;;  %3496 = vmatmul.f32.gmra.mxu3 %v9013_v0  ;;  %v4211_v56 = vand.u32 4294901760, %v4210_v45 }
 0x416   :  { %4204 = vmatmul.f32.gmra.mxu0 %v4203_v59  ;;  %4386 = vmatmul.f32.gmra.mxu1 %v9571_v14  ;;  %v3312_v54 = vsub.f32 %v11600_v13, %v11601_v6  ;;  %11602 = vst [vmem:[#allocation21_spill] sm:$0xff] %v9632_v31  ;;  %v11603_v59 = vld [vmem:[#allocation28_spill] sm:$0xff]  ;;  %v11605_v6 = vld [vmem:[#allocation19_spill] sm:$0xff] }
 0x417   :  { %v2301_v30 = vsel %vm1333_vm0, %v11603_v59, 0 }
 0x418   :  { %v2776_v62 = vpop.f32.mrf.mxu2  ;;  %v2943_v60 = vpop.f32.mrf.mxu3  ;;  %v3313_v42 = vand.u32 4294901760, %v3312_v54  ;;  %v9639_v13 = vand.u32 4294901760, %v2301_v30 }
 0x419   :  { %v2777_v21 = vadd.f32 %v2776_v62, %v2640_v24  ;;  %v2644_v24 = vadd.f32 %v11607_v36, %v11606_v35  ;;  %v2303_v36 = vsel %vm1333_vm0, %v11614_v38, 0 }
 0x41a   :  { %11604 = vst [vmem:[#allocation28_spill] sm:$0xff] %v9639_v13 }
 0x41b   :  { %v9636_v58 = vadd.f32 %v2937_v7, %v2777_v21  ;;  %v9645_v62 = vpop.f32.mrf.mxu0  ;;  %v9647_v59 = vpop.f32.mrf.mxu1  ;;  %v11610_v7 = vld [vmem:[#allocation99_spill] sm:$0xff] }
 0x41c   :  { %11608 = vst [vmem:[#allocation18_spill] sm:$0xff] %v9645_v62  ;;  %v11611_v54 = vand.u32 4294901760, %v11610_v7 }
 0x41d   :  { %3314 = vmatmul.f32.gmra.mxu2 %v3313_v42  ;;  %3500 = vmatmul.f32.gmra.mxu3 %v11605_v6  ;;  %11609 = vst [vmem:[#allocation17_spill] sm:$0xff] %v9647_v59  ;;  %v11612_v42 = vand.u32 4294901760, %v9632_v31 }
 0x41e   :  { %4212 = vmatmul.f32.gmra.mxu0 %v4211_v56  ;;  %4390 = vmatmul.f32.gmra.mxu1 %v9595_v28  ;;  %v3320_v45 = vsub.f32 %v11610_v7, %v11611_v54  ;;  %v9656_v56 = vsub.f32 %v2301_v30, %v9639_v13  ;;  %v9663_v7 = vand.u32 4294901760, %v2303_v36  ;;  %v11617_v54 = vld [vmem:[#allocation23_spill] sm:$0xff]  ;;  %v11618_v30 = vld [vmem:[#allocation104_spill] sm:$0xff] }
 0x41f   :  { %v4218_v25 = vsub.f32 %v9632_v31, %v11612_v42  ;;  %v11619_v42 = vld [vmem:[#allocation102_spill] sm:$0xff] }
 0x420   :  { %v2781_v21 = vpop.f32.mrf.mxu2  ;;  %v2949_v63 = vpop.f32.mrf.mxu3  ;;  %11613 = vst [vmem:[#allocation99_spill] sm:$0xff] %v9656_v56  ;;  %v3321_v59 = vand.u32 4294901760, %v3320_v45  ;;  %v11250_v28 = vand.u32 4294901760, %v9656_v56 }
 0x421   :  { %v2782_v55 = vadd.f32 %v2781_v21, %v2644_v24  ;;  %v4219_v62 = vand.u32 4294901760, %v4218_v25  ;;  %11616 = vst [vmem:[#allocation154_spill] sm:$0xff] %v9663_v7  ;;  %v2648_v24 = vadd.f32 %v11619_v42, %v11618_v30  ;;  %v11620_v21 = vld [vmem:[#allocation103_spill] sm:$0xff] }
 0x422   :  { %v11621_v31 = vand.u32 4294901760, %v11620_v21  ;;  %v4226_v25 = vsub.f32 %v9656_v56, %v11250_v28  ;;  %v11627_v28 = vld [vmem:[#allocation27_spill] sm:$0xff] }
 0x423   :  { %v9660_v35 = vadd.f32 %v2943_v60, %v2782_v55  ;;  %v9678_v45 = vpop.f32.mrf.mxu0 }
 0x424   :  { %v3328_v38 = vsub.f32 %v11620_v21, %v11621_v31  ;;  %11623 = vst [vmem:[#allocation102_spill] sm:$0xff] %v9678_v45  ;;  %v4227_v21 = vand.u32 4294901760, %v4226_v25 }
 0x425   :  { %11615 = vst [vmem:[#allocation34_spill] sm:$0xff] %v9660_v35  ;;  %3322 = vmatmul.f32.gmra.mxu2 %v3321_v59  ;;  %3504 = vmatmul.f32.gmra.mxu3 %v11617_v54  ;;  %v9676_v59 = vsub.f32 %v2303_v36, %v9663_v7  ;;  %v11625_v54 = vld [vmem:[#allocation32_spill] sm:$0xff]  ;;  %v11628_v36 = vld [vmem:[#allocation105_spill] sm:$0xff] }
 0x426   :  { %4220 = vmatmul.f32.gmra.mxu0 %v4219_v62  ;;  %4394 = vmatmul.f32.gmra.mxu1 %v9615_v51  ;;  %v9680_v62 = vpop.f32.mrf.mxu1  ;;  %v2305_v30 = vsel %vm1333_vm0, %v11625_v54, 0  ;;  %v3329_v31 = vand.u32 4294901760, %v3328_v38 }
 0x427   :  { %11622 = vst [vmem:[#allocation104_spill] sm:$0xff] %v9676_v59  ;;  %v11255_v6 = vand.u32 4294901760, %v9676_v59  ;;  %v9687_v35 = vand.u32 4294901760, %v2305_v30 }
 0x428   :  { %v2786_v55 = vpop.f32.mrf.mxu2  ;;  %v2955_v60 = vpop.f32.mrf.mxu3  ;;  %11624 = vst [vmem:[#allocation103_spill] sm:$0xff] %v9680_v62 }
 0x429   :  { %v2787_v51 = vadd.f32 %v2786_v55, %v2648_v24  ;;  %11626 = vst [vmem:[#allocation32_spill] sm:$0xff] %v9687_v35  ;;  %v2652_v24 = vadd.f32 %v11628_v36, %v9105_v49  ;;  %v11629_v55 = vld [vmem:[#allocation106_spill] sm:$0xff]  ;;  %v4234_v38 = vsub.f32 %v9676_v59, %v11255_v6  ;;  %v9700_v25 = vsub.f32 %v2305_v30, %v9687_v35  ;;  %v11636_v6 = vld [vmem:[#allocation33_spill] sm:$0xff] }
 0x42a   :  { %v11630_v62 = vand.u32 4294901760, %v11629_v55  ;;  %v11637_v30 = vld [vmem:[#allocation26_spill] sm:$0xff] }
 0x42b   :  { %v9684_v42 = vadd.f32 %v2949_v63, %v2787_v51  ;;  %11631 = vst [vmem:[#allocation105_spill] sm:$0xff] %v9700_v25  ;;  %v9704_v45 = vpop.f32.mrf.mxu0 }
 0x42c   :  { %v3336_v51 = vsub.f32 %v11629_v55, %v11630_v62  ;;  %11633 = vst [vmem:[#allocation106_spill] sm:$0xff] %v9704_v45  ;;  %v4235_v55 = vand.u32 4294901760, %v4234_v38 }
 0x42d   :  { %3330 = vmatmul.f32.gmra.mxu2 %v3329_v31  ;;  %3508 = vmatmul.f32.gmra.mxu3 %v11627_v28 }
 0x42e   :  { %4228 = vmatmul.f32.gmra.mxu0 %v4227_v21  ;;  %4398 = vmatmul.f32.gmra.mxu1 %v9639_v13  ;;  %v11632_v21 = vld [vmem:[#allocation37_spill] sm:$0xff]  ;;  %v9706_v49 = vpop.f32.mrf.mxu1  ;;  %v3337_v62 = vand.u32 4294901760, %v3336_v51  ;;  %v11260_v13 = vand.u32 4294901760, %v9700_v25 }
 0x42f   :  { %v2307_v56 = vsel %vm1333_vm0, %v11632_v21, 0  ;;  %11634 = vst [vmem:[#allocation37_spill] sm:$0xff] %v9706_v49 }
 0x430   :  { %v2791_v63 = vpop.f32.mrf.mxu2  ;;  %v2961_v54 = vpop.f32.mrf.mxu3  ;;  %v9711_v28 = vand.u32 4294901760, %v2307_v56  ;;  %v4242_v38 = vsub.f32 %v9700_v25, %v11260_v13  ;;  %v11645_v13 = vld [vmem:[#allocation31_spill] sm:$0xff] }
 0x431   :  { %v2792_v31 = vadd.f32 %v2791_v63, %v2652_v24  ;;  %v2656_v24 = vadd.f32 %v11637_v30, %v9127_v12  ;;  %v11638_v63 = vld [vmem:[#allocation109_spill] sm:$0xff] }
 0x432   :  { %11635 = vst [vmem:[#allocation155_spill] sm:$0xff] %v9711_v28  ;;  %v11639_v21 = vand.u32 4294901760, %v11638_v63  ;;  %v4243_v30 = vand.u32 4294901760, %v4242_v38 }
 0x433   :  { %v9708_v36 = vadd.f32 %v2955_v60, %v2792_v31 }
 0x434   :  { %v3344_v60 = vsub.f32 %v11638_v63, %v11639_v21  ;;  %v9733_v21 = vpop.f32.mrf.mxu0 }
 0x435   :  { %3338 = vmatmul.f32.gmra.mxu2 %v3337_v62  ;;  %3512 = vmatmul.f32.gmra.mxu3 %v11636_v6  ;;  %v9724_v62 = vsub.f32 %v2307_v56, %v9711_v28  ;;  %v11646_v56 = vld [vmem:[#allocation29_spill] sm:$0xff] }
 0x436   :  { %4236 = vmatmul.f32.gmra.mxu0 %v4235_v55  ;;  %4402 = vmatmul.f32.gmra.mxu1 %v9663_v7  ;;  %v11641_v55 = vld [vmem:[#allocation41_spill] sm:$0xff]  ;;  %v3345_v12 = vand.u32 4294901760, %v3344_v60  ;;  %v9735_v6 = vpop.f32.mrf.mxu1 }
 0x437   :  { %11640 = vst [vmem:[#allocation26_spill] sm:$0xff] %v9724_v62  ;;  %v2309_v59 = vsel %vm1333_vm0, %v11641_v55, 0  ;;  %v11265_v7 = vand.u32 4294901760, %v9724_v62 }
 0x438   :  { %v2796_v31 = vpop.f32.mrf.mxu2  ;;  %v2967_v51 = vpop.f32.mrf.mxu3  ;;  %v9731_v63 = vand.u32 4294901760, %v2309_v59  ;;  %11643 = vst [vmem:[#allocation41_spill] sm:$0xff] %v9733_v21 }
 0x439   :  { %v2797_v49 = vadd.f32 %v2796_v31, %v2656_v24  ;;  %11644 = vst [vmem:[#allocation156_spill] sm:$0xff] %v9735_v6  ;;  %v4250_v55 = vsub.f32 %v9724_v62, %v11265_v7  ;;  %v11655_v7 = vld [vmem:[#allocation30_spill] sm:$0xff] }
 0x43a   :  { %11642 = vst [vmem:[#allocation109_spill] sm:$0xff] %v9731_v63 }
 0x43b   :  { %v9728_v45 = vadd.f32 %v2961_v54, %v2797_v49  ;;  %v2660_v54 = vadd.f32 %v11646_v56, %v9149_v37  ;;  %v11647_v49 = vld [vmem:[#allocation111_spill] sm:$0xff]  ;;  %v4251_v56 = vand.u32 4294901760, %v4250_v55 }
 0x43c   :  { %v11648_v24 = vand.u32 4294901760, %v11647_v49 }
 0x43d   :  { %3346 = vmatmul.f32.gmra.mxu2 %v3345_v12  ;;  %3516 = vmatmul.f32.gmra.mxu3 %v11645_v13  ;;  %v9748_v12 = vsub.f32 %v2309_v59, %v9731_v63  ;;  %v11654_v59 = vld [vmem:[#allocation119_spill] sm:$0xff] }
 0x43e   :  { %4244 = vmatmul.f32.gmra.mxu0 %v4243_v30  ;;  %4406 = vmatmul.f32.gmra.mxu1 %v9687_v35  ;;  %v3352_v60 = vsub.f32 %v11647_v49, %v11648_v24  ;;  %v11650_v30 = vld [vmem:[#allocation50_spill] sm:$0xff] }
 0x43f   :  { %11649 = vst [vmem:[#allocation29_spill] sm:$0xff] %v9748_v12  ;;  %v2311_v25 = vsel %vm1333_vm0, %v11650_v30, 0  ;;  %v11653_v24 = vld [vmem:[#allocation114_spill] sm:$0xff]  ;;  %v9763_v30 = vpop.f32.mrf.mxu1 }
 0x440   :  { %v2801_v31 = vpop.f32.mrf.mxu2  ;;  %v2973_v38 = vpop.f32.mrf.mxu3  ;;  %v3353_v37 = vand.u32 4294901760, %v3352_v60  ;;  %v9755_v49 = vand.u32 4294901760, %v2311_v25  ;;  %11657 = vst [vmem:[#allocation30_spill] sm:$0xff] %v9763_v30 }
 0x441   :  { %v2802_v6 = vadd.f32 %v2801_v31, %v2660_v54  ;;  %v2664_v54 = vadd.f32 %v11655_v7, %v11654_v59  ;;  %v9761_v31 = vpop.f32.mrf.mxu0 }
 0x442   :  { %11652 = vst [vmem:[#allocation50_spill] sm:$0xff] %v9755_v49 }
 0x443   :  { %v9752_v21 = vadd.f32 %v2967_v51, %v2802_v6  ;;  %11656 = vst [vmem:[#allocation119_spill] sm:$0xff] %v9761_v31  ;;  %v11658_v6 = vld [vmem:[#allocation115_spill] sm:$0xff] }
 0x444   :  { %v11659_v51 = vand.u32 4294901760, %v11658_v6 }
 0x445   :  { %11651 = vst [vmem:[#allocation111_spill] sm:$0xff] %v9752_v21  ;;  %3354 = vmatmul.f32.gmra.mxu2 %v3353_v37  ;;  %3520 = vmatmul.f32.gmra.mxu3 %v11653_v24  ;;  %v11660_v37 = vand.u32 4294901760, %v9748_v12  ;;  %v11662_v24 = vld [vmem:[#allocation54_spill] sm:$0xff] }
 0x446   :  { %4252 = vmatmul.f32.gmra.mxu0 %v4251_v56  ;;  %4410 = vmatmul.f32.gmra.mxu1 %v9711_v28  ;;  %v3360_v60 = vsub.f32 %v11658_v6, %v11659_v51  ;;  %v9772_v56 = vsub.f32 %v2311_v25, %v9755_v49  ;;  %v2313_v7 = vsel %vm1333_vm0, %v11662_v24, 0  ;;  %v11665_v51 = vld [vmem:[#allocation118_spill] sm:$0xff]  ;;  %v11666_v25 = vld [vmem:[#allocation120_spill] sm:$0xff] }
 0x447   :  { %v4258_v62 = vsub.f32 %v9748_v12, %v11660_v37  ;;  %v9779_v6 = vand.u32 4294901760, %v2313_v7  ;;  %v11667_v37 = vand.u32 4294901760, %v11666_v25  ;;  %v11672_v12 = vld [vmem:[#allocation57_spill] sm:$0xff] }
 0x448   :  { %v2806_v55 = vpop.f32.mrf.mxu2  ;;  %v2979_v35 = vpop.f32.mrf.mxu3  ;;  %11661 = vst [vmem:[#allocation115_spill] sm:$0xff] %v9772_v56  ;;  %v3361_v30 = vand.u32 4294901760, %v3360_v60  ;;  %v11274_v13 = vand.u32 4294901760, %v9772_v56 }
 0x449   :  { %v2807_v28 = vadd.f32 %v2806_v55, %v2664_v54  ;;  %v4259_v31 = vand.u32 4294901760, %v4258_v62  ;;  %11664 = vst [vmem:[#allocation157_spill] sm:$0xff] %v9779_v6  ;;  %v3368_v54 = vsub.f32 %v11666_v25, %v11667_v37  ;;  %v9790_v62 = vsub.f32 %v2313_v7, %v9779_v6  ;;  %v11673_v37 = vld [vmem:[#allocation64_spill] sm:$0xff] }
 0x44b   :  { %v9776_v59 = vadd.f32 %v2973_v38, %v2807_v28  ;;  %v4266_v28 = vsub.f32 %v9772_v56, %v11274_v13  ;;  %11668 = vst [vmem:[#allocation120_spill] sm:$0xff] %v9790_v62  ;;  %v9792_v38 = vpop.f32.mrf.mxu0  ;;  %v3369_v25 = vand.u32 4294901760, %v3368_v54  ;;  %v11279_v13 = vand.u32 4294901760, %v9790_v62  ;;  %v11675_v56 = vld [vmem:[#allocation123_spill] sm:$0xff] }
 0x44c   :  { %11669 = vst [vmem:[#allocation158_spill] sm:$0xff] %v9792_v38 }
 0x44d   :  { %11663 = vst [vmem:[#allocation54_spill] sm:$0xff] %v9776_v59  ;;  %3362 = vmatmul.f32.gmra.mxu2 %v3361_v30  ;;  %3524 = vmatmul.f32.gmra.mxu3 %v11665_v51  ;;  %v9794_v30 = vpop.f32.mrf.mxu1  ;;  %v3004_v59 = vadd.f32 %v11673_v37, %v9217_v57  ;;  %v4267_v21 = vand.u32 4294901760, %v4266_v28  ;;  %v4274_v57 = vsub.f32 %v9790_v62, %v11279_v13  ;;  %v11679_v37 = vld [vmem:[#allocation58_spill] sm:$0xff] }
 0x44e   :  { %4260 = vmatmul.f32.gmra.mxu0 %v4259_v31  ;;  %4414 = vmatmul.f32.gmra.mxu1 %v9731_v63  ;;  %11670 = vst [vmem:[#allocation159_spill] sm:$0xff] %v9794_v30  ;;  %v11671_v31 = vld [vmem:[#allocation124_spill] sm:$0xff]  ;;  %v2315_v63 = vsel %vm1333_vm0, %v11672_v12, 0 }
 0x44f   :  { %v9804_v7 = vand.u32 4294901760, %v2315_v63 }
 0x450   :  { %v2811_v55 = vpop.f32.mrf.mxu2  ;;  %v3461_v24 = vpop.f32.mrf.mxu3 }
 0x451   :  { %v2812_v60 = vadd.f32 %v2811_v55, %v11671_v31  ;;  %11674 = vst [vmem:[#allocation124_spill] sm:$0xff] %v9804_v7  ;;  %v11676_v55 = vld [vmem:[#allocation63_spill] sm:$0xff]  ;;  %v9816_v28 = vsub.f32 %v2315_v63, %v9804_v7 }
 0x452   :  { %v3122_v31 = vadd.f32 %v11676_v55, %v3004_v59  ;;  %v11684_v63 = vld [vmem:[#allocation127_spill] sm:$0xff] }
 0x453   :  { %v9799_v51 = vadd.f32 %v2979_v35, %v2812_v60  ;;  %v11677_v35 = vand.u32 4294901760, %v9193_v44  ;;  %11678 = vst [vmem:[#allocation57_spill] sm:$0xff] %v9816_v28  ;;  %v9820_v30 = vpop.f32.mrf.mxu0  ;;  %v11284_v13 = vand.u32 4294901760, %v9816_v28 }
 0x454   :  { %11680 = vst [vmem:[#allocation64_spill] sm:$0xff] %v9820_v30 }
 0x455   :  { %3370 = vmatmul.f32.gmra.mxu2 %v3369_v25  ;;  %3528 = vmatmul.f32.gmra.mxu3 %v11675_v56  ;;  %v3376_v12 = vsub.f32 %v9193_v44, %v11677_v35  ;;  %v9822_v59 = vpop.f32.mrf.mxu1  ;;  %v11682_v35 = vld [vmem:[#allocation67_spill] sm:$0xff] }
 0x456   :  { %4268 = vmatmul.f32.gmra.mxu0 %v4267_v21  ;;  %4418 = vmatmul.f32.gmra.mxu1 %v9755_v49  ;;  %v2317_v21 = vsel %vm1333_vm0, %v11679_v37, 0  ;;  %11681 = vst [vmem:[#allocation123_spill] sm:$0xff] %v9822_v59  ;;  %v3008_v38 = vadd.f32 %v11682_v35, %v9239_v48  ;;  %v4275_v49 = vand.u32 4294901760, %v4274_v57  ;;  %v4282_v48 = vsub.f32 %v9816_v28, %v11284_v13  ;;  %v11688_v35 = vld [vmem:[#allocation65_spill] sm:$0xff] }
 0x457   :  { %v3377_v44 = vand.u32 4294901760, %v3376_v12  ;;  %v9829_v62 = vand.u32 4294901760, %v2317_v21  ;;  %v11699_v28 = vld [vmem:[#allocation77_spill] sm:$0xff] }
 0x458   :  { %v3243_v54 = vpop.f32.mrf.mxu2  ;;  %v3465_v60 = vpop.f32.mrf.mxu3 }
 0x459   :  { %v3244_v25 = vadd.f32 %v3243_v54, %v3122_v31  ;;  %11683 = vst [vmem:[#allocation63_spill] sm:$0xff] %v9829_v62  ;;  %v11685_v31 = vld [vmem:[#allocation66_spill] sm:$0xff]  ;;  %v9841_v57 = vsub.f32 %v2317_v21, %v9829_v62  ;;  %v11694_v21 = vld [vmem:[#allocation128_spill] sm:$0xff] }
 0x45a   :  { %v3126_v54 = vadd.f32 %v11685_v31, %v3008_v38  ;;  %v11690_v31 = vld [vmem:[#allocation69_spill] sm:$0xff] }
 0x45b   :  { %v9824_v55 = vadd.f32 %v3461_v24, %v3244_v25  ;;  %v11686_v24 = vand.u32 4294901760, %v9215_v1  ;;  %11687 = vst [vmem:[#allocation58_spill] sm:$0xff] %v9841_v57  ;;  %v3012_v30 = vadd.f32 %v11690_v31, %v9261_v15 }
 0x45d   :  { %3378 = vmatmul.f32.gmra.mxu2 %v3377_v44  ;;  %3532 = vmatmul.f32.gmra.mxu3 %v11684_v63  ;;  %v3384_v12 = vsub.f32 %v9215_v1, %v11686_v24  ;;  %v4283_v1 = vand.u32 4294901760, %v4282_v48  ;;  %v11289_v24 = vand.u32 4294901760, %v9841_v57  ;;  %v9852_v63 = vpop.f32.mrf.mxu0  ;;  %v9854_v13 = vpop.f32.mrf.mxu1 }
 0x45e   :  { %4276 = vmatmul.f32.gmra.mxu0 %v4275_v49  ;;  %4422 = vmatmul.f32.gmra.mxu1 %v9779_v6  ;;  %v2319_v49 = vsel %vm1333_vm0, %v11688_v35, 0  ;;  %11692 = vst [vmem:[#allocation65_spill] sm:$0xff] %v9852_v63  ;;  %v11702_v63 = vld [vmem:[#allocation71_spill] sm:$0xff] }
 0x45f   :  { %v3385_v38 = vand.u32 4294901760, %v3384_v12  ;;  %v9850_v6 = vand.u32 4294901760, %v2319_v49  ;;  %11693 = vst [vmem:[#allocation69_spill] sm:$0xff] %v9854_v13  ;;  %v11696_v12 = vld [vmem:[#allocation39_spill] sm:$0xff]  ;;  %v4290_v35 = vsub.f32 %v9841_v57, %v11289_v24  ;;  %v11704_v24 = vld [vmem:[#allocation130_spill] sm:$0xff] }
 0x460   :  { %v3251_v25 = vpop.f32.mrf.mxu2  ;;  %v3469_v37 = vpop.f32.mrf.mxu3 }
 0x461   :  { %v3252_v44 = vadd.f32 %v3251_v25, %v3126_v54  ;;  %11691 = vst [vmem:[#allocation66_spill] sm:$0xff] %v9850_v6  ;;  %v11697_v25 = vand.u32 4294901760, %v11696_v12  ;;  %v9866_v31 = vsub.f32 %v2319_v49, %v9850_v6  ;;  %v2219_v49 = vld.sshfl [vmem:[#allocation1 + $0x30] sm:$0xff pattern:$0x73625140] }
 0x463   :  { %v9845_v59 = vadd.f32 %v3465_v60, %v3252_v44  ;;  %v11695_v60 = vld [vmem:[#allocation68_spill] sm:$0xff]  ;;  %v3392_v15 = vsub.f32 %v11696_v12, %v11697_v25  ;;  %v4291_v12 = vand.u32 4294901760, %v4290_v35  ;;  %v11294_v25 = vand.u32 4294901760, %v9866_v31 }
 0x464   :  { %v3130_v54 = vadd.f32 %v11695_v60, %v3012_v30  ;;  %11698 = vst [vmem:[#allocation68_spill] sm:$0xff] %v9866_v31  ;;  %v11701_v60 = vld [vmem:[#allocation43_spill] sm:$0xff] }
 0x465   :  { %11689 = vst [vmem:[#allocation67_spill] sm:$0xff] %v9845_v59  ;;  %3386 = vmatmul.f32.gmra.mxu2 %v3385_v38  ;;  %3536 = vmatmul.f32.gmra.mxu3 %v11694_v21  ;;  %v3393_v30 = vand.u32 4294901760, %v3392_v15  ;;  %v11713_v59 = vld [vmem:[#allocation132_spill] sm:$0xff] }
 0x466   :  { %4284 = vmatmul.f32.gmra.mxu0 %v4283_v1  ;;  %4426 = vmatmul.f32.gmra.mxu1 %v9804_v7  ;;  %v2321_v1 = vsel %vm1333_vm0, %v11699_v28, 0  ;;  %v3016_v7 = vadd.f32 %v11702_v63, %v11701_v60  ;;  %v9881_v28 = vpop.f32.mrf.mxu1 }
 0x467   :  { %v9875_v21 = vand.u32 4294901760, %v2321_v1  ;;  %11706 = vst [vmem:[#allocation71_spill] sm:$0xff] %v9881_v28 }
 0x468   :  { %v3259_v48 = vpop.f32.mrf.mxu2  ;;  %v3473_v44 = vpop.f32.mrf.mxu3 }
 0x469   :  { %v3260_v38 = vadd.f32 %v3259_v48, %v3130_v54  ;;  %11703 = vst [vmem:[#allocation77_spill] sm:$0xff] %v9875_v21  ;;  %v9879_v54 = vpop.f32.mrf.mxu0  ;;  %v11708_v48 = vld [vmem:[#allocation42_spill] sm:$0xff] }
 0x46a   :  { %11705 = vst [vmem:[#allocation43_spill] sm:$0xff] %v9879_v54  ;;  %v11709_v63 = vand.u32 4294901760, %v11708_v48  ;;  %v2323_v54 = vsel %vm1333_vm0, %v2219_v49, 0 }
 0x46b   :  { %v9870_v13 = vadd.f32 %v3469_v37, %v3260_v38  ;;  %v11707_v37 = vld [vmem:[#allocation70_spill] sm:$0xff] }
 0x46c   :  { %v3134_v15 = vadd.f32 %v11707_v37, %v3016_v7  ;;  %v3400_v35 = vsub.f32 %v11708_v48, %v11709_v63  ;;  %v11711_v7 = vld [vmem:[#allocation45_spill] sm:$0xff]  ;;  %v9899_v63 = vand.u32 4294901760, %v2323_v54 }
 0x46d   :  { %11700 = vst [vmem:[#allocation39_spill] sm:$0xff] %v9870_v13  ;;  %3394 = vmatmul.f32.gmra.mxu2 %v3393_v30  ;;  %3540 = vmatmul.f32.gmra.mxu3 %v11704_v24  ;;  %v4298_v30 = vsub.f32 %v9866_v31, %v11294_v25  ;;  %v11712_v37 = vld [vmem:[#allocation73_spill] sm:$0xff] }
 0x46e   :  { %4292 = vmatmul.f32.gmra.mxu0 %v4291_v12  ;;  %4430 = vmatmul.f32.gmra.mxu1 %v9829_v62  ;;  %v9891_v12 = vsub.f32 %v2321_v1, %v9875_v21  ;;  %v3401_v28 = vand.u32 4294901760, %v3400_v35  ;;  %v3020_v24 = vadd.f32 %v11712_v37, %v11711_v7  ;;  %v2226_v1 = vld.sshfl [vmem:[#allocation1 + $0x10] sm:$0xff pattern:$0x73625140] }
 0x46f   :  { %v4299_v13 = vand.u32 4294901760, %v4298_v30 }
 0x470   :  { %v3267_v38 = vpop.f32.mrf.mxu2  ;;  %v3477_v60 = vpop.f32.mrf.mxu3  ;;  %11710 = vst [vmem:[#allocation70_spill] sm:$0xff] %v9891_v12  ;;  %v11299_v48 = vand.u32 4294901760, %v9891_v12 }
 0x471   :  { %v3268_v57 = vadd.f32 %v3267_v38, %v3134_v15  ;;  %v11714_v15 = vld [vmem:[#allocation72_spill] sm:$0xff]  ;;  %v9913_v37 = vpop.f32.mrf.mxu0 }
 0x472   :  { %v3138_v49 = vadd.f32 %v11714_v15, %v3020_v24  ;;  %v4306_v30 = vsub.f32 %v9891_v12, %v11299_v48  ;;  %11718 = vst [vmem:[#allocation45_spill] sm:$0xff] %v9913_v37  ;;  %v2325_v24 = vsel %vm1333_vm0, %v2226_v1, 0  ;;  %v11723_v1 = vld [vmem:[#allocation46_spill] sm:$0xff] }
 0x473   :  { %v9894_v62 = vadd.f32 %v3473_v44, %v3268_v57  ;;  %v11715_v57 = vld [vmem:[#allocation44_spill] sm:$0xff]  ;;  %v9923_v48 = vand.u32 4294901760, %v2325_v24 }
 0x474   :  { %v11716_v44 = vand.u32 4294901760, %v11715_v57 }
 0x475   :  { %3402 = vmatmul.f32.gmra.mxu2 %v3401_v28  ;;  %3544 = vmatmul.f32.gmra.mxu3 %v11713_v59  ;;  %v9911_v28 = vsub.f32 %v2323_v54, %v9899_v63  ;;  %v11721_v54 = vld [vmem:[#allocation135_spill] sm:$0xff] }
 0x476   :  { %4300 = vmatmul.f32.gmra.mxu0 %v4299_v13  ;;  %4434 = vmatmul.f32.gmra.mxu1 %v9850_v6  ;;  %v3408_v35 = vsub.f32 %v11715_v57, %v11716_v44  ;;  %v9915_v13 = vpop.f32.mrf.mxu1  ;;  %v11720_v57 = vld [vmem:[#allocation75_spill] sm:$0xff]  ;;  %v4307_v6 = vand.u32 4294901760, %v4306_v30  ;;  %v9935_v30 = vsub.f32 %v2325_v24, %v9923_v48  ;;  %v11729_v24 = vld [vmem:[#allocation76_spill] sm:$0xff] }
 0x477   :  { %11717 = vst [vmem:[#allocation42_spill] sm:$0xff] %v9911_v28  ;;  %v3024_v44 = vadd.f32 %v11720_v57, %v9340_v41  ;;  %v11304_v59 = vand.u32 4294901760, %v9911_v28 }
 0x478   :  { %v3275_v38 = vpop.f32.mrf.mxu2  ;;  %v3481_v7 = vpop.f32.mrf.mxu3  ;;  %11719 = vst [vmem:[#allocation73_spill] sm:$0xff] %v9915_v13  ;;  %v3409_v31 = vand.u32 4294901760, %v3408_v35  ;;  %v11307_v37 = vand.u32 4294901760, %v9935_v30 }
 0x479   :  { %v3276_v25 = vadd.f32 %v3275_v38, %v3138_v49  ;;  %v11722_v49 = vld [vmem:[#allocation74_spill] sm:$0xff]  ;;  %v4314_v41 = vsub.f32 %v9911_v28, %v11304_v59  ;;  %v9937_v57 = vpop.f32.mrf.mxu0 }
 0x47a   :  { %v3142_v38 = vadd.f32 %v11722_v49, %v3024_v44  ;;  %11725 = vst [vmem:[#allocation72_spill] sm:$0xff] %v9937_v57  ;;  %v11727_v49 = vld [vmem:[#allocation78_spill] sm:$0xff] }
 0x47b   :  { %v9918_v15 = vadd.f32 %v3477_v60, %v3276_v25  ;;  %v11724_v25 = vand.u32 4294901760, %v11723_v1 }
 0x47d   :  { %3410 = vmatmul.f32.gmra.mxu2 %v3409_v31  ;;  %3548 = vmatmul.f32.gmra.mxu3 %v11721_v54  ;;  %v3416_v60 = vsub.f32 %v11723_v1, %v11724_v25  ;;  %v3028_v1 = vadd.f32 %v11727_v49, %v9367_v29  ;;  %v4315_v25 = vand.u32 4294901760, %v4314_v41  ;;  %v4322_v29 = vsub.f32 %v9935_v30, %v11307_v37 }
 0x47e   :  { %4308 = vmatmul.f32.gmra.mxu0 %v4307_v6  ;;  %4438 = vmatmul.f32.gmra.mxu1 %v9875_v21  ;;  %v9939_v6 = vpop.f32.mrf.mxu1  ;;  %v11728_v21 = vld [vmem:[#allocation138_spill] sm:$0xff] }
 0x47f   :  { %11726 = vst [vmem:[#allocation44_spill] sm:$0xff] %v9939_v6  ;;  %v3417_v44 = vand.u32 4294901760, %v3416_v60  ;;  %v4323_v6 = vand.u32 4294901760, %v4322_v29 }
 0x480   :  { %v3283_v35 = vpop.f32.mrf.mxu2  ;;  %v3485_v12 = vpop.f32.mrf.mxu3 }
 0x481   :  { %v3284_v31 = vadd.f32 %v3283_v35, %v3142_v38  ;;  %v3146_v38 = vadd.f32 %v11729_v24, %v3028_v1  ;;  %v11730_v35 = vld [vmem:[#allocation48_spill] sm:$0xff]  ;;  %v9959_v57 = vpop.f32.mrf.mxu0 }
 0x482   :  { %v11731_v59 = vand.u32 4294901760, %v11730_v35 }
 0x483   :  { %v9941_v13 = vadd.f32 %v3481_v7, %v3284_v31 }
 0x484   :  { %v3424_v7 = vsub.f32 %v11730_v35, %v11731_v59  ;;  %v11733_v59 = vld [vmem:[#allocation79_spill] sm:$0xff] }
 0x485   :  { %3418 = vmatmul.f32.gmra.mxu2 %v3417_v44  ;;  %3552 = vmatmul.f32.gmra.mxu3 %v11728_v21 }
 0x486   :  { %4316 = vmatmul.f32.gmra.mxu0 %v4315_v25  ;;  %4442 = vmatmul.f32.gmra.mxu1 %v9899_v63  ;;  %v3425_v44 = vand.u32 4294901760, %v3424_v7  ;;  %v11732_v25 = vld [vmem:[#allocation80_spill] sm:$0xff]  ;;  %v9961_v1 = vpop.f32.mrf.mxu1 }
 0x487   :  { %v3032_v28 = vadd.f32 %v11732_v25, %v9393_v50  ;;  %v11736_v25 = vld [vmem:[#allocation82_spill] sm:$0xff] }
 0x488   :  { %v3291_v31 = vpop.f32.mrf.mxu2  ;;  %v3489_v60 = vpop.f32.mrf.mxu3 }
 0x489   :  { %v3292_v41 = vadd.f32 %v3291_v31, %v3146_v38  ;;  %v3150_v24 = vadd.f32 %v11733_v59, %v3032_v28  ;;  %v11734_v38 = vld [vmem:[#allocation49_spill] sm:$0xff]  ;;  %v9976_v28 = vpop.f32.mrf.mxu0 }
 0x48a   :  { %v11737_v59 = vld [vmem:[#allocation81_spill] sm:$0xff] }
 0x48b   :  { %v9955_v49 = vadd.f32 %v3485_v12, %v3292_v41  ;;  %v11735_v12 = vand.u32 4294901760, %v11734_v38 }
 0x48d   :  { %3426 = vmatmul.f32.gmra.mxu2 %v3425_v44  ;;  %3556 = vmatmul.f32.gmra.mxu3 %v9347_v43  ;;  %v3432_v35 = vsub.f32 %v11734_v38, %v11735_v12  ;;  %v3036_v44 = vadd.f32 %v11736_v25, %v9419_v20  ;;  %v11738_v20 = vld [vmem:[#allocation84_spill] sm:$0xff] }
 0x48e   :  { %4324 = vmatmul.f32.gmra.mxu0 %v4323_v6  ;;  %4446 = vmatmul.f32.gmra.mxu1 %v9923_v48  ;;  %v9978_v6 = vpop.f32.mrf.mxu1 }
 0x48f   :  { %v3433_v41 = vand.u32 4294901760, %v3432_v35  ;;  %v3154_v38 = vadd.f32 %v11737_v59, %v3036_v44 }
 0x490   :  { %v3299_v7 = vpop.f32.mrf.mxu2  ;;  %v3493_v31 = vpop.f32.mrf.mxu3 }
 0x491   :  { %v3300_v50 = vadd.f32 %v3299_v7, %v3150_v24  ;;  %v3040_v7 = vadd.f32 %v11738_v20, %v9444_v10  ;;  %v9990_v44 = vpop.f32.mrf.mxu0  ;;  %v11740_v10 = vld [vmem:[#allocation86_spill] sm:$0xff] }
 0x493   :  { %v9969_v29 = vadd.f32 %v3489_v60, %v3300_v50 }
 0x495   :  { %3434 = vmatmul.f32.gmra.mxu2 %v3433_v41  ;;  %4010 = vmatmul.f32.vlgmr.msrb.gmra.mxu3 %v8849_v19 }
 0x496   :  { %4782 = vmatmul.f32.vlgmr.msra.gmra.mxu0 %v9349_v53  ;;  %4900 = vmatmul.f32.vlgmr.msra.gmra.mxu1 %v9349_v53  ;;  %v11739_v53 = vld [vmem:[#allocation83_spill] sm:$0xff]  ;;  %v9992_v59 = vpop.f32.mrf.mxu1 }
 0x497   :  { %v3158_v50 = vadd.f32 %v11739_v53, %v3040_v7 }
 0x498   :  { %v3307_v24 = vpop.f32.mrf.mxu2  ;;  %v3497_v60 = vpop.f32.mrf.mxu3 }
 0x499   :  { %v3308_v12 = vadd.f32 %v3307_v24, %v3154_v38  ;;  %v10003_v53 = vpop.f32.mrf.mxu0 }
 0x49b   :  { %v9981_v35 = vadd.f32 %v3493_v31, %v3308_v12 }
 0x49d   :  { %3892 = vmatmul.f32.vlgmr.msrb.gmra.mxu2 %v8849_v19  ;;  %4014 = vmatmul.f32.gmra.mxu3 %v8867_v33  ;;  %v3044_v19 = vadd.f32 %v11740_v10, %v9468_v11  ;;  %v11742_v11 = vld [vmem:[#allocation88_spill] sm:$0xff] }
 0x49e   :  { %4786 = vmatmul.f32.gmra.mxu0 %v9375_v46  ;;  %4904 = vmatmul.f32.gmra.mxu1 %v9375_v46  ;;  %v11741_v46 = vld [vmem:[#allocation85_spill] sm:$0xff] }
 0x49f   :  { %v3162_v24 = vadd.f32 %v11741_v46, %v3044_v19 }
 0x4a0   :  { %v3315_v41 = vpop.f32.mrf.mxu2  ;;  %v3501_v25 = vpop.f32.mrf.mxu3 }
 0x4a1   :  { %v3316_v31 = vadd.f32 %v3315_v41, %v3158_v50 }
 0x4a3   :  { %v9994_v38 = vadd.f32 %v3497_v60, %v3316_v31  ;;  %v10005_v60 = vpop.f32.mrf.mxu1 }
 0x4a5   :  { %3896 = vmatmul.f32.gmra.mxu2 %v8867_v33  ;;  %4018 = vmatmul.f32.gmra.mxu3 %v8885_v4  ;;  %v3048_v33 = vadd.f32 %v11742_v11, %v9492_v61 }
 0x4a6   :  { %4790 = vmatmul.f32.gmra.mxu0 %v9400_v18  ;;  %4908 = vmatmul.f32.gmra.mxu1 %v9400_v18  ;;  %v11743_v18 = vld [vmem:[#allocation87_spill] sm:$0xff] }
 0x4a7   :  { %v3166_v41 = vadd.f32 %v11743_v18, %v3048_v33 }
 0x4a8   :  { %v3323_v12 = vpop.f32.mrf.mxu2  ;;  %v3505_v20 = vpop.f32.mrf.mxu3 }
 0x4a9   :  { %v3324_v7 = vadd.f32 %v3323_v12, %v3162_v24  ;;  %v10020_v12 = vpop.f32.mrf.mxu0 }
 0x4ab   :  { %v10007_v50 = vadd.f32 %v3501_v25, %v3324_v7  ;;  %v11744_v25 = vld [vmem:[#allocation90_spill] sm:$0xff]  ;;  %v10022_v61 = vpop.f32.mrf.mxu1 }
 0x4ac   :  { %v3052_v24 = vadd.f32 %v11744_v25, %v9516_v23  ;;  %v11746_v23 = vld [vmem:[#allocation92_spill] sm:$0xff] }
 0x4ad   :  { %3900 = vmatmul.f32.gmra.mxu2 %v8885_v4  ;;  %4022 = vmatmul.f32.gmra.mxu3 %v8903_v40  ;;  %v11745_v4 = vld [vmem:[#allocation89_spill] sm:$0xff]  ;;  %v3056_v18 = vadd.f32 %v11746_v23, %v9540_v32  ;;  %v11748_v32 = vld [vmem:[#allocation94_spill] sm:$0xff] }
 0x4ae   :  { %4794 = vmatmul.f32.gmra.mxu0 %v9426_v34  ;;  %4912 = vmatmul.f32.gmra.mxu1 %v9426_v34  ;;  %v3170_v34 = vadd.f32 %v11745_v4, %v3052_v24 }
 0x4b0   :  { %v3331_v31 = vpop.f32.mrf.mxu2  ;;  %v3509_v10 = vpop.f32.mrf.mxu3 }
 0x4b1   :  { %v3332_v19 = vadd.f32 %v3331_v31, %v3166_v41  ;;  %v11747_v41 = vld [vmem:[#allocation91_spill] sm:$0xff] }
 0x4b2   :  { %v3174_v31 = vadd.f32 %v11747_v41, %v3056_v18 }
 0x4b3   :  { %v10016_v46 = vadd.f32 %v3505_v20, %v3332_v19 }
 0x4b5   :  { %3904 = vmatmul.f32.gmra.mxu2 %v8903_v40  ;;  %4026 = vmatmul.f32.gmra.mxu3 %v8921_v9  ;;  %v10037_v40 = vpop.f32.mrf.mxu0 }
 0x4b6   :  { %4798 = vmatmul.f32.gmra.mxu0 %v9451_v26  ;;  %4916 = vmatmul.f32.gmra.mxu1 %v9451_v26  ;;  %v10039_v26 = vpop.f32.mrf.mxu1 }
 0x4b8   :  { %v3339_v7 = vpop.f32.mrf.mxu2  ;;  %v3513_v20 = vpop.f32.mrf.mxu3 }
 0x4b9   :  { %v3340_v11 = vadd.f32 %v3339_v7, %v3170_v34 }
 0x4bb   :  { %v10029_v33 = vadd.f32 %v3509_v10, %v3340_v11 }
 0x4bd   :  { %3908 = vmatmul.f32.gmra.mxu2 %v8921_v9  ;;  %4030 = vmatmul.f32.gmra.mxu3 %v8939_v16  ;;  %v3060_v9 = vadd.f32 %v11748_v32, %v9564_v8  ;;  %v10051_v11 = vpop.f32.mrf.mxu0  ;;  %v11752_v8 = vld [vmem:[#allocation96_spill] sm:$0xff] }
 0x4be   :  { %4802 = vmatmul.f32.gmra.mxu0 %v9475_v3  ;;  %4920 = vmatmul.f32.gmra.mxu1 %v9475_v3  ;;  %v11749_v3 = vld [vmem:[#allocation93_spill] sm:$0xff]  ;;  %11750 = vst [vmem:[#allocation75_spill] sm:$0xff] %v10051_v11  ;;  %v10053_v23 = vpop.f32.mrf.mxu1 }
 0x4bf   :  { %v3178_v4 = vadd.f32 %v11749_v3, %v3060_v9  ;;  %11751 = vst [vmem:[#allocation135_spill] sm:$0xff] %v10053_v23  ;;  %v11941_v23 = vld [vmem:[#allocation68_spill] sm:$0xff] }
 0x4c0   :  { %v3347_v19 = vpop.f32.mrf.mxu2  ;;  %v3517_v10 = vpop.f32.mrf.mxu3  ;;  %v11942_v11 = vand.u32 4294901760, %v11941_v23 }
 0x4c1   :  { %v3348_v25 = vadd.f32 %v3347_v19, %v3174_v31 }
 0x4c3   :  { %v10042_v24 = vadd.f32 %v3513_v20, %v3348_v25 }
 0x4c5   :  { %3912 = vmatmul.f32.gmra.mxu2 %v8939_v16  ;;  %4034 = vmatmul.f32.gmra.mxu3 %v8957_v5  ;;  %v3064_v16 = vadd.f32 %v11752_v8, %v9588_v47  ;;  %v10064_v32 = vpop.f32.mrf.mxu0  ;;  %v11756_v47 = vld [vmem:[#allocation97_spill] sm:$0xff] }
 0x4c6   :  { %4806 = vmatmul.f32.gmra.mxu0 %v9499_v52  ;;  %4924 = vmatmul.f32.gmra.mxu1 %v9499_v52  ;;  %v11753_v52 = vld [vmem:[#allocation95_spill] sm:$0xff]  ;;  %11754 = vst [vmem:[#allocation74_spill] sm:$0xff] %v10064_v32 }
 0x4c7   :  { %v3182_v41 = vadd.f32 %v11753_v52, %v3064_v16 }
 0x4c8   :  { %v3355_v34 = vpop.f32.mrf.mxu2  ;;  %v3521_v7 = vpop.f32.mrf.mxu3 }
 0x4c9   :  { %v3356_v20 = vadd.f32 %v3355_v34, %v3178_v4 }
 0x4cb   :  { %v10055_v18 = vadd.f32 %v3517_v10, %v3356_v20  ;;  %v10066_v10 = vpop.f32.mrf.mxu1 }
 0x4cc   :  { %11755 = vst [vmem:[#allocation46_spill] sm:$0xff] %v10066_v10 }
 0x4cd   :  { %3916 = vmatmul.f32.gmra.mxu2 %v8957_v5  ;;  %4038 = vmatmul.f32.gmra.mxu3 %v8975_v27  ;;  %v3068_v5 = vadd.f32 %v11756_v47, %v9612_v17  ;;  %v10081_v52 = vpop.f32.mrf.mxu0  ;;  %v11763_v47 = vld [vmem:[#allocation13_spill] sm:$0xff] }
 0x4ce   :  { %4810 = vmatmul.f32.gmra.mxu0 %v9523_v2  ;;  %4928 = vmatmul.f32.gmra.mxu1 %v9523_v2  ;;  %v11757_v2 = vld [vmem:[#allocation8_spill] sm:$0xff]  ;;  %11759 = vst [vmem:[#allocation78_spill] sm:$0xff] %v10081_v52 }
 0x4cf   :  { %v3186_v3 = vadd.f32 %v11757_v2, %v3068_v5  ;;  %v11764_v2 = vld [vmem:[#allocation19_spill] sm:$0xff] }
 0x4d0   :  { %v3363_v31 = vpop.f32.mrf.mxu2  ;;  %v3525_v19 = vpop.f32.mrf.mxu3 }
 0x4d1   :  { %v3364_v25 = vadd.f32 %v3363_v31, %v3182_v41 }
 0x4d3   :  { %v10068_v9 = vadd.f32 %v3521_v7, %v3364_v25  ;;  %v11758_v7 = vld [vmem:[#allocation9_spill] sm:$0xff]  ;;  %v10083_v17 = vpop.f32.mrf.mxu1 }
 0x4d4   :  { %v3072_v16 = vadd.f32 %v11758_v7, %v9636_v58  ;;  %11760 = vst [vmem:[#allocation138_spill] sm:$0xff] %v10083_v17  ;;  %v11762_v58 = vld [vmem:[#allocation34_spill] sm:$0xff] }
 0x4d5   :  { %3920 = vmatmul.f32.gmra.mxu2 %v8975_v27  ;;  %4042 = vmatmul.f32.gmra.mxu3 %v8993_v39  ;;  %v11761_v27 = vld [vmem:[#allocation11_spill] sm:$0xff]  ;;  %v3076_v5 = vadd.f32 %v11763_v47, %v11762_v58  ;;  %v11772_v58 = vld [vmem:[#allocation98_spill] sm:$0xff] }
 0x4d6   :  { %4814 = vmatmul.f32.gmra.mxu0 %v9547_v22  ;;  %4932 = vmatmul.f32.gmra.mxu1 %v9547_v22  ;;  %v3190_v22 = vadd.f32 %v11761_v27, %v3072_v16 }
 0x4d8   :  { %v3371_v4 = vpop.f32.mrf.mxu2  ;;  %v3529_v34 = vpop.f32.mrf.mxu3 }
 0x4d9   :  { %v3372_v20 = vadd.f32 %v3371_v4, %v3186_v3  ;;  %v10098_v3 = vpop.f32.mrf.mxu0  ;;  %v11768_v4 = vld [vmem:[#allocation15_spill] sm:$0xff] }
 0x4da   :  { %11766 = vst [vmem:[#allocation76_spill] sm:$0xff] %v10098_v3 }
 0x4db   :  { %v10077_v8 = vadd.f32 %v3525_v19, %v3372_v20  ;;  %v3194_v20 = vadd.f32 %v11768_v4, %v3076_v5 }
 0x4dd   :  { %3924 = vmatmul.f32.gmra.mxu2 %v8993_v39  ;;  %4046 = vmatmul.f32.gmra.mxu3 %v9013_v0  ;;  %v11765_v39 = vld [vmem:[#allocation150_spill] sm:$0xff] }
 0x4de   :  { %4818 = vmatmul.f32.gmra.mxu0 %v9571_v14  ;;  %4936 = vmatmul.f32.gmra.mxu1 %v9571_v14  ;;  %v10100_v14 = vpop.f32.mrf.mxu1 }
 0x4df   :  { %11767 = vst [vmem:[#allocation48_spill] sm:$0xff] %v10100_v14  ;;  %v11801_v14 = vld [vmem:[#allocation109_spill] sm:$0xff] }
 0x4e0   :  { %v3379_v41 = vpop.f32.mrf.mxu2  ;;  %v3533_v31 = vpop.f32.mrf.mxu3 }
 0x4e1   :  { %v3380_v19 = vadd.f32 %v3379_v41, %v3190_v22  ;;  %v11769_v22 = vld [vmem:[#allocation14_spill] sm:$0xff]  ;;  %v11770_v41 = vld [vmem:[#allocation23_spill] sm:$0xff]  ;;  %v10112_v4 = vpop.f32.mrf.mxu0 }
 0x4e2   :  { %11773 = vst [vmem:[#allocation80_spill] sm:$0xff] %v10112_v4 }
 0x4e3   :  { %v10090_v25 = vadd.f32 %v3529_v34, %v3380_v19  ;;  %v11771_v19 = vld [vmem:[#allocation24_spill] sm:$0xff] }
 0x4e5   :  { %3928 = vmatmul.f32.gmra.mxu2 %v9013_v0  ;;  %4050 = vmatmul.f32.gmra.mxu3 %v11764_v2  ;;  %v3080_v0 = vadd.f32 %v11769_v22, %v9684_v42  ;;  %v11775_v42 = vld [vmem:[#allocation100_spill] sm:$0xff] }
 0x4e6   :  { %4822 = vmatmul.f32.gmra.mxu0 %v11765_v39  ;;  %4940 = vmatmul.f32.gmra.mxu1 %v11765_v39  ;;  %v11777_v22 = vld [vmem:[#allocation28_spill] sm:$0xff] }
 0x4e7   :  { %v3198_v47 = vadd.f32 %v11772_v58, %v3080_v0  ;;  %v11778_v0 = vld [vmem:[#allocation101_spill] sm:$0xff] }
 0x4e8   :  { %v3387_v7 = vpop.f32.mrf.mxu2  ;;  %v3537_v34 = vpop.f32.mrf.mxu3 }
 0x4e9   :  { %v3388_v16 = vadd.f32 %v3387_v7, %v3194_v20  ;;  %v10114_v20 = vpop.f32.mrf.mxu1 }
 0x4ea   :  { %11774 = vst [vmem:[#allocation79_spill] sm:$0xff] %v10114_v20  ;;  %v10125_v20 = vpop.f32.mrf.mxu0 }
 0x4eb   :  { %v10103_v27 = vadd.f32 %v3533_v31, %v3388_v16  ;;  %v11776_v16 = vld [vmem:[#allocation27_spill] sm:$0xff]  ;;  %11779 = vst [vmem:[#allocation49_spill] sm:$0xff] %v10125_v20 }
 0x4ed   :  { %3932 = vmatmul.f32.gmra.mxu2 %v11764_v2  ;;  %4054 = vmatmul.f32.gmra.mxu3 %v11770_v41  ;;  %v3084_v2 = vadd.f32 %v11775_v42, %v9708_v36  ;;  %v11781_v36 = vld [vmem:[#allocation25_spill] sm:$0xff]  ;;  %v11784_v42 = vld [vmem:[#allocation107_spill] sm:$0xff] }
 0x4ee   :  { %4826 = vmatmul.f32.gmra.mxu0 %v11771_v19  ;;  %4944 = vmatmul.f32.gmra.mxu1 %v11771_v19 }
 0x4ef   :  { %v3202_v19 = vadd.f32 %v11778_v0, %v3084_v2 }
 0x4f0   :  { %v3395_v39 = vpop.f32.mrf.mxu2  ;;  %v3541_v5 = vpop.f32.mrf.mxu3 }
 0x4f1   :  { %v3396_v31 = vadd.f32 %v3395_v39, %v3198_v47  ;;  %v11782_v39 = vld [vmem:[#allocation33_spill] sm:$0xff] }
 0x4f2   :  { %v10142_v20 = vpop.f32.mrf.mxu0 }
 0x4f3   :  { %v10116_v7 = vadd.f32 %v3537_v34, %v3396_v31  ;;  %v10127_v34 = vpop.f32.mrf.mxu1  ;;  %v11783_v31 = vld [vmem:[#allocation154_spill] sm:$0xff]  ;;  %11787 = vst [vmem:[#allocation81_spill] sm:$0xff] %v10142_v20 }
 0x4f4   :  { %11780 = vst [vmem:[#allocation82_spill] sm:$0xff] %v10127_v34 }
 0x4f5   :  { %3936 = vmatmul.f32.gmra.mxu2 %v11770_v41  ;;  %4058 = vmatmul.f32.gmra.mxu3 %v11776_v16  ;;  %v3088_v41 = vadd.f32 %v11781_v36, %v9728_v45  ;;  %v11790_v36 = vld [vmem:[#allocation32_spill] sm:$0xff] }
 0x4f6   :  { %4830 = vmatmul.f32.gmra.mxu0 %v11777_v22  ;;  %4948 = vmatmul.f32.gmra.mxu1 %v11777_v22 }
 0x4f7   :  { %v3206_v2 = vadd.f32 %v11784_v42, %v3088_v41  ;;  %v11791_v41 = vld [vmem:[#allocation110_spill] sm:$0xff] }
 0x4f8   :  { %v3403_v58 = vpop.f32.mrf.mxu2  ;;  %v3545_v37 = vpop.f32.mrf.mxu3 }
 0x4f9   :  { %v3404_v4 = vadd.f32 %v3403_v58, %v3202_v19 }
 0x4fa   :  { %v10159_v20 = vpop.f32.mrf.mxu0 }
 0x4fb   :  { %v10129_v47 = vadd.f32 %v3541_v5, %v3404_v4  ;;  %v11785_v5 = vld [vmem:[#allocation111_spill] sm:$0xff]  ;;  %v11786_v4 = vld [vmem:[#allocation108_spill] sm:$0xff]  ;;  %v10144_v45 = vpop.f32.mrf.mxu1  ;;  %11796 = vst [vmem:[#allocation83_spill] sm:$0xff] %v10159_v20 }
 0x4fc   :  { %v3092_v34 = vadd.f32 %v11786_v4, %v11785_v5  ;;  %11788 = vst [vmem:[#allocation84_spill] sm:$0xff] %v10144_v45  ;;  %v11793_v5 = vld [vmem:[#allocation112_spill] sm:$0xff]  ;;  %v11794_v45 = vld [vmem:[#allocation114_spill] sm:$0xff] }
 0x4fd   :  { %3940 = vmatmul.f32.gmra.mxu2 %v11776_v16  ;;  %4062 = vmatmul.f32.gmra.mxu3 %v11782_v39  ;;  %v11789_v16 = vld [vmem:[#allocation31_spill] sm:$0xff] }
 0x4fe   :  { %4834 = vmatmul.f32.gmra.mxu0 %v11783_v31  ;;  %4952 = vmatmul.f32.gmra.mxu1 %v11783_v31  ;;  %v3210_v31 = vadd.f32 %v11791_v41, %v3092_v34  ;;  %v11798_v34 = vld [vmem:[#allocation113_spill] sm:$0xff] }
 0x500   :  { %v3411_v22 = vpop.f32.mrf.mxu2  ;;  %v3549_v0 = vpop.f32.mrf.mxu3 }
 0x501   :  { %v3412_v19 = vadd.f32 %v3411_v22, %v3206_v2 }
 0x503   :  { %v10138_v58 = vadd.f32 %v3545_v37, %v3412_v19  ;;  %v11792_v19 = vld [vmem:[#allocation54_spill] sm:$0xff] }
 0x504   :  { %v3096_v4 = vadd.f32 %v11793_v5, %v11792_v19  ;;  %v11799_v19 = vld [vmem:[#allocation116_spill] sm:$0xff]  ;;  %v11800_v5 = vld [vmem:[#allocation118_spill] sm:$0xff] }
 0x505   :  { %3944 = vmatmul.f32.gmra.mxu2 %v11782_v39  ;;  %4066 = vmatmul.f32.gmra.mxu3 %v11789_v16  ;;  %v11795_v39 = vld [vmem:[#allocation155_spill] sm:$0xff] }
 0x506   :  { %4838 = vmatmul.f32.gmra.mxu0 %v11790_v36  ;;  %4956 = vmatmul.f32.gmra.mxu1 %v11790_v36  ;;  %v10161_v36 = vpop.f32.mrf.mxu1  ;;  %v3214_v41 = vadd.f32 %v11798_v34, %v3096_v4  ;;  %v10173_v34 = vpop.f32.mrf.mxu0 }
 0x507   :  { %11797 = vst [vmem:[#allocation86_spill] sm:$0xff] %v10161_v36 }
 0x508   :  { %v3419_v42 = vpop.f32.mrf.mxu2  ;;  %v3553_v37 = vpop.f32.mrf.mxu3  ;;  %11803 = vst [vmem:[#allocation85_spill] sm:$0xff] %v10173_v34 }
 0x509   :  { %v3420_v2 = vadd.f32 %v3419_v42, %v3210_v31 }
 0x50b   :  { %v10151_v22 = vadd.f32 %v3549_v0, %v3420_v2 }
 0x50d   :  { %3948 = vmatmul.f32.gmra.mxu2 %v11789_v16  ;;  %4070 = vmatmul.f32.gmra.mxu3 %v11794_v45  ;;  %v3100_v16 = vadd.f32 %v11799_v19, %v9799_v51  ;;  %v11805_v51 = vld [vmem:[#allocation121_spill] sm:$0xff] }
 0x50e   :  { %4842 = vmatmul.f32.gmra.mxu0 %v11795_v39  ;;  %4960 = vmatmul.f32.gmra.mxu1 %v11795_v39  ;;  %v11802_v39 = vld [vmem:[#allocation117_spill] sm:$0xff] }
 0x50f   :  { %v3218_v36 = vadd.f32 %v11802_v39, %v3100_v16 }
 0x510   :  { %v3427_v31 = vpop.f32.mrf.mxu2  ;;  %v3557_v0 = vpop.f32.mrf.mxu3 }
 0x511   :  { %v3428_v42 = vadd.f32 %v3427_v31, %v3214_v41  ;;  %v10175_v41 = vpop.f32.mrf.mxu1 }
 0x512   :  { %11804 = vst [vmem:[#allocation88_spill] sm:$0xff] %v10175_v41  ;;  %v10186_v41 = vpop.f32.mrf.mxu0 }
 0x513   :  { %v10164_v2 = vadd.f32 %v3553_v37, %v3428_v42  ;;  %v11806_v42 = vld [vmem:[#allocation50_spill] sm:$0xff]  ;;  %11808 = vst [vmem:[#allocation87_spill] sm:$0xff] %v10186_v41 }
 0x515   :  { %3952 = vmatmul.f32.gmra.mxu2 %v11794_v45  ;;  %4074 = vmatmul.f32.gmra.mxu3 %v11800_v5  ;;  %v3582_v45 = vadd.f32 %v11805_v51, %v9824_v55  ;;  %v11810_v55 = vld [vmem:[#allocation67_spill] sm:$0xff]  ;;  %v11813_v51 = vld [vmem:[#allocation157_spill] sm:$0xff] }
 0x516   :  { %4846 = vmatmul.f32.gmra.mxu0 %v11801_v14  ;;  %4964 = vmatmul.f32.gmra.mxu1 %v11801_v14  ;;  %v11807_v14 = vld [vmem:[#allocation122_spill] sm:$0xff] }
 0x517   :  { %v3726_v19 = vadd.f32 %v11807_v14, %v3582_v45  ;;  %v11814_v45 = vld [vmem:[#allocation126_spill] sm:$0xff] }
 0x518   :  { %v3435_v20 = vpop.f32.mrf.mxu2  ;;  %v4011_v4 = vpop.f32.mrf.mxu3 }
 0x519   :  { %v3436_v37 = vadd.f32 %v3435_v20, %v3218_v36  ;;  %v10188_v20 = vpop.f32.mrf.mxu1 }
 0x51a   :  { %11809 = vst [vmem:[#allocation90_spill] sm:$0xff] %v10188_v20  ;;  %v10203_v3 = vpop.f32.mrf.mxu0 }
 0x51b   :  { %v10177_v31 = vadd.f32 %v3557_v0, %v3436_v37  ;;  %v11811_v0 = vld [vmem:[#allocation125_spill] sm:$0xff]  ;;  %v11812_v37 = vld [vmem:[#allocation127_spill] sm:$0xff]  ;;  %11817 = vst [vmem:[#allocation89_spill] sm:$0xff] %v10203_v3  ;;  %v11830_v3 = vld [vmem:[#allocation66_spill] sm:$0xff] }
 0x51d   :  { %3956 = vmatmul.f32.gmra.mxu2 %v11800_v5  ;;  %4078 = vmatmul.f32.gmra.mxu3 %v11675_v56  ;;  %v3587_v5 = vadd.f32 %v11811_v0, %v11810_v55  ;;  %v11820_v0 = vld [vmem:[#allocation124_spill] sm:$0xff] }
 0x51e   :  { %4850 = vmatmul.f32.gmra.mxu0 %v11806_v42  ;;  %4968 = vmatmul.f32.gmra.mxu1 %v11806_v42 }
 0x51f   :  { %v3732_v42 = vadd.f32 %v11814_v45, %v3587_v5  ;;  %v11821_v5 = vld [vmem:[#allocation35_spill] sm:$0xff] }
 0x520   :  { %v3893_v16 = vpop.f32.mrf.mxu2  ;;  %v4015_v39 = vpop.f32.mrf.mxu3 }
 0x521   :  { %v3894_v34 = vadd.f32 %v3893_v16, %v3726_v19  ;;  %v10205_v55 = vpop.f32.mrf.mxu1 }
 0x522   :  { %11818 = vst [vmem:[#allocation92_spill] sm:$0xff] %v10205_v55  ;;  %v10220_v55 = vpop.f32.mrf.mxu0 }
 0x523   :  { %v10190_v36 = vadd.f32 %v4011_v4, %v3894_v34  ;;  %v11815_v4 = vld [vmem:[#allocation39_spill] sm:$0xff]  ;;  %v11816_v34 = vld [vmem:[#allocation36_spill] sm:$0xff]  ;;  %11825 = vst [vmem:[#allocation91_spill] sm:$0xff] %v10220_v55 }
 0x524   :  { %v3592_v20 = vadd.f32 %v11816_v34, %v11815_v4  ;;  %v11823_v34 = vld [vmem:[#allocation130_spill] sm:$0xff] }
 0x525   :  { %3960 = vmatmul.f32.gmra.mxu2 %v11675_v56  ;;  %4082 = vmatmul.f32.gmra.mxu3 %v11812_v37  ;;  %v11819_v56 = vld [vmem:[#allocation128_spill] sm:$0xff] }
 0x526   :  { %4854 = vmatmul.f32.gmra.mxu0 %v11813_v51  ;;  %4972 = vmatmul.f32.gmra.mxu1 %v11813_v51  ;;  %v3738_v51 = vadd.f32 %v11821_v5, %v3592_v20  ;;  %v11827_v20 = vld [vmem:[#allocation129_spill] sm:$0xff] }
 0x528   :  { %v3897_v14 = vpop.f32.mrf.mxu2  ;;  %v4019_v19 = vpop.f32.mrf.mxu3 }
 0x529   :  { %v3898_v16 = vadd.f32 %v3897_v14, %v3732_v42 }
 0x52a   :  { %v10234_v17 = vpop.f32.mrf.mxu0 }
 0x52b   :  { %v10199_v41 = vadd.f32 %v4015_v39, %v3898_v16  ;;  %v11822_v16 = vld [vmem:[#allocation38_spill] sm:$0xff]  ;;  %11832 = vst [vmem:[#allocation93_spill] sm:$0xff] %v10234_v17 }
 0x52c   :  { %v3597_v4 = vadd.f32 %v11822_v16, %v9894_v62  ;;  %v11828_v62 = vld [vmem:[#allocation40_spill] sm:$0xff] }
 0x52d   :  { %3964 = vmatmul.f32.gmra.mxu2 %v11812_v37  ;;  %4086 = vmatmul.f32.gmra.mxu3 %v11819_v56  ;;  %v11824_v37 = vld [vmem:[#allocation63_spill] sm:$0xff]  ;;  %v11829_v16 = vld [vmem:[#allocation132_spill] sm:$0xff] }
 0x52e   :  { %4858 = vmatmul.f32.gmra.mxu0 %v11820_v0  ;;  %4976 = vmatmul.f32.gmra.mxu1 %v11820_v0  ;;  %v10222_v0 = vpop.f32.mrf.mxu1  ;;  %v3744_v5 = vadd.f32 %v11827_v20, %v3597_v4 }
 0x52f   :  { %11826 = vst [vmem:[#allocation94_spill] sm:$0xff] %v10222_v0 }
 0x530   :  { %v3901_v45 = vpop.f32.mrf.mxu2  ;;  %v4023_v39 = vpop.f32.mrf.mxu3 }
 0x531   :  { %v3902_v42 = vadd.f32 %v3901_v45, %v3738_v51 }
 0x533   :  { %v10212_v14 = vadd.f32 %v4019_v19, %v3902_v42 }
 0x535   :  { %3968 = vmatmul.f32.gmra.mxu2 %v11819_v56  ;;  %4090 = vmatmul.f32.gmra.mxu3 %v11823_v34  ;;  %v3602_v56 = vadd.f32 %v11828_v62, %v9918_v15  ;;  %v11834_v15 = vld [vmem:[#allocation133_spill] sm:$0xff] }
 0x536   :  { %4862 = vmatmul.f32.gmra.mxu0 %v11824_v37  ;;  %4980 = vmatmul.f32.gmra.mxu1 %v11824_v37  ;;  %v11831_v37 = vld [vmem:[#allocation131_spill] sm:$0xff] }
 0x537   :  { %v3750_v0 = vadd.f32 %v11831_v37, %v3602_v56 }
 0x538   :  { %v3905_v51 = vpop.f32.mrf.mxu2  ;;  %v4027_v19 = vpop.f32.mrf.mxu3 }
 0x539   :  { %v3906_v45 = vadd.f32 %v3905_v51, %v3744_v5  ;;  %v11835_v51 = vld [vmem:[#allocation77_spill] sm:$0xff] }
 0x53b   :  { %v10225_v42 = vadd.f32 %v4023_v39, %v3906_v45  ;;  %v10236_v39 = vpop.f32.mrf.mxu1 }
 0x53c   :  { %11833 = vst [vmem:[#allocation96_spill] sm:$0xff] %v10236_v39 }
 0x53d   :  { %3972 = vmatmul.f32.gmra.mxu2 %v11823_v34  ;;  %4094 = vmatmul.f32.gmra.mxu3 %v11829_v16  ;;  %v3607_v34 = vadd.f32 %v11834_v15, %v9941_v13 }
 0x53e   :  { %4866 = vmatmul.f32.gmra.mxu0 %v11830_v3  ;;  %4984 = vmatmul.f32.gmra.mxu1 %v11830_v3  ;;  %v11836_v3 = vld [vmem:[#allocation134_spill] sm:$0xff] }
 0x53f   :  { %v3756_v45 = vadd.f32 %v11836_v3, %v3607_v34 }
 0x540   :  { %v3909_v55 = vpop.f32.mrf.mxu2  ;;  %v4031_v4 = vpop.f32.mrf.mxu3 }
 0x541   :  { %v3910_v20 = vadd.f32 %v3909_v55, %v3750_v0 }
 0x543   :  { %v10238_v5 = vadd.f32 %v4027_v19, %v3910_v20  ;;  %v11837_v19 = vld [vmem:[#allocation136_spill] sm:$0xff]  ;;  %v10251_v20 = vpop.f32.mrf.mxu0  ;;  %v10253_v13 = vpop.f32.mrf.mxu1 }
 0x544   :  { %v3612_v37 = vadd.f32 %v11837_v19, %v9955_v49  ;;  %11838 = vst [vmem:[#allocation95_spill] sm:$0xff] %v10251_v20  ;;  %v11841_v49 = vld [vmem:[#allocation47_spill] sm:$0xff] }
 0x545   :  { %3976 = vmatmul.f32.gmra.mxu2 %v11829_v16  ;;  %4098 = vmatmul.f32.gmra.mxu3 %v11721_v54  ;;  %11839 = vst [vmem:[#allocation97_spill] sm:$0xff] %v10253_v13  ;;  %v11840_v16 = vld [vmem:[#allocation137_spill] sm:$0xff] }
 0x546   :  { %4870 = vmatmul.f32.gmra.mxu0 %v11835_v51  ;;  %4988 = vmatmul.f32.gmra.mxu1 %v11835_v51  ;;  %v3762_v15 = vadd.f32 %v11840_v16, %v3612_v37 }
 0x548   :  { %v3913_v55 = vpop.f32.mrf.mxu2  ;;  %v4035_v0 = vpop.f32.mrf.mxu3 }
 0x549   :  { %v3914_v62 = vadd.f32 %v3913_v55, %v3756_v45  ;;  %v3617_v45 = vadd.f32 %v11841_v49, %v9969_v29  ;;  %v11843_v29 = vld [vmem:[#allocation3_spill] sm:$0xff] }
 0x54b   :  { %v10247_v56 = vadd.f32 %v4031_v4, %v3914_v62  ;;  %v10268_v55 = vpop.f32.mrf.mxu1 }
 0x54d   :  { %3980 = vmatmul.f32.gmra.mxu2 %v11721_v54  ;;  %4102 = vmatmul.f32.gmra.mxu3 %v11728_v21  ;;  %v10266_v54 = vpop.f32.mrf.mxu0 }
 0x54e   :  { %4874 = vmatmul.f32.gmra.mxu0 %v9899_v63  ;;  %4992 = vmatmul.f32.gmra.mxu1 %v9899_v63  ;;  %v11842_v63 = vld [vmem:[#allocation2_spill] sm:$0xff] }
 0x54f   :  { %v3768_v62 = vadd.f32 %v11842_v63, %v3617_v45  ;;  %v11847_v45 = vld [vmem:[#allocation4_spill] sm:$0xff] }
 0x550   :  { %v3917_v34 = vpop.f32.mrf.mxu2  ;;  %v4039_v4 = vpop.f32.mrf.mxu3  ;;  %v3627_v63 = vadd.f32 %v11847_v45, %v9994_v38  ;;  %v11854_v38 = vld [vmem:[#allocation144_spill] sm:$0xff] }
 0x551   :  { %v3918_v51 = vadd.f32 %v3917_v34, %v3762_v15  ;;  %v11844_v15 = vld [vmem:[#allocation139_spill] sm:$0xff] }
 0x552   :  { %v11845_v34 = vand.u32 4294901760, %v11844_v15 }
 0x553   :  { %v10260_v3 = vadd.f32 %v4035_v0, %v3918_v51  ;;  %v11846_v51 = vld [vmem:[#allocation140_spill] sm:$0xff] }
 0x555   :  { %3984 = vmatmul.f32.gmra.mxu2 %v11728_v21  ;;  %4106 = vmatmul.f32.gmra.mxu3 %v9347_v43  ;;  %v3622_v21 = vadd.f32 %v11843_v29, %v9981_v35  ;;  %v11850_v35 = vld [vmem:[#allocation142_spill] sm:$0xff] }
 0x556   :  { %4878 = vmatmul.f32.gmra.mxu0 %v9923_v48  ;;  %4996 = vmatmul.f32.gmra.mxu1 %v9923_v48 }
 0x557   :  { %v3774_v49 = vadd.f32 %v11846_v51, %v3622_v21  ;;  %v11851_v21 = vld [vmem:[#allocation6_spill] sm:$0xff] }
 0x558   :  { %v3921_v19 = vpop.f32.mrf.mxu2  ;;  %v4043_v0 = vpop.f32.mrf.mxu3 }
 0x559   :  { %v3922_v37 = vadd.f32 %v3921_v19, %v3768_v62 }
 0x55b   :  { %v10273_v16 = vadd.f32 %v4039_v4, %v3922_v37  ;;  %v11848_v4 = vld [vmem:[#allocation141_spill] sm:$0xff] }
 0x55c   :  { %v11849_v62 = vand.u32 4294901760, %v11848_v4 }
 0x55d   :  { %3988 = vmatmul.f32.gmra.mxu2 %v9347_v43  ;;  %4614 = vmatmul.f32.vlgmr.msra.gmra.mxu3 %v11845_v34  ;;  %v3780_v43 = vadd.f32 %v11850_v35, %v3627_v63  ;;  %v11855_v63 = vld [vmem:[#allocation5_spill] sm:$0xff] }
 0x55e   :  { %v3637_v35 = vadd.f32 %v11855_v63, %v10016_v46  ;;  %v11862_v46 = vld [vmem:[#allocation7_spill] sm:$0xff] }
 0x560   :  { %v3925_v13 = vpop.f32.mrf.mxu2  ;;  %v4047_v20 = vpop.f32.mrf.mxu3 }
 0x561   :  { %v3926_v48 = vadd.f32 %v3925_v13, %v3774_v49  ;;  %v3632_v13 = vadd.f32 %v11851_v21, %v10007_v50  ;;  %v11858_v50 = vld [vmem:[#allocation146_spill] sm:$0xff] }
 0x563   :  { %v10281_v39 = vadd.f32 %v4043_v0, %v3926_v48  ;;  %v11852_v0 = vld [vmem:[#allocation143_spill] sm:$0xff] }
 0x564   :  { %v11853_v51 = vand.u32 4294901760, %v11852_v0 }
 0x565   :  { %4470 = vmatmul.f32.vlgmr.msra.gmra.mxu2 %v11844_v15  ;;  %4620 = vmatmul.f32.gmra.mxu3 %v11849_v62  ;;  %v3786_v15 = vadd.f32 %v11854_v38, %v3632_v13  ;;  %v11859_v13 = vld [vmem:[#allocation51_spill] sm:$0xff] }
 0x566   :  { %v3642_v38 = vadd.f32 %v11859_v13, %v10029_v33  ;;  %v11867_v33 = vld [vmem:[#allocation147_spill] sm:$0xff] }
 0x568   :  { %v3929_v19 = vpop.f32.mrf.mxu2  ;;  %v4051_v37 = vpop.f32.mrf.mxu3 }
 0x569   :  { %v3930_v29 = vadd.f32 %v3929_v19, %v3780_v43 }
 0x56b   :  { %v10289_v34 = vadd.f32 %v4047_v20, %v3930_v29  ;;  %v11856_v20 = vld [vmem:[#allocation145_spill] sm:$0xff] }
 0x56c   :  { %v11857_v43 = vand.u32 4294901760, %v11856_v20 }
 0x56d   :  { %4475 = vmatmul.f32.gmra.mxu2 %v11848_v4  ;;  %4626 = vmatmul.f32.gmra.mxu3 %v11853_v51  ;;  %v3792_v4 = vadd.f32 %v11858_v50, %v3637_v35  ;;  %v11864_v35 = vld [vmem:[#allocation10_spill] sm:$0xff] }
 0x56e   :  { %v3647_v50 = vadd.f32 %v11864_v35, %v10042_v24  ;;  %v11872_v24 = vld [vmem:[#allocation148_spill] sm:$0xff] }
 0x570   :  { %v3933_v49 = vpop.f32.mrf.mxu2  ;;  %v4055_v48 = vpop.f32.mrf.mxu3 }
 0x571   :  { %v3934_v45 = vadd.f32 %v3933_v49, %v3786_v15 }
 0x573   :  { %v10297_v62 = vadd.f32 %v4051_v37, %v3934_v45  ;;  %v11860_v37 = vld [vmem:[#allocation52_spill] sm:$0xff] }
 0x574   :  { %v11861_v15 = vand.u32 4294901760, %v11860_v37 }
 0x575   :  { %4480 = vmatmul.f32.gmra.mxu2 %v11852_v0  ;;  %4632 = vmatmul.f32.gmra.mxu3 %v11857_v43  ;;  %v3798_v0 = vadd.f32 %v11862_v46, %v3642_v38  ;;  %v11869_v38 = vld [vmem:[#allocation12_spill] sm:$0xff] }
 0x576   :  { %v3652_v46 = vadd.f32 %v11869_v38, %v10055_v18  ;;  %v11877_v18 = vld [vmem:[#allocation16_spill] sm:$0xff] }
 0x578   :  { %v3937_v19 = vpop.f32.mrf.mxu2  ;;  %v4059_v29 = vpop.f32.mrf.mxu3 }
 0x579   :  { %v3938_v21 = vadd.f32 %v3937_v19, %v3792_v4 }
 0x57b   :  { %v10305_v51 = vadd.f32 %v4055_v48, %v3938_v21  ;;  %v11865_v48 = vld [vmem:[#allocation53_spill] sm:$0xff] }
 0x57c   :  { %v11866_v4 = vand.u32 4294901760, %v11865_v48 }
 0x57d   :  { %4485 = vmatmul.f32.gmra.mxu2 %v11856_v20  ;;  %4638 = vmatmul.f32.gmra.mxu3 %v11861_v15  ;;  %v3804_v20 = vadd.f32 %v11867_v33, %v3647_v50  ;;  %v11874_v50 = vld [vmem:[#allocation56_spill] sm:$0xff] }
 0x57e   :  { %v3657_v33 = vadd.f32 %v11874_v50, %v10068_v9  ;;  %v11882_v9 = vld [vmem:[#allocation149_spill] sm:$0xff] }
 0x580   :  { %v3941_v49 = vpop.f32.mrf.mxu2  ;;  %v4063_v45 = vpop.f32.mrf.mxu3 }
 0x581   :  { %v3942_v63 = vadd.f32 %v3941_v49, %v3798_v0 }
 0x583   :  { %v10313_v43 = vadd.f32 %v4059_v29, %v3942_v63  ;;  %v11870_v29 = vld [vmem:[#allocation55_spill] sm:$0xff] }
 0x584   :  { %v11871_v0 = vand.u32 4294901760, %v11870_v29 }
 0x585   :  { %11863 = vst [vmem:[#allocation8_spill] sm:$0xff] %v10313_v43  ;;  %4490 = vmatmul.f32.gmra.mxu2 %v11860_v37  ;;  %4644 = vmatmul.f32.gmra.mxu3 %v11866_v4  ;;  %v3810_v37 = vadd.f32 %v11872_v24, %v3652_v46  ;;  %v11879_v46 = vld [vmem:[#allocation22_spill] sm:$0xff] }
 0x586   :  { %v3662_v24 = vadd.f32 %v11879_v46, %v10077_v8  ;;  %v11887_v8 = vld [vmem:[#allocation20_spill] sm:$0xff] }
 0x588   :  { %v3945_v19 = vpop.f32.mrf.mxu2  ;;  %v4067_v21 = vpop.f32.mrf.mxu3 }
 0x589   :  { %v3946_v13 = vadd.f32 %v3945_v19, %v3804_v20 }
 0x58b   :  { %v10321_v15 = vadd.f32 %v4063_v45, %v3946_v13  ;;  %v11875_v45 = vld [vmem:[#allocation59_spill] sm:$0xff] }
 0x58c   :  { %v11876_v20 = vand.u32 4294901760, %v11875_v45 }
 0x58d   :  { %11868 = vst [vmem:[#allocation9_spill] sm:$0xff] %v10321_v15  ;;  %4495 = vmatmul.f32.gmra.mxu2 %v11865_v48  ;;  %4650 = vmatmul.f32.gmra.mxu3 %v11871_v0  ;;  %v3816_v48 = vadd.f32 %v11877_v18, %v3657_v33  ;;  %v11884_v33 = vld [vmem:[#allocation61_spill] sm:$0xff] }
 0x58e   :  { %v3667_v18 = vadd.f32 %v11884_v33, %v10090_v25  ;;  %v11892_v25 = vld [vmem:[#allocation153_spill] sm:$0xff] }
 0x590   :  { %v3949_v49 = vpop.f32.mrf.mxu2  ;;  %v4071_v63 = vpop.f32.mrf.mxu3 }
 0x591   :  { %v3950_v35 = vadd.f32 %v3949_v49, %v3810_v37 }
 0x593   :  { %v10329_v4 = vadd.f32 %v4067_v21, %v3950_v35  ;;  %v11880_v21 = vld [vmem:[#allocation60_spill] sm:$0xff] }
 0x594   :  { %v11881_v37 = vand.u32 4294901760, %v11880_v21 }
 0x595   :  { %11873 = vst [vmem:[#allocation11_spill] sm:$0xff] %v10329_v4  ;;  %4500 = vmatmul.f32.gmra.mxu2 %v11870_v29  ;;  %4656 = vmatmul.f32.gmra.mxu3 %v11876_v20  ;;  %v3822_v29 = vadd.f32 %v11882_v9, %v3662_v24  ;;  %v11889_v24 = vld [vmem:[#allocation152_spill] sm:$0xff] }
 0x596   :  { %v3672_v9 = vadd.f32 %v11889_v24, %v10103_v27  ;;  %v11897_v27 = vld [vmem:[#allocation17_spill] sm:$0xff] }
 0x598   :  { %v3953_v19 = vpop.f32.mrf.mxu2  ;;  %v4075_v13 = vpop.f32.mrf.mxu3 }
 0x599   :  { %v3954_v38 = vadd.f32 %v3953_v19, %v3816_v48 }
 0x59b   :  { %v10337_v0 = vadd.f32 %v4071_v63, %v3954_v38  ;;  %v11885_v63 = vld [vmem:[#allocation62_spill] sm:$0xff] }
 0x59c   :  { %v11886_v48 = vand.u32 4294901760, %v11885_v63 }
 0x59d   :  { %11878 = vst [vmem:[#allocation34_spill] sm:$0xff] %v10337_v0  ;;  %4505 = vmatmul.f32.gmra.mxu2 %v11875_v45  ;;  %4662 = vmatmul.f32.gmra.mxu3 %v11881_v37  ;;  %v3828_v45 = vadd.f32 %v11887_v8, %v3667_v18  ;;  %v11894_v18 = vld [vmem:[#allocation18_spill] sm:$0xff] }
 0x59e   :  { %v3677_v8 = vadd.f32 %v11894_v18, %v10116_v7  ;;  %v11902_v7 = vld [vmem:[#allocation103_spill] sm:$0xff] }
 0x5a0   :  { %v3957_v49 = vpop.f32.mrf.mxu2  ;;  %v4079_v35 = vpop.f32.mrf.mxu3 }
 0x5a1   :  { %v3958_v50 = vadd.f32 %v3957_v49, %v3822_v29 }
 0x5a3   :  { %v10345_v20 = vadd.f32 %v4075_v13, %v3958_v50  ;;  %v11890_v13 = vld [vmem:[#allocation151_spill] sm:$0xff] }
 0x5a4   :  { %v11891_v29 = vand.u32 4294901760, %v11890_v13 }
 0x5a5   :  { %11883 = vst [vmem:[#allocation13_spill] sm:$0xff] %v10345_v20  ;;  %4510 = vmatmul.f32.gmra.mxu2 %v11880_v21  ;;  %4668 = vmatmul.f32.gmra.mxu3 %v11886_v48  ;;  %v3834_v21 = vadd.f32 %v11892_v25, %v3672_v9  ;;  %v11899_v9 = vld [vmem:[#allocation102_spill] sm:$0xff] }
 0x5a6   :  { %v3682_v25 = vadd.f32 %v11899_v9, %v10129_v47 }
 0x5a8   :  { %v3961_v19 = vpop.f32.mrf.mxu2  ;;  %v4083_v38 = vpop.f32.mrf.mxu3 }
 0x5a9   :  { %v3962_v46 = vadd.f32 %v3961_v19, %v3828_v45 }
 0x5ab   :  { %v10353_v37 = vadd.f32 %v4079_v35, %v3962_v46  ;;  %v11895_v35 = vld [vmem:[#allocation21_spill] sm:$0xff] }
 0x5ac   :  { %v11896_v45 = vand.u32 4294901760, %v11895_v35 }
 0x5ad   :  { %11888 = vst [vmem:[#allocation19_spill] sm:$0xff] %v10353_v37  ;;  %4515 = vmatmul.f32.gmra.mxu2 %v11885_v63  ;;  %4674 = vmatmul.f32.gmra.mxu3 %v11891_v29  ;;  %v3840_v63 = vadd.f32 %v11897_v27, %v3677_v8  ;;  %v11904_v8 = vld [vmem:[#allocation106_spill] sm:$0xff] }
 0x5ae   :  { %v3687_v27 = vadd.f32 %v11904_v8, %v10138_v58  ;;  %v11910_v58 = vld [vmem:[#allocation105_spill] sm:$0xff] }
 0x5b0   :  { %v3965_v49 = vpop.f32.mrf.mxu2  ;;  %v4087_v50 = vpop.f32.mrf.mxu3 }
 0x5b1   :  { %v3966_v33 = vadd.f32 %v3965_v49, %v3834_v21 }
 0x5b3   :  { %v10361_v48 = vadd.f32 %v4083_v38, %v3966_v33  ;;  %v11900_v38 = vld [vmem:[#allocation99_spill] sm:$0xff] }
 0x5b4   :  { %v11901_v21 = vand.u32 4294901760, %v11900_v38 }
 0x5b5   :  { %11893 = vst [vmem:[#allocation150_spill] sm:$0xff] %v10361_v48  ;;  %4520 = vmatmul.f32.gmra.mxu2 %v11890_v13  ;;  %4680 = vmatmul.f32.gmra.mxu3 %v11896_v45  ;;  %v3846_v13 = vadd.f32 %v11902_v7, %v3682_v25 }
 0x5b8   :  { %v3969_v19 = vpop.f32.mrf.mxu2  ;;  %v4091_v46 = vpop.f32.mrf.mxu3 }
 0x5b9   :  { %v3970_v24 = vadd.f32 %v3969_v19, %v3840_v63  ;;  %v11905_v63 = vld [vmem:[#allocation104_spill] sm:$0xff]  ;;  %v11907_v19 = vld [vmem:[#allocation37_spill] sm:$0xff] }
 0x5ba   :  { %v11906_v47 = vand.u32 4294901760, %v11905_v63 }
 0x5bb   :  { %v10369_v29 = vadd.f32 %v4087_v50, %v3970_v24  ;;  %v4787_v50 = vpop.f32.mrf.mxu0  ;;  %v3852_v24 = vadd.f32 %v11907_v19, %v3687_v27 }
 0x5bd   :  { %11898 = vst [vmem:[#allocation15_spill] sm:$0xff] %v10369_v29  ;;  %4525 = vmatmul.f32.gmra.mxu2 %v11895_v35  ;;  %4686 = vmatmul.f32.gmra.mxu3 %v11901_v21  ;;  %v10384_v35 = vpop.f32.mrf.mxu1 }
 0x5c0   :  { %v3973_v49 = vpop.f32.mrf.mxu2  ;;  %v4095_v33 = vpop.f32.mrf.mxu3 }
 0x5c1   :  { %v3974_v18 = vadd.f32 %v3973_v49, %v3846_v13  ;;  %v11911_v49 = vand.u32 4294901760, %v11910_v58 }
 0x5c3   :  { %v10377_v45 = vadd.f32 %v4091_v46, %v3974_v18  ;;  %v11909_v46 = vld [vmem:[#allocation41_spill] sm:$0xff]  ;;  %v11912_v18 = vld [vmem:[#allocation156_spill] sm:$0xff] }
 0x5c4   :  { %v3692_v13 = vadd.f32 %v11909_v46, %v10151_v22  ;;  %v11915_v22 = vld [vmem:[#allocation26_spill] sm:$0xff] }
 0x5c5   :  { %11903 = vst [vmem:[#allocation14_spill] sm:$0xff] %v10377_v45  ;;  %4530 = vmatmul.f32.gmra.mxu2 %v11900_v38  ;;  %4692 = vmatmul.f32.gmra.mxu3 %v11906_v47  ;;  %v10394_v38 = vpop.f32.mrf.mxu0  ;;  %v10397_v27 = vpop.f32.mrf.mxu1 }
 0x5c6   :  { %v3858_v8 = vadd.f32 %v11912_v18, %v3692_v13 }
 0x5c8   :  { %v3977_v9 = vpop.f32.mrf.mxu2  ;;  %v4099_v25 = vpop.f32.mrf.mxu3 }
 0x5c9   :  { %v3978_v21 = vadd.f32 %v3977_v9, %v3852_v24 }
 0x5cb   :  { %v10387_v7 = vadd.f32 %v4095_v33, %v3978_v21  ;;  %v11914_v33 = vld [vmem:[#allocation119_spill] sm:$0xff]  ;;  %v11917_v21 = vld [vmem:[#allocation30_spill] sm:$0xff] }
 0x5cc   :  { %v3697_v9 = vadd.f32 %v11914_v33, %v10164_v2  ;;  %v11920_v2 = vld [vmem:[#allocation29_spill] sm:$0xff] }
 0x5cd   :  { %11908 = vst [vmem:[#allocation23_spill] sm:$0xff] %v10387_v7  ;;  %4535 = vmatmul.f32.gmra.mxu2 %v11905_v63  ;;  %4698 = vmatmul.f32.gmra.mxu3 %v11911_v49  ;;  %v11916_v63 = vand.u32 4294901760, %v11915_v22  ;;  %v10407_v13 = vpop.f32.mrf.mxu0  ;;  %v10409_v45 = vpop.f32.mrf.mxu1 }
 0x5ce   :  { %v3864_v46 = vadd.f32 %v11917_v21, %v3697_v9 }
 0x5d0   :  { %v3981_v47 = vpop.f32.mrf.mxu2  ;;  %v4103_v17 = vpop.f32.mrf.mxu3 }
 0x5d1   :  { %v3982_v19 = vadd.f32 %v3981_v47, %v3858_v8 }
 0x5d3   :  { %v10399_v24 = vadd.f32 %v4099_v25, %v3982_v19  ;;  %v11919_v25 = vld [vmem:[#allocation158_spill] sm:$0xff]  ;;  %v11922_v19 = vld [vmem:[#allocation159_spill] sm:$0xff] }
 0x5d4   :  { %v3702_v47 = vadd.f32 %v11919_v25, %v10177_v31  ;;  %v11925_v31 = vld [vmem:[#allocation115_spill] sm:$0xff] }
 0x5d5   :  { %11913 = vst [vmem:[#allocation24_spill] sm:$0xff] %v10399_v24  ;;  %4540 = vmatmul.f32.gmra.mxu2 %v11910_v58  ;;  %4704 = vmatmul.f32.gmra.mxu3 %v11916_v63  ;;  %v11921_v58 = vand.u32 4294901760, %v11920_v2  ;;  %v10419_v24 = vpop.f32.mrf.mxu0  ;;  %v11927_v25 = vld [vmem:[#allocation123_spill] sm:$0xff] }
 0x5d6   :  { %v3870_v33 = vadd.f32 %v11922_v19, %v3702_v47 }
 0x5d8   :  { %v3985_v49 = vpop.f32.mrf.mxu2  ;;  %v4107_v7 = vpop.f32.mrf.mxu3 }
 0x5d9   :  { %v3986_v18 = vadd.f32 %v3985_v49, %v3864_v46 }
 0x5db   :  { %v10411_v8 = vadd.f32 %v4103_v17, %v3986_v18  ;;  %v11924_v17 = vld [vmem:[#allocation64_spill] sm:$0xff]  ;;  %v10425_v18 = vpop.f32.mrf.mxu1 }
 0x5dc   :  { %v4134_v49 = vadd.f32 %v11924_v17, %v10190_v36  ;;  %v11929_v36 = vld [vmem:[#allocation120_spill] sm:$0xff] }
 0x5dd   :  { %11918 = vst [vmem:[#allocation98_spill] sm:$0xff] %v10411_v8  ;;  %4545 = vmatmul.f32.gmra.mxu2 %v11915_v22  ;;  %4710 = vmatmul.f32.gmra.mxu3 %v11921_v58  ;;  %v11926_v22 = vand.u32 4294901760, %v11925_v31  ;;  %v11930_v17 = vand.u32 4294901760, %v11929_v36 }
 0x5de   :  { %v4352_v58 = vadd.f32 %v11927_v25, %v4134_v49 }
 0x5e0   :  { %v3989_v9 = vpop.f32.mrf.mxu2  ;;  %v4615_v63 = vpop.f32.mrf.mxu3 }
 0x5e1   :  { %v3990_v21 = vadd.f32 %v3989_v9, %v3870_v33  ;;  %v11928_v9 = vld [vmem:[#allocation65_spill] sm:$0xff] }
 0x5e3   :  { %v10421_v46 = vadd.f32 %v4107_v7, %v3990_v21  ;;  %v4142_v7 = vadd.f32 %v11928_v9, %v10199_v41  ;;  %v10433_v21 = vpop.f32.mrf.mxu0  ;;  %v11932_v41 = vld [vmem:[#allocation43_spill] sm:$0xff] }
 0x5e5   :  { %11923 = vst [vmem:[#allocation100_spill] sm:$0xff] %v10421_v46  ;;  %4550 = vmatmul.f32.gmra.mxu2 %v11920_v2  ;;  %4716 = vmatmul.f32.gmra.mxu3 %v11926_v22  ;;  %v10438_v2 = vpop.f32.mrf.mxu1  ;;  %v11931_v46 = vld [vmem:[#allocation69_spill] sm:$0xff] }
 0x5e6   :  { %v4356_v49 = vadd.f32 %v11931_v46, %v4142_v7  ;;  %v11935_v46 = vld [vmem:[#allocation71_spill] sm:$0xff] }
 0x5e8   :  { %v4471_v47 = vpop.f32.mrf.mxu2  ;;  %v4621_v19 = vpop.f32.mrf.mxu3 }
 0x5e9   :  { %v4472_v8 = vadd.f32 %v4471_v47, %v4352_v58 }
 0x5eb   :  { %v4616_v33 = vadd.f32 %v4615_v63, %v4472_v8  ;;  %v4150_v63 = vadd.f32 %v11932_v41, %v10212_v14  ;;  %v10448_v48 = vpop.f32.mrf.mxu0  ;;  %v11936_v14 = vld [vmem:[#allocation45_spill] sm:$0xff] }
 0x5ed   :  { %4555 = vmatmul.f32.gmra.mxu2 %v11925_v31  ;;  %4722 = vmatmul.f32.gmra.mxu3 %v11930_v17  ;;  %v4784_v22 = vadd.f32 %v10266_v54, %v4616_v33  ;;  %v11933_v31 = vld [vmem:[#allocation57_spill] sm:$0xff]  ;;  %v4360_v7 = vadd.f32 %v11935_v46, %v4150_v63 }
 0x5ee   :  { %v11934_v9 = vand.u32 4294901760, %v11933_v31 }
 0x5ef   :  { %v4902_v8 = vadd.f32 %v10268_v55, %v4784_v22 }
 0x5f0   :  { %v4476_v25 = vpop.f32.mrf.mxu2  ;;  %v4627_v29 = vpop.f32.mrf.mxu3 }
 0x5f1   :  { %v4477_v58 = vadd.f32 %v4476_v25, %v4356_v49  ;;  %v5025_v54 = vrot.slane %v4902_v8, 2  ;;  %v5026_v33 = vrot.slane %v4902_v8, 4  ;;  %v10456_v25 = vpop.f32.mrf.mxu1 }
 0x5f3   :  { %v4622_v47 = vadd.f32 %v4621_v19, %v4477_v58  ;;  %v4158_v19 = vadd.f32 %v11936_v14, %v10225_v42  ;;  %v5100_v58 = vperm.slane %v4902_v8, 0  ;;  %v5195_v46 = vperm.slane %v5025_v54, 0 }
 0x5f4   :  { %v5339_v37 = vperm.slane %v5026_v33, 1 }
 0x5f5   :  { %4560 = vmatmul.f32.gmra.mxu2 %v11929_v36  ;;  %4728 = vmatmul.f32.gmra.mxu3 %v11934_v9  ;;  %v4788_v17 = vadd.f32 %v4787_v50, %v4622_v47  ;;  %v5027_v36 = vrot.slane %v4902_v8, 6  ;;  %v5147_v50 = vperm.slane %v4902_v8, 1 }
 0x5f7   :  { %v10452_v49 = vadd.f32 %v10384_v35, %v4788_v17  ;;  %v5243_v17 = vperm.slane %v5025_v54, 1 }
 0x5f8   :  { %v4481_v55 = vpop.f32.mrf.mxu2  ;;  %v4633_v22 = vpop.f32.mrf.mxu3 }
 0x5f9   :  { %v4482_v41 = vadd.f32 %v4481_v55, %v4360_v7  ;;  %v5028_v47 = vrot.slane %v10452_v49, 2  ;;  %v5029_v9 = vrot.slane %v10452_v49, 4  ;;  %v5030_v63 = vrot.slane %v10452_v49, 6  ;;  %v11937_v7 = vld [vmem:[#allocation58_spill] sm:$0xff] }
 0x5fa   :  { %v11938_v8 = vand.u32 4294901760, %v11937_v7  ;;  %v5291_v55 = vperm.slane %v5026_v33, 0 }
 0x5fb   :  { %v4628_v35 = vadd.f32 %v4627_v29, %v4482_v41  ;;  %v5148_v20 = vperm.slane %v5028_v47, 1  ;;  %v5244_v0 = vperm.slane %v5029_v9, 1  ;;  %v5196_v42 = vperm.slane %v5029_v9, 0 }
 0x5fc   :  { %v5340_v14 = vperm.slane %v5030_v63, 1  ;;  %v5292_v52 = vperm.slane %v5030_v63, 0  ;;  %v5101_v15 = vperm.slane %v5028_v47, 0  ;;  %v11940_v47 = vld [vmem:[#allocation72_spill] sm:$0xff] }
 0x5fd   :  { %v4792_v4 = vadd.f32 %v10394_v38, %v4628_v35  ;;  %4565 = vmatmul.f32.gmra.mxu2 %v11933_v31  ;;  %4734 = vmatmul.f32.gmra.mxu3 %v11938_v8  ;;  %v5167_v10 = vsel %vm5120_vm9, %v5148_v20, %v5147_v50  ;;  %v5263_v29 = vsel %vm5120_vm9, %v5244_v0, %v5243_v17  ;;  %v11939_v35 = vld [vmem:[#allocation73_spill] sm:$0xff]  ;;  %v5387_v20 = vperm.slane %v5027_v36, 0  ;;  %v10475_v0 = vpop.f32.mrf.mxu0 }
 0x5fe   :  { %v5215_v54 = vsel %vm5120_vm9, %v5196_v42, %v5195_v46  ;;  %v5359_v41 = vsel %vm5120_vm9, %v5340_v14, %v5339_v37  ;;  %v5311_v38 = vsel %vm5120_vm9, %v5292_v52, %v5291_v55  ;;  %v5121_v31 = vsel %vm5120_vm9, %v5101_v15, %v5100_v58  ;;  %v10478_v58 = vpop.f32.mrf.mxu1 }
 0x5ff   :  { %v4910_v9 = vadd.f32 %v10397_v27, %v4792_v4  ;;  %v4364_v32 = vadd.f32 %v11939_v35, %v4158_v19  ;;  %v4166_v63 = vadd.f32 %v11940_v47, %v10238_v5  ;;  %v5483_v4 = vperm.slane %v10452_v49, 0 }
 0x600   :  { %v4486_v8 = vpop.f32.mrf.mxu2  ;;  %v4639_v33 = vpop.f32.mrf.mxu3  ;;  %v5435_v15 = vperm.slane %v5027_v36, 1  ;;  %v5531_v19 = vperm.slane %v10452_v49, 1 }
 0x601   :  { %v5031_v50 = vrot.slane %v4910_v9, 2  ;;  %v5032_v17 = vrot.slane %v4910_v9, 4  ;;  %v5033_v37 = vrot.slane %v4910_v9, 6  ;;  %v5388_v46 = vperm.slane %v4910_v9, 0 }
 0x602   :  { %v5436_v52 = vperm.slane %v4910_v9, 1  ;;  %v4487_v27 = vadd.f32 %v4486_v8, %v4364_v32 }
 0x603   :  { %v5149_v42 = vperm.slane %v5032_v17, 1  ;;  %v5245_v14 = vperm.slane %v5033_v37, 1  ;;  %v5197_v5 = vperm.slane %v5033_v37, 0  ;;  %v5407_v35 = vsel %vm5120_vm9, %v5388_v46, %v5387_v20  ;;  %v11943_v37 = vld [vmem:[#allocation44_spill] sm:$0xff] }
 0x604   :  { %v4634_v55 = vadd.f32 %v4633_v22, %v4487_v27  ;;  %v5484_v47 = vperm.slane %v5031_v50, 0  ;;  %v5455_v43 = vsel %vm5120_vm9, %v5436_v52, %v5435_v15  ;;  %v5532_v9 = vperm.slane %v5031_v50, 1 }
 0x605   :  { %4570 = vmatmul.f32.gmra.mxu2 %v11937_v7  ;;  %4740 = vmatmul.f32.gmra.mxu3 %v11942_v11  ;;  %v5168_v32 = vsel %vm5122_vm10, %v5149_v42, %v5167_v10  ;;  %v5264_v36 = vsel %vm5122_vm10, %v5245_v14, %v5263_v29  ;;  %v5216_v49 = vsel %vm5122_vm10, %v5197_v5, %v5215_v54  ;;  %v5102_v20 = vperm.slane %v5032_v17, 0  ;;  %v10495_v14 = vpop.f32.mrf.mxu0 }
 0x606   :  { %v4796_v8 = vadd.f32 %v10407_v13, %v4634_v55  ;;  %v5503_v22 = vsel %vm5120_vm9, %v5484_v47, %v5483_v4  ;;  %v4368_v46 = vadd.f32 %v11943_v37, %v4166_v63  ;;  %v5551_v52 = vsel %vm5120_vm9, %v5532_v9, %v5531_v19  ;;  %v10500_v55 = vpop.f32.mrf.mxu1  ;;  %v11944_v47 = vld [vmem:[#allocation70_spill] sm:$0xff] }
 0x607   :  { %v5123_v10 = vsel %vm5122_vm10, %v5102_v20, %v5121_v31  ;;  %v4174_v17 = vadd.f32 %v9959_v57, %v10247_v56  ;;  %v11945_v9 = vand.u32 4294901760, %v11944_v47 }
 0x608   :  { %v4914_v7 = vadd.f32 %v10409_v45, %v4796_v8  ;;  %v4491_v27 = vpop.f32.mrf.mxu2  ;;  %v4645_v11 = vpop.f32.mrf.mxu3 }
 0x609   :  { %v4492_v15 = vadd.f32 %v4491_v27, %v4368_v46  ;;  %v4372_v46 = vadd.f32 %v9961_v1, %v4174_v17 }
 0x60a   :  { %v5034_v29 = vrot.slane %v4914_v7, 2  ;;  %v5035_v42 = vrot.slane %v4914_v7, 4  ;;  %v5036_v54 = vrot.slane %v4914_v7, 6  ;;  %v5341_v50 = vperm.slane %v4914_v7, 1 }
 0x60b   :  { %v4640_v13 = vadd.f32 %v4639_v33, %v4492_v15  ;;  %v5293_v63 = vperm.slane %v4914_v7, 0 }
 0x60c   :  { %v5150_v4 = vperm.slane %v5036_v54, 1  ;;  %v5360_v45 = vsel %vm5122_vm10, %v5341_v50, %v5359_v41  ;;  %v5389_v19 = vperm.slane %v5034_v29, 0  ;;  %v5485_v5 = vperm.slane %v5035_v42, 0 }
 0x60d   :  { %v4800_v31 = vadd.f32 %v10419_v24, %v4640_v13  ;;  %4575 = vmatmul.f32.gmra.mxu2 %v11941_v23  ;;  %4746 = vmatmul.f32.gmra.mxu3 %v11945_v9  ;;  %v5312_v33 = vsel %vm5122_vm10, %v5293_v63, %v5311_v38  ;;  %v5437_v8 = vperm.slane %v5034_v29, 1  ;;  %v5533_v20 = vperm.slane %v5035_v42, 1  ;;  %v5644_v23 = vld [vmem:[%s11077_s1 + $0x18] sm:$0xfe] }
 0x60e   :  { %v5169_v57 = vsel %vm5124_vm11, %v5150_v4, %v5168_v32  ;;  %v5408_v56 = vsel %vm5122_vm10, %v5389_v19, %v5407_v35  ;;  %v5504_v41 = vsel %vm5122_vm10, %v5485_v5, %v5503_v22  ;;  %v5103_v7 = vperm.slane %v5036_v54, 0 }
 0x60f   :  { %v4918_v37 = vadd.f32 %v10425_v18, %v4800_v31  ;;  %v5456_v24 = vsel %vm5122_vm10, %v5437_v8, %v5455_v43  ;;  %v5649_v15 = vperm.slane %v5644_v23, 2  ;;  %v5552_v32 = vsel %vm5122_vm10, %v5533_v20, %v5551_v52  ;;  %v10523_v31 = vpop.f32.mrf.mxu0 }
 0x610   :  { %v4496_v38 = vpop.f32.mrf.mxu2  ;;  %v4651_v27 = vpop.f32.mrf.mxu3  ;;  %v4182_v18 = vadd.f32 %v9976_v28, %v10260_v3  ;;  %v5125_v43 = vsel %vm5124_vm11, %v5103_v7, %v5123_v10  ;;  %v11946_v3 = vld [vmem:[#allocation42_spill] sm:$0xff]  ;;  %v5703_v7 = vperm.slane %v5644_v23, 5 }
 0x611   :  { %v4497_v35 = vadd.f32 %v4496_v38, %v4372_v46  ;;  %v5246_v29 = vperm.slane %v4918_v37, 1  ;;  %v5198_v22 = vperm.slane %v4918_v37, 0  ;;  %v5037_v42 = vrot.slane %v4918_v37, 2  ;;  %5651 = vrot.lane.b32.xlu1 %v5649_v15, %s6343_s5 }
 0x612   :  { %v5038_v1 = vrot.slane %v4918_v37, 4  ;;  %v5039_v50 = vrot.slane %v4918_v37, 6  ;;  %v11947_v9 = vand.u32 4294901760, %v11946_v3  ;;  %v10534_v37 = vpop.f32.mrf.mxu1  ;;  %v5666_v46 = vperm.slane %v5644_v23, 3 }
 0x613   :  { %v4646_v54 = vadd.f32 %v4645_v11, %v4497_v35  ;;  %v5265_v13 = vsel %vm5124_vm11, %v5246_v29, %v5264_v36  ;;  %v5217_v17 = vsel %vm5124_vm11, %v5198_v22, %v5216_v49  ;;  %v5342_v52 = vperm.slane %v5037_v42, 1 }
 0x614   :  { %v5390_v63 = vperm.slane %v5038_v1, 0  ;;  %v5294_v4 = vperm.slane %v5037_v42, 0  ;;  %v5486_v19 = vperm.slane %v5039_v50, 0  ;;  %v5438_v5 = vperm.slane %v5038_v1, 1  ;;  %5668 = vrot.lane.b32.xlu2 %v5666_v46, %s6344_s6 }
 0x615   :  { %v4804_v28 = vadd.f32 %v10433_v21, %v4646_v54  ;;  %4580 = vmatmul.f32.gmra.mxu2 %v11944_v47  ;;  %4752 = vmatmul.f32.gmra.mxu3 %v11947_v9  ;;  %v5361_v11 = vsel %vm5124_vm11, %v5342_v52, %v5360_v45  ;;  %v5534_v10 = vperm.slane %v5039_v50, 1  ;;  %v4376_v47 = vadd.f32 %v9978_v6, %v4182_v18 }
 0x616   :  { %v5409_v36 = vsel %vm5124_vm11, %v5390_v63, %v5408_v56  ;;  %v5313_v49 = vsel %vm5124_vm11, %v5294_v4, %v5312_v33  ;;  %v5505_v8 = vsel %vm5124_vm11, %v5486_v19, %v5504_v41  ;;  %v5457_v20 = vsel %vm5124_vm11, %v5438_v5, %v5456_v24 }
 0x617   :  { %v4922_v21 = vadd.f32 %v10438_v2, %v4804_v28  ;;  %v5553_v45 = vsel %vm5124_vm11, %v5534_v10, %v5552_v32  ;;  %v4190_v35 = vadd.f32 %v9990_v44, %v10273_v16  ;;  %v11948_v52 = vand.u32 4294901760, %v9935_v30  ;;  %v10554_v19 = vpop.f32.mrf.mxu0 }
 0x618   :  { %v4501_v38 = vpop.f32.mrf.mxu2  ;;  %v4657_v15 = vpop.f32.mrf.mxu3 }
 0x619   :  { %v4502_v56 = vadd.f32 %v4501_v38, %v4376_v47  ;;  %v5151_v33 = vperm.slane %v4922_v21, 1  ;;  %v5040_v41 = vrot.slane %v4922_v21, 2  ;;  %v5041_v24 = vrot.slane %v4922_v21, 4  ;;  %5705 = vrot.lane.b32.xlu1 %v5703_v7, %s6343_s5 }
 0x61a   :  { %v5042_v6 = vrot.slane %v4922_v21, 6  ;;  %v5104_v2 = vperm.slane %v4922_v21, 0  ;;  %v4380_v5 = vadd.f32 %v9992_v59, %v4190_v35  ;;  %v10559_v9 = vpop.f32.mrf.mxu1 }
 0x61b   :  { %v4652_v23 = vadd.f32 %v4651_v27, %v4502_v56  ;;  %v5170_v29 = vsel %vm5126_vm12, %v5151_v33, %v5169_v57  ;;  %v5247_v22 = vperm.slane %v5040_v41, 1  ;;  %v5199_v42 = vperm.slane %v5040_v41, 0 }
 0x61c   :  { %v5343_v32 = vperm.slane %v5041_v24, 1  ;;  %v5391_v18 = vperm.slane %v5042_v6, 0  ;;  %v5295_v1 = vperm.slane %v5041_v24, 0  ;;  %v5439_v50 = vperm.slane %v5042_v6, 1 }
 0x61d   :  { %v4808_v54 = vadd.f32 %v10448_v48, %v4652_v23  ;;  %4585 = vmatmul.f32.gmra.mxu2 %v11946_v3  ;;  %4758 = vmatmul.f32.gmra.mxu3 %v11948_v52  ;;  %v5266_v44 = vsel %vm5126_vm12, %v5247_v22, %v5265_v13  ;;  %v5218_v16 = vsel %vm5126_vm12, %v5199_v42, %v5217_v17 }
 0x61e   :  { %v5362_v27 = vsel %vm5126_vm12, %v5343_v32, %v5361_v11  ;;  %v5410_v57 = vsel %vm5126_vm12, %v5391_v18, %v5409_v36  ;;  %v5314_v63 = vsel %vm5126_vm12, %v5295_v1, %v5313_v49  ;;  %v5458_v4 = vsel %vm5126_vm12, %v5439_v50, %v5457_v20 }
 0x61f   :  { %v4926_v48 = vadd.f32 %v10456_v25, %v4808_v54  ;;  %v5127_v28 = vsel %vm5126_vm12, %v5104_v2, %v5125_v43  ;;  %v4198_v49 = vadd.f32 %v10003_v53, %v10281_v39  ;;  %v4206_v32 = vadd.f32 %v10020_v12, %v10289_v34 }
 0x620   :  { %v4506_v3 = vpop.f32.mrf.mxu2  ;;  %v4663_v13 = vpop.f32.mrf.mxu3 }
 0x621   :  { %v4507_v17 = vadd.f32 %v4506_v3, %v4380_v5  ;;  %v5043_v11 = vrot.slane %v4926_v48, 2  ;;  %v5044_v10 = vrot.slane %v4926_v48, 4  ;;  %v5045_v36 = vrot.slane %v4926_v48, 6 }
 0x622   :  { %v5487_v20 = vperm.slane %v4926_v48, 0  ;;  %v5535_v21 = vperm.slane %v4926_v48, 1  ;;  %v10579_v50 = vpop.f32.mrf.mxu1 }
 0x623   :  { %v4658_v47 = vadd.f32 %v4657_v15, %v4507_v17  ;;  %v5152_v25 = vperm.slane %v5043_v11, 1  ;;  %v5248_v46 = vperm.slane %v5044_v10, 1  ;;  %v5200_v59 = vperm.slane %v5044_v10, 0 }
 0x624   :  { %v5344_v7 = vperm.slane %v5045_v36, 1  ;;  %v5296_v43 = vperm.slane %v5045_v36, 0  ;;  %v5506_v38 = vsel %vm5126_vm12, %v5487_v20, %v5505_v8  ;;  %v5554_v56 = vsel %vm5126_vm12, %v5535_v21, %v5553_v45 }
 0x625   :  { %v4812_v33 = vadd.f32 %v10475_v0, %v4658_v47  ;;  %4590 = vmatmul.f32.gmra.mxu2 %v9935_v30  ;;  %v5171_v41 = vsel %vm5128_vm13, %v5152_v25, %v5170_v29  ;;  %v5267_v53 = vsel %vm5128_vm13, %v5248_v46, %v5266_v44  ;;  %v5219_v39 = vsel %vm5128_vm13, %v5200_v59, %v5218_v16  ;;  %v10575_v30 = vpop.f32.mrf.mxu0 }
 0x626   :  { %v5363_v15 = vsel %vm5128_vm13, %v5344_v7, %v5362_v27  ;;  %v5315_v24 = vsel %vm5128_vm13, %v5296_v43, %v5314_v63  ;;  %v5105_v35 = vperm.slane %v5043_v11, 0  ;;  %v4384_v8 = vadd.f32 %v10005_v60, %v4198_v49 }
 0x627   :  { %v4930_v6 = vadd.f32 %v10478_v58, %v4812_v33  ;;  %v4214_v21 = vadd.f32 %v10037_v40, %v10297_v62 }
 0x628   :  { %v4511_v45 = vpop.f32.mrf.mxu2  ;;  %v4669_v2 = vpop.f32.mrf.mxu3  ;;  %v5129_v0 = vsel %vm5128_vm13, %v5105_v35, %v5127_v28 }
 0x629   :  { %v4512_v23 = vadd.f32 %v4511_v45, %v4384_v8  ;;  %v5047_v29 = vrot.slane %v4930_v6, 4  ;;  %v5048_v22 = vrot.slane %v4930_v6, 6  ;;  %v5392_v42 = vperm.slane %v4930_v6, 0 }
 0x62a   :  { %v5046_v18 = vrot.slane %v4930_v6, 2  ;;  %v5440_v1 = vperm.slane %v4930_v6, 1  ;;  %v4392_v8 = vadd.f32 %v10039_v26, %v4214_v21 }
 0x62b   :  { %v4664_v58 = vadd.f32 %v4663_v13, %v4512_v23  ;;  %v5153_v60 = vperm.slane %v5047_v29, 1  ;;  %v5249_v54 = vperm.slane %v5048_v22, 1  ;;  %v5201_v52 = vperm.slane %v5048_v22, 0 }
 0x62c   :  { %v5411_v44 = vsel %vm5128_vm13, %v5392_v42, %v5410_v57  ;;  %v5488_v16 = vperm.slane %v5046_v18, 0  ;;  %v5459_v27 = vsel %vm5128_vm13, %v5440_v1, %v5458_v4  ;;  %v5536_v63 = vperm.slane %v5046_v18, 1  ;;  %v11949_v42 = vld [vmem:[#allocation75_spill] sm:$0xff] }
 0x62d   :  { %v4816_v48 = vadd.f32 %v10495_v14, %v4664_v58  ;;  %v5172_v5 = vsel %vm5130_vm14, %v5153_v60, %v5171_v41  ;;  %v5268_v12 = vsel %vm5130_vm14, %v5249_v54, %v5267_v53  ;;  %v5220_v34 = vsel %vm5130_vm14, %v5201_v52, %v5219_v39  ;;  %v10594_v46 = vpop.f32.mrf.mxu0  ;;  %v10598_v41 = vpop.f32.mrf.mxu1 }
 0x62e   :  { %v5507_v28 = vsel %vm5128_vm13, %v5488_v16, %v5506_v38  ;;  %v5555_v3 = vsel %vm5128_vm13, %v5536_v63, %v5554_v56  ;;  %v5106_v13 = vperm.slane %v5047_v29, 0  ;;  %v4388_v57 = vadd.f32 %v10022_v61, %v4206_v32 }
 0x62f   :  { %v4934_v17 = vadd.f32 %v10500_v55, %v4816_v48  ;;  %v4222_v32 = vadd.f32 %v11949_v42, %v10305_v51 }
 0x630   :  { %v4516_v11 = vpop.f32.mrf.mxu2  ;;  %v4675_v4 = vpop.f32.mrf.mxu3  ;;  %v5131_v10 = vsel %vm5130_vm14, %v5106_v13, %v5129_v0  ;;  %v11950_v13 = vld [vmem:[#allocation135_spill] sm:$0xff] }
 0x631   :  { %v4517_v14 = vadd.f32 %v4516_v11, %v4388_v57  ;;  %v5051_v36 = vrot.slane %v4934_v17, 6  ;;  %v5345_v49 = vperm.slane %v4934_v17, 1  ;;  %v5049_v20 = vrot.slane %v4934_v17, 2 }
 0x632   :  { %v5297_v47 = vperm.slane %v4934_v17, 0  ;;  %v5050_v25 = vrot.slane %v4934_v17, 4  ;;  %v4396_v17 = vadd.f32 %v11950_v13, %v4222_v32 }
 0x633   :  { %v4670_v59 = vadd.f32 %v4669_v2, %v4517_v14  ;;  %v5154_v55 = vperm.slane %v5051_v36, 1  ;;  %v5364_v61 = vsel %vm5130_vm14, %v5345_v49, %v5363_v15  ;;  %v5393_v7 = vperm.slane %v5049_v20, 0  ;;  %v11952_v49 = vld [vmem:[#allocation74_spill] sm:$0xff] }
 0x634   :  { %v5316_v43 = vsel %vm5130_vm14, %v5297_v47, %v5315_v24  ;;  %v5489_v38 = vperm.slane %v5050_v25, 0  ;;  %v5441_v56 = vperm.slane %v5049_v20, 1  ;;  %v5537_v33 = vperm.slane %v5050_v25, 1 }
 0x635   :  { %v4820_v53 = vadd.f32 %v10523_v31, %v4670_v59  ;;  %v5173_v40 = vsel %vm5132_vm15, %v5154_v55, %v5172_v5  ;;  %v5412_v62 = vsel %vm5130_vm14, %v5393_v7, %v5411_v44  ;;  %v5107_v39 = vperm.slane %v5051_v36, 0  ;;  %v11951_v36 = vld [vmem:[#allocation8_spill] sm:$0xff] }
 0x636   :  { %5183 = vrot.lane.b32.xlu0 %v5173_v40, %s6343_s5  ;;  %v5508_v35 = vsel %vm5130_vm14, %v5489_v38, %v5507_v28  ;;  %v5460_v15 = vsel %vm5130_vm14, %v5441_v56, %v5459_v27  ;;  %v5556_v24 = vsel %vm5130_vm14, %v5537_v33, %v5555_v3  ;;  %v10618_v27 = vpop.f32.mrf.mxu0  ;;  %v10627_v3 = vpop.f32.mrf.mxu1  ;;  %v4230_v20 = vadd.f32 %v11952_v49, %v11951_v36  ;;  %v11954_v38 = vld [vmem:[#allocation9_spill] sm:$0xff]  ;;  %v11955_v56 = vld [vmem:[#allocation78_spill] sm:$0xff] }
 0x637   :  { %v4938_v6 = vadd.f32 %v10534_v37, %v4820_v53  ;;  %v10610_v45 = vsel %vm5132_vm15, %v5107_v39, %v5131_v10  ;;  %v4238_v33 = vadd.f32 %v11955_v56, %v11954_v38 }
 0x638   :  { %v4521_v31 = vpop.f32.mrf.mxu2  ;;  %v4681_v2 = vpop.f32.mrf.mxu3 }
 0x639   :  { %v4522_v0 = vadd.f32 %v4521_v31, %v4392_v8  ;;  %v5250_v23 = vperm.slane %v4938_v6, 1  ;;  %v5202_v29 = vperm.slane %v4938_v6, 0  ;;  %v5052_v22 = vrot.slane %v4938_v6, 2 }
 0x63a   :  { %v5053_v18 = vrot.slane %v4938_v6, 4  ;;  %v5054_v1 = vrot.slane %v4938_v6, 6 }
 0x63b   :  { %v4676_v58 = vadd.f32 %v4675_v4, %v4522_v0  ;;  %v5269_v60 = vsel %vm5132_vm15, %v5250_v23, %v5268_v12  ;;  %v5221_v37 = vsel %vm5132_vm15, %v5202_v29, %v5220_v34  ;;  %v5346_v26 = vperm.slane %v5052_v22, 1 }
 0x63c   :  { %5279 = vrot.lane.b32.xlu2 %v5269_v60, %s6345_s7  ;;  %5231 = vrot.lane.b32.xlu1 %v5221_v37, %s6344_s6  ;;  %v5394_v54 = vperm.slane %v5053_v18, 0  ;;  %v5298_v52 = vperm.slane %v5052_v22, 0  ;;  %v5490_v44 = vperm.slane %v5054_v1, 0  ;;  %v5442_v16 = vperm.slane %v5053_v18, 1 }
 0x63d   :  { %v4824_v51 = vadd.f32 %v10554_v19, %v4676_v58  ;;  %v5365_v63 = vsel %vm5132_vm15, %v5346_v26, %v5364_v61  ;;  %v5538_v48 = vperm.slane %v5054_v1, 1 }
 0x63e   :  { %5375 = vrot.lane.b32.xlu0 %v5365_v63, %s6346_s8  ;;  %v5413_v5 = vsel %vm5132_vm15, %v5394_v54, %v5412_v62  ;;  %v5317_v12 = vsel %vm5132_vm15, %v5298_v52, %v5316_v43  ;;  %v5509_v34 = vsel %vm5132_vm15, %v5490_v44, %v5508_v35  ;;  %v5461_v28 = vsel %vm5132_vm15, %v5442_v16, %v5460_v15  ;;  %v10638_v59 = vpop.f32.mrf.mxu0  ;;  %v10646_v40 = vpop.f32.mrf.mxu1  ;;  %v11956_v52 = vld [vmem:[#allocation138_spill] sm:$0xff] }
 0x63f   :  { %v5557_v19 = vsel %vm5132_vm15, %v5538_v48, %v5556_v24  ;;  %v4942_v10 = vadd.f32 %v10559_v9, %v4824_v51  ;;  %v11953_v9 = vld [vmem:[#allocation46_spill] sm:$0xff]  ;;  %v4404_v44 = vadd.f32 %v11956_v52, %v4238_v33 }
 0x640   :  { %v4526_v57 = vpop.f32.mrf.mxu2  ;;  %v4687_v11 = vpop.f32.mrf.mxu3  ;;  %v4400_v61 = vadd.f32 %v11953_v9, %v4230_v20  ;;  %v11959_v9 = vld [vmem:[#allocation48_spill] sm:$0xff] }
 0x641   :  { %v4527_v4 = vadd.f32 %v4526_v57, %v4396_v17  ;;  %v5055_v47 = vrot.slane %v4942_v10, 2  ;;  %v5056_v25 = vrot.slane %v4942_v10, 4  ;;  %v5155_v53 = vperm.slane %v4942_v10, 1  ;;  %v11957_v17 = vld [vmem:[#allocation11_spill] sm:$0xff] }
 0x642   :  { %v5108_v6 = vperm.slane %v4942_v10, 0  ;;  %v5057_v26 = vrot.slane %v4942_v10, 6 }
 0x643   :  { %v4682_v14 = vadd.f32 %v4681_v2, %v4527_v4  ;;  %v5203_v15 = vperm.slane %v5055_v47, 0  ;;  %v5347_v24 = vperm.slane %v5056_v25, 1  ;;  %v5299_v29 = vperm.slane %v5056_v25, 0 }
 0x644   :  { %5423 = vrot.lane.b32.xlu2 %v5413_v5, %s6347_s9  ;;  %5327 = vrot.lane.b32.xlu1 %v5317_v12, %s6340_s15  ;;  %v5395_v12 = vperm.slane %v5057_v26, 0  ;;  %v5443_v4 = vperm.slane %v5057_v26, 1 }
 0x645   :  { %v4828_v21 = vadd.f32 %v10575_v30, %v4682_v14 }
 0x646   :  { %5519 = vrot.lane.b32.xlu0 %v5509_v34, %s6341_s16  ;;  %v10665_v63 = vpop.f32.mrf.mxu0  ;;  %v10667_v13 = vpop.f32.mrf.mxu1 }
 0x647   :  { %v10641_v55 = vadd.f32 %v10579_v50, %v4828_v21  ;;  %v5251_v50 = vperm.slane %v5055_v47, 1 }
 0x648   :  { %v4531_v7 = vpop.f32.mrf.mxu2  ;;  %v4693_v43 = vpop.f32.mrf.mxu3 }
 0x649   :  { %v4532_v30 = vadd.f32 %v4531_v7, %v4400_v61  ;;  %v5059_v62 = vrot.slane %v10641_v55, 4  ;;  %v5058_v39 = vrot.slane %v10641_v55, 2  ;;  %v5060_v35 = vrot.slane %v10641_v55, 6 }
 0x64b   :  { %v4688_v8 = vadd.f32 %v4687_v11, %v4532_v30  ;;  %v5204_v31 = vperm.slane %v5059_v62, 0  ;;  %v5252_v2 = vperm.slane %v5059_v62, 1  ;;  %v5156_v0 = vperm.slane %v5058_v39, 1  ;;  %v11961_v30 = vld [vmem:[#allocation80_spill] sm:$0xff] }
 0x64c   :  { %5471 = vrot.lane.b32.xlu1 %v5461_v28, %s6348_s10  ;;  %v5348_v23 = vperm.slane %v5060_v35, 1  ;;  %v5300_v22 = vperm.slane %v5060_v35, 0  ;;  %v5109_v42 = vperm.slane %v5058_v39, 0  ;;  %v5491_v11 = vperm.slane %v10641_v55, 0 }
 0x64d   :  { %v4832_v32 = vadd.f32 %v10594_v46, %v4688_v8  ;;  %v5222_v18 = vsel %vm5120_vm9, %v5204_v31, %v5203_v15  ;;  %v5270_v1 = vsel %vm5120_vm9, %v5252_v2, %v5251_v50  ;;  %v5174_v58 = vsel %vm5120_vm9, %v5156_v0, %v5155_v53  ;;  %v11960_v53 = vld [vmem:[#allocation34_spill] sm:$0xff]  ;;  %v11962_v0 = vld [vmem:[#allocation79_spill] sm:$0xff] }
 0x64e   :  { %5567 = vrot.lane.b32.xlu0 %v5557_v19, %s6349_s11  ;;  %5233 = vrot.lane.b32.xlu2 %v5222_v18, %s6344_s6  ;;  %v5366_v60 = vsel %vm5120_vm9, %v5348_v23, %v5347_v24  ;;  %v5318_v37 = vsel %vm5120_vm9, %v5300_v22, %v5299_v29  ;;  %v10661_v54 = vsel %vm5120_vm9, %v5109_v42, %v5108_v6  ;;  %v11958_v19 = vld [vmem:[#allocation76_spill] sm:$0xff]  ;;  %v10687_v62 = vpop.f32.mrf.mxu0  ;;  %v10690_v31 = vpop.f32.mrf.mxu1 }
 0x64f   :  { %v4950_v46 = vadd.f32 %v10598_v41, %v4832_v32  ;;  %v4246_v57 = vadd.f32 %v11958_v19, %v11957_v17  ;;  %v5539_v41 = vperm.slane %v10641_v55, 1 }
 0x650   :  { %v4536_v16 = vpop.f32.mrf.mxu2  ;;  %v4699_v51 = vpop.f32.mrf.mxu3 }
 0x651   :  { %v4537_v48 = vadd.f32 %v4536_v16, %v4404_v44  ;;  %v5061_v5 = vrot.slane %v4950_v46, 2  ;;  %v5396_v34 = vperm.slane %v4950_v46, 0  ;;  %v5444_v28 = vperm.slane %v4950_v46, 1 }
 0x652   :  { %v5062_v55 = vrot.slane %v4950_v46, 4  ;;  %v4408_v61 = vadd.f32 %v11959_v9, %v4246_v57  ;;  %v5063_v39 = vrot.slane %v4950_v46, 6 }
 0x653   :  { %v4694_v10 = vadd.f32 %v4693_v43, %v4537_v48  ;;  %v5492_v14 = vperm.slane %v5061_v5, 0  ;;  %v5414_v36 = vsel %vm5120_vm9, %v5396_v34, %v5395_v12  ;;  %v5540_v49 = vperm.slane %v5061_v5, 1 }
 0x654   :  { %5281 = vrot.lane.b32.xlu1 %v5270_v1, %s6345_s7  ;;  %v10676_v20 = vsel %vm5120_vm9, %v5444_v28, %v5443_v4  ;;  %v5110_v35 = vperm.slane %v5062_v55, 0  ;;  %v5157_v50 = vperm.slane %v5062_v55, 1  ;;  %v5205_v42 = vperm.slane %v5063_v39, 0  ;;  %v11963_v1 = vld [vmem:[#allocation13_spill] sm:$0xff] }
 0x655   :  { %v4836_v21 = vadd.f32 %v10618_v27, %v4694_v10  ;;  %v5510_v47 = vsel %vm5120_vm9, %v5492_v14, %v5491_v11  ;;  %v5558_v25 = vsel %vm5120_vm9, %v5540_v49, %v5539_v41  ;;  %v4254_v27 = vadd.f32 %v11961_v30, %v11960_v53  ;;  %v11967_v53 = vld [vmem:[#allocation81_spill] sm:$0xff] }
 0x656   :  { %5185 = vrot.lane.b32.xlu0 %v5174_v58, %s6343_s5  ;;  %5377 = vrot.lane.b32.xlu2 %v5366_v60, %s6346_s8  ;;  %v5253_v32 = vperm.slane %v5063_v39, 1  ;;  %v11964_v58 = vld [vmem:[#allocation49_spill] sm:$0xff] }
 0x657   :  { %v4954_v7 = vadd.f32 %v10627_v3, %v4836_v21  ;;  %v4412_v23 = vadd.f32 %v11962_v0, %v4254_v27  ;;  %v4262_v60 = vadd.f32 %v11964_v58, %v11963_v1 }
 0x658   :  { %v4541_v43 = vpop.f32.mrf.mxu2  ;;  %v4705_v38 = vpop.f32.mrf.mxu3 }
 0x659   :  { %v4542_v56 = vadd.f32 %v4541_v43, %v4408_v61  ;;  %v5066_v33 = vrot.slane %v4954_v7, 6  ;;  %v5064_v24 = vrot.slane %v4954_v7, 2  ;;  %v5065_v2 = vrot.slane %v4954_v7, 4  ;;  %v4969_v43 = vpop.f32.mrf.mxu1 }
 0x65a   :  { %v5349_v26 = vperm.slane %v4954_v7, 1 }
 0x65b   :  { %v4700_v15 = vadd.f32 %v4699_v51, %v4542_v56  ;;  %v5111_v6 = vperm.slane %v5066_v33, 0  ;;  %v5158_v8 = vperm.slane %v5066_v33, 1  ;;  %v5397_v46 = vperm.slane %v5064_v24, 0  ;;  %v11966_v33 = vld [vmem:[#allocation19_spill] sm:$0xff] }
 0x65c   :  { %5521 = vrot.lane.b32.xlu1 %v5510_v47, %s6341_s16  ;;  %v5493_v12 = vperm.slane %v5065_v2, 0  ;;  %v5541_v34 = vperm.slane %v5065_v2, 1  ;;  %v4270_v30 = vadd.f32 %v11967_v53, %v11966_v33 }
 0x65d   :  { %v4840_v3 = vadd.f32 %v10638_v59, %v4700_v15  ;;  %v5175_v29 = vsel %vm5120_vm9, %v5158_v8, %v5157_v50  ;;  %v10698_v22 = vsel %vm5120_vm9, %v5111_v6, %v5110_v35  ;;  %v5301_v59 = vperm.slane %v4954_v7, 0 }
 0x65e   :  { %5329 = vrot.lane.b32.xlu0 %v5318_v37, %s6340_s15  ;;  %5425 = vrot.lane.b32.xlu2 %v5414_v36, %s6347_s9  ;;  %v5445_v37 = vperm.slane %v5064_v24, 1  ;;  %v4851_v36 = vpop.f32.mrf.mxu0 }
 0x65f   :  { %v4958_v18 = vadd.f32 %v10646_v40, %v4840_v3  ;;  %v11968_v3 = vld [vmem:[#allocation84_spill] sm:$0xff] }
 0x660   :  { %v4546_v52 = vpop.f32.mrf.mxu2  ;;  %v4711_v44 = vpop.f32.mrf.mxu3  ;;  %v4420_v2 = vadd.f32 %v11968_v3, %v4270_v30  ;;  %v11971_v30 = vld [vmem:[#allocation86_spill] sm:$0xff] }
 0x661   :  { %v5067_v16 = vrot.slane %v4958_v18, 2  ;;  %v5068_v51 = vrot.slane %v4958_v18, 4  ;;  %v5069_v48 = vrot.slane %v4958_v18, 6  ;;  %v5206_v5 = vperm.slane %v4958_v18, 0 }
 0x662   :  { %v5254_v28 = vperm.slane %v4958_v18, 1  ;;  %v4547_v17 = vadd.f32 %v4546_v52, %v4412_v23 }
 0x663   :  { %v5302_v19 = vperm.slane %v5067_v16, 0  ;;  %v5350_v57 = vperm.slane %v5067_v16, 1  ;;  %v5398_v40 = vperm.slane %v5068_v51, 0  ;;  %v5446_v11 = vperm.slane %v5068_v51, 1 }
 0x664   :  { %v5494_v41 = vperm.slane %v5069_v48, 0  ;;  %v5542_v4 = vperm.slane %v5069_v48, 1  ;;  %v4706_v10 = vadd.f32 %v4705_v38, %v4547_v17  ;;  %5569 = vrot.lane.b32.xlu1 %v5558_v25, %s6349_s11  ;;  %v5271_v14 = vsel %vm5120_vm9, %v5254_v28, %v5253_v32  ;;  %v11965_v38 = vld [vmem:[#allocation82_spill] sm:$0xff]  ;;  %v4973_v28 = vpop.f32.mrf.mxu1 }
 0x665   :  { %v5415_v49 = vsel %vm5120_vm9, %v5398_v40, %v5397_v46  ;;  %v5319_v21 = vsel %vm5120_vm9, %v5302_v19, %v5301_v59  ;;  %v5223_v47 = vsel %vm5120_vm9, %v5206_v5, %v5205_v42  ;;  %v5367_v55 = vsel %vm5120_vm9, %v5350_v57, %v5349_v26  ;;  %v11969_v17 = vld [vmem:[#allocation150_spill] sm:$0xff]  ;;  %v11970_v19 = vld [vmem:[#allocation83_spill] sm:$0xff] }
 0x666   :  { %v4844_v9 = vadd.f32 %v10665_v63, %v4706_v10  ;;  %5473 = vrot.lane.b32.xlu2 %v10676_v20, %s6348_s10  ;;  %v5463_v61 = vsel %vm5120_vm9, %v5446_v11, %v5445_v37  ;;  %v5511_v25 = vsel %vm5120_vm9, %v5494_v41, %v5493_v12  ;;  %v5559_v7 = vsel %vm5120_vm9, %v5542_v4, %v5541_v34  ;;  %v4855_v37 = vpop.f32.mrf.mxu0 }
 0x667   :  { %v4416_v56 = vadd.f32 %v11965_v38, %v4262_v60  ;;  %v4278_v57 = vadd.f32 %v11970_v19, %v11969_v17  ;;  %v11975_v19 = vld [vmem:[#allocation14_spill] sm:$0xff] }
 0x668   :  { %v4962_v27 = vadd.f32 %v10667_v13, %v4844_v9  ;;  %v4551_v39 = vpop.f32.mrf.mxu2  ;;  %v4717_v35 = vpop.f32.mrf.mxu3 }
 0x669   :  { %v4552_v63 = vadd.f32 %v4551_v39, %v4416_v56 }
 0x66a   :  { %v5070_v15 = vrot.slane %v4962_v27, 2  ;;  %v5071_v50 = vrot.slane %v4962_v27, 4  ;;  %v5072_v20 = vrot.slane %v4962_v27, 6  ;;  %v5112_v24 = vperm.slane %v4962_v27, 0 }
 0x66b   :  { %v5159_v6 = vperm.slane %v4962_v27, 1  ;;  %v4712_v8 = vadd.f32 %v4711_v44, %v4552_v63 }
 0x66c   :  { %v5255_v0 = vperm.slane %v5070_v15, 1  ;;  %v5399_v23 = vperm.slane %v5072_v20, 0  ;;  %v5303_v42 = vperm.slane %v5071_v50, 0  ;;  %v5207_v32 = vperm.slane %v5070_v15, 0 }
 0x66d   :  { %v4848_v18 = vadd.f32 %v10687_v62, %v4712_v8  ;;  %v5176_v1 = vsel %vm5122_vm10, %v5159_v6, %v5175_v29  ;;  %v5351_v13 = vperm.slane %v5071_v50, 1  ;;  %v5447_v58 = vperm.slane %v5072_v20, 1  ;;  %v11972_v20 = vld [vmem:[#allocation15_spill] sm:$0xff] }
 0x66e   :  { %v5272_v60 = vsel %vm5122_vm10, %v5255_v0, %v5271_v14  ;;  %v5416_v59 = vsel %vm5122_vm10, %v5399_v23, %v5415_v49  ;;  %v5320_v26 = vsel %vm5122_vm10, %v5303_v42, %v5319_v21  ;;  %v5224_v46 = vsel %vm5122_vm10, %v5207_v32, %v5223_v47  ;;  %v4859_v50 = vpop.f32.mrf.mxu0  ;;  %v4977_v42 = vpop.f32.mrf.mxu1 }
 0x66f   :  { %v4966_v52 = vadd.f32 %v10690_v31, %v4848_v18  ;;  %v5368_v44 = vsel %vm5122_vm10, %v5351_v13, %v5367_v55  ;;  %v5464_v16 = vsel %vm5122_vm10, %v5447_v58, %v5463_v61  ;;  %v5136_v62 = vsel %vm5122_vm10, %v5112_v24, %v10698_v22  ;;  %v11973_v24 = vld [vmem:[#allocation85_spill] sm:$0xff] }
 0x670   :  { %v4556_v29 = vpop.f32.mrf.mxu2  ;;  %v4723_v51 = vpop.f32.mrf.mxu3  ;;  %v4286_v6 = vadd.f32 %v11973_v24, %v11972_v20  ;;  %v11978_v20 = vld [vmem:[#allocation23_spill] sm:$0xff]  ;;  %v11979_v24 = vld [vmem:[#allocation89_spill] sm:$0xff] }
 0x671   :  { %v5495_v48 = vperm.slane %v4966_v52, 0  ;;  %v5543_v5 = vperm.slane %v4966_v52, 1  ;;  %v4557_v12 = vadd.f32 %v4556_v29, %v4420_v2  ;;  %v5074_v34 = vrot.slane %v4966_v52, 4 }
 0x672   :  { %v5073_v40 = vrot.slane %v4966_v52, 2  ;;  %v5075_v11 = vrot.slane %v4966_v52, 6 }
 0x673   :  { %v4718_v31 = vadd.f32 %v4717_v35, %v4557_v12  ;;  %v5256_v41 = vperm.slane %v5074_v34, 1  ;;  %v5208_v4 = vperm.slane %v5074_v34, 0  ;;  %v5512_v10 = vsel %vm5122_vm10, %v5495_v48, %v5511_v25 }
 0x674   :  { %v5160_v14 = vperm.slane %v5073_v40, 1  ;;  %v5304_v49 = vperm.slane %v5075_v11, 0  ;;  %v5352_v22 = vperm.slane %v5075_v11, 1  ;;  %v5560_v21 = vsel %vm5122_vm10, %v5543_v5, %v5559_v7 }
 0x675   :  { %v4852_v47 = vadd.f32 %v4851_v36, %v4718_v31  ;;  %v5273_v55 = vsel %vm5124_vm11, %v5256_v41, %v5272_v60  ;;  %v5225_v9 = vsel %vm5124_vm11, %v5208_v4, %v5224_v46  ;;  %v5113_v61 = vperm.slane %v5073_v40, 0 }
 0x676   :  { %v5177_v38 = vsel %vm5124_vm11, %v5160_v14, %v5176_v1  ;;  %v5321_v56 = vsel %vm5124_vm11, %v5304_v49, %v5320_v26  ;;  %v5369_v33 = vsel %vm5124_vm11, %v5352_v22, %v5368_v44  ;;  %v4424_v25 = vadd.f32 %v11971_v30, %v4278_v57  ;;  %v11976_v57 = vld [vmem:[#allocation87_spill] sm:$0xff]  ;;  %v4863_v14 = vpop.f32.mrf.mxu0 }
 0x677   :  { %v4970_v53 = vadd.f32 %v4969_v43, %v4852_v47  ;;  %v5137_v27 = vsel %vm5124_vm11, %v5113_v61, %v5136_v62  ;;  %v4294_v40 = vadd.f32 %v11976_v57, %v11975_v19  ;;  %v11981_v57 = vld [vmem:[#allocation24_spill] sm:$0xff]  ;;  %vm5608_vm10 = vcmask 457728  }
 0x678   :  { %v4561_v39 = vpop.f32.mrf.mxu2  ;;  %v4729_v35 = vpop.f32.mrf.mxu3 }
 0x679   :  { %v4562_v7 = vadd.f32 %v4561_v39, %v4424_v25  ;;  %v5078_v36 = vrot.slane %v4970_v53, 6  ;;  %v5077_v63 = vrot.slane %v4970_v53, 4  ;;  %v5400_v15 = vperm.slane %v4970_v53, 0  ;;  %v11977_v39 = vld [vmem:[#allocation90_spill] sm:$0xff] }
 0x67a   :  { %v5448_v8 = vperm.slane %v4970_v53, 1  ;;  %v5076_v3 = vrot.slane %v4970_v53, 2  ;;  %v4981_v53 = vpop.f32.mrf.mxu1 }
 0x67b   :  { %v4724_v2 = vadd.f32 %v4723_v51, %v4562_v7  ;;  %v5257_v0 = vperm.slane %v5078_v36, 1  ;;  %v5161_v23 = vperm.slane %v5077_v63, 1  ;;  %v5417_v43 = vsel %vm5124_vm11, %v5400_v15, %v5416_v59  ;;  %v11974_v59 = vld [vmem:[#allocation88_spill] sm:$0xff] }
 0x67c   :  { %v5209_v32 = vperm.slane %v5078_v36, 0  ;;  %v5465_v18 = vsel %vm5124_vm11, %v5448_v8, %v5464_v16  ;;  %v5496_v1 = vperm.slane %v5076_v3, 0  ;;  %v5544_v13 = vperm.slane %v5076_v3, 1 }
 0x67d   :  { %v4856_v58 = vadd.f32 %v4855_v37, %v4724_v2  ;;  %v5274_v60 = vsel %vm5126_vm12, %v5257_v0, %v5273_v55  ;;  %v5178_v26 = vsel %vm5126_vm12, %v5161_v23, %v5177_v38  ;;  %v5114_v46 = vperm.slane %v5077_v63, 0 }
 0x67e   :  { %v5226_v52 = vsel %vm5126_vm12, %v5209_v32, %v5225_v9  ;;  %v5513_v44 = vsel %vm5124_vm11, %v5496_v1, %v5512_v10  ;;  %v5561_v62 = vsel %vm5124_vm11, %v5544_v13, %v5560_v21  ;;  %v4428_v51 = vadd.f32 %v11974_v59, %v4286_v6 }
 0x67f   :  { %v4974_v29 = vadd.f32 %v4973_v28, %v4856_v58  ;;  %v5138_v48 = vsel %vm5126_vm12, %v5114_v46, %v5137_v27  ;;  %v4302_v6 = vadd.f32 %v11979_v24, %v11978_v20  ;;  %vm5617_vm11 = vcmask 588800  }
 0x680   :  { %v4566_v16 = vpop.f32.mrf.mxu2  ;;  %v4735_v17 = vpop.f32.mrf.mxu3 }
 0x681   :  { %v4567_v5 = vadd.f32 %v4566_v16, %v4428_v51  ;;  %v5081_v12 = vrot.slane %v4974_v29, 6  ;;  %v5079_v37 = vrot.slane %v4974_v29, 2  ;;  %v5305_v34 = vperm.slane %v4974_v29, 0 }
 0x682   :  { %v5353_v11 = vperm.slane %v4974_v29, 1  ;;  %v5080_v31 = vrot.slane %v4974_v29, 4 }
 0x683   :  { %v4730_v41 = vadd.f32 %v4729_v35, %v4567_v5  ;;  %v5162_v4 = vperm.slane %v5081_v12, 1  ;;  %v5401_v10 = vperm.slane %v5079_v37, 0  ;;  %v5322_v28 = vsel %vm5126_vm12, %v5305_v34, %v5321_v56  ;;  %v4985_v5 = vpop.f32.mrf.mxu1 }
 0x684   :  { %v5370_v49 = vsel %vm5126_vm12, %v5353_v11, %v5369_v33  ;;  %v5449_v22 = vperm.slane %v5079_v37, 1  ;;  %v5497_v21 = vperm.slane %v5080_v31, 0  ;;  %v5545_v47 = vperm.slane %v5080_v31, 1 }
 0x685   :  { %v4860_v55 = vadd.f32 %v4859_v50, %v4730_v41  ;;  %v5179_v9 = vsel %vm5128_vm13, %v5162_v4, %v5178_v26  ;;  %v5418_v61 = vsel %vm5126_vm12, %v5401_v10, %v5417_v43  ;;  %v5115_v38 = vperm.slane %v5081_v12, 0 }
 0x686   :  { %v5466_v30 = vsel %vm5126_vm12, %v5449_v22, %v5465_v18  ;;  %v5514_v25 = vsel %vm5126_vm12, %v5497_v21, %v5513_v44  ;;  %v5562_v27 = vsel %vm5126_vm12, %v5545_v47, %v5561_v62  ;;  %v4432_v35 = vadd.f32 %v11977_v39, %v4294_v40  ;;  %v4867_v62 = vpop.f32.mrf.mxu0  ;;  %v11982_v40 = vld [vmem:[#allocation91_spill] sm:$0xff] }
 0x687   :  { %v4978_v56 = vadd.f32 %v4977_v42, %v4860_v55  ;;  %v5139_v33 = vsel %vm5128_vm13, %v5115_v38, %v5138_v48  ;;  %v11980_v48 = vld [vmem:[#allocation92_spill] sm:$0xff]  ;;  %v4310_v11 = vadd.f32 %v11982_v40, %v11981_v57  ;;  %vm5692_vm12 = vcmask 1046528  }
 0x688   :  { %v4571_v7 = vpop.f32.mrf.mxu2  ;;  %v4741_v42 = vpop.f32.mrf.mxu3  ;;  %v4436_v16 = vadd.f32 %v11980_v48, %v4302_v6 }
 0x689   :  { %v4572_v36 = vadd.f32 %v4571_v7, %v4432_v35  ;;  %v5258_v63 = vperm.slane %v4978_v56, 1  ;;  %v5083_v15 = vrot.slane %v4978_v56, 4  ;;  %v5082_v50 = vrot.slane %v4978_v56, 2  ;;  %v11983_v35 = vld [vmem:[#allocation94_spill] sm:$0xff] }
 0x68a   :  { %v5210_v8 = vperm.slane %v4978_v56, 0  ;;  %v5084_v3 = vrot.slane %v4978_v56, 6  ;;  %v4440_v7 = vadd.f32 %v11983_v35, %v4310_v11 }
 0x68b   :  { %v4736_v2 = vadd.f32 %v4735_v17, %v4572_v36  ;;  %v5275_v0 = vsel %vm5128_vm13, %v5258_v63, %v5274_v60  ;;  %v5402_v23 = vperm.slane %v5083_v15, 0  ;;  %v5306_v43 = vperm.slane %v5082_v50, 0  ;;  %v4989_v6 = vpop.f32.mrf.mxu1 }
 0x68c   :  { %v5227_v32 = vsel %vm5128_vm13, %v5210_v8, %v5226_v52  ;;  %v5354_v18 = vperm.slane %v5082_v50, 1  ;;  %v5450_v1 = vperm.slane %v5083_v15, 1  ;;  %v5498_v13 = vperm.slane %v5084_v3, 0  ;;  %v10786_v15 = vpop.permute.xlu2 %5668  ;;  %v10788_v8 = vpop.permute.xlu1 %5651 }
 0x68d   :  { %v4864_v58 = vadd.f32 %v4863_v14, %v4736_v2  ;;  %v5419_v26 = vsel %vm5128_vm13, %v5402_v23, %v5418_v61  ;;  %v5323_v46 = vsel %vm5128_vm13, %v5306_v43, %v5322_v28  ;;  %v5546_v44 = vperm.slane %v5084_v3, 1  ;;  %v11984_v3 = vld [vmem:[#allocation98_spill] sm:$0xff]  ;;  %v11985_v2 = vld [vmem:[#allocation93_spill] sm:$0xff] }
 0x68e   :  { %v5371_v29 = vsel %vm5128_vm13, %v5354_v18, %v5370_v49  ;;  %v5467_v59 = vsel %vm5128_vm13, %v5450_v1, %v5466_v30  ;;  %v5515_v60 = vsel %vm5128_vm13, %v5498_v13, %v5514_v25  ;;  %v4871_v36 = vpop.f32.mrf.mxu0 }
 0x68f   :  { %v4982_v51 = vadd.f32 %v4981_v53, %v4864_v58  ;;  %v5563_v52 = vsel %vm5128_vm13, %v5546_v44, %v5562_v27 }
 0x690   :  { %v4576_v12 = vpop.f32.mrf.mxu2  ;;  %v4747_v30 = vpop.f32.mrf.mxu3 }
 0x691   :  { %v4577_v37 = vadd.f32 %v4576_v12, %v4436_v16  ;;  %v5085_v34 = vrot.slane %v4982_v51, 2  ;;  %v5163_v17 = vperm.slane %v4982_v51, 1  ;;  %v5087_v19 = vrot.slane %v4982_v51, 6 }
 0x692   :  { %v5086_v31 = vrot.slane %v4982_v51, 4  ;;  %v5116_v41 = vperm.slane %v4982_v51, 0 }
 0x693   :  { %v4742_v4 = vadd.f32 %v4741_v42, %v4577_v37  ;;  %v5259_v10 = vperm.slane %v5085_v34, 1  ;;  %v5180_v28 = vsel %vm5130_vm14, %v5163_v17, %v5179_v9  ;;  %v5403_v14 = vperm.slane %v5087_v19, 0 }
 0x694   :  { %v5307_v49 = vperm.slane %v5086_v31, 0  ;;  %v5211_v22 = vperm.slane %v5085_v34, 0  ;;  %v5355_v21 = vperm.slane %v5086_v31, 1  ;;  %v5451_v47 = vperm.slane %v5087_v19, 1 }
 0x695   :  { %v4868_v55 = vadd.f32 %v4867_v62, %v4742_v4  ;;  %v5276_v61 = vsel %vm5130_vm14, %v5259_v10, %v5275_v0  ;;  %v5420_v38 = vsel %vm5130_vm14, %v5403_v14, %v5419_v26  ;;  %v5140_v53 = vsel %vm5130_vm14, %v5116_v41, %v5139_v33  ;;  %v11987_v10 = vld [vmem:[#allocation100_spill] sm:$0xff] }
 0x696   :  { %v5324_v25 = vsel %vm5130_vm14, %v5307_v49, %v5323_v46  ;;  %v5228_v27 = vsel %vm5130_vm14, %v5211_v22, %v5227_v32  ;;  %v5372_v56 = vsel %vm5130_vm14, %v5355_v21, %v5371_v29  ;;  %v5468_v9 = vsel %vm5130_vm14, %v5451_v47, %v5467_v59  ;;  %v4875_v57 = vpop.f32.mrf.mxu0  ;;  %v10805_v31 = vpop.permute.xlu2 %5279 }
 0x697   :  { %v4986_v39 = vadd.f32 %v4985_v5, %v4868_v55  ;;  %v4318_v0 = vadd.f32 %v11985_v2, %v11984_v3  ;;  %v11986_v5 = vld [vmem:[#allocation96_spill] sm:$0xff]  ;;  %v4993_v22 = vpop.f32.mrf.mxu1  ;;  %v10812_v21 = vpop.permute.xlu1 %5705 }
 0x698   :  { %v4581_v63 = vpop.f32.mrf.mxu2 }
 0x699   :  { %v4582_v50 = vadd.f32 %v4581_v63, %v4440_v7  ;;  %v5089_v20 = vrot.slane %v4986_v39, 4  ;;  %v5088_v24 = vrot.slane %v4986_v39, 2  ;;  %v5090_v33 = vrot.slane %v4986_v39, 6 }
 0x69a   :  { %v5499_v23 = vperm.slane %v4986_v39, 0  ;;  %v5547_v43 = vperm.slane %v4986_v39, 1 }
 0x69b   :  { %v4748_v42 = vadd.f32 %v4747_v30, %v4582_v50  ;;  %v5260_v32 = vperm.slane %v5089_v20, 1  ;;  %v5164_v18 = vperm.slane %v5088_v24, 1  ;;  %v5308_v1 = vperm.slane %v5090_v33, 0 }
 0x69c   :  { %v5212_v13 = vperm.slane %v5089_v20, 0  ;;  %v5356_v58 = vperm.slane %v5090_v33, 1  ;;  %v5516_v26 = vsel %vm5130_vm14, %v5499_v23, %v5515_v60  ;;  %v5564_v46 = vsel %vm5130_vm14, %v5547_v43, %v5563_v52  ;;  %v4753_v52 = vpop.f32.mrf.mxu3 }
 0x69d   :  { %v4872_v44 = vadd.f32 %v4871_v36, %v4748_v42  ;;  %v5277_v62 = vsel %vm5132_vm15, %v5260_v32, %v5276_v61  ;;  %v5181_v29 = vsel %vm5132_vm15, %v5164_v18, %v5180_v28  ;;  %v5325_v59 = vsel %vm5132_vm15, %v5308_v1, %v5324_v25  ;;  %v11988_v28 = vld [vmem:[#allocation95_spill] sm:$0xff]  ;;  %v11989_v25 = vld [vmem:[#allocation97_spill] sm:$0xff] }
 0x69e   :  { %5283 = vrot.lane.b32.xlu0 %v5277_v62, %s6345_s7  ;;  %5187 = vrot.lane.b32.xlu1 %v5181_v29, %s6343_s5  ;;  %v5229_v51 = vsel %vm5132_vm15, %v5212_v13, %v5228_v27  ;;  %v5373_v48 = vsel %vm5132_vm15, %v5356_v58, %v5372_v56  ;;  %v4444_v60 = vadd.f32 %v11986_v5, %v4318_v0  ;;  %v5117_v12 = vperm.slane %v5088_v24, 0  ;;  %v4879_v33 = vpop.f32.mrf.mxu0  ;;  %v5424_v0 = vpop.permute.xlu2 %5423 }
 0x69f   :  { %v4990_v16 = vadd.f32 %v4989_v6, %v4872_v44  ;;  %v4326_v14 = vadd.f32 %v11988_v28, %v11987_v10  ;;  %v4997_v42 = vpop.f32.mrf.mxu1 }
 0x6a0   :  { %v4586_v37 = vpop.f32.mrf.mxu2  ;;  %v10803_v11 = vsel %vm5132_vm15, %v5117_v12, %v5140_v53 }
 0x6a1   :  { %v4587_v34 = vadd.f32 %v4586_v37, %v4444_v60  ;;  %v5404_v17 = vperm.slane %v4990_v16, 0  ;;  %v5452_v19 = vperm.slane %v4990_v16, 1  ;;  %v5091_v40 = vrot.slane %v4990_v16, 2 }
 0x6a2   :  { %v4448_v27 = vadd.f32 %v11989_v25, %v4326_v14  ;;  %v5092_v56 = vrot.slane %v4990_v16, 4  ;;  %v5093_v24 = vrot.slane %v4990_v16, 6 }
 0x6a3   :  { %v4754_v41 = vadd.f32 %v4753_v52, %v4587_v34  ;;  %v5421_v4 = vsel %vm5132_vm15, %v5404_v17, %v5420_v38  ;;  %v5469_v49 = vsel %vm5132_vm15, %v5452_v19, %v5468_v9  ;;  %v5500_v47 = vperm.slane %v5091_v40, 0 }
 0x6a4   :  { %5427 = vrot.lane.b32.xlu2 %v5421_v4, %s6347_s9  ;;  %v5548_v55 = vperm.slane %v5091_v40, 1  ;;  %v4759_v36 = vpop.f32.mrf.mxu3  ;;  %v5165_v50 = vperm.slane %v5092_v56, 1  ;;  %v5118_v3 = vperm.slane %v5092_v56, 0  ;;  %v5261_v58 = vperm.slane %v5093_v24, 1 }
 0x6a5   :  { %v4876_v61 = vadd.f32 %v4875_v57, %v4754_v41  ;;  %v5517_v53 = vsel %vm5132_vm15, %v5500_v47, %v5516_v26  ;;  %v5213_v26 = vperm.slane %v5093_v24, 0 }
 0x6a6   :  { %5331 = vrot.lane.b32.xlu0 %v5325_v59, %s6340_s15  ;;  %5235 = vrot.lane.b32.xlu1 %v5229_v51, %s6344_s6  ;;  %v10818_v38 = vsel %vm5132_vm15, %v5548_v55, %v5564_v46 }
 0x6a7   :  { %v10820_v30 = vadd.f32 %v4993_v22, %v4876_v61 }
 0x6a8   :  { %v4591_v9 = vpop.f32.mrf.mxu2  ;;  %v5184_v39 = vpop.permute.xlu0 %5183 }
 0x6a9   :  { %v4592_v35 = vadd.f32 %v4591_v9, %v4448_v27  ;;  %v5096_v7 = vrot.slane %v10820_v30, 6  ;;  %v5094_v6 = vrot.slane %v10820_v30, 2  ;;  %v5095_v18 = vrot.slane %v10820_v30, 4  ;;  %v5234_v10 = vpop.permute.xlu2 %5233 }
 0x6aa   :  { %v5580_v46 = vsel %vm5579_vm2, %v10610_v45, %v5184_v39  ;;  %v5357_v29 = vperm.slane %v10820_v30, 1  ;;  %v5309_v59 = vperm.slane %v10820_v30, 0 }
 0x6ab   :  { %v4760_v63 = vadd.f32 %v4759_v36, %v4592_v35  ;;  %v5166_v20 = vperm.slane %v5096_v7, 1  ;;  %v5119_v2 = vperm.slane %v5096_v7, 0  ;;  %v5453_v62 = vperm.slane %v5094_v6, 1  ;;  %v10862_v7 = vld [vmem:[%s11077_s1 + $0x18] ss:$0 sm:$0xff] }
 0x6ac   :  { %v5405_v12 = vperm.slane %v5094_v6, 0  ;;  %v5549_v37 = vperm.slane %v5095_v18, 1  ;;  %v5624_v36 = vld [vmem:[%s11077_s1 + $0x48] sm:$0xf] }
 0x6ad   :  { %v4880_v23 = vadd.f32 %v4879_v33, %v4760_v63  ;;  %v5182_v43 = vsel %vm5120_vm9, %v5166_v20, %v5165_v50  ;;  %v10830_v1 = vsel %vm5120_vm9, %v5119_v2, %v5118_v3  ;;  %v5645_v20 = vld [vmem:[%s11077_s1 + $0x30] sm:$0x3]  ;;  %v10875_v6 = vrot.slane %v5624_v36, 2 }
 0x6ae   :  { %5379 = vrot.lane.b32.xlu0 %v5373_v48, %s6346_s8  ;;  %5189 = vrot.lane.b32.xlu2 %v5182_v43, %s6343_s5  ;;  %v5232_v32 = vpop.permute.xlu1 %5231  ;;  %v5776_v2 = vperm.slane %v5645_v20, 0 }
 0x6af   :  { %v4998_v13 = vadd.f32 %v4997_v42, %v4880_v23  ;;  %5475 = vrot.lane.b32.xlu1 %v5469_v49, %s6348_s10  ;;  %v5585_v60 = vsel %vm5584_vm3, %v5580_v46, %v5232_v32  ;;  %v5501_v49 = vperm.slane %v5095_v18, 0 }
 0x6b0   :  { %v5376_v44 = vpop.permute.xlu0 %5375  ;;  %v5590_v30 = vsel %vm5589_vm4, %v5585_v60, %v10805_v31 }
 0x6b1   :  { %v5262_v51 = vperm.slane %v4998_v13, 1  ;;  %v5214_v48 = vperm.slane %v4998_v13, 0  ;;  %v5098_v16 = vrot.slane %v4998_v13, 4  ;;  %v5097_v5 = vrot.slane %v4998_v13, 2  ;;  %v5378_v31 = vpop.permute.xlu2 %5377 }
 0x6b2   :  { %v5099_v52 = vrot.slane %v4998_v13, 6 }
 0x6b3   :  { %v5278_v34 = vsel %vm5120_vm9, %v5262_v51, %v5261_v58  ;;  %v5230_v17 = vsel %vm5120_vm9, %v5214_v48, %v5213_v26  ;;  %v5454_v45 = vperm.slane %v5098_v16, 1  ;;  %v5358_v19 = vperm.slane %v5097_v5, 1  ;;  %v10902_v51 = vld [vmem:[%s11077_s1 + $0x18] sm:$0xfe] }
 0x6b4   :  { %v5406_v57 = vperm.slane %v5098_v16, 0  ;;  %v5310_v40 = vperm.slane %v5097_v5, 0  ;;  %v5550_v41 = vperm.slane %v5099_v52, 1  ;;  %v5502_v4 = vperm.slane %v5099_v52, 0 }
 0x6b5   :  { %v5470_v28 = vsel %vm5120_vm9, %v5454_v45, %v5453_v62  ;;  %v5374_v14 = vsel %vm5120_vm9, %v5358_v19, %v5357_v29  ;;  %v5730_v48 = vperm.slane %v10902_v51, 6 }
 0x6b6   :  { %5523 = vrot.lane.b32.xlu0 %v5517_v53, %s6341_s16  ;;  %v5328_v22 = vpop.permute.xlu1 %5327  ;;  %5237 = vrot.lane.b32.xlu2 %v5230_v17, %s6344_s6  ;;  %v5422_v47 = vsel %vm5120_vm9, %v5406_v57, %v5405_v12  ;;  %v5326_v55 = vsel %vm5120_vm9, %v5310_v40, %v5309_v59  ;;  %v5566_v61 = vsel %vm5120_vm9, %v5550_v41, %v5549_v37  ;;  %v5803_v59 = vperm.slane %v5645_v20, 1 }
 0x6b7   :  { %5285 = vrot.lane.b32.xlu1 %v5278_v34, %s6345_s7  ;;  %v5518_v25 = vsel %vm5120_vm9, %v5502_v4, %v5501_v49  ;;  %v5594_v27 = vsel %vm1333_vm0, %v5590_v30, %v5328_v22 }
 0x6b8   :  { %v5520_v53 = vpop.permute.xlu0 %5519  ;;  %v5599_v56 = vsel %vm5598_vm5, %v5594_v27, %v5376_v44 }
 0x6b9   :  { %v5604_v9 = vsel %vm5603_vm8, %v5599_v56, %v5424_v0  ;;  %v5426_v32 = vpop.permute.xlu2 %5425 }
 0x6be   :  { %5571 = vrot.lane.b32.xlu0 %v10818_v38, %s6349_s11  ;;  %v5472_v39 = vpop.permute.xlu1 %5471  ;;  %5381 = vrot.lane.b32.xlu2 %v5374_v14, %s6346_s8  ;;  %v5623_v38 = vld [vmem:[%s11077_s1 + $0x30] sm:$0xfc]  ;;  %v5832_v14 = vld [vmem:[%s11077_s1 + $0x78] sm:$0xf] }
 0x6bf   :  { %v5609_v35 = vsel %vm5608_vm10, %v5604_v9, %v5472_v39  ;;  %5477 = vrot.lane.b32.xlu1 %v5470_v28, %s6348_s10  ;;  %v5635_v33 = vrot.slane %v5623_v38, 2  ;;  %v10927_v28 = vld [vmem:[%s11077_s1 + $0x60] sm:$0xff]  ;;  %v5840_v22 = vrot.slane %v5832_v14, 4 }
 0x6c0   :  { %v5568_v63 = vpop.permute.xlu0 %5567  ;;  %v5613_v50 = vsel %vm1374_vm1, %v5609_v35, %v5520_v53  ;;  %v5838_v49 = vrot.slane %v10927_v28, 4 }
 0x6c1   :  { %v5618_v24 = vsel %vm5617_vm11, %v5613_v50, %v5568_v63  ;;  %v10880_v23 = vsel %vm1789_vm6, %v5635_v33, %v10875_v6  ;;  %v5474_v16 = vpop.permute.xlu2 %5473 }
 0x6c2   :  { %v5625_v3 = vadd.f32 %v10862_v7, %v5618_v24 }
 0x6c4   :  { %v5629_v0 = vmax.f32 %v5625_v3, 0.0 }
 0x6c6   :  { %v5282_v43 = vpop.permute.xlu1 %5281  ;;  %5429 = vrot.lane.b32.xlu2 %v5422_v47, %s6347_s9  ;;  %5333 = vrot.lane.b32.xlu0 %v5326_v55, %s6340_s15  ;;  %v10886_v18 = vmul.f32 %v10880_v23, %v5629_v0  ;;  %s6350_s15 = smov 112   ;;  %v5841_v47 = vsel %vm1778_vm7, %v5838_v49, %v5840_v22  ;;  %v5830_v22 = vld [vmem:[%s11077_s1 + $0x48] sm:$0xf0] }
 0x6c7   :  { %5778 = vrot.lane.b32.xlu1 %v5776_v2, %s6343_s5  ;;  %v5850_v55 = vsel %vm1374_vm1, %v5841_v47, 0  ;;  %v5837_v47 = vrot.slane %v5830_v22, 4  ;;  %v5646_v22 = vperm.slane %v10902_v51, 1 }
 0x6c8   :  { %v5186_v42 = vpop.permute.xlu0 %5185  ;;  %v5671_v26 = vmul.f32 %v10786_v15, %v10886_v18  ;;  %v5654_v19 = vmul.f32 %v10788_v8, %v10886_v18  ;;  %v5708_v57 = vmul.f32 %v10812_v21, %v10886_v18 }
 0x6c9   :  { %v5581_v13 = vsel %vm5579_vm2, %v10661_v54, %v5186_v42 }
 0x6ca   :  { %v5586_v58 = vsel %vm5584_vm3, %v5581_v13, %v5234_v10  ;;  %v5716_v41 = vrot.slane %v5708_v57, 1 }
 0x6cb   :  { %v5591_v62 = vsel %vm5589_vm4, %v5586_v58, %v5282_v43 }
 0x6ce   :  { %v5522_v46 = vpop.permute.xlu1 %5521  ;;  %5573 = vrot.lane.b32.xlu2 %v5566_v61, %s6349_s11  ;;  %5525 = vrot.lane.b32.xlu0 %v5518_v25, %s6341_s16  ;;  %s6351_s16 = smov 120   ;;  %v10937_v61 = vand.u32 4294901760, %v5850_v55 }
 0x6cf   :  { %5675 = vrot.lane.b32.xlu1 %v5671_v26, %s6350_s15 }
 0x6d0   :  { %v5330_v44 = vpop.permute.xlu0 %5329  ;;  %5867 = vmatpush.xpose.msrb.mxu2 %v10937_v61  ;;  %v10941_v30 = vsub.f32 %v5850_v55, %v10937_v61 }
 0x6d1   :  { %v5595_v29 = vsel %vm1333_vm0, %v5591_v62, %v5330_v44 }
 0x6d2   :  { %v5600_v54 = vsel %vm5598_vm5, %v5595_v29, %v5378_v31  ;;  %v5903_v25 = vand.u32 4294901760, %v10941_v30 }
 0x6d3   :  { %v5605_v5 = vsel %vm5603_vm8, %v5600_v54, %v5426_v32 }
 0x6d4   :  { %v5610_v60 = vsel %vm5608_vm10, %v5605_v5, %v5474_v16  ;;  %v5904_v27 = vsub.f32 %v10941_v30, %v5903_v25 }
 0x6d5   :  { %v5614_v12 = vsel %vm1374_vm1, %v5610_v60, %v5522_v46 }
 0x6d6   :  { %v5570_v52 = vpop.permute.xlu1 %5569  ;;  %5805 = vrot.lane.b32.xlu2 %v5803_v59, %s6344_s6  ;;  %5732 = vrot.lane.b32.xlu0 %v5730_v48, %s6344_s6  ;;  %v5905_v53 = vand.u32 4294901760, %v5904_v27 }
 0x6d7   :  { %v5619_v37 = vsel %vm5617_vm11, %v5614_v12, %v5570_v52 }
 0x6d8   :  { %v5626_v34 = vadd.f32 %v10862_v7, %v5619_v37  ;;  %5906 = vmatpush.xpose.msrb.mxu3 %v5905_v53 }
 0x6da   :  { %v5630_v17 = vmax.f32 %v5626_v34, 0.0 }
 0x6dc   :  { %v10913_v45 = vmul.f32 %v10875_v6, %v5630_v17 }
 0x6de   :  { %5658 = vrot.lane.b32.xlu0 %v5654_v19, %s6351_s16  ;;  %v5709_v40 = vmul.f32 %v10812_v21, %v10913_v45 }
 0x6e0   :  { %v5717_v4 = vrot.slane %v5709_v40, 1 }
 0x6e2   :  { %v5718_v10 = vsel %vm5692_vm12, %v5716_v41, %v5717_v4 }
 0x6e3   :  { %5722 = vrot.lane.b32.xlu2 %v5718_v10, %s6351_s16 }
 0x6fe   :  { %v5428_v56 = vpop.permute.xlu2 %5427 }
 0x708   :  { %v5190_v9 = vpop.permute.xlu2 %5189 }
 0x709   :  { %v5583_v59 = vsel %vm5579_vm2, %v10830_v1, %v5190_v9  ;;  %v5839_v9 = vsel %vm1778_vm7, %v5837_v47, %v5838_v49  ;;  %v5647_v47 = vmul.f32 %v5646_v22, %v10886_v18 }
 0x710   :  { %v5284_v39 = vpop.permute.xlu0 %5283  ;;  %v5188_v31 = vpop.permute.xlu1 %5187 }
 0x711   :  { %v5238_v35 = vpop.permute.xlu2 %5237  ;;  %v5582_v20 = vsel %vm5579_vm2, %v10803_v11, %v5188_v31  ;;  %v5848_v31 = vsel %vm1374_vm1, %v5839_v9, 0 }
 0x712   :  { %v5588_v5 = vsel %vm5584_vm3, %v5583_v59, %v5238_v35 }
 0x718   :  { %v5332_v38 = vpop.permute.xlu0 %5331  ;;  %v5236_v36 = vpop.permute.xlu1 %5235 }
 0x719   :  { %v5382_v63 = vpop.permute.xlu2 %5381  ;;  %v5587_v33 = vsel %vm5584_vm3, %v5582_v20, %v5236_v36 }
 0x71a   :  { %v5592_v2 = vsel %vm5589_vm4, %v5587_v33, %v5284_v39 }
 0x71b   :  { %v5596_v0 = vsel %vm1333_vm0, %v5592_v2, %v5332_v38  ;;  %v10990_v38 = vand.u32 4294901760, %v5848_v31 }
 0x71d   :  { %5869 = vmatpush.xpose.msrb.mxu2 %v10990_v38  ;;  %v11000_v20 = vsub.f32 %v5848_v31, %v10990_v38 }
 0x720   :  { %v5380_v50 = vpop.permute.xlu0 %5379 }
 0x721   :  { %v5476_v24 = vpop.permute.xlu1 %5475  ;;  %v5430_v3 = vpop.permute.xlu2 %5429  ;;  %v5601_v42 = vsel %vm5598_vm5, %v5596_v0, %v5380_v50  ;;  %5938 = vmatpush.xpose.msra.mxu2 %v10941_v30 }
 0x722   :  { %v5606_v13 = vsel %vm5603_vm8, %v5601_v42, %v5428_v56 }
 0x723   :  { %v5611_v26 = vsel %vm5608_vm10, %v5606_v13, %v5476_v24  ;;  %v11004_v24 = vperm.slane %v10902_v51, 7 }
 0x725   :  { %5941 = vmatpush.xpose.msra.mxu2 %v11000_v20 }
 0x728   :  { %v5524_v43 = vpop.permute.xlu0 %5523 }
 0x729   :  { %v5286_v32 = vpop.permute.xlu1 %5285  ;;  %v5574_v58 = vpop.permute.xlu2 %5573  ;;  %v5615_v46 = vsel %vm1374_vm1, %v5611_v26, %v5524_v43 }
 0x72a   :  { %v5593_v60 = vsel %vm5589_vm4, %v5588_v5, %v5286_v32 }
 0x730   :  { %v5572_v11 = vpop.permute.xlu0 %5571 }
 0x731   :  { %v5620_v44 = vsel %vm5617_vm11, %v5615_v46, %v5572_v11  ;;  %v5478_v62 = vpop.permute.xlu1 %5477  ;;  %v5806_v16 = vpop.permute.xlu2 %5805 }
 0x732   :  { %v5627_v29 = vadd.f32 %v10862_v7, %v5620_v44  ;;  %v5808_v37 = vmul.f32 %v5806_v16, %v10886_v18  ;;  %v5809_v34 = vmul.f32 %v5806_v16, %v10913_v45 }
 0x734   :  { %v5631_v54 = vmax.f32 %v5627_v29, 0.0  ;;  %v5816_v4 = vrot.slane %v5808_v37, 2  ;;  %v5817_v10 = vrot.slane %v5809_v34, 2 }
 0x736   :  { %v10961_v48 = vmul.f32 %v10880_v23, %v5631_v54  ;;  %v5818_v56 = vsel %vm1789_vm6, %v5816_v4, %v5817_v10 }
 0x738   :  { %v5334_v12 = vpop.permute.xlu0 %5333  ;;  %v5672_v52 = vmul.f32 %v10786_v15, %v10961_v48  ;;  %v5810_v36 = vmul.f32 %v5806_v16, %v10961_v48  ;;  %v5710_v50 = vmul.f32 %v10812_v21, %v10961_v48  ;;  %v5655_v49 = vmul.f32 %v10788_v8, %v10961_v48 }
 0x739   :  { %v5779_v17 = vpop.permute.xlu1 %5778  ;;  %v5597_v19 = vsel %vm1333_vm0, %v5593_v60, %v5334_v12  ;;  %v5760_v32 = vmul.f32 %v11004_v24, %v10961_v48  ;;  %vm6049_vm0 = vcmask 1042432  }
 0x73a   :  { %v5781_v1 = vmul.f32 %v5779_v17, %v10886_v18  ;;  %v5782_v23 = vmul.f32 %v5779_v17, %v10913_v45  ;;  %5677 = vrot.lane.b32.xlu2 %v5672_v52, %s6350_s15  ;;  %v5602_v57 = vsel %vm5598_vm5, %v5597_v19, %v5382_v63  ;;  %v5783_v63 = vmul.f32 %v5779_v17, %v10961_v48 }
 0x73b   :  { %v5607_v15 = vsel %vm5603_vm8, %v5602_v57, %v5430_v3  ;;  %v5909_v3 = vand.u32 4294901760, %v11000_v20  ;;  %v5819_v2 = vrot.slane %v5810_v36, 2  ;;  %v5719_v42 = vrot.slane %v5710_v50, 1 }
 0x73c   :  { %v5789_v40 = vrot.slane %v5781_v1, 2  ;;  %v5790_v41 = vrot.slane %v5782_v23, 2  ;;  %v5612_v55 = vsel %vm5608_vm10, %v5607_v15, %v5478_v62  ;;  %v5792_v0 = vrot.slane %v5783_v63, 2 }
 0x73d   :  { %v5910_v62 = vsub.f32 %v11000_v20, %v5909_v3  ;;  %v5648_v36 = vmul.f32 %v5646_v22, %v10961_v48  ;;  %v5833_v20 = vld [vmem:[%s11077_s1 + $0x7c] ss:$0 sm:$0xff] }
 0x73e   :  { %v5791_v14 = vsel %vm1789_vm6, %v5789_v40, %v5790_v41  ;;  %v5769_v41 = vrot.slane %v5760_v32, 2 }
 0x73f   :  { %5795 = vrot.lane.b32.xlu0 %v5791_v14, %s6351_s16  ;;  %v5911_v37 = vand.u32 4294901760, %v5910_v62 }
 0x740   :  { %v5526_v27 = vpop.permute.xlu0 %5525 }
 0x741   :  { %v5616_v53 = vsel %vm1374_vm1, %v5612_v55, %v5526_v27  ;;  %5912 = vmatpush.xpose.msrb.mxu3 %v5911_v37 }
 0x742   :  { %v5621_v39 = vsel %vm5617_vm11, %v5616_v53, %v5574_v58  ;;  %5822 = vrot.lane.b32.xlu2 %v5818_v56, %s6350_s15  ;;  %v5723_v53 = vpop.permute.xlu2 %5722 }
 0x743   :  { %v5628_v35 = vadd.f32 %v10862_v7, %v5621_v39  ;;  %v5683_v7 = vperm.slane %v10902_v51, 4  ;;  %v5676_v39 = vpop.permute.xlu1 %5675  ;;  %v5759_v51 = vmul.f32 %v11004_v24, %v10913_v45 }
 0x745   :  { %v5632_v28 = vmax.f32 %v5628_v35, 0.0  ;;  %v5686_v8 = vmul.f32 %v5683_v7, %v10961_v48  ;;  %5968 = vmatpush.xpose.msra.mxu3 %v10937_v61  ;;  %v5685_v27 = vmul.f32 %v5683_v7, %v10913_v45  ;;  %v5684_v9 = vmul.f32 %v5683_v7, %v10886_v18 }
 0x747   :  { %v5643_v33 = vmul.f32 %v10875_v6, %v5632_v28  ;;  %5660 = vrot.lane.b32.xlu0 %v5655_v49, %s6351_s16  ;;  %v5696_v57 = vrot.slane %v5686_v8, 1  ;;  %v5694_v31 = vrot.slane %v5685_v27, 1  ;;  %v5693_v63 = vrot.slane %v5684_v9, 1 }
 0x748   :  { %v5733_v43 = vpop.permute.xlu0 %5732 }
 0x749   :  { %v5735_v13 = vmul.f32 %v5733_v43, %v10886_v18  ;;  %v5736_v58 = vmul.f32 %v5733_v43, %v10913_v45  ;;  %v5737_v26 = vmul.f32 %v5733_v43, %v10961_v48  ;;  %v5738_v6 = vmul.f32 %v5733_v43, %v5643_v33  ;;  %5970 = vmatpush.xpose.msra.mxu3 %v10990_v38 }
 0x74a   :  { %v5811_v46 = vmul.f32 %v5806_v16, %v5643_v33  ;;  %v5711_v11 = vmul.f32 %v10812_v21, %v5643_v33  ;;  %v5784_v44 = vmul.f32 %v5779_v17, %v5643_v33  ;;  %v5687_v21 = vmul.f32 %v5683_v7, %v5643_v33 }
 0x74b   :  { %v5743_v29 = vrot.slane %v5735_v13, 1  ;;  %v5744_v54 = vrot.slane %v5736_v58, 1  ;;  %v5746_v59 = vrot.slane %v5737_v26, 1  ;;  %v5747_v5 = vrot.slane %v5738_v6, 1 }
 0x74c   :  { %v5820_v60 = vrot.slane %v5811_v46, 2  ;;  %v5720_v12 = vrot.slane %v5711_v11, 1  ;;  %v5793_v52 = vrot.slane %v5784_v44, 2  ;;  %v5761_v17 = vmul.f32 %v11004_v24, %v5643_v33 }
 0x74d   :  { %v5748_v34 = vsel %vm5692_vm12, %v5746_v59, %v5747_v5  ;;  %v5745_v16 = vsel %vm5692_vm12, %v5743_v29, %v5744_v54  ;;  %v5697_v40 = vrot.slane %v5687_v21, 1  ;;  %v5695_v49 = vsel %vm5692_vm12, %v5693_v63, %v5694_v31 }
 0x74e   :  { %v5821_v19 = vsel %vm1789_vm6, %v5819_v2, %v5820_v60  ;;  %5749 = vrot.lane.b32.xlu1 %v5745_v16, %s6350_s15  ;;  %v5721_v1 = vsel %vm5692_vm12, %v5719_v42, %v5720_v12  ;;  %v5794_v23 = vsel %vm1789_vm6, %v5792_v0, %v5793_v52  ;;  %v5770_v4 = vrot.slane %v5761_v17, 2 }
 0x74f   :  { %5824 = vrot.lane.b32.xlu2 %v5821_v19, %s6350_s15  ;;  %5751 = vrot.lane.b32.xlu0 %v5748_v34, %s6350_s15  ;;  %v5698_v10 = vsel %vm5692_vm12, %v5696_v57, %v5697_v40  ;;  %v5758_v0 = vmul.f32 %v11004_v24, %v10886_v18  ;;  %v5767_v7 = vrot.slane %v5759_v51, 2 }
 0x750   :  { %v5771_v15 = vsel %vm1789_vm6, %v5769_v41, %v5770_v4  ;;  %v5659_v14 = vpop.permute.xlu0 %5658 }
 0x751   :  { %v5664_v56 = vadd.f32 %v5659_v14, %v5647_v47  ;;  %v5766_v32 = vrot.slane %v5758_v0, 2  ;;  %v6044_v47 = vld [vmem:[%s11077_s1 + $0x78] sm:$0xe0] }
 0x752   :  { %v6050_v9 = vrot.slane %v6044_v47, 5 }
 0x753   :  { %v5681_v35 = vadd.f32 %v5676_v39, %v5664_v56  ;;  %v5768_v58 = vsel %vm1789_vm6, %v5766_v32, %v5767_v7  ;;  %vm6078_vm6 = vcmask 0  }
 0x755   :  { %v5701_v8 = vadd.f32 %v5695_v49, %v5681_v35 }
 0x756   :  { %5724 = vrot.lane.b32.xlu1 %v5721_v1, %s6351_s16 }
 0x757   :  { %v5728_v42 = vadd.f32 %v5723_v53, %v5701_v8 }
 0x75e   :  { %5797 = vrot.lane.b32.xlu1 %v5794_v23, %s6351_s16 }
 0x794   :  { %v5678_v33 = vpop.permute.xlu2 %5677 }
 0x79c   :  { %v5823_v46 = vpop.permute.xlu2 %5822 }
 0x7a9   :  { %v5825_v37 = vpop.permute.xlu2 %5824 }
 0x7b1   :  { %v5796_v55 = vpop.permute.xlu0 %5795 }
 0x7b9   :  { %v5661_v50 = vpop.permute.xlu0 %5660 }
 0x7ba   :  { %v5665_v28 = vadd.f32 %v5661_v50, %v5648_v36 }
 0x7bc   :  { %v5682_v2 = vadd.f32 %v5678_v33, %v5665_v28 }
 0x7be   :  { %v5702_v43 = vadd.f32 %v5698_v10, %v5682_v2 }
 0x7c0   :  { %v5750_v13 = vpop.permute.xlu1 %5749 }
 0x7c1   :  { %v5755_v48 = vadd.f32 %v5750_v13, %v5728_v42  ;;  %v5752_v54 = vpop.permute.xlu0 %5751  ;;  %v6064_v13 = vlaneseq }
 0x7c3   :  { %v5774_v26 = vadd.f32 %v5768_v58, %v5755_v48  ;;  %v6065_v48 = vand.u32 127, %v6064_v13 }
 0x7c5   :  { %v5801_v6 = vadd.f32 %v5796_v55, %v5774_v26  ;;  %v6045_v55 = vld [vmem:[%s11077_s1 + $0x90] sm:$0x1f] }
 0x7c6   :  { %v6051_v39 = vrot.slane %v6045_v55, 5 }
 0x7c7   :  { %v5828_v11 = vadd.f32 %v5823_v46, %v5801_v6 }
 0x7c8   :  { %v5725_v44 = vpop.permute.xlu1 %5724  ;;  %v6052_v50 = vsel %vm6049_vm0, %v6050_v9, %v6051_v39 }
 0x7c9   :  { %v5843_v45 = vsel %vm1374_vm1, %v5828_v11, 0  ;;  %v5729_v62 = vadd.f32 %v5725_v44, %v5702_v43 }
 0x7ca   :  { %v5870_v29 = vand.u32 4294901760, %v5843_v45 }
 0x7cb   :  { %v5756_v59 = vadd.f32 %v5752_v54, %v5729_v62 }
 0x7cc   :  { %v5871_v18 = vsub.f32 %v5843_v45, %v5870_v29  ;;  %5914 = vmatmul.f32.vlgmr.msrb.gmra.mxu3 %v5870_v29  ;;  %v6046_v45 = vld [vmem:[%s11077_s1 + $0x95] ss:$0 sm:$0xff] }
 0x7cd   :  { %v5775_v24 = vadd.f32 %v5771_v15, %v5756_v59  ;;  %6030 = vmatpush.xpose.msrb.mxu3 %v10937_v61 }
 0x7ce   :  { %v5872_v5 = vand.u32 4294901760, %v5871_v18 }
 0x7d0   :  { %v5798_v60 = vpop.permute.xlu1 %5797  ;;  %v5873_v12 = vsub.f32 %v5871_v18, %v5872_v5 }
 0x7d1   :  { %v5802_v52 = vadd.f32 %v5798_v60, %v5775_v24  ;;  %6032 = vmatpush.xpose.msrb.mxu3 %v10990_v38 }
 0x7d2   :  { %v5874_v34 = vand.u32 4294901760, %v5873_v12 }
 0x7d3   :  { %v5829_v16 = vadd.f32 %v5825_v37, %v5802_v52 }
 0x7d4   :  { %5875 = vmatmul.f32.vlgmr.msrb.gmra.mxu2 %v5874_v34 }
 0x7d5   :  { %v5846_v21 = vsel %vm1374_vm1, %v5829_v16, 0  ;;  %6001 = vmatpush.xpose.msrb.mxu2 %v5903_v25  ;;  %vm6070_vm1 = vcmask 58368  }
 0x7d6   :  { %v5878_v17 = vand.u32 4294901760, %v5846_v21 }
 0x7d8   :  { %v5879_v19 = vsub.f32 %v5846_v21, %v5878_v17  ;;  %5918 = vmatmul.f32.gmra.mxu3 %v5878_v17 }
 0x7d9   :  { %6005 = vmatpush.xpose.msrb.mxu2 %v5909_v3 }
 0x7da   :  { %v5880_v61 = vand.u32 4294901760, %v5879_v19 }
 0x7dc   :  { %v5881_v1 = vsub.f32 %v5879_v19, %v5880_v61 }
 0x7de   :  { %v5882_v23 = vand.u32 4294901760, %v5881_v1 }
 0x7e0   :  { %5883 = vmatmul.f32.gmra.mxu2 %v5882_v23  ;;  %5974 = vmatmul.f32.vlgmr.msra.gmra.mxu3 %v5872_v5 }
 0x7e8   :  { %5944 = vmatmul.f32.vlgmr.msra.gmra.mxu2 %v5871_v18  ;;  %5980 = vmatmul.f32.gmra.mxu3 %v5880_v61 }
 0x7f0   :  { %5949 = vmatmul.f32.gmra.mxu2 %v5879_v19  ;;  %6034 = vmatmul.f32.vlgmr.msrb.gmra.mxu3 %v5870_v29 }
 0x7f8   :  { %6007 = vmatmul.f32.vlgmr.msrb.gmra.mxu2 %v5870_v29  ;;  %6038 = vmatmul.f32.gmra.mxu3 %v5878_v17 }
 0x800   :  { %6011 = vmatmul.f32.gmra.mxu2 %v5878_v17 }
 0x84f   :  { %v5915_v30 = vpop.f32.mrf.mxu3 }
 0x857   :  { %v5876_v25 = vpop.f32.mrf.mxu2 }
 0x858   :  { %v5877_v3 = vadd.f32 %v5876_v25, %v5833_v20 }
 0x85a   :  { %v5916_v15 = vadd.f32 %v5915_v30, %v5877_v3 }
 0x85b   :  { %v5919_v38 = vpop.f32.mrf.mxu3 }
 0x863   :  { %v5884_v57 = vpop.f32.mrf.mxu2  ;;  %v5975_v40 = vpop.f32.mrf.mxu3 }
 0x864   :  { %v5885_v22 = vadd.f32 %v5884_v57, %v5833_v20 }
 0x866   :  { %v5920_v31 = vadd.f32 %v5919_v38, %v5885_v22 }
 0x86b   :  { %v5945_v41 = vpop.f32.mrf.mxu2  ;;  %v5981_v4 = vpop.f32.mrf.mxu3 }
 0x86c   :  { %v5946_v14 = vadd.f32 %v5945_v41, %v5916_v15 }
 0x86e   :  { %v5976_v27 = vadd.f32 %v5975_v40, %v5946_v14 }
 0x873   :  { %v5950_v10 = vpop.f32.mrf.mxu2  ;;  %v6035_v53 = vpop.f32.mrf.mxu3 }
 0x874   :  { %v5951_v36 = vadd.f32 %v5950_v10, %v5920_v31 }
 0x876   :  { %v5982_v49 = vadd.f32 %v5981_v4, %v5951_v36 }
 0x87b   :  { %v6008_v56 = vpop.f32.mrf.mxu2  ;;  %v6039_v0 = vpop.f32.mrf.mxu3 }
 0x87c   :  { %v6009_v35 = vadd.f32 %v6008_v56, %v5976_v27 }
 0x87e   :  { %v6036_v63 = vadd.f32 %v6035_v53, %v6009_v35 }
 0x880   :  { %v6042_v28 = vmax.f32 %v6036_v63, 0.0 }
 0x882   :  { %v6054_v51 = vmul.f32 %v6052_v50, %v6042_v28 }
 0x883   :  { %v6012_v33 = vpop.f32.mrf.mxu2 }
 0x884   :  { %v6013_v8 = vadd.f32 %v6012_v33, %v5982_v49  ;;  %v6056_v2 = vsel %vm5584_vm3, %v6054_v51, 0.0 }
 0x885   :  { %6057 = vadd.xlane.f32.xlu0 %v6056_v2 }
 0x886   :  { %v6040_v7 = vadd.f32 %v6039_v0, %v6013_v8 }
 0x888   :  { %v6043_v43 = vmax.f32 %v6040_v7, 0.0 }
 0x88a   :  { %v6055_v42 = vmul.f32 %v6052_v50, %v6043_v43 }
 0x88c   :  { %v6059_v32 = vsel %vm5584_vm3, %v6055_v42, 0.0 }
 0x88d   :  { %6060 = vadd.xlane.f32.xlu1 %v6059_v32 }
 0x8f8   :  { %v6058_v58 = vpop.xlane.xlu0 %6057 }
 0x8f9   :  { %v6066_v6 = vperm.slane %v6058_v58, %v6065_v48 }
 0x900   :  { %v6061_v26 = vpop.xlane.xlu1 %6060 }
 0x901   :  { %v6067_v46 = vperm.slane %v6061_v26, %v6065_v48 }
 0x903   :  { %v6068_v11 = vsel %vm5120_vm9, %v6067_v46, %v6066_v6 }
 0x904   :  { %v6071_v44 = vsel %vm6070_vm1, %v6068_v11, 0.0 }
 0x905   :  { %6072 = vadd.xlane.f32.xlu2 %v6071_v44 }
 0x978   :  { %v6073_v62 = vpop.xlane.xlu2 %6072 }
 0x979   :  { %v6074_v29 = vadd.f32 %v6073_v62, %v6046_v45 }
 0x97b   :  { %v6076_v54 = vrot.slane %v6074_v29, 1  ;;  %6079 = vst.msk [vmem:[%s11078_s2] sm:$0x1] %vm6078_vm6, %v6074_v29 }
 0x97d   :  { %6080 = vst.msk [vmem:[%s11078_s2 + $0x1] sm:$0x1] %vm6078_vm6, %v6076_v54 }

</bundles_post_ra>
